<compile_context>
chip_gen: v7x
topology: tpu7x:2x2x1
jax: 0.10.0
libtpu: 0.0.40
codegen_flags: <defaults>
</compile_context>

<pallas_src>
import jax
import jax.numpy as jnp
from jax.experimental import pallas as pl
from jax.experimental.pallas import tpu as pltpu


def _round_up(x, m):
    return ((x + m - 1) // m) * m


def _fused_decoder_kernel(
    x_ref,
    w1_ref, b1_ref,
    w2_ref, b2_ref,
    w3_ref, b3_ref,
    w4_ref, b4_ref,
    w5_ref, b5_ref,
    o_ref,
):
    """Fused 5x (Linear -> ReLU).  Weights bf16, f32 accumulation on the MXU."""
    h = x_ref[...].astype(jnp.bfloat16)  # no-op guard (wrapper already casts)
    out_f32 = None
    for w_ref, b_ref in (
        (w1_ref, b1_ref),
        (w2_ref, b2_ref),
        (w3_ref, b3_ref),
        (w4_ref, b4_ref),
        (w5_ref, b5_ref),
    ):
        acc = jnp.dot(h, w_ref[...], preferred_element_type=jnp.float32)
        out_f32 = jnp.maximum(acc + b_ref[...], 0.0)   # bias broadcast (1, N)
        h = out_f32.astype(jnp.bfloat16)               # next layer's input
    o_ref[...] = out_f32.astype(o_ref.dtype)


def image_decoder_forward_pallas(emb, params):
    """emb: (M, E) float32; params: list of 5 (W (in,out) bf16, b (out,) f32)."""
    M, E = emb.shape
    ws = [w for (w, _) in params]
    bs = [b for (_, b) in params]
    n_out = ws[-1].shape[1]

    # --- Lane-dense output: pad the last layer up to a multiple of 128 cols ---
    n_pad = _round_up(n_out, 128)
    if n_pad != n_out:
        ws = ws[:-1] + [jnp.pad(ws[-1], ((0, 0), (0, n_pad - n_out)))]
        bs = bs[:-1] + [jnp.pad(bs[-1], (0, n_pad - n_out))]
    bs = [b.reshape(1, -1) for b in bs]

    # --- Fixed batch tile: bounded VMEM at any batch size ---------------------
    tm = 256 if M >= 256 else _round_up(M, 8)
    m_pad = _round_up(M, tm)
    grid = (m_pad // tm,)

    x = emb.astype(jnp.bfloat16)
    if m_pad != M:
        x = jnp.pad(x, ((0, m_pad - M), (0, 0)))

    # --- BlockSpecs ------------------------------------------------------------
    # x / out tiles: default double-buffered pipelining over the batch grid.
    # Weights & biases: constant block index -> single-buffered, VMEM-resident.
    in_specs = [pl.BlockSpec((tm, E), lambda i: (i, 0))]
    for w, b in zip(ws, bs):
        in_specs.append(
            pl.BlockSpec(w.shape, lambda i: (0, 0), pipeline_mode=pl.Buffered(1)))
        in_specs.append(
            pl.BlockSpec(b.shape, lambda i: (0, 0), pipeline_mode=pl.Buffered(1)))

    args = [x]
    for w, b in zip(ws, bs):
        args += [w, b]

    # --- Right-sized scoped-VMEM request ---------------------------------------
    weight_bytes = sum(int(w.size) * w.dtype.itemsize for w in ws)   # single-buffered
    bias_bytes = sum(int(b.size) * b.dtype.itemsize for b in bs)
    x_tile_bytes = tm * E * 2                                        # bf16, x2 buffers
    out_tile_bytes = tm * n_pad * 4                                  # f32,  x2 buffers
    act_bytes = tm * 2048 * (4 + 2) + tm * 1024 * (4 + 2)            # largest f32+bf16 acts
    vmem_limit = int(1.5 * (weight_bytes + bias_bytes
                            + 2 * x_tile_bytes + 2 * out_tile_bytes + act_bytes))
    vmem_limit = min(max(vmem_limit, 24 * 1024 * 1024), 96 * 1024 * 1024)

    out = pl.pallas_call(
        _fused_decoder_kernel,
        out_shape=jax.ShapeDtypeStruct((m_pad, n_pad), jnp.float32),
        grid_spec=pltpu.PrefetchScalarGridSpec(
            num_scalar_prefetch=0,
            grid=grid,
            in_specs=in_specs,
            out_specs=pl.BlockSpec((tm, n_pad), lambda i: (i, 0)),
        ),
        compiler_params=pltpu.CompilerParams(
            dimension_semantics=("parallel",),
            vmem_limit_bytes=vmem_limit,
        ),
    )(*args)

    return out[:M, :n_out]


image_decoder_forward = jax.jit(image_decoder_forward_pallas)


def init_image_decoder_params(key, embedding_dimension, image_dimension):
    """Synthetic params mirroring nn.Linear default init.

    Layer l: W stored transposed as (in, out) in bfloat16; b (out,) float32.
    """
    dims = [embedding_dimension, 256, 512, 1024, 2048, image_dimension]
    params = []
    for l in range(5):
        fan_in, fan_out = dims[l], dims[l + 1]
        key, kw, kb = jax.random.split(key, 3)
        bound = 1.0 / float(fan_in) ** 0.5
        w = jax.random.uniform(
            kw, (fan_in, fan_out), jnp.float32, minval=-bound, maxval=bound
        ).astype(jnp.bfloat16)
        b = jax.random.uniform(
            kb, (fan_out,), jnp.float32, minval=-bound, maxval=bound
        )
        params.append((w, b))
    return params


def _reference_forward(emb, params):
    """Pure-JAX reference with identical bf16-weight / f32-accumulate numerics."""
    h = emb.astype(jnp.bfloat16)
    out = None
    for (w, b) in params:
        acc = jnp.dot(h, w, preferred_element_type=jnp.float32) + b
        out = jnp.maximum(acc, 0.0)
        h = out.astype(jnp.bfloat16)
    return out


if __name__ == "__main__":
    embedding_dimension = 32
    image_dimension = 64
    batch = 8

    key = jax.random.PRNGKey(0)
    key, k_emb = jax.random.split(key)
    emb = jax.random.normal(k_emb, (batch, embedding_dimension), jnp.float32)

    params = init_image_decoder_params(key, embedding_dimension, image_dimension)

    out = image_decoder_forward(emb, params)
    out = jax.block_until_ready(out)

    ref = _reference_forward(emb, params)
    assert out.shape == (batch, image_dimension), out.shape
    assert jnp.allclose(out, ref, atol=1e-2, rtol=1e-2), "mismatch vs reference"

    print("KERNEL_OK")
</pallas_src>

<mosaic_0001>
module attributes {stable_mosaic.version = 11 : i64} {
  func.func @_fused_decoder_kernel(%arg0: i32, %arg1: memref<8x32xbf16, #tpu.memory_space<vmem>>, %arg2: memref<32x256xbf16, #tpu.memory_space<vmem>>, %arg3: memref<1x256xf32, #tpu.memory_space<vmem>>, %arg4: memref<256x512xbf16, #tpu.memory_space<vmem>>, %arg5: memref<1x512xf32, #tpu.memory_space<vmem>>, %arg6: memref<512x1024xbf16, #tpu.memory_space<vmem>>, %arg7: memref<1x1024xf32, #tpu.memory_space<vmem>>, %arg8: memref<1024x2048xbf16, #tpu.memory_space<vmem>>, %arg9: memref<1x2048xf32, #tpu.memory_space<vmem>>, %arg10: memref<2048x128xbf16, #tpu.memory_space<vmem>>, %arg11: memref<1x128xf32, #tpu.memory_space<vmem>>, %arg12: memref<8x128xf32, #tpu.memory_space<vmem>>) attributes {dimension_semantics = [#tpu.dimension_semantics<parallel>], iteration_bounds = array<i64: 1>, scalar_prefetch = 0 : i64, scratch_operands = 0 : i64, tpu.core_type = #tpu.core_type<tc>, window_params = [{transform_indices = @transform_0, window_bounds = array<i64: 8, 32>}, {pipeline_mode = #tpu.pipeline_mode<synchronous>, transform_indices = @transform_1, window_bounds = array<i64: 32, 256>}, {pipeline_mode = #tpu.pipeline_mode<synchronous>, transform_indices = @transform_2, window_bounds = array<i64: 1, 256>}, {pipeline_mode = #tpu.pipeline_mode<synchronous>, transform_indices = @transform_3, window_bounds = array<i64: 256, 512>}, {pipeline_mode = #tpu.pipeline_mode<synchronous>, transform_indices = @transform_4, window_bounds = array<i64: 1, 512>}, {pipeline_mode = #tpu.pipeline_mode<synchronous>, transform_indices = @transform_5, window_bounds = array<i64: 512, 1024>}, {pipeline_mode = #tpu.pipeline_mode<synchronous>, transform_indices = @transform_6, window_bounds = array<i64: 1, 1024>}, {pipeline_mode = #tpu.pipeline_mode<synchronous>, transform_indices = @transform_7, window_bounds = array<i64: 1024, 2048>}, {pipeline_mode = #tpu.pipeline_mode<synchronous>, transform_indices = @transform_8, window_bounds = array<i64: 1, 2048>}, {pipeline_mode = #tpu.pipeline_mode<synchronous>, transform_indices = @transform_9, window_bounds = array<i64: 2048, 128>}, {pipeline_mode = #tpu.pipeline_mode<synchronous>, transform_indices = @transform_10, window_bounds = array<i64: 1, 128>}, {transform_indices = @transform_11, window_bounds = array<i64: 8, 128>}]} {
    %c0 = arith.constant 0 : index
    %c0_0 = arith.constant 0 : index
    %0 = vector.load %arg1[%c0, %c0_0] : memref<8x32xbf16, #tpu.memory_space<vmem>>, vector<8x32xbf16>
    %c0_1 = arith.constant 0 : index
    %c0_2 = arith.constant 0 : index
    %1 = vector.load %arg2[%c0_1, %c0_2] : memref<32x256xbf16, #tpu.memory_space<vmem>>, vector<32x256xbf16>
    %cst = arith.constant dense<0.000000e+00> : vector<8x256xf32>
    %2 = tpu.matmul %0, %1, %cst {dimension_numbers = #tpu.dot_dimension_numbers<[1], [0], [0], [1], [0, 0, 1, 1], [], []>} : vector<8x32xbf16>, vector<32x256xbf16>, vector<8x256xf32> -> vector<8x256xf32>
    %c0_3 = arith.constant 0 : index
    %c0_4 = arith.constant 0 : index
    %3 = vector.load %arg3[%c0_3, %c0_4] : memref<1x256xf32, #tpu.memory_space<vmem>>, vector<1x256xf32>
    %4 = vector.broadcast %3 : vector<1x256xf32> to vector<8x256xf32>
    %5 = arith.addf %2, %4 : vector<8x256xf32>
    %cst_5 = arith.constant 0.000000e+00 : f32
    %6 = vector.broadcast %cst_5 : f32 to vector<8x256xf32>
    %7 = arith.maximumf %5, %6 : vector<8x256xf32>
    %8 = arith.truncf %7 : vector<8x256xf32> to vector<8x256xbf16>
    %c0_6 = arith.constant 0 : index
    %c0_7 = arith.constant 0 : index
    %9 = vector.load %arg4[%c0_6, %c0_7] : memref<256x512xbf16, #tpu.memory_space<vmem>>, vector<256x512xbf16>
    %cst_8 = arith.constant dense<0.000000e+00> : vector<8x512xf32>
    %10 = tpu.matmul %8, %9, %cst_8 {dimension_numbers = #tpu.dot_dimension_numbers<[1], [0], [0], [1], [0, 0, 1, 1], [], []>} : vector<8x256xbf16>, vector<256x512xbf16>, vector<8x512xf32> -> vector<8x512xf32>
    %c0_9 = arith.constant 0 : index
    %c0_10 = arith.constant 0 : index
    %11 = vector.load %arg5[%c0_9, %c0_10] : memref<1x512xf32, #tpu.memory_space<vmem>>, vector<1x512xf32>
    %12 = vector.broadcast %11 : vector<1x512xf32> to vector<8x512xf32>
    %13 = arith.addf %10, %12 : vector<8x512xf32>
    %cst_11 = arith.constant 0.000000e+00 : f32
    %14 = vector.broadcast %cst_11 : f32 to vector<8x512xf32>
    %15 = arith.maximumf %13, %14 : vector<8x512xf32>
    %16 = arith.truncf %15 : vector<8x512xf32> to vector<8x512xbf16>
    %c0_12 = arith.constant 0 : index
    %c0_13 = arith.constant 0 : index
    %17 = vector.load %arg6[%c0_12, %c0_13] : memref<512x1024xbf16, #tpu.memory_space<vmem>>, vector<512x1024xbf16>
    %cst_14 = arith.constant dense<0.000000e+00> : vector<8x1024xf32>
    %18 = tpu.matmul %16, %17, %cst_14 {dimension_numbers = #tpu.dot_dimension_numbers<[1], [0], [0], [1], [0, 0, 1, 1], [], []>} : vector<8x512xbf16>, vector<512x1024xbf16>, vector<8x1024xf32> -> vector<8x1024xf32>
    %c0_15 = arith.constant 0 : index
    %c0_16 = arith.constant 0 : index
    %19 = vector.load %arg7[%c0_15, %c0_16] : memref<1x1024xf32, #tpu.memory_space<vmem>>, vector<1x1024xf32>
    %20 = vector.broadcast %19 : vector<1x1024xf32> to vector<8x1024xf32>
    %21 = arith.addf %18, %20 : vector<8x1024xf32>
    %cst_17 = arith.constant 0.000000e+00 : f32
    %22 = vector.broadcast %cst_17 : f32 to vector<8x1024xf32>
    %23 = arith.maximumf %21, %22 : vector<8x1024xf32>
    %24 = arith.truncf %23 : vector<8x1024xf32> to vector<8x1024xbf16>
    %c0_18 = arith.constant 0 : index
    %c0_19 = arith.constant 0 : index
    %25 = vector.load %arg8[%c0_18, %c0_19] : memref<1024x2048xbf16, #tpu.memory_space<vmem>>, vector<1024x2048xbf16>
    %cst_20 = arith.constant dense<0.000000e+00> : vector<8x2048xf32>
    %26 = tpu.matmul %24, %25, %cst_20 {dimension_numbers = #tpu.dot_dimension_numbers<[1], [0], [0], [1], [0, 0, 1, 1], [], []>} : vector<8x1024xbf16>, vector<1024x2048xbf16>, vector<8x2048xf32> -> vector<8x2048xf32>
    %c0_21 = arith.constant 0 : index
    %c0_22 = arith.constant 0 : index
    %27 = vector.load %arg9[%c0_21, %c0_22] : memref<1x2048xf32, #tpu.memory_space<vmem>>, vector<1x2048xf32>
    %28 = vector.broadcast %27 : vector<1x2048xf32> to vector<8x2048xf32>
    %29 = arith.addf %26, %28 : vector<8x2048xf32>
    %cst_23 = arith.constant 0.000000e+00 : f32
    %30 = vector.broadcast %cst_23 : f32 to vector<8x2048xf32>
    %31 = arith.maximumf %29, %30 : vector<8x2048xf32>
    %32 = arith.truncf %31 : vector<8x2048xf32> to vector<8x2048xbf16>
    %c0_24 = arith.constant 0 : index
    %c0_25 = arith.constant 0 : index
    %33 = vector.load %arg10[%c0_24, %c0_25] : memref<2048x128xbf16, #tpu.memory_space<vmem>>, vector<2048x128xbf16>
    %cst_26 = arith.constant dense<0.000000e+00> : vector<8x128xf32>
    %34 = tpu.matmul %32, %33, %cst_26 {dimension_numbers = #tpu.dot_dimension_numbers<[1], [0], [0], [1], [0, 0, 1, 1], [], []>} : vector<8x2048xbf16>, vector<2048x128xbf16>, vector<8x128xf32> -> vector<8x128xf32>
    %c0_27 = arith.constant 0 : index
    %c0_28 = arith.constant 0 : index
    %35 = vector.load %arg11[%c0_27, %c0_28] : memref<1x128xf32, #tpu.memory_space<vmem>>, vector<1x128xf32>
    %36 = vector.broadcast %35 : vector<1x128xf32> to vector<8x128xf32>
    %37 = arith.addf %34, %36 : vector<8x128xf32>
    %cst_29 = arith.constant 0.000000e+00 : f32
    %38 = vector.broadcast %cst_29 : f32 to vector<8x128xf32>
    %39 = arith.maximumf %37, %38 : vector<8x128xf32>
    %c0_30 = arith.constant 0 : index
    %c0_31 = arith.constant 0 : index
    %40 = vector.load %arg12[%c0_30, %c0_31] : memref<8x128xf32, #tpu.memory_space<vmem>>, vector<8x128xf32>
    tpu.vector_store %arg12[%c0_30, %c0_31], %39 {strides = array<i32>} : memref<8x128xf32, #tpu.memory_space<vmem>>, vector<8x128xf32>,
    return
  }
  func.func @transform_0(%arg0: i32) -> (i32, i32) {
    %c0_i32 = arith.constant 0 : i32
    %c0_i32_0 = arith.constant 0 : i32
    return %arg0, %c0_i32 : i32, i32
  }
  func.func @transform_1(%arg0: i32) -> (i32, i32) {
    %c0_i32 = arith.constant 0 : i32
    %c0_i32_0 = arith.constant 0 : i32
    %c0_i32_1 = arith.constant 0 : i32
    return %c0_i32, %c0_i32_0 : i32, i32
  }
  func.func @transform_2(%arg0: i32) -> (i32, i32) {
    %c0_i32 = arith.constant 0 : i32
    %c0_i32_0 = arith.constant 0 : i32
    %c0_i32_1 = arith.constant 0 : i32
    return %c0_i32, %c0_i32_0 : i32, i32
  }
  func.func @transform_3(%arg0: i32) -> (i32, i32) {
    %c0_i32 = arith.constant 0 : i32
    %c0_i32_0 = arith.constant 0 : i32
    %c0_i32_1 = arith.constant 0 : i32
    return %c0_i32, %c0_i32_0 : i32, i32
  }
  func.func @transform_4(%arg0: i32) -> (i32, i32) {
    %c0_i32 = arith.constant 0 : i32
    %c0_i32_0 = arith.constant 0 : i32
    %c0_i32_1 = arith.constant 0 : i32
    return %c0_i32, %c0_i32_0 : i32, i32
  }
  func.func @transform_5(%arg0: i32) -> (i32, i32) {
    %c0_i32 = arith.constant 0 : i32
    %c0_i32_0 = arith.constant 0 : i32
    %c0_i32_1 = arith.constant 0 : i32
    return %c0_i32, %c0_i32_0 : i32, i32
  }
  func.func @transform_6(%arg0: i32) -> (i32, i32) {
    %c0_i32 = arith.constant 0 : i32
    %c0_i32_0 = arith.constant 0 : i32
    %c0_i32_1 = arith.constant 0 : i32
    return %c0_i32, %c0_i32_0 : i32, i32
  }
  func.func @transform_7(%arg0: i32) -> (i32, i32) {
    %c0_i32 = arith.constant 0 : i32
    %c0_i32_0 = arith.constant 0 : i32
    %c0_i32_1 = arith.constant 0 : i32
    return %c0_i32, %c0_i32_0 : i32, i32
  }
  func.func @transform_8(%arg0: i32) -> (i32, i32) {
    %c0_i32 = arith.constant 0 : i32
    %c0_i32_0 = arith.constant 0 : i32
    %c0_i32_1 = arith.constant 0 : i32
    return %c0_i32, %c0_i32_0 : i32, i32
  }
  func.func @transform_9(%arg0: i32) -> (i32, i32) {
    %c0_i32 = arith.constant 0 : i32
    %c0_i32_0 = arith.constant 0 : i32
    %c0_i32_1 = arith.constant 0 : i32
    return %c0_i32, %c0_i32_0 : i32, i32
  }
  func.func @transform_10(%arg0: i32) -> (i32, i32) {
    %c0_i32 = arith.constant 0 : i32
    %c0_i32_0 = arith.constant 0 : i32
    %c0_i32_1 = arith.constant 0 : i32
    return %c0_i32, %c0_i32_0 : i32, i32
  }
  func.func @transform_11(%arg0: i32) -> (i32, i32) {
    %c0_i32 = arith.constant 0 : i32
    %c0_i32_0 = arith.constant 0 : i32
    return %arg0, %c0_i32 : i32, i32
  }
}

</mosaic_0001>

<bundles_post_ra>
// kernel: image_decoder_forward_pallas.1
= control target key start
LH: loop header
LB: loop body
LE: loop exit
PB: predicated region body
PF: predicated region fallthrough
CT: control target
= control target key end

     0   :  { %16 = vsyncpa [#allocation3], 0  ;;  %s14661_s0 = inlined_call_operand.vmem [shape: bf16[8,32], index: 0, kind: input, shape index: {}]   ;;  %s14662_s1 = inlined_call_operand.hbm [shape: bf16[32,256], index: 1, kind: input, shape index: {}]   ;;  %s14663_s2 = inlined_call_operand.hbm [shape: f32[1,256], index: 2, kind: input, shape index: {}]   ;;  %s14664_s3 = inlined_call_operand.hbm [shape: bf16[256,512], index: 3, kind: input, shape index: {}]   ;;  %s14665_s4 = inlined_call_operand.hbm [shape: f32[1,512], index: 4, kind: input, shape index: {}]   ;;  %s14666_s5 = inlined_call_operand.hbm [shape: bf16[512,1024], index: 5, kind: input, shape index: {}]   ;;  %s14667_s6 = inlined_call_operand.hbm [shape: f32[1,1024], index: 6, kind: input, shape index: {}]   ;;  %s14668_s7 = inlined_call_operand.hbm [shape: bf16[1024,2048], index: 7, kind: input, shape index: {}]   ;;  %s14669_s8 = inlined_call_operand.hbm [shape: f32[1,2048], index: 8, kind: input, shape index: {}]   ;;  %s14670_s9 = inlined_call_operand.vmem [shape: bf16[2048,128], index: 9, kind: input, shape index: {}]   ;;  %s14671_s10 = inlined_call_operand.vmem [shape: f32[1,128], index: 10, kind: input, shape index: {}]   ;;  %s14672_s11 = inlined_call_operand.hbm [shape: f32[8,128], index: 11, kind: output, shape index: {}]  }
   0x1   :  { %17 = vsyncpa [#allocation6], 0 }
   0x2   :  { %18 = vsyncpa [#allocation9], 0 }
   0x3   :  { %19 = vsyncpa [#allocation12], 0 }
   0x4   :  { %20 = vsyncpa [#allocation15], 0 }
   0x5   :  { %21 = vsyncpa [#allocation4], 0  ;;  %s13838_s17 = smov [#allocation5]   ;;  %s13839_s19 = smov [#allocation8]  }
   0x6   :  { %s42_s18 = sshll.u32 %s13838_s17, 4  ;;  %s64_s20 = sshll.u32 %s13839_s19, 4  ;;  %s43_s18 = int_to_ptr.vmem [resolvable:$true] %s42_s18  ;;  %s65_s20 = int_to_ptr.vmem [resolvable:$true] %s64_s20 }
   0x7   :  { %s13628_s23 = scalar_lea.hbm %s14663_s2, 32 }
   0x8   :  { %p13629_p0 = scmp.ne.s32.totalorder %s14663_s2, %s13628_s23  ;;  %p13632_p1 = scmp.lt.u32.totalorder %s13628_s23, %s14663_s2 }
   0xa   :  { %p13634_p2 = pnand %p13632_p1, %p13629_p0 }
   0xc   :  { %13637 = shalt.err (!%p13634_p2)
}
   0xd   :  { %s13638_s28 = scalar_lea.vmem %s43_s18, 32  ;;  %p13643_p4 = scmp.lt.s32.totalorder %s43_s18, %s43_s18 }
   0xe   :  { %p13639_p3 = scmp.ne.s32.totalorder %s43_s18, %s13638_s28  ;;  %p13644_p5 = scmp.lt.s32.totalorder %s13638_s28, %s13638_s28 }
  0x10   :  { %p13645_p6 = por %p13644_p5, %p13643_p4 }
  0x12   :  { %p13646_p7 = pnand %p13645_p6, %p13639_p3 }
  0x14   :  { %13649 = shalt.err (!%p13646_p7)
}
  0x15   :  { %45 = dma.hbm_to_vmem [thread:$0]  %s14663_s2, 32, %s43_s18, [#allocation6]  }
  0x16   :  { %s13650_s14 = scalar_lea.hbm %s14665_s4, 64 }
  0x17   :  { %p13651_p8 = scmp.ne.s32.totalorder %s14665_s4, %s13650_s14  ;;  %p13654_p9 = scmp.lt.u32.totalorder %s13650_s14, %s14665_s4 }
  0x19   :  { %p13656_p10 = pnand %p13654_p9, %p13651_p8 }
  0x1b   :  { %13659 = shalt.err (!%p13656_p10)
}
  0x1c   :  { %s13660_s21 = scalar_lea.vmem %s65_s20, 64  ;;  %p13665_p12 = scmp.lt.s32.totalorder %s65_s20, %s65_s20 }
  0x1d   :  { %p13661_p11 = scmp.ne.s32.totalorder %s65_s20, %s13660_s21  ;;  %p13666_p13 = scmp.lt.s32.totalorder %s13660_s21, %s13660_s21 }
  0x1f   :  { %p13667_p0 = por %p13666_p13, %p13665_p12 }
  0x21   :  { %p13668_p1 = pnand %p13667_p0, %p13661_p11 }
  0x23   :  { %13671 = shalt.err (!%p13668_p1)
}
  0x24   :  { %67 = dma.hbm_to_vmem [thread:$0]  %s14665_s4, 64, %s65_s20, [#allocation9]  }
  0x25   :  { %s13840_s22 = smov [#allocation11]   ;;  %s13841_s24 = smov [#allocation2]  }
  0x26   :  { %s86_s23 = sshll.u32 %s13840_s22, 4  ;;  %s29_s25 = sshll.u32 %s13841_s24, 4  ;;  %s87_s23 = int_to_ptr.vmem [resolvable:$true] %s86_s23  ;;  %s13940_s25 = int_to_ptr.vmem [resolvable:$true] %s29_s25 }
  0x27   :  { %s13672_s28 = scalar_lea.hbm %s14667_s6, 128 }
  0x28   :  { %p13673_p2 = scmp.ne.s32.totalorder %s14667_s6, %s13672_s28  ;;  %p13676_p3 = scmp.lt.u32.totalorder %s13672_s28, %s14667_s6 }
  0x2a   :  { %p13678_p4 = pnand %p13676_p3, %p13673_p2 }
  0x2c   :  { %13681 = shalt.err (!%p13678_p4)
}
  0x2d   :  { %s13682_s4 = scalar_lea.vmem %s87_s23, 128  ;;  %p13687_p6 = scmp.lt.s32.totalorder %s87_s23, %s87_s23 }
  0x2e   :  { %p13683_p5 = scmp.ne.s32.totalorder %s87_s23, %s13682_s4  ;;  %p13688_p7 = scmp.lt.s32.totalorder %s13682_s4, %s13682_s4 }
  0x30   :  { %p13689_p8 = por %p13688_p7, %p13687_p6 }
  0x32   :  { %p13690_p9 = pnand %p13689_p8, %p13683_p5 }
  0x34   :  { %13693 = shalt.err (!%p13690_p9)
}
  0x35   :  { %89 = dma.hbm_to_vmem [thread:$0]  %s14667_s6, 128, %s87_s23, [#allocation12]  }
  0x36   :  { %s13694_s17 = scalar_lea.hbm %s14662_s1, 512 }
  0x37   :  { %p13695_p10 = scmp.ne.s32.totalorder %s14662_s1, %s13694_s17  ;;  %p13698_p11 = scmp.lt.u32.totalorder %s13694_s17, %s14662_s1 }
  0x39   :  { %p13700_p12 = pnand %p13698_p11, %p13695_p10 }
  0x3b   :  { %13703 = shalt.err (!%p13700_p12)
}
  0x3c   :  { %s13704_s22 = scalar_lea.vmem %s13940_s25, 512  ;;  %p13709_p0 = scmp.lt.s32.totalorder %s13940_s25, %s13940_s25 }
  0x3d   :  { %p13705_p13 = scmp.ne.s32.totalorder %s13940_s25, %s13704_s22  ;;  %p13710_p1 = scmp.lt.s32.totalorder %s13704_s22, %s13704_s22 }
  0x3f   :  { %p13711_p2 = por %p13710_p1, %p13709_p0 }
  0x41   :  { %p13712_p3 = pnand %p13711_p2, %p13705_p13 }
  0x43   :  { %13715 = shalt.err (!%p13712_p3)
}
  0x44   :  { %s13842_s6 = smov 128   ;;  %s13843_s23 = smov 8  }
  0x45   :  { %35 = dma.hbm_to_vmem [thread:$0]  %s14662_s1, 512, %s13940_s25, [#allocation3], %s13842_s6, %s13842_s6, %s13843_s23  }
  0x46   :  { %s13844_s27 = smov [#allocation7]   ;;  %s13716_s12 = scalar_lea.hbm %s14664_s3, 8192 }
  0x47   :  { %s51_s28 = sshll.u32 %s13844_s27, 4  ;;  %p13717_p4 = scmp.ne.s32.totalorder %s14664_s3, %s13716_s12  ;;  %s52_s28 = int_to_ptr.vmem [resolvable:$true] %s51_s28 }
  0x48   :  { %p13720_p5 = scmp.lt.u32.totalorder %s13716_s12, %s14664_s3 }
  0x4a   :  { %p13722_p6 = pnand %p13720_p5, %p13717_p4 }
  0x4c   :  { %13725 = shalt.err (!%p13722_p6)
}
  0x4d   :  { %s13726_s15 = scalar_lea.vmem %s52_s28, 8192  ;;  %p13731_p8 = scmp.lt.s32.totalorder %s52_s28, %s52_s28 }
  0x4e   :  { %p13727_p7 = scmp.ne.s32.totalorder %s52_s28, %s13726_s15  ;;  %p13732_p9 = scmp.lt.s32.totalorder %s13726_s15, %s13726_s15 }
  0x50   :  { %p13733_p10 = por %p13732_p9, %p13731_p8 }
  0x52   :  { %p13734_p11 = pnand %p13733_p10, %p13727_p7 }
  0x54   :  { %13737 = shalt.err (!%p13734_p11)
}
  0x55   :  { %s13845_s1 = smov 256   ;;  %s13846_s25 = smov 16  }
  0x56   :  { %57 = dma.hbm_to_vmem [thread:$0]  %s14664_s3, 8192, %s52_s28, [#allocation6], %s13845_s1, %s13845_s1, %s13846_s25  }
  0x57   :  { %s13847_s19 = smov [#allocation10]   ;;  %s13738_s22 = scalar_lea.hbm %s14666_s5, 32768 }
  0x58   :  { %s73_s21 = sshll.u32 %s13847_s19, 4  ;;  %p13739_p12 = scmp.ne.s32.totalorder %s14666_s5, %s13738_s22  ;;  %s74_s21 = int_to_ptr.vmem [resolvable:$true] %s73_s21 }
  0x59   :  { %p13742_p13 = scmp.lt.u32.totalorder %s13738_s22, %s14666_s5 }
  0x5b   :  { %p13744_p0 = pnand %p13742_p13, %p13739_p12 }
  0x5d   :  { %13747 = shalt.err (!%p13744_p0)
}
  0x5e   :  { %s13748_s27 = scalar_lea.vmem %s74_s21, 32768  ;;  %p13753_p2 = scmp.lt.s32.totalorder %s74_s21, %s74_s21 }
  0x5f   :  { %p13749_p1 = scmp.ne.s32.totalorder %s74_s21, %s13748_s27  ;;  %p13754_p3 = scmp.lt.s32.totalorder %s13748_s27, %s13748_s27 }
  0x61   :  { %p13755_p4 = por %p13754_p3, %p13753_p2 }
  0x63   :  { %p13756_p5 = pnand %p13755_p4, %p13749_p1 }
  0x65   :  { %13759 = shalt.err (!%p13756_p5)
}
  0x66   :  { %s13848_s3 = smov 512   ;;  %s13849_s28 = smov 32  }
  0x67   :  { %79 = dma.hbm_to_vmem [thread:$0]  %s14666_s5, 32768, %s74_s21, [#allocation9], %s13848_s3, %s13848_s3, %s13849_s28  }
  0x68   :  { %s13850_s12 = smov [#allocation13]   ;;  %s13760_s14 = scalar_lea.hbm %s14668_s7, 131072 }
  0x69   :  { %s95_s13 = sshll.u32 %s13850_s12, 4  ;;  %p13761_p6 = scmp.ne.s32.totalorder %s14668_s7, %s13760_s14  ;;  %s96_s13 = int_to_ptr.vmem [resolvable:$true] %s95_s13 }
  0x6a   :  { %p13764_p7 = scmp.lt.u32.totalorder %s13760_s14, %s14668_s7 }
  0x6c   :  { %p13766_p8 = pnand %p13764_p7, %p13761_p6 }
  0x6e   :  { %13769 = shalt.err (!%p13766_p8)
}
  0x6f   :  { %s13770_s17 = scalar_lea.vmem %s96_s13, 131072  ;;  %p13775_p10 = scmp.lt.s32.totalorder %s96_s13, %s96_s13 }
  0x70   :  { %p13771_p9 = scmp.ne.s32.totalorder %s96_s13, %s13770_s17  ;;  %p13776_p11 = scmp.lt.s32.totalorder %s13770_s17, %s13770_s17 }
  0x72   :  { %p13777_p12 = por %p13776_p11, %p13775_p10 }
  0x74   :  { %p13778_p13 = pnand %p13777_p12, %p13771_p9 }
  0x76   :  { %13781 = shalt.err (!%p13778_p13)
}
  0x77   :  { %s13851_s5 = smov 1024   ;;  %s13852_s19 = smov 64  }
  0x78   :  { %101 = dma.hbm_to_vmem [thread:$0]  %s14668_s7, 131072, %s96_s13, [#allocation12], %s13851_s5, %s13851_s5, %s13852_s19  }
  0x79   :  { %s13853_s18 = smov [#allocation14]   ;;  %s13782_s24 = scalar_lea.hbm %s14669_s8, 256 }
  0x7a   :  { %s108_s22 = sshll.u32 %s13853_s18, 4  ;;  %p13783_p0 = scmp.ne.s32.totalorder %s14669_s8, %s13782_s24  ;;  %s109_s22 = int_to_ptr.vmem [resolvable:$true] %s108_s22 }
  0x7b   :  { %p13786_p1 = scmp.lt.u32.totalorder %s13782_s24, %s14669_s8 }
  0x7d   :  { %p13788_p2 = pnand %p13786_p1, %p13783_p0 }
  0x7f   :  { %13791 = shalt.err (!%p13788_p2)
}
  0x80   :  { %s13792_s29 = scalar_lea.vmem %s109_s22, 256  ;;  %p13797_p4 = scmp.lt.s32.totalorder %s109_s22, %s109_s22 }
  0x81   :  { %p13793_p3 = scmp.ne.s32.totalorder %s109_s22, %s13792_s29  ;;  %p13798_p5 = scmp.lt.s32.totalorder %s13792_s29, %s13792_s29 }
  0x83   :  { %p13799_p6 = por %p13798_p5, %p13797_p4 }
  0x85   :  { %p13800_p7 = pnand %p13799_p6, %p13793_p3 }
  0x87   :  { %13803 = shalt.err (!%p13800_p7)
}
  0x88   :  { %111 = dma.hbm_to_vmem [thread:$0]  %s14669_s8, 256, %s109_s22, [#allocation15]  }
  0x89   :  { %13826 = dma.done.wait [#allocation3], 512  }
  0x8a   :  { %13827 = vsyncadd [#allocation3], 4294966784 }
  0x8b   :  { %13828 = dma.done.wait [#allocation6], 8224  }
  0x8c   :  { %13829 = vsyncadd [#allocation6], 4294959072 }
  0x8d   :  { %13830 = dma.done.wait [#allocation9], 32832  }
  0x8e   :  { %13831 = vsyncadd [#allocation9], 4294934464 }
  0x8f   :  { %13832 = dma.done.wait [#allocation12], 131200  }
  0x90   :  { %13833 = vsyncadd [#allocation12], 4294836096 }
  0x91   :  { %13834 = dma.done.wait [#allocation15], 256  }
  0x92   :  { %13835 = vsyncadd [#allocation15], 4294967040  ;;  %v13854_v0 = vmov 0   ;;  %v13397_v1 = vld [vmem:[#allocation2 + $0x4] ss:$8 sps:$4 sm:$0xff]   ;;  %vm178_vm0 = vcmask 261120  }
  0x93   :  { %214 = vmatprep.mubr.bf16.mxu0 %v13854_v0  ;;  %v13399_v2 = vld [vmem:[#allocation2] ss:$8 sps:$4 sm:$0xff]   ;;  %182 = vmatprep.subr.bf16.mxu0 %v13397_v1  ;;  %v13400_v3 = vld [vmem:[#allocation2 + $0x14] ss:$8 sps:$4 sm:$0xff]   ;;  %v13402_v4 = vld [vmem:[#allocation2 + $0x10] ss:$8 sps:$4 sm:$0xff]  }
  0x94   :  { %183 = vmatpush1.bf16.msra.mxu0 %v13399_v2  ;;  %v13403_v5 = vld [vmem:[#allocation7 + $0x4] ss:$16 sps:$4 sm:$0xff]   ;;  %v141_v6 = vld [vmem:[%s14661_s0] sm:$0xf]  ;;  %v13405_v10 = vld [vmem:[#allocation7 + $0x8] ss:$16 sps:$4 sm:$0xff]  }
  0x95   :  { %184 = vmatprep.subr.bf16.mxu0 %v13400_v3  ;;  %633 = vmatprep.subr.bf16.mxu1 %v13403_v5  ;;  %v13407_v7 = vld [vmem:[#allocation7 + $0xc] ss:$16 sps:$4 sm:$0xff]   ;;  %v13408_v8 = vld [vmem:[#allocation7] ss:$16 sps:$4 sm:$0xff]   ;;  %v13409_v9 = vld [vmem:[#allocation7 + $0x24] ss:$16 sps:$4 sm:$0xff]  }
  0x96   :  { %634 = vmatpush1.bf16.msra.mxu1 %v13408_v8  ;;  %v13413_v11 = vld [vmem:[#allocation7 + $0x2c] ss:$16 sps:$4 sm:$0xff]   ;;  %v13414_v12 = vld [vmem:[#allocation7 + $0x20] ss:$16 sps:$4 sm:$0xff]   ;;  %v13415_v13 = vld [vmem:[#allocation7 + $0x44] ss:$16 sps:$4 sm:$0xff]  }
  0x97   :  { %635 = vmatprep.subr.bf16.mxu1 %v13409_v9  ;;  %v13411_v14 = vld [vmem:[#allocation7 + $0x28] ss:$16 sps:$4 sm:$0xff]   ;;  %v13419_v15 = vld [vmem:[#allocation7 + $0x4c] ss:$16 sps:$4 sm:$0xff]   ;;  %v13420_v16 = vld [vmem:[#allocation7 + $0x40] ss:$16 sps:$4 sm:$0xff]  }
  0x98   :  { %185 = vmatpush1.bf16.msra.mxu0 %v13402_v4  ;;  %v13421_v17 = vld [vmem:[#allocation7 + $0x64] ss:$16 sps:$4 sm:$0xff]   ;;  %v13417_v18 = vld [vmem:[#allocation7 + $0x48] ss:$16 sps:$4 sm:$0xff]   ;;  %v13425_v19 = vld [vmem:[#allocation7 + $0x6c] ss:$16 sps:$4 sm:$0xff]  }
  0x99   :  { %674 = vmatprep.subr.bf16.mxu0 %v13407_v7  ;;  %v13426_v20 = vld [vmem:[#allocation7 + $0x60] ss:$16 sps:$4 sm:$0xff]   ;;  %v13427_v21 = vld [vmem:[#allocation7 + $0x84] ss:$16 sps:$4 sm:$0xff]   ;;  %v13423_v22 = vld [vmem:[#allocation7 + $0x68] ss:$16 sps:$4 sm:$0xff]  }
  0x9a   :  { %636 = vmatpush1.bf16.msra.mxu1 %v13414_v12  ;;  %v13431_v23 = vld [vmem:[#allocation7 + $0x8c] ss:$16 sps:$4 sm:$0xff]   ;;  %v13432_v24 = vld [vmem:[#allocation7 + $0x80] ss:$16 sps:$4 sm:$0xff]   ;;  %v13433_v25 = vld [vmem:[#allocation7 + $0xa4] ss:$16 sps:$4 sm:$0xff]  }
  0x9b   :  { %11593 = vmatmul.mubr.msk.bf16.vlgmr.msra.gmra.mrb[0].mxu0 %vm178_vm0, %v141_v6  ;;  %637 = vmatprep.subr.bf16.mxu1 %v13415_v13  ;;  %v13429_v26 = vld [vmem:[#allocation7 + $0x88] ss:$16 sps:$4 sm:$0xff]   ;;  %v13437_v27 = vld [vmem:[#allocation7 + $0xac] ss:$16 sps:$4 sm:$0xff]   ;;  %v13438_v28 = vld [vmem:[#allocation7 + $0xa0] ss:$16 sps:$4 sm:$0xff]  }
  0x9c   :  { %675 = vmatpush1.bf16.msra.mxu0 %v13405_v10  ;;  %v13439_v29 = vld [vmem:[#allocation7 + $0xc4] ss:$16 sps:$4 sm:$0xff]   ;;  %v13435_v30 = vld [vmem:[#allocation7 + $0xa8] ss:$16 sps:$4 sm:$0xff]   ;;  %v13443_v31 = vld [vmem:[#allocation7 + $0xcc] ss:$16 sps:$4 sm:$0xff]  }
  0x9d   :  { %676 = vmatprep.subr.bf16.mxu0 %v13413_v11  ;;  %v13444_v32 = vld [vmem:[#allocation7 + $0xc0] ss:$16 sps:$4 sm:$0xff]   ;;  %v13445_v33 = vld [vmem:[#allocation7 + $0xe4] ss:$16 sps:$4 sm:$0xff]   ;;  %v13441_v34 = vld [vmem:[#allocation7 + $0xc8] ss:$16 sps:$4 sm:$0xff]  }
  0x9e   :  { %638 = vmatpush1.bf16.msra.mxu1 %v13420_v16  ;;  %v13449_v35 = vld [vmem:[#allocation7 + $0xec] ss:$16 sps:$4 sm:$0xff]   ;;  %v13450_v36 = vld [vmem:[#allocation7 + $0xe0] ss:$16 sps:$4 sm:$0xff]   ;;  %v13451_v37 = vld [vmem:[#allocation7 + $0x104] ss:$16 sps:$4 sm:$0xff]  }
  0x9f   :  { %639 = vmatprep.subr.bf16.mxu1 %v13421_v17  ;;  %v13447_v38 = vld [vmem:[#allocation7 + $0xe8] ss:$16 sps:$4 sm:$0xff]   ;;  %v13455_v39 = vld [vmem:[#allocation7 + $0x10c] ss:$16 sps:$4 sm:$0xff]   ;;  %v13456_v40 = vld [vmem:[#allocation7 + $0x100] ss:$16 sps:$4 sm:$0xff]  }
  0xa0   :  { %677 = vmatpush1.bf16.msra.mxu0 %v13411_v14  ;;  %v13457_v41 = vld [vmem:[#allocation7 + $0x124] ss:$16 sps:$4 sm:$0xff]   ;;  %v13453_v42 = vld [vmem:[#allocation7 + $0x108] ss:$16 sps:$4 sm:$0xff]   ;;  %v13462_v43 = vld [vmem:[#allocation7 + $0x120] ss:$16 sps:$4 sm:$0xff]   ;;  %v148_v14 = vlaneseq }
  0xa1   :  { %678 = vmatprep.subr.bf16.mxu0 %v13419_v15  ;;  %v13461_v44 = vld [vmem:[#allocation7 + $0x12c] ss:$16 sps:$4 sm:$0xff]   ;;  %v13463_v45 = vld [vmem:[#allocation7 + $0x144] ss:$16 sps:$4 sm:$0xff]   ;;  %v13459_v46 = vld [vmem:[#allocation7 + $0x128] ss:$16 sps:$4 sm:$0xff]  }
  0xa2   :  { %640 = vmatpush1.bf16.msra.mxu1 %v13426_v20  ;;  %v13468_v47 = vld [vmem:[#allocation7 + $0x140] ss:$16 sps:$4 sm:$0xff]   ;;  %v13467_v48 = vld [vmem:[#allocation7 + $0x14c] ss:$16 sps:$4 sm:$0xff]   ;;  %v13469_v49 = vld [vmem:[#allocation7 + $0x164] ss:$16 sps:$4 sm:$0xff]  }
  0xa3   :  { %641 = vmatprep.subr.bf16.mxu1 %v13427_v21  ;;  %v13465_v50 = vld [vmem:[#allocation7 + $0x148] ss:$16 sps:$4 sm:$0xff]   ;;  %v13474_v51 = vld [vmem:[#allocation7 + $0x160] ss:$16 sps:$4 sm:$0xff]   ;;  %v13473_v52 = vld [vmem:[#allocation7 + $0x16c] ss:$16 sps:$4 sm:$0xff]  }
  0xa4   :  { %679 = vmatpush1.bf16.msra.mxu0 %v13417_v18  ;;  %v13475_v53 = vld [vmem:[#allocation7 + $0x184] ss:$16 sps:$4 sm:$0xff]   ;;  %v13471_v54 = vld [vmem:[#allocation7 + $0x168] ss:$16 sps:$4 sm:$0xff]   ;;  %v13480_v55 = vld [vmem:[#allocation7 + $0x180] ss:$16 sps:$4 sm:$0xff]  }
  0xa5   :  { %680 = vmatprep.subr.bf16.mxu0 %v13425_v19  ;;  %v13479_v56 = vld [vmem:[#allocation7 + $0x18c] ss:$16 sps:$4 sm:$0xff]   ;;  %v13481_v57 = vld [vmem:[#allocation7 + $0x1a4] ss:$16 sps:$4 sm:$0xff]   ;;  %v13477_v58 = vld [vmem:[#allocation7 + $0x188] ss:$16 sps:$4 sm:$0xff]  }
  0xa6   :  { %642 = vmatpush1.bf16.msra.mxu1 %v13432_v24  ;;  %v13486_v59 = vld [vmem:[#allocation7 + $0x1a0] ss:$16 sps:$4 sm:$0xff]   ;;  %v13485_v60 = vld [vmem:[#allocation7 + $0x1ac] ss:$16 sps:$4 sm:$0xff]   ;;  %v13483_v61 = vld [vmem:[#allocation7 + $0x1a8] ss:$16 sps:$4 sm:$0xff]  }
  0xa7   :  { %643 = vmatprep.subr.bf16.mxu1 %v13433_v25  ;;  %v13487_v62 = vld [vmem:[#allocation7 + $0x1c4] ss:$16 sps:$4 sm:$0xff]   ;;  %v13491_v63 = vld [vmem:[#allocation7 + $0x1cc] ss:$16 sps:$4 sm:$0xff]   ;;  %v13489_v0 = vld [vmem:[#allocation7 + $0x1c8] ss:$16 sps:$4 sm:$0xff]  }
  0xa8   :  { %681 = vmatpush1.bf16.msra.mxu0 %v13423_v22  ;;  %v13492_v1 = vld [vmem:[#allocation7 + $0x1c0] ss:$16 sps:$4 sm:$0xff]   ;;  %v13493_v2 = vld [vmem:[#allocation7 + $0x1e4] ss:$16 sps:$4 sm:$0xff]   ;;  %v13497_v3 = vld [vmem:[#allocation7 + $0x1ec] ss:$16 sps:$4 sm:$0xff]  }
  0xa9   :  { %682 = vmatprep.subr.bf16.mxu0 %v13431_v23  ;;  %v13495_v4 = vld [vmem:[#allocation7 + $0x1e8] ss:$16 sps:$4 sm:$0xff]   ;;  %v13498_v5 = vld [vmem:[#allocation7 + $0x1e0] ss:$16 sps:$4 sm:$0xff]   ;;  %v14022_v15 = vshrl.u32 %v148_v14, 7 }
  0xaa   :  { %644 = vmatpush1.bf16.msra.mxu1 %v13438_v28  ;;  %v723_v6 = vld [vmem:[#allocation10] sm:$0xff]  ;;  %v724_v8 = vld [vmem:[#allocation10 + $0x8] sm:$0xff]  ;;  %v146_v17 = vld [vmem:[#allocation5] sm:$0x3] }
  0xab   :  { %645 = vmatprep.subr.bf16.mxu1 %v13439_v29  ;;  %v727_v7 = vld [vmem:[#allocation10 + $0x20] sm:$0xff]  ;;  %v728_v11 = vld [vmem:[#allocation10 + $0x28] sm:$0xff]  ;;  %v14025_v16 = vsub.s32 0, %v14022_v15  ;;  %v14028_v18 = vsub.s32 1, %v14022_v15 }
  0xac   :  { %683 = vmatpush1.bf16.msra.mxu0 %v13429_v26  ;;  %v11658_v9 = vcombine.low %v723_v6, %v727_v7  ;;  %v11659_v10 = vcombine.high %v723_v6, %v727_v7  ;;  %v11660_v12 = vcombine.low %v724_v8, %v728_v11  ;;  %v11661_v13 = vcombine.high %v724_v8, %v728_v11  ;;  %v731_v28 = vld [vmem:[#allocation10 + $0x40] sm:$0xff]  ;;  %v772_v7 = vld [vmem:[#allocation10 + $0x188] sm:$0xff] }
  0xad   :  { %684 = vmatprep.subr.bf16.mxu0 %v13437_v27  ;;  %v151_v19 = vrot.slane %v146_v17, %v14025_v16  ;;  %v155_v20 = vrot.slane %v146_v17, %v14028_v18  ;;  %v775_v6 = vld [vmem:[#allocation10 + $0x1a0] sm:$0xff]  ;;  %v776_v8 = vld [vmem:[#allocation10 + $0x1a8] sm:$0xff] }
  0xae   :  { %646 = vmatpush1.bf16.msra.mxu1 %v13444_v32  ;;  %v736_v32 = vld [vmem:[#allocation10 + $0x68] sm:$0xff]  ;;  %v783_v14 = vld [vmem:[#allocation10 + $0x1e0] sm:$0xff] }
  0xaf   :  { %647 = vmatprep.subr.bf16.mxu1 %v13445_v33  ;;  %v780_v17 = vld [vmem:[#allocation10 + $0x1c8] sm:$0xff] }
  0xb0   :  { %685 = vmatpush1.bf16.msra.mxu0 %v13435_v30  ;;  %v735_v30 = vld [vmem:[#allocation10 + $0x60] sm:$0xff] }
  0xb1   :  { %686 = vmatprep.subr.bf16.mxu0 %v13443_v31  ;;  %v732_v31 = vld [vmem:[#allocation10 + $0x48] sm:$0xff] }
  0xb2   :  { %648 = vmatpush1.bf16.msra.mxu1 %v13450_v36  ;;  %v11669_v36 = vcombine.high %v732_v31, %v736_v32 }
  0xb3   :  { %649 = vmatprep.subr.bf16.mxu1 %v13451_v37  ;;  %v739_v37 = vld [vmem:[#allocation10 + $0x80] sm:$0xff] }
  0xb4   :  { %687 = vmatpush1.bf16.msra.mxu0 %v13441_v34 }
  0xb5   :  { %688 = vmatprep.subr.bf16.mxu0 %v13449_v35  ;;  %v11667_v35 = vcombine.high %v731_v28, %v735_v30 }
  0xb6   :  { %650 = vmatpush1.bf16.msra.mxu1 %v13456_v40  ;;  %v744_v40 = vld [vmem:[#allocation10 + $0xa8] sm:$0xff] }
  0xb7   :  { %651 = vmatprep.subr.bf16.mxu1 %v13457_v41  ;;  %v11666_v41 = vcombine.low %v731_v28, %v735_v30 }
  0xb8   :  { %689 = vmatpush1.bf16.msra.mxu0 %v13447_v38  ;;  %v743_v38 = vld [vmem:[#allocation10 + $0xa0] sm:$0xff] }
  0xb9   :  { %690 = vmatprep.subr.bf16.mxu0 %v13455_v39  ;;  %v740_v39 = vld [vmem:[#allocation10 + $0x88] sm:$0xff] }
  0xba   :  { %652 = vmatpush1.bf16.msra.mxu1 %v13462_v43  ;;  %v11675_v43 = vcombine.high %v739_v37, %v743_v38 }
  0xbb   :  { %653 = vmatprep.subr.bf16.mxu1 %v13463_v45  ;;  %v747_v45 = vld [vmem:[#allocation10 + $0xc0] sm:$0xff] }
  0xbc   :  { %691 = vmatpush1.bf16.msra.mxu0 %v13453_v42  ;;  %v11668_v42 = vcombine.low %v732_v31, %v736_v32  ;;  %v795_v32 = vld [vmem:[#allocation10 + $0x240] sm:$0xff] }
  0xbd   :  { %692 = vmatprep.subr.bf16.mxu0 %v13461_v44  ;;  %v11677_v44 = vcombine.high %v740_v39, %v744_v40 }
  0xbe   :  { %654 = vmatpush1.bf16.msra.mxu1 %v13468_v47  ;;  %v748_v47 = vld [vmem:[#allocation10 + $0xc8] sm:$0xff] }
  0xbf   :  { %655 = vmatprep.subr.bf16.mxu1 %v13469_v49  ;;  %v11674_v49 = vcombine.low %v739_v37, %v743_v38 }
  0xc0   :  { %693 = vmatpush1.bf16.msra.mxu0 %v13459_v46  ;;  %v751_v46 = vld [vmem:[#allocation10 + $0xe0] sm:$0xff] }
  0xc1   :  { %694 = vmatprep.subr.bf16.mxu0 %v13467_v48  ;;  %v752_v48 = vld [vmem:[#allocation10 + $0xe8] sm:$0xff] }
  0xc2   :  { %656 = vmatpush1.bf16.msra.mxu1 %v13474_v51  ;;  %v11683_v51 = vcombine.high %v747_v45, %v751_v46 }
  0xc3   :  { %657 = vmatprep.subr.bf16.mxu1 %v13475_v53  ;;  %v755_v53 = vld [vmem:[#allocation10 + $0x100] sm:$0xff] }
  0xc4   :  { %695 = vmatpush1.bf16.msra.mxu0 %v13465_v50  ;;  %v11676_v50 = vcombine.low %v740_v39, %v744_v40  ;;  %v803_v40 = vld [vmem:[#allocation10 + $0x280] sm:$0xff] }
  0xc5   :  { %696 = vmatprep.subr.bf16.mxu0 %v13473_v52  ;;  %v11685_v52 = vcombine.high %v748_v47, %v752_v48 }
  0xc6   :  { %658 = vmatpush1.bf16.msra.mxu1 %v13480_v55  ;;  %v756_v55 = vld [vmem:[#allocation10 + $0x108] sm:$0xff] }
  0xc7   :  { %659 = vmatprep.subr.bf16.mxu1 %v13481_v57  ;;  %v11682_v57 = vcombine.low %v747_v45, %v751_v46 }
  0xc8   :  { %697 = vmatpush1.bf16.msra.mxu0 %v13471_v54  ;;  %v759_v54 = vld [vmem:[#allocation10 + $0x120] sm:$0xff] }
  0xc9   :  { %698 = vmatprep.subr.bf16.mxu0 %v13479_v56  ;;  %v760_v56 = vld [vmem:[#allocation10 + $0x128] sm:$0xff] }
  0xca   :  { %660 = vmatpush1.bf16.msra.mxu1 %v13486_v59  ;;  %v11691_v59 = vcombine.high %v755_v53, %v759_v54 }
  0xcb   :  { %661 = vmatprep.subr.bf16.mxu1 %v13487_v62  ;;  %v767_v62 = vld [vmem:[#allocation10 + $0x160] sm:$0xff] }
  0xcc   :  { %699 = vmatpush1.bf16.msra.mxu0 %v13477_v58  ;;  %v11684_v58 = vcombine.low %v748_v47, %v752_v48  ;;  %v811_v48 = vld [vmem:[#allocation10 + $0x2c0] sm:$0xff] }
  0xcd   :  { %700 = vmatprep.subr.bf16.mxu0 %v13485_v60  ;;  %v11693_v60 = vcombine.high %v756_v55, %v760_v56 }
  0xce   :  { %662 = vmatpush1.bf16.msra.mxu1 %v13492_v1  ;;  %v11690_v1 = vcombine.low %v755_v53, %v759_v54 }
  0xcf   :  { %663 = vmatprep.subr.bf16.mxu1 %v13493_v2  ;;  %v11692_v2 = vcombine.low %v756_v55, %v760_v56  ;;  %v819_v56 = vld [vmem:[#allocation10 + $0x300] sm:$0xff] }
  0xd0   :  { %701 = vmatpush1.bf16.msra.mxu0 %v13483_v61  ;;  %v763_v61 = vld [vmem:[#allocation10 + $0x140] sm:$0xff] }
  0xd1   :  { %702 = vmatprep.subr.bf16.mxu0 %v13491_v63  ;;  %v764_v63 = vld [vmem:[#allocation10 + $0x148] sm:$0xff] }
  0xd2   :  { %664 = vmatpush1.bf16.msra.mxu1 %v13498_v5  ;;  %v771_v5 = vld [vmem:[#allocation10 + $0x180] sm:$0xff] }
  0xd3   :  { %2301 = vmatprep.subr.bf16.mxu1 %v11659_v10  ;;  %v11707_v11 = vcombine.high %v771_v5, %v775_v6 }
  0xd4   :  { %703 = vmatpush1.bf16.msra.mxu0 %v13489_v0  ;;  %v768_v0 = vld [vmem:[#allocation10 + $0x168] sm:$0xff] }
  0xd5   :  { %704 = vmatprep.subr.bf16.mxu0 %v13497_v3  ;;  %v11699_v3 = vcombine.high %v763_v61, %v767_v62  ;;  %v11700_v10 = vcombine.low %v764_v63, %v768_v0 }
  0xd8   :  { %705 = vmatpush1.bf16.msra.mxu0 %v13495_v4  ;;  %v11701_v4 = vcombine.high %v764_v63, %v768_v0  ;;  %v827_v0 = vld [vmem:[#allocation10 + $0x340] sm:$0xff] }
  0xd9   :  { %2383 = vmatprep.subr.bf16.mxu0 %v11661_v13  ;;  %v779_v13 = vld [vmem:[#allocation10 + $0x1c0] sm:$0xff] }
  0xda   :  { %v11714_v28 = vcombine.low %v779_v13, %v783_v14 }
 0x16e   :  { %v216_v21 = vpop.f32.mrb[0].mxu0 }
 0x16f   :  { %v217_v22 = vadd.f32 %v216_v21, %v151_v19  ;;  %v218_v23 = vpop.f32.mrb[1].mxu0  ;;  %v784_v19 = vld [vmem:[#allocation10 + $0x1e8] sm:$0xff]  ;;  %v11708_v21 = vcombine.low %v772_v7, %v776_v8 }
 0x170   :  { %v219_v24 = vadd.f32 %v218_v23, %v155_v20  ;;  %v220_v25 = vpop.f32.mrb[2].mxu0  ;;  %v11706_v20 = vcombine.low %v771_v5, %v775_v6  ;;  %v11717_v23 = vcombine.high %v780_v17, %v784_v19 }
 0x171   :  { %v223_v26 = vmax.f32 %v217_v22, 0.0  ;;  %v221_v27 = vpop.f32.mrb[3].mxu0  ;;  %v11715_v22 = vcombine.high %v779_v13, %v783_v14  ;;  %v791_v25 = vld [vmem:[#allocation10 + $0x220] sm:$0xff]  ;;  %v840_v14 = vld [vmem:[#allocation10 + $0x3a8] sm:$0xff] }
 0x172   :  { %v224_v29 = vmax.f32 %v219_v24, 0.0  ;;  %v787_v24 = vld [vmem:[#allocation10 + $0x200] sm:$0xff]  ;;  %v792_v27 = vld [vmem:[#allocation10 + $0x228] sm:$0xff] }
 0x173   :  { %v225_v34 = vpack.c.bf16 %v223_v26, %v223_v26  ;;  %v788_v26 = vld [vmem:[#allocation10 + $0x208] sm:$0xff]  ;;  %v11723_v30 = vcombine.high %v787_v24, %v791_v25 }
 0x174   :  { %v226_v33 = vpack.c.bf16 %v224_v29, %v224_v29  ;;  %v11716_v29 = vcombine.low %v780_v17, %v784_v19  ;;  %v11725_v31 = vcombine.high %v788_v26, %v792_v27  ;;  %v11724_v37 = vcombine.low %v788_v26, %v792_v27 }
 0x176   :  { %665 = vmatprep.mubr.bf16.mxu1 %v226_v33  ;;  %706 = vmatprep.mubr.bf16.mxu0 %v226_v33  ;;  %v799_v33 = vld [vmem:[#allocation10 + $0x260] sm:$0xff] }
 0x177   :  { %666 = vmatmul.mubr.bf16.vlgmr.msra.gmra.mrb[0].mxu1 %v225_v34  ;;  %707 = vmatmul.mubr.bf16.vlgmr.msra.gmra.mrb[4].mxu0 %v225_v34  ;;  %v796_v34 = vld [vmem:[#allocation10 + $0x248] sm:$0xff]  ;;  %v11731_v38 = vcombine.high %v795_v32, %v799_v33 }
 0x178   :  { %2302 = vmatpush1.bf16.msra.mxu1 %v11658_v9  ;;  %2384 = vmatpush1.bf16.msra.mxu0 %v11660_v12  ;;  %v11698_v9 = vcombine.low %v763_v61, %v767_v62  ;;  %v11709_v12 = vcombine.high %v772_v7, %v776_v8 }
 0x179   :  { %2303 = vmatprep.subr.bf16.mxu1 %v11667_v35  ;;  %2385 = vmatprep.subr.bf16.mxu0 %v11669_v36  ;;  %v800_v35 = vld [vmem:[#allocation10 + $0x268] sm:$0xff]  ;;  %v11722_v36 = vcombine.low %v787_v24, %v791_v25 }
 0x17a   :  { %v11733_v39 = vcombine.high %v796_v34, %v800_v35  ;;  %v11732_v45 = vcombine.low %v796_v34, %v800_v35  ;;  %v848_v25 = vld [vmem:[#allocation10 + $0x3e8] sm:$0xff] }
 0x17c   :  { %2304 = vmatpush1.bf16.msra.mxu1 %v11666_v41  ;;  %2386 = vmatpush1.bf16.msra.mxu0 %v11668_v42  ;;  %v807_v41 = vld [vmem:[#allocation10 + $0x2a0] sm:$0xff]  ;;  %v804_v42 = vld [vmem:[#allocation10 + $0x288] sm:$0xff] }
 0x17d   :  { %2305 = vmatprep.subr.bf16.mxu1 %v11675_v43  ;;  %2387 = vmatprep.subr.bf16.mxu0 %v11677_v44  ;;  %v808_v43 = vld [vmem:[#allocation10 + $0x2a8] sm:$0xff]  ;;  %v11730_v44 = vcombine.low %v795_v32, %v799_v33  ;;  %v11739_v46 = vcombine.high %v803_v40, %v807_v41 }
 0x17e   :  { %v11741_v47 = vcombine.high %v804_v42, %v808_v43  ;;  %v11740_v53 = vcombine.low %v804_v42, %v808_v43  ;;  %v856_v33 = vld [vmem:[#allocation10 + $0x428] sm:$0xff] }
 0x180   :  { %2306 = vmatpush1.bf16.msra.mxu1 %v11674_v49  ;;  %2388 = vmatpush1.bf16.msra.mxu0 %v11676_v50  ;;  %v815_v49 = vld [vmem:[#allocation10 + $0x2e0] sm:$0xff]  ;;  %v812_v50 = vld [vmem:[#allocation10 + $0x2c8] sm:$0xff] }
 0x181   :  { %2307 = vmatprep.subr.bf16.mxu1 %v11683_v51  ;;  %2389 = vmatprep.subr.bf16.mxu0 %v11685_v52  ;;  %v816_v51 = vld [vmem:[#allocation10 + $0x2e8] sm:$0xff]  ;;  %v11738_v52 = vcombine.low %v803_v40, %v807_v41  ;;  %v11747_v54 = vcombine.high %v811_v48, %v815_v49 }
 0x182   :  { %v11749_v55 = vcombine.high %v812_v50, %v816_v51  ;;  %v11748_v61 = vcombine.low %v812_v50, %v816_v51 }
 0x184   :  { %2308 = vmatpush1.bf16.msra.mxu1 %v11682_v57  ;;  %2390 = vmatpush1.bf16.msra.mxu0 %v11684_v58  ;;  %v823_v57 = vld [vmem:[#allocation10 + $0x320] sm:$0xff]  ;;  %v820_v58 = vld [vmem:[#allocation10 + $0x308] sm:$0xff] }
 0x185   :  { %2309 = vmatprep.subr.bf16.mxu1 %v11691_v59  ;;  %2391 = vmatprep.subr.bf16.mxu0 %v11693_v60  ;;  %v824_v59 = vld [vmem:[#allocation10 + $0x328] sm:$0xff]  ;;  %v11746_v60 = vcombine.low %v811_v48, %v815_v49  ;;  %v11755_v62 = vcombine.high %v819_v56, %v823_v57 }
 0x186   :  { %v11757_v63 = vcombine.high %v820_v58, %v824_v59  ;;  %v11756_v5 = vcombine.low %v820_v58, %v824_v59  ;;  %v860_v58 = vld [vmem:[#allocation10 + $0x448] sm:$0xff] }
 0x187   :  { %v864_v59 = vld [vmem:[#allocation10 + $0x468] sm:$0xff] }
 0x188   :  { %2310 = vmatpush1.bf16.msra.mxu1 %v11690_v1  ;;  %2392 = vmatpush1.bf16.msra.mxu0 %v11692_v2  ;;  %v831_v1 = vld [vmem:[#allocation10 + $0x360] sm:$0xff]  ;;  %v828_v2 = vld [vmem:[#allocation10 + $0x348] sm:$0xff] }
 0x189   :  { %2311 = vmatprep.subr.bf16.mxu1 %v11699_v3  ;;  %2393 = vmatprep.subr.bf16.mxu0 %v11701_v4  ;;  %v832_v3 = vld [vmem:[#allocation10 + $0x368] sm:$0xff]  ;;  %v11754_v4 = vcombine.low %v819_v56, %v823_v57  ;;  %v11763_v6 = vcombine.high %v827_v0, %v831_v1  ;;  %v11762_v8 = vcombine.low %v827_v0, %v831_v1  ;;  %v863_v57 = vld [vmem:[#allocation10 + $0x460] sm:$0xff] }
 0x18a   :  { %v11765_v7 = vcombine.high %v828_v2, %v832_v3  ;;  %v11797_v0 = vcombine.high %v860_v58, %v864_v59  ;;  %v871_v1 = vld [vmem:[#allocation10 + $0x4a0] sm:$0xff] }
 0x18c   :  { %2312 = vmatpush1.bf16.msra.mxu1 %v11698_v9  ;;  %2394 = vmatpush1.bf16.msra.mxu0 %v11700_v10  ;;  %v11764_v9 = vcombine.low %v828_v2, %v832_v3  ;;  %v835_v10 = vld [vmem:[#allocation10 + $0x380] sm:$0xff]  ;;  %v868_v2 = vld [vmem:[#allocation10 + $0x488] sm:$0xff] }
 0x18d   :  { %2313 = vmatprep.subr.bf16.mxu1 %v11707_v11  ;;  %2395 = vmatprep.subr.bf16.mxu0 %v11709_v12  ;;  %v839_v11 = vld [vmem:[#allocation10 + $0x3a0] sm:$0xff]  ;;  %v836_v12 = vld [vmem:[#allocation10 + $0x388] sm:$0xff] }
 0x18e   :  { %v11771_v13 = vcombine.high %v835_v10, %v839_v11  ;;  %v11770_v17 = vcombine.low %v835_v10, %v839_v11  ;;  %v11772_v19 = vcombine.low %v836_v12, %v840_v14  ;;  %v872_v3 = vld [vmem:[#allocation10 + $0x4a8] sm:$0xff]  ;;  %v879_v10 = vld [vmem:[#allocation10 + $0x4e0] sm:$0xff] }
 0x18f   :  { %v876_v11 = vld [vmem:[#allocation10 + $0x4c8] sm:$0xff] }
 0x190   :  { %2314 = vmatpush1.bf16.msra.mxu1 %v11706_v20  ;;  %2396 = vmatpush1.bf16.msra.mxu0 %v11708_v21  ;;  %v11773_v20 = vcombine.high %v836_v12, %v840_v14  ;;  %v843_v21 = vld [vmem:[#allocation10 + $0x3c0] sm:$0xff]  ;;  %v880_v12 = vld [vmem:[#allocation10 + $0x4e8] sm:$0xff]  ;;  %v11804_v14 = vcombine.low %v868_v2, %v872_v3 }
 0x191   :  { %2315 = vmatprep.subr.bf16.mxu1 %v11715_v22  ;;  %2397 = vmatprep.subr.bf16.mxu0 %v11717_v23  ;;  %v847_v22 = vld [vmem:[#allocation10 + $0x3e0] sm:$0xff]  ;;  %v844_v23 = vld [vmem:[#allocation10 + $0x3c8] sm:$0xff] }
 0x192   :  { %v11779_v24 = vcombine.high %v843_v21, %v847_v22  ;;  %v11778_v26 = vcombine.low %v843_v21, %v847_v22  ;;  %v11780_v27 = vcombine.low %v844_v23, %v848_v25  ;;  %v887_v21 = vld [vmem:[#allocation10 + $0x520] sm:$0xff]  ;;  %v884_v22 = vld [vmem:[#allocation10 + $0x508] sm:$0xff] }
 0x194   :  { %2316 = vmatpush1.bf16.msra.mxu1 %v11714_v28  ;;  %2398 = vmatpush1.bf16.msra.mxu0 %v11716_v29  ;;  %v11781_v28 = vcombine.high %v844_v23, %v848_v25  ;;  %v851_v29 = vld [vmem:[#allocation10 + $0x400] sm:$0xff]  ;;  %v888_v23 = vld [vmem:[#allocation10 + $0x528] sm:$0xff]  ;;  %v11812_v25 = vcombine.low %v876_v11, %v880_v12 }
 0x195   :  { %2317 = vmatprep.subr.bf16.mxu1 %v11723_v30  ;;  %2399 = vmatprep.subr.bf16.mxu0 %v11725_v31  ;;  %v855_v30 = vld [vmem:[#allocation10 + $0x420] sm:$0xff]  ;;  %v852_v31 = vld [vmem:[#allocation10 + $0x408] sm:$0xff] }
 0x196   :  { %v11787_v32 = vcombine.high %v851_v29, %v855_v30  ;;  %v11786_v34 = vcombine.low %v851_v29, %v855_v30  ;;  %v11788_v35 = vcombine.low %v852_v31, %v856_v33  ;;  %v895_v29 = vld [vmem:[#allocation10 + $0x560] sm:$0xff]  ;;  %v892_v30 = vld [vmem:[#allocation10 + $0x548] sm:$0xff] }
 0x198   :  { %2318 = vmatpush1.bf16.msra.mxu1 %v11722_v36  ;;  %2400 = vmatpush1.bf16.msra.mxu0 %v11724_v37  ;;  %v11789_v36 = vcombine.high %v852_v31, %v856_v33  ;;  %v14032_v37 = vld [vmem:[#allocation8] sm:$0xf]  ;;  %v896_v31 = vld [vmem:[#allocation10 + $0x568] sm:$0xff]  ;;  %v11820_v33 = vcombine.low %v884_v22, %v888_v23 }
 0x199   :  { %2319 = vmatprep.subr.bf16.mxu1 %v11731_v38  ;;  %2401 = vmatprep.subr.bf16.mxu0 %v11733_v39  ;;  %v14035_v38 = vsub.s32 3, %v14022_v15  ;;  %v296_v39 = vrot.slane %v14032_v37, %v14025_v16  ;;  %v300_v40 = vrot.slane %v14032_v37, %v14028_v18 }
 0x19b   :  { %v308_v41 = vrot.slane %v14032_v37, %v14035_v38 }
 0x19c   :  { %2320 = vmatpush1.bf16.msra.mxu1 %v11730_v44  ;;  %2402 = vmatpush1.bf16.msra.mxu0 %v11732_v45 }
 0x19d   :  { %2321 = vmatprep.subr.bf16.mxu1 %v11739_v46  ;;  %2403 = vmatprep.subr.bf16.mxu0 %v11741_v47 }
 0x1a0   :  { %2322 = vmatpush1.bf16.msra.mxu1 %v11738_v52  ;;  %2404 = vmatpush1.bf16.msra.mxu0 %v11740_v53 }
 0x1a1   :  { %2323 = vmatprep.subr.bf16.mxu1 %v11747_v54  ;;  %2405 = vmatprep.subr.bf16.mxu0 %v11749_v55  ;;  %v859_v55 = vld [vmem:[#allocation10 + $0x440] sm:$0xff] }
 0x1a4   :  { %2324 = vmatpush1.bf16.msra.mxu1 %v11746_v60  ;;  %2406 = vmatpush1.bf16.msra.mxu0 %v11748_v61 }
 0x1a5   :  { %2325 = vmatprep.subr.bf16.mxu1 %v11755_v62  ;;  %2407 = vmatprep.subr.bf16.mxu0 %v11757_v63  ;;  %v867_v62 = vld [vmem:[#allocation10 + $0x480] sm:$0xff]  ;;  %v11795_v63 = vcombine.high %v859_v55, %v863_v57 }
 0x1a8   :  { %2326 = vmatpush1.bf16.msra.mxu1 %v11754_v4  ;;  %2408 = vmatpush1.bf16.msra.mxu0 %v11756_v5  ;;  %v11794_v5 = vcombine.low %v859_v55, %v863_v57  ;;  %v915_v55 = vld [vmem:[#allocation10 + $0x600] sm:$0xff]  ;;  %v916_v57 = vld [vmem:[#allocation10 + $0x608] sm:$0xff] }
 0x1a9   :  { %2327 = vmatprep.subr.bf16.mxu1 %v11763_v6  ;;  %2409 = vmatprep.subr.bf16.mxu0 %v11765_v7  ;;  %v11796_v6 = vcombine.low %v860_v58, %v864_v59  ;;  %v11803_v7 = vcombine.high %v867_v62, %v871_v1  ;;  %v920_v58 = vld [vmem:[#allocation10 + $0x628] sm:$0xff] }
 0x1ac   :  { %2328 = vmatpush1.bf16.msra.mxu1 %v11762_v8  ;;  %2410 = vmatpush1.bf16.msra.mxu0 %v11764_v9  ;;  %v11805_v8 = vcombine.high %v868_v2, %v872_v3  ;;  %v875_v9 = vld [vmem:[#allocation10 + $0x4c0] sm:$0xff]  ;;  %v924_v3 = vld [vmem:[#allocation10 + $0x648] sm:$0xff] }
 0x1ad   :  { %2329 = vmatprep.subr.bf16.mxu1 %v11771_v13  ;;  %2411 = vmatprep.subr.bf16.mxu0 %v11773_v20  ;;  %v11802_v13 = vcombine.low %v867_v62, %v871_v1  ;;  %v883_v20 = vld [vmem:[#allocation10 + $0x500] sm:$0xff] }
 0x1ae   :  { %v923_v1 = vld [vmem:[#allocation10 + $0x640] sm:$0xff] }
 0x1af   :  { %v927_v2 = vld [vmem:[#allocation10 + $0x660] sm:$0xff] }
 0x1b0   :  { %2330 = vmatpush1.bf16.msra.mxu1 %v11770_v17  ;;  %2412 = vmatpush1.bf16.msra.mxu0 %v11772_v19  ;;  %v11811_v17 = vcombine.high %v875_v9, %v879_v10  ;;  %v11813_v19 = vcombine.high %v876_v11, %v880_v12  ;;  %v935_v11 = vld [vmem:[#allocation10 + $0x6a0] sm:$0xff]  ;;  %v932_v12 = vld [vmem:[#allocation10 + $0x688] sm:$0xff] }
 0x1b1   :  { %2331 = vmatprep.subr.bf16.mxu1 %v11779_v24  ;;  %2413 = vmatprep.subr.bf16.mxu0 %v11781_v28  ;;  %v11810_v24 = vcombine.low %v875_v9, %v879_v10  ;;  %v891_v28 = vld [vmem:[#allocation10 + $0x540] sm:$0xff] }
 0x1b2   :  { %v931_v10 = vld [vmem:[#allocation10 + $0x680] sm:$0xff] }
 0x1b4   :  { %2332 = vmatpush1.bf16.msra.mxu1 %v11778_v26  ;;  %2414 = vmatpush1.bf16.msra.mxu0 %v11780_v27  ;;  %v11819_v26 = vcombine.high %v883_v20, %v887_v21  ;;  %v11821_v27 = vcombine.high %v884_v22, %v888_v23  ;;  %v943_v22 = vld [vmem:[#allocation10 + $0x6e0] sm:$0xff]  ;;  %v940_v23 = vld [vmem:[#allocation10 + $0x6c8] sm:$0xff] }
 0x1b5   :  { %2342 = vmatprep.subr.bf16.mxu1 %v11787_v32  ;;  %2424 = vmatprep.subr.bf16.mxu0 %v11789_v36  ;;  %v11818_v32 = vcombine.low %v883_v20, %v887_v21  ;;  %v899_v36 = vld [vmem:[#allocation10 + $0x580] sm:$0xff] }
 0x1b6   :  { %v939_v21 = vld [vmem:[#allocation10 + $0x6c0] sm:$0xff] }
 0x24a   :  { %v667_v42 = vpop.f32.mrb[0].mxu1  ;;  %v14043_v43 = vpop.f32.mrb[4].mxu0 }
 0x24b   :  { %v668_v44 = vadd.f32 %v667_v42, %v296_v39  ;;  %v669_v45 = vpop.f32.mrb[1].mxu1  ;;  %v710_v46 = vpop.f32.mrb[5].mxu0  ;;  %v903_v39 = vld [vmem:[#allocation10 + $0x5a0] sm:$0xff]  ;;  %v11826_v42 = vcombine.low %v891_v28, %v895_v29 }
 0x24c   :  { %v670_v47 = vadd.f32 %v669_v45, %v300_v40  ;;  %v711_v48 = vadd.f32 %v710_v46, %v308_v41  ;;  %v671_v49 = vpop.f32.mrb[2].mxu1  ;;  %v712_v50 = vpop.f32.mrb[6].mxu0  ;;  %v900_v40 = vld [vmem:[#allocation10 + $0x588] sm:$0xff]  ;;  %v11835_v45 = vcombine.high %v899_v36, %v903_v39 }
 0x24d   :  { %v715_v51 = vmax.f32 %v668_v44, 0.0  ;;  %v672_v52 = vpop.f32.mrb[3].mxu1  ;;  %v713_v53 = vpop.f32.mrb[7].mxu0  ;;  %v904_v41 = vld [vmem:[#allocation10 + $0x5a8] sm:$0xff]  ;;  %v11828_v44 = vcombine.low %v892_v30, %v896_v31 }
 0x24e   :  { %v716_v54 = vmax.f32 %v670_v47, 0.0  ;;  %v718_v56 = vmax.f32 %v711_v48, 0.0  ;;  %v11837_v46 = vcombine.high %v900_v40, %v904_v41  ;;  %v907_v47 = vld [vmem:[#allocation10 + $0x5c0] sm:$0xff]  ;;  %v908_v49 = vld [vmem:[#allocation10 + $0x5c8] sm:$0xff]  ;;  %v11836_v52 = vcombine.low %v900_v40, %v904_v41 }
 0x24f   :  { %v14047_v61 = vpack.c.bf16 %v715_v51, %v715_v51  ;;  %v911_v48 = vld [vmem:[#allocation10 + $0x5e0] sm:$0xff]  ;;  %v912_v50 = vld [vmem:[#allocation10 + $0x5e8] sm:$0xff]  ;;  %v11834_v51 = vcombine.low %v899_v36, %v903_v39 }
 0x250   :  { %v14045_v60 = vpack.c.bf16 %v716_v54, %v716_v54  ;;  %v14051_v4 = vpack.c.bf16 %v718_v56, %v718_v56  ;;  %v11843_v53 = vcombine.high %v907_v47, %v911_v48  ;;  %v11845_v54 = vcombine.high %v908_v49, %v912_v50  ;;  %v919_v56 = vld [vmem:[#allocation10 + $0x620] sm:$0xff]  ;;  %v956_v41 = vld [vmem:[#allocation10 + $0x748] sm:$0xff] }
 0x251   :  { %v11842_v59 = vcombine.low %v907_v47, %v911_v48  ;;  %v11844_v62 = vcombine.low %v908_v49, %v912_v50  ;;  %v955_v39 = vld [vmem:[#allocation10 + $0x740] sm:$0xff] }
 0x252   :  { %2333 = vmatprep.mubr.bf16.mxu1 %v14045_v60  ;;  %2415 = vmatprep.mubr.bf16.mxu0 %v14045_v60  ;;  %v959_v40 = vld [vmem:[#allocation10 + $0x760] sm:$0xff] }
 0x253   :  { %2334 = vmatmul.mubr.bf16.vlgmr.msra.gmra.mrb[4].mxu1 %v14047_v61  ;;  %2416 = vmatmul.mubr.bf16.vlgmr.msra.gmra.mrb[8].mxu0 %v14047_v61  ;;  %v11891_v47 = vcombine.high %v955_v39, %v959_v40  ;;  %v963_v49 = vld [vmem:[#allocation10 + $0x780] sm:$0xff] }
 0x254   :  { %2343 = vmatpush1.bf16.msra.mxu1 %v11786_v34  ;;  %2425 = vmatpush1.bf16.msra.mxu0 %v11788_v35  ;;  %v11827_v34 = vcombine.high %v891_v28, %v895_v29  ;;  %v11829_v35 = vcombine.high %v892_v30, %v896_v31  ;;  %v947_v29 = vld [vmem:[#allocation10 + $0x700] sm:$0xff]  ;;  %v948_v31 = vld [vmem:[#allocation10 + $0x708] sm:$0xff] }
 0x255   :  { %2374 = vmatprep.mubr.bf16.mxu1 %v14051_v4  ;;  %2456 = vmatprep.mubr.bf16.mxu0 %v14051_v4  ;;  %v951_v30 = vld [vmem:[#allocation10 + $0x720] sm:$0xff] }
 0x256   :  { %2344 = vmatprep.subr.bf16.mxu1 %v11795_v63  ;;  %2426 = vmatprep.subr.bf16.mxu0 %v11797_v0  ;;  %v11851_v63 = vcombine.high %v915_v55, %v919_v56  ;;  %v11853_v0 = vcombine.high %v916_v57, %v920_v58  ;;  %v967_v50 = vld [vmem:[#allocation10 + $0x7a0] sm:$0xff] }
 0x258   :  { %2345 = vmatpush1.bf16.msra.mxu1 %v11794_v5  ;;  %2427 = vmatpush1.bf16.msra.mxu0 %v11796_v6  ;;  %v928_v5 = vld [vmem:[#allocation10 + $0x668] sm:$0xff]  ;;  %v11850_v6 = vcombine.low %v915_v55, %v919_v56  ;;  %v11899_v56 = vcombine.high %v963_v49, %v967_v50 }
 0x259   :  { %2346 = vmatprep.subr.bf16.mxu1 %v11803_v7  ;;  %2428 = vmatprep.subr.bf16.mxu0 %v11805_v8  ;;  %v11852_v7 = vcombine.low %v916_v57, %v920_v58  ;;  %v11859_v8 = vcombine.high %v923_v1, %v927_v2  ;;  %v11861_v9 = vcombine.high %v924_v3, %v928_v5  ;;  %v971_v58 = vld [vmem:[#allocation10 + $0x7c0] sm:$0xff] }
 0x25c   :  { %2347 = vmatpush1.bf16.msra.mxu1 %v11802_v13  ;;  %2429 = vmatpush1.bf16.msra.mxu0 %v11804_v14  ;;  %v936_v13 = vld [vmem:[#allocation10 + $0x6a8] sm:$0xff]  ;;  %v11858_v14 = vcombine.low %v923_v1, %v927_v2 }
 0x25d   :  { %2348 = vmatprep.subr.bf16.mxu1 %v11811_v17  ;;  %2430 = vmatprep.subr.bf16.mxu0 %v11813_v19  ;;  %v11860_v17 = vcombine.low %v924_v3, %v928_v5  ;;  %v11867_v19 = vcombine.high %v931_v10, %v935_v11  ;;  %v11869_v20 = vcombine.high %v932_v12, %v936_v13 }
 0x260   :  { %2349 = vmatpush1.bf16.msra.mxu1 %v11810_v24  ;;  %2431 = vmatpush1.bf16.msra.mxu0 %v11812_v25  ;;  %v944_v24 = vld [vmem:[#allocation10 + $0x6e8] sm:$0xff]  ;;  %v11866_v25 = vcombine.low %v931_v10, %v935_v11 }
 0x261   :  { %2350 = vmatprep.subr.bf16.mxu1 %v11819_v26  ;;  %2432 = vmatprep.subr.bf16.mxu0 %v11821_v27  ;;  %v11868_v26 = vcombine.low %v932_v12, %v936_v13  ;;  %v11875_v27 = vcombine.high %v939_v21, %v943_v22  ;;  %v11877_v28 = vcombine.high %v940_v23, %v944_v24 }
 0x264   :  { %2351 = vmatpush1.bf16.msra.mxu1 %v11818_v32  ;;  %2433 = vmatpush1.bf16.msra.mxu0 %v11820_v33  ;;  %v952_v32 = vld [vmem:[#allocation10 + $0x728] sm:$0xff]  ;;  %v11874_v33 = vcombine.low %v939_v21, %v943_v22 }
 0x265   :  { %2352 = vmatprep.subr.bf16.mxu1 %v11827_v34  ;;  %2434 = vmatprep.subr.bf16.mxu0 %v11829_v35  ;;  %v11876_v34 = vcombine.low %v940_v23, %v944_v24  ;;  %v11883_v35 = vcombine.high %v947_v29, %v951_v30  ;;  %v11885_v36 = vcombine.high %v948_v31, %v952_v32 }
 0x268   :  { %2353 = vmatpush1.bf16.msra.mxu1 %v11826_v42  ;;  %2435 = vmatpush1.bf16.msra.mxu0 %v11828_v44  ;;  %v960_v42 = vld [vmem:[#allocation10 + $0x768] sm:$0xff]  ;;  %v11882_v44 = vcombine.low %v947_v29, %v951_v30 }
 0x269   :  { %2354 = vmatprep.subr.bf16.mxu1 %v11835_v45  ;;  %2436 = vmatprep.subr.bf16.mxu0 %v11837_v46  ;;  %v11884_v45 = vcombine.low %v948_v31, %v952_v32  ;;  %v14058_v46 = vsub.s32 2, %v14022_v15  ;;  %v11893_v48 = vcombine.high %v956_v41, %v960_v42 }
 0x26b   :  { %v304_v55 = vrot.slane %v14032_v37, %v14058_v46  ;;  %v729_v37 = vld [vmem:[#allocation10 + $0x30] sm:$0xff] }
 0x26c   :  { %2355 = vmatpush1.bf16.msra.mxu1 %v11834_v51  ;;  %2437 = vmatpush1.bf16.msra.mxu0 %v11836_v52  ;;  %v964_v51 = vld [vmem:[#allocation10 + $0x788] sm:$0xff] }
 0x26d   :  { %2356 = vmatprep.subr.bf16.mxu1 %v11843_v53  ;;  %2438 = vmatprep.subr.bf16.mxu0 %v11845_v54  ;;  %v968_v52 = vld [vmem:[#allocation10 + $0x7a8] sm:$0xff]  ;;  %v11890_v53 = vcombine.low %v955_v39, %v959_v40  ;;  %v11892_v54 = vcombine.low %v956_v41, %v960_v42  ;;  %v709_v2 = vadd.f32 %v14043_v43, %v304_v55  ;;  %v734_v43 = vld [vmem:[#allocation10 + $0x58] sm:$0xff] }
 0x26e   :  { %v11901_v57 = vcombine.high %v964_v51, %v968_v52  ;;  %v11900_v1 = vcombine.low %v964_v51, %v968_v52  ;;  %v765_v52 = vld [vmem:[#allocation10 + $0x150] sm:$0xff]  ;;  %v770_v55 = vld [vmem:[#allocation10 + $0x178] sm:$0xff] }
 0x26f   :  { %v717_v11 = vmax.f32 %v709_v2, 0.0 }
 0x270   :  { %2357 = vmatpush1.bf16.msra.mxu1 %v11842_v59  ;;  %2439 = vmatpush1.bf16.msra.mxu0 %v11844_v62  ;;  %v975_v59 = vld [vmem:[#allocation10 + $0x7e0] sm:$0xff]  ;;  %v972_v62 = vld [vmem:[#allocation10 + $0x7c8] sm:$0xff] }
 0x271   :  { %2358 = vmatprep.subr.bf16.mxu1 %v11851_v63  ;;  %2440 = vmatprep.subr.bf16.mxu0 %v11853_v0  ;;  %v976_v63 = vld [vmem:[#allocation10 + $0x7e8] sm:$0xff]  ;;  %v11898_v0 = vcombine.low %v963_v49, %v967_v50  ;;  %v11907_v3 = vcombine.high %v971_v58, %v975_v59  ;;  %v14063_v21 = vpack.c.bf16 %v717_v11, %v717_v11 }
 0x272   :  { %v11909_v5 = vcombine.high %v972_v62, %v976_v63  ;;  %v11908_v10 = vcombine.low %v972_v62, %v976_v63  ;;  %v773_v62 = vld [vmem:[#allocation10 + $0x190] sm:$0xff] }
 0x273   :  { %v777_v63 = vld [vmem:[#allocation10 + $0x1b0] sm:$0xff] }
 0x274   :  { %2359 = vmatpush1.bf16.msra.mxu1 %v11850_v6  ;;  %2441 = vmatpush1.bf16.msra.mxu0 %v11852_v7  ;;  %v725_v6 = vld [vmem:[#allocation10 + $0x10] sm:$0xff]  ;;  %v726_v7 = vld [vmem:[#allocation10 + $0x18] sm:$0xff] }
 0x275   :  { %2360 = vmatprep.subr.bf16.mxu1 %v11859_v8  ;;  %2442 = vmatprep.subr.bf16.mxu0 %v11861_v9  ;;  %v730_v8 = vld [vmem:[#allocation10 + $0x38] sm:$0xff]  ;;  %v11906_v9 = vcombine.low %v971_v58, %v975_v59  ;;  %v11663_v12 = vcombine.high %v725_v6, %v729_v37 }
 0x276   :  { %v11665_v13 = vcombine.high %v726_v7, %v730_v8  ;;  %v11664_v22 = vcombine.low %v726_v7, %v730_v8  ;;  %v785_v7 = vld [vmem:[#allocation10 + $0x1f0] sm:$0xff]  ;;  %v782_v8 = vld [vmem:[#allocation10 + $0x1d8] sm:$0xff] }
 0x278   :  { %2361 = vmatpush1.bf16.msra.mxu1 %v11858_v14  ;;  %2443 = vmatpush1.bf16.msra.mxu0 %v11860_v17  ;;  %v733_v14 = vld [vmem:[#allocation10 + $0x50] sm:$0xff] }
 0x279   :  { %2362 = vmatprep.subr.bf16.mxu1 %v11867_v19  ;;  %2444 = vmatprep.subr.bf16.mxu0 %v11869_v20  ;;  %v737_v17 = vld [vmem:[#allocation10 + $0x70] sm:$0xff]  ;;  %v738_v19 = vld [vmem:[#allocation10 + $0x78] sm:$0xff]  ;;  %v11662_v20 = vcombine.low %v725_v6, %v729_v37 }
 0x27a   :  { %v11671_v23 = vcombine.high %v733_v14, %v737_v17  ;;  %v11673_v24 = vcombine.high %v734_v43, %v738_v19  ;;  %v11670_v29 = vcombine.low %v733_v14, %v737_v17  ;;  %v11672_v30 = vcombine.low %v734_v43, %v738_v19  ;;  %v781_v37 = vld [vmem:[#allocation10 + $0x1d0] sm:$0xff]  ;;  %v790_v43 = vld [vmem:[#allocation10 + $0x218] sm:$0xff] }
 0x27b   :  { %v789_v14 = vld [vmem:[#allocation10 + $0x210] sm:$0xff]  ;;  %v794_v19 = vld [vmem:[#allocation10 + $0x238] sm:$0xff] }
 0x27c   :  { %2363 = vmatpush1.bf16.msra.mxu1 %v11866_v25  ;;  %2445 = vmatpush1.bf16.msra.mxu0 %v11868_v26  ;;  %v741_v25 = vld [vmem:[#allocation10 + $0x90] sm:$0xff] }
 0x27d   :  { %2364 = vmatprep.subr.bf16.mxu1 %v11875_v27  ;;  %2446 = vmatprep.subr.bf16.mxu0 %v11877_v28  ;;  %v745_v26 = vld [vmem:[#allocation10 + $0xb0] sm:$0xff]  ;;  %v742_v27 = vld [vmem:[#allocation10 + $0x98] sm:$0xff] }
 0x27e   :  { %v746_v28 = vld [vmem:[#allocation10 + $0xb8] sm:$0xff]  ;;  %v11679_v31 = vcombine.high %v741_v25, %v745_v26  ;;  %v11678_v39 = vcombine.low %v741_v25, %v745_v26  ;;  %v793_v17 = vld [vmem:[#allocation10 + $0x230] sm:$0xff] }
 0x27f   :  { %v11681_v32 = vcombine.high %v742_v27, %v746_v28  ;;  %v11680_v40 = vcombine.low %v742_v27, %v746_v28  ;;  %v797_v25 = vld [vmem:[#allocation10 + $0x250] sm:$0xff]  ;;  %v798_v27 = vld [vmem:[#allocation10 + $0x258] sm:$0xff] }
 0x280   :  { %2365 = vmatpush1.bf16.msra.mxu1 %v11874_v33  ;;  %2447 = vmatpush1.bf16.msra.mxu0 %v11876_v34  ;;  %v749_v33 = vld [vmem:[#allocation10 + $0xd0] sm:$0xff]  ;;  %v802_v28 = vld [vmem:[#allocation10 + $0x278] sm:$0xff] }
 0x281   :  { %2366 = vmatprep.subr.bf16.mxu1 %v11883_v35  ;;  %2448 = vmatprep.subr.bf16.mxu0 %v11885_v36  ;;  %v753_v34 = vld [vmem:[#allocation10 + $0xf0] sm:$0xff]  ;;  %v750_v35 = vld [vmem:[#allocation10 + $0xd8] sm:$0xff] }
 0x282   :  { %v754_v36 = vld [vmem:[#allocation10 + $0xf8] sm:$0xff]  ;;  %v11687_v41 = vcombine.high %v749_v33, %v753_v34  ;;  %v801_v26 = vld [vmem:[#allocation10 + $0x270] sm:$0xff] }
 0x283   :  { %v11689_v42 = vcombine.high %v750_v35, %v754_v36  ;;  %v11688_v49 = vcombine.low %v750_v35, %v754_v36  ;;  %v806_v35 = vld [vmem:[#allocation10 + $0x298] sm:$0xff] }
 0x284   :  { %2367 = vmatpush1.bf16.msra.mxu1 %v11882_v44  ;;  %2449 = vmatpush1.bf16.msra.mxu0 %v11884_v45  ;;  %v757_v44 = vld [vmem:[#allocation10 + $0x110] sm:$0xff]  ;;  %v810_v36 = vld [vmem:[#allocation10 + $0x2b8] sm:$0xff] }
 0x285   :  { %2368 = vmatprep.subr.bf16.mxu1 %v11891_v47  ;;  %2450 = vmatprep.subr.bf16.mxu0 %v11893_v48  ;;  %v761_v45 = vld [vmem:[#allocation10 + $0x130] sm:$0xff]  ;;  %v762_v47 = vld [vmem:[#allocation10 + $0x138] sm:$0xff]  ;;  %v11686_v48 = vcombine.low %v749_v33, %v753_v34 }
 0x286   :  { %v11695_v50 = vcombine.high %v757_v44, %v761_v45  ;;  %v805_v33 = vld [vmem:[#allocation10 + $0x290] sm:$0xff] }
 0x287   :  { %v809_v34 = vld [vmem:[#allocation10 + $0x2b0] sm:$0xff] }
 0x288   :  { %2369 = vmatpush1.bf16.msra.mxu1 %v11890_v53  ;;  %2451 = vmatpush1.bf16.msra.mxu0 %v11892_v54  ;;  %v769_v53 = vld [vmem:[#allocation10 + $0x170] sm:$0xff]  ;;  %v766_v54 = vld [vmem:[#allocation10 + $0x158] sm:$0xff] }
 0x289   :  { %2370 = vmatprep.subr.bf16.mxu1 %v11899_v56  ;;  %2452 = vmatprep.subr.bf16.mxu0 %v11901_v57  ;;  %v11694_v56 = vcombine.low %v757_v44, %v761_v45  ;;  %v11703_v58 = vcombine.high %v765_v52, %v769_v53  ;;  %v11705_v59 = vcombine.high %v766_v54, %v770_v55  ;;  %v813_v44 = vld [vmem:[#allocation10 + $0x2d0] sm:$0xff] }
 0x28a   :  { %v11702_v2 = vcombine.low %v765_v52, %v769_v53  ;;  %v817_v45 = vld [vmem:[#allocation10 + $0x2f0] sm:$0xff] }
 0x28b   :  { %v821_v52 = vld [vmem:[#allocation10 + $0x310] sm:$0xff] }
 0x28c   :  { %2371 = vmatpush1.bf16.msra.mxu1 %v11898_v0  ;;  %2453 = vmatpush1.bf16.msra.mxu0 %v11900_v1  ;;  %v774_v0 = vld [vmem:[#allocation10 + $0x198] sm:$0xff]  ;;  %v825_v53 = vld [vmem:[#allocation10 + $0x330] sm:$0xff] }
 0x28d   :  { %2372 = vmatprep.subr.bf16.mxu1 %v11907_v3  ;;  %2454 = vmatprep.subr.bf16.mxu0 %v11909_v5  ;;  %v778_v1 = vld [vmem:[#allocation10 + $0x1b8] sm:$0xff]  ;;  %v11704_v3 = vcombine.low %v766_v54, %v770_v55  ;;  %v11711_v5 = vcombine.high %v773_v62, %v777_v63 }
 0x28e   :  { %v11713_v6 = vcombine.high %v774_v0, %v778_v1  ;;  %v11712_v11 = vcombine.low %v774_v0, %v778_v1  ;;  %v822_v54 = vld [vmem:[#allocation10 + $0x318] sm:$0xff] }
 0x28f   :  { %v826_v55 = vld [vmem:[#allocation10 + $0x338] sm:$0xff] }
 0x290   :  { %2373 = vmatpush1.bf16.msra.mxu1 %v11906_v9  ;;  %2455 = vmatpush1.bf16.msra.mxu0 %v11908_v10  ;;  %v786_v9 = vld [vmem:[#allocation10 + $0x1f8] sm:$0xff]  ;;  %v11710_v10 = vcombine.low %v773_v62, %v777_v63  ;;  %v829_v62 = vld [vmem:[#allocation10 + $0x350] sm:$0xff] }
 0x291   :  { %2465 = vmatprep.subr.bf16.mxu1 %v11663_v12  ;;  %2547 = vmatprep.subr.bf16.mxu0 %v11665_v13  ;;  %v11719_v12 = vcombine.high %v781_v37, %v785_v7  ;;  %v11721_v13 = vcombine.high %v782_v8, %v786_v9  ;;  %v833_v63 = vld [vmem:[#allocation10 + $0x370] sm:$0xff]  ;;  %v830_v0 = vld [vmem:[#allocation10 + $0x358] sm:$0xff] }
 0x292   :  { %v834_v1 = vld [vmem:[#allocation10 + $0x378] sm:$0xff] }
 0x293   :  { %2375 = vmatmul.mubr.bf16.vlgmr.msra.gmra.mrb[4].mxu1 %v14063_v21  ;;  %2457 = vmatmul.mubr.bf16.vlgmr.msra.gmra.mrb[8].mxu0 %v14063_v21 }
 0x294   :  { %2466 = vmatpush1.bf16.msra.mxu1 %v11662_v20  ;;  %2497 = vmatprep.mubr.bf16.mxu1 %v14045_v60  ;;  %v11718_v20 = vcombine.low %v781_v37, %v785_v7  ;;  %v837_v37 = vld [vmem:[#allocation10 + $0x390] sm:$0xff] }
 0x295   :  { %2548 = vmatpush1.bf16.msra.mxu0 %v11664_v22  ;;  %2579 = vmatprep.mubr.bf16.mxu0 %v14045_v60  ;;  %v758_v60 = vld [vmem:[#allocation10 + $0x118] sm:$0xff]  ;;  %v11720_v22 = vcombine.low %v782_v8, %v786_v9  ;;  %v841_v7 = vld [vmem:[#allocation10 + $0x3b0] sm:$0xff] }
 0x296   :  { %2467 = vmatprep.subr.bf16.mxu1 %v11671_v23  ;;  %2549 = vmatprep.subr.bf16.mxu0 %v11673_v24  ;;  %v11697_v51 = vcombine.high %v758_v60, %v762_v47  ;;  %v11696_v57 = vcombine.low %v758_v60, %v762_v47  ;;  %v11727_v23 = vcombine.high %v789_v14, %v793_v17  ;;  %v814_v60 = vld [vmem:[#allocation10 + $0x2d8] sm:$0xff] }
 0x297   :  { %v11729_v24 = vcombine.high %v790_v43, %v794_v19  ;;  %v818_v47 = vld [vmem:[#allocation10 + $0x2f8] sm:$0xff] }
 0x298   :  { %2468 = vmatpush1.bf16.msra.mxu1 %v11670_v29  ;;  %v11726_v29 = vcombine.low %v789_v14, %v793_v17  ;;  %v838_v8 = vld [vmem:[#allocation10 + $0x398] sm:$0xff]  ;;  %v845_v14 = vld [vmem:[#allocation10 + $0x3d0] sm:$0xff] }
 0x299   :  { %2550 = vmatpush1.bf16.msra.mxu0 %v11672_v30  ;;  %2469 = vmatprep.subr.bf16.mxu1 %v11679_v31  ;;  %v11728_v30 = vcombine.low %v790_v43, %v794_v19  ;;  %v11735_v31 = vcombine.high %v797_v25, %v801_v26  ;;  %v842_v9 = vld [vmem:[#allocation10 + $0x3b8] sm:$0xff]  ;;  %v849_v17 = vld [vmem:[#allocation10 + $0x3f0] sm:$0xff] }
 0x29a   :  { %2551 = vmatprep.subr.bf16.mxu0 %v11681_v32  ;;  %v11737_v32 = vcombine.high %v798_v27, %v802_v28  ;;  %v846_v43 = vld [vmem:[#allocation10 + $0x3d8] sm:$0xff] }
 0x29b   :  { %v850_v19 = vld [vmem:[#allocation10 + $0x3f8] sm:$0xff] }
 0x29c   :  { %2470 = vmatpush1.bf16.msra.mxu1 %v11678_v39  ;;  %v11734_v39 = vcombine.low %v797_v25, %v801_v26  ;;  %v853_v25 = vld [vmem:[#allocation10 + $0x410] sm:$0xff] }
 0x29d   :  { %2552 = vmatpush1.bf16.msra.mxu0 %v11680_v40  ;;  %2471 = vmatprep.subr.bf16.mxu1 %v11687_v41  ;;  %v11736_v40 = vcombine.low %v798_v27, %v802_v28  ;;  %v11743_v41 = vcombine.high %v805_v33, %v809_v34  ;;  %v857_v26 = vld [vmem:[#allocation10 + $0x430] sm:$0xff]  ;;  %v854_v27 = vld [vmem:[#allocation10 + $0x418] sm:$0xff] }
 0x29e   :  { %2553 = vmatprep.subr.bf16.mxu0 %v11689_v42  ;;  %v11745_v42 = vcombine.high %v806_v35, %v810_v36  ;;  %v858_v28 = vld [vmem:[#allocation10 + $0x438] sm:$0xff] }
 0x2a0   :  { %2472 = vmatpush1.bf16.msra.mxu1 %v11686_v48  ;;  %v11742_v48 = vcombine.low %v805_v33, %v809_v34  ;;  %v861_v33 = vld [vmem:[#allocation10 + $0x450] sm:$0xff] }
 0x2a1   :  { %2554 = vmatpush1.bf16.msra.mxu0 %v11688_v49  ;;  %2473 = vmatprep.subr.bf16.mxu1 %v11695_v50  ;;  %v11744_v49 = vcombine.low %v806_v35, %v810_v36  ;;  %v11751_v50 = vcombine.high %v813_v44, %v817_v45  ;;  %v865_v34 = vld [vmem:[#allocation10 + $0x470] sm:$0xff]  ;;  %v11790_v35 = vcombine.low %v853_v25, %v857_v26  ;;  %v862_v36 = vld [vmem:[#allocation10 + $0x458] sm:$0xff] }
 0x2a2   :  { %2555 = vmatprep.subr.bf16.mxu0 %v11697_v51  ;;  %v11753_v51 = vcombine.high %v814_v60, %v818_v47 }
 0x2a4   :  { %2474 = vmatpush1.bf16.msra.mxu1 %v11694_v56  ;;  %v11750_v56 = vcombine.low %v813_v44, %v817_v45  ;;  %v873_v44 = vld [vmem:[#allocation10 + $0x4b0] sm:$0xff] }
 0x2a5   :  { %2556 = vmatpush1.bf16.msra.mxu0 %v11696_v57  ;;  %2475 = vmatprep.subr.bf16.mxu1 %v11703_v58  ;;  %v11752_v57 = vcombine.low %v814_v60, %v818_v47  ;;  %v11759_v58 = vcombine.high %v821_v52, %v825_v53  ;;  %v870_v60 = vld [vmem:[#allocation10 + $0x498] sm:$0xff] }
 0x2a6   :  { %2557 = vmatprep.subr.bf16.mxu0 %v11705_v59  ;;  %v11761_v59 = vcombine.high %v822_v54, %v826_v55  ;;  %v874_v47 = vld [vmem:[#allocation10 + $0x4b8] sm:$0xff] }
 0x2a8   :  { %2476 = vmatpush1.bf16.msra.mxu1 %v11702_v2  ;;  %v11758_v2 = vcombine.low %v821_v52, %v825_v53  ;;  %v877_v52 = vld [vmem:[#allocation10 + $0x4d0] sm:$0xff] }
 0x2a9   :  { %2558 = vmatpush1.bf16.msra.mxu0 %v11704_v3  ;;  %2477 = vmatprep.subr.bf16.mxu1 %v11711_v5  ;;  %v11760_v3 = vcombine.low %v822_v54, %v826_v55  ;;  %v11767_v5 = vcombine.high %v829_v62, %v833_v63  ;;  %v881_v53 = vld [vmem:[#allocation10 + $0x4f0] sm:$0xff]  ;;  %v878_v54 = vld [vmem:[#allocation10 + $0x4d8] sm:$0xff] }
 0x2aa   :  { %2559 = vmatprep.subr.bf16.mxu0 %v11713_v6  ;;  %v11769_v6 = vcombine.high %v830_v0, %v834_v1  ;;  %v882_v55 = vld [vmem:[#allocation10 + $0x4f8] sm:$0xff] }
 0x2ac   :  { %2478 = vmatpush1.bf16.msra.mxu1 %v11710_v10  ;;  %v11766_v10 = vcombine.low %v829_v62, %v833_v63  ;;  %v889_v62 = vld [vmem:[#allocation10 + $0x530] sm:$0xff]  ;;  %v886_v63 = vld [vmem:[#allocation10 + $0x518] sm:$0xff] }
 0x2ad   :  { %2560 = vmatpush1.bf16.msra.mxu0 %v11712_v11  ;;  %2479 = vmatprep.subr.bf16.mxu1 %v11719_v12  ;;  %v11768_v11 = vcombine.low %v830_v0, %v834_v1  ;;  %v11775_v12 = vcombine.high %v837_v37, %v841_v7  ;;  %v890_v0 = vld [vmem:[#allocation10 + $0x538] sm:$0xff]  ;;  %v11816_v1 = vcombine.low %v878_v54, %v882_v55 }
 0x2ae   :  { %2561 = vmatprep.subr.bf16.mxu0 %v11721_v13  ;;  %v11777_v13 = vcombine.high %v838_v8, %v842_v9 }
 0x2b0   :  { %2480 = vmatpush1.bf16.msra.mxu1 %v11718_v20  ;;  %v11774_v20 = vcombine.low %v837_v37, %v841_v7  ;;  %v894_v37 = vld [vmem:[#allocation10 + $0x558] sm:$0xff] }
 0x2b1   :  { %2562 = vmatpush1.bf16.msra.mxu0 %v11720_v22  ;;  %2481 = vmatprep.subr.bf16.mxu1 %v11727_v23  ;;  %v11776_v22 = vcombine.low %v838_v8, %v842_v9  ;;  %v11783_v23 = vcombine.high %v845_v14, %v849_v17  ;;  %v898_v7 = vld [vmem:[#allocation10 + $0x578] sm:$0xff]  ;;  %v11824_v9 = vcombine.low %v886_v63, %v890_v0 }
 0x2b2   :  { %2563 = vmatprep.subr.bf16.mxu0 %v11729_v24  ;;  %v11785_v24 = vcombine.high %v846_v43, %v850_v19 }
 0x2b4   :  { %2482 = vmatpush1.bf16.msra.mxu1 %v11726_v29  ;;  %v11782_v29 = vcombine.low %v845_v14, %v849_v17  ;;  %v902_v14 = vld [vmem:[#allocation10 + $0x598] sm:$0xff] }
 0x2b5   :  { %2564 = vmatpush1.bf16.msra.mxu0 %v11728_v30  ;;  %2483 = vmatprep.subr.bf16.mxu1 %v11735_v31  ;;  %v11784_v30 = vcombine.low %v846_v43, %v850_v19  ;;  %v11791_v31 = vcombine.high %v853_v25, %v857_v26  ;;  %v906_v17 = vld [vmem:[#allocation10 + $0x5b8] sm:$0xff]  ;;  %v11832_v19 = vcombine.low %v894_v37, %v898_v7 }
 0x2b6   :  { %2565 = vmatprep.subr.bf16.mxu0 %v11737_v32  ;;  %v11793_v32 = vcombine.high %v854_v27, %v858_v28  ;;  %v910_v25 = vld [vmem:[#allocation10 + $0x5d8] sm:$0xff] }
 0x2b7   :  { %v914_v26 = vld [vmem:[#allocation10 + $0x5f8] sm:$0xff] }
 0x2b8   :  { %2484 = vmatpush1.bf16.msra.mxu1 %v11734_v39  ;;  %v866_v39 = vld [vmem:[#allocation10 + $0x478] sm:$0xff] }
 0x2b9   :  { %2566 = vmatpush1.bf16.msra.mxu0 %v11736_v40  ;;  %2485 = vmatprep.subr.bf16.mxu1 %v11743_v41  ;;  %v11792_v40 = vcombine.low %v854_v27, %v858_v28  ;;  %v11799_v41 = vcombine.high %v861_v33, %v865_v34  ;;  %v11801_v45 = vcombine.high %v862_v36, %v866_v39 }
 0x2ba   :  { %2567 = vmatprep.subr.bf16.mxu0 %v11745_v42  ;;  %v869_v42 = vld [vmem:[#allocation10 + $0x490] sm:$0xff]  ;;  %v11840_v28 = vcombine.low %v902_v14, %v906_v17 }
 0x2bc   :  { %2486 = vmatpush1.bf16.msra.mxu1 %v11742_v48  ;;  %v11798_v48 = vcombine.low %v861_v33, %v865_v34  ;;  %v918_v33 = vld [vmem:[#allocation10 + $0x618] sm:$0xff] }
 0x2bd   :  { %2568 = vmatpush1.bf16.msra.mxu0 %v11744_v49  ;;  %2487 = vmatprep.subr.bf16.mxu1 %v11751_v50  ;;  %v11800_v49 = vcombine.low %v862_v36, %v866_v39  ;;  %v11807_v50 = vcombine.high %v869_v42, %v873_v44  ;;  %v922_v34 = vld [vmem:[#allocation10 + $0x638] sm:$0xff]  ;;  %v11848_v36 = vcombine.low %v910_v25, %v914_v26 }
 0x2be   :  { %2569 = vmatprep.subr.bf16.mxu0 %v11753_v51  ;;  %v11809_v51 = vcombine.high %v870_v60, %v874_v47 }
 0x2c0   :  { %2488 = vmatpush1.bf16.msra.mxu1 %v11750_v56  ;;  %v11806_v56 = vcombine.low %v869_v42, %v873_v44  ;;  %v929_v42 = vld [vmem:[#allocation10 + $0x670] sm:$0xff]  ;;  %v926_v44 = vld [vmem:[#allocation10 + $0x658] sm:$0xff] }
 0x2c1   :  { %2570 = vmatpush1.bf16.msra.mxu0 %v11752_v57  ;;  %2489 = vmatprep.subr.bf16.mxu1 %v11759_v58  ;;  %v11815_v57 = vcombine.high %v877_v52, %v881_v53  ;;  %v11817_v58 = vcombine.high %v878_v54, %v882_v55 }
 0x2c2   :  { %2571 = vmatprep.subr.bf16.mxu0 %v11761_v59  ;;  %v885_v59 = vld [vmem:[#allocation10 + $0x510] sm:$0xff] }
 0x2c3   :  { %v11822_v8 = vcombine.low %v885_v59, %v889_v62 }
 0x2c4   :  { %2490 = vmatpush1.bf16.msra.mxu1 %v11758_v2  ;;  %v11823_v2 = vcombine.high %v885_v59, %v889_v62  ;;  %v942_v59 = vld [vmem:[#allocation10 + $0x6d8] sm:$0xff] }
 0x2c5   :  { %2572 = vmatpush1.bf16.msra.mxu0 %v11760_v3  ;;  %2491 = vmatprep.subr.bf16.mxu1 %v11767_v5  ;;  %v11825_v3 = vcombine.high %v886_v63, %v890_v0  ;;  %v893_v5 = vld [vmem:[#allocation10 + $0x550] sm:$0xff]  ;;  %v946_v62 = vld [vmem:[#allocation10 + $0x6f8] sm:$0xff] }
 0x2c6   :  { %2573 = vmatprep.subr.bf16.mxu0 %v11769_v6  ;;  %v897_v6 = vld [vmem:[#allocation10 + $0x570] sm:$0xff] }
 0x2c7   :  { %v11830_v43 = vcombine.low %v893_v5, %v897_v6 }
 0x2c8   :  { %2492 = vmatpush1.bf16.msra.mxu1 %v11766_v10  ;;  %v11831_v10 = vcombine.high %v893_v5, %v897_v6  ;;  %v950_v5 = vld [vmem:[#allocation10 + $0x718] sm:$0xff] }
 0x2c9   :  { %2574 = vmatpush1.bf16.msra.mxu0 %v11768_v11  ;;  %2493 = vmatprep.subr.bf16.mxu1 %v11775_v12  ;;  %v11833_v11 = vcombine.high %v894_v37, %v898_v7  ;;  %v901_v12 = vld [vmem:[#allocation10 + $0x590] sm:$0xff]  ;;  %v954_v6 = vld [vmem:[#allocation10 + $0x738] sm:$0xff]  ;;  %v11880_v7 = vcombine.low %v942_v59, %v946_v62 }
 0x2ca   :  { %2575 = vmatprep.subr.bf16.mxu0 %v11777_v13  ;;  %v905_v13 = vld [vmem:[#allocation10 + $0x5b0] sm:$0xff] }
 0x2cb   :  { %v11838_v27 = vcombine.low %v901_v12, %v905_v13 }
 0x2cc   :  { %2494 = vmatpush1.bf16.msra.mxu1 %v11774_v20  ;;  %v11839_v20 = vcombine.high %v901_v12, %v905_v13  ;;  %v958_v12 = vld [vmem:[#allocation10 + $0x758] sm:$0xff] }
 0x2cd   :  { %2576 = vmatpush1.bf16.msra.mxu0 %v11776_v22  ;;  %2495 = vmatprep.subr.bf16.mxu1 %v11783_v23  ;;  %v11841_v22 = vcombine.high %v902_v14, %v906_v17  ;;  %v909_v23 = vld [vmem:[#allocation10 + $0x5d0] sm:$0xff]  ;;  %v962_v13 = vld [vmem:[#allocation10 + $0x778] sm:$0xff]  ;;  %v11888_v17 = vcombine.low %v950_v5, %v954_v6 }
 0x2ce   :  { %2577 = vmatprep.subr.bf16.mxu0 %v11785_v24  ;;  %v913_v24 = vld [vmem:[#allocation10 + $0x5f0] sm:$0xff] }
 0x2d0   :  { %2496 = vmatpush1.bf16.msra.mxu1 %v11782_v29  ;;  %v11847_v29 = vcombine.high %v909_v23, %v913_v24 }
 0x2d1   :  { %2578 = vmatpush1.bf16.msra.mxu0 %v11784_v30  ;;  %2506 = vmatprep.subr.bf16.mxu1 %v11791_v31  ;;  %v11849_v30 = vcombine.high %v910_v25, %v914_v26  ;;  %v917_v31 = vld [vmem:[#allocation10 + $0x610] sm:$0xff]  ;;  %v11896_v26 = vcombine.low %v958_v12, %v962_v13 }
 0x2d2   :  { %2588 = vmatprep.subr.bf16.mxu0 %v11793_v32  ;;  %v921_v32 = vld [vmem:[#allocation10 + $0x630] sm:$0xff] }
 0x2d3   :  { %2498 = vmatmul.mubr.bf16.vlgmr.msra.gmra.mrb[8].mxu1 %v14047_v61  ;;  %v11855_v39 = vcombine.high %v917_v31, %v921_v32 }
 0x2d4   :  { %2580 = vmatmul.mubr.bf16.vlgmr.msra.gmra.mrb[12].mxu0 %v14047_v61  ;;  %2507 = vmatpush1.bf16.msra.mxu1 %v11790_v35  ;;  %v11808_v61 = vcombine.low %v870_v60, %v874_v47  ;;  %v11846_v35 = vcombine.low %v909_v23, %v913_v24  ;;  %v11854_v60 = vcombine.low %v917_v31, %v921_v32  ;;  %v966_v23 = vld [vmem:[#allocation10 + $0x798] sm:$0xff] }
 0x2d5   :  { %2538 = vmatprep.mubr.bf16.mxu1 %v14051_v4  ;;  %2589 = vmatpush1.bf16.msra.mxu0 %v11792_v40  ;;  %v11857_v40 = vcombine.high %v918_v33, %v922_v34  ;;  %v11856_v47 = vcombine.low %v918_v33, %v922_v34  ;;  %v970_v24 = vld [vmem:[#allocation10 + $0x7b8] sm:$0xff] }
 0x2d6   :  { %2620 = vmatprep.mubr.bf16.mxu0 %v14051_v4  ;;  %2508 = vmatprep.subr.bf16.mxu1 %v11799_v41  ;;  %v11814_v4 = vcombine.low %v877_v52, %v881_v53  ;;  %v925_v41 = vld [vmem:[#allocation10 + $0x650] sm:$0xff]  ;;  %v934_v52 = vld [vmem:[#allocation10 + $0x698] sm:$0xff]  ;;  %v11904_v34 = vcombine.low %v966_v23, %v970_v24 }
 0x2d7   :  { %2590 = vmatprep.subr.bf16.mxu0 %v11801_v45  ;;  %v930_v45 = vld [vmem:[#allocation10 + $0x678] sm:$0xff]  ;;  %v11862_v54 = vcombine.low %v925_v41, %v929_v42 }
 0x2d8   :  { %2509 = vmatpush1.bf16.msra.mxu1 %v11798_v48  ;;  %v11863_v48 = vcombine.high %v925_v41, %v929_v42  ;;  %v938_v53 = vld [vmem:[#allocation10 + $0x6b8] sm:$0xff]  ;;  %v11864_v55 = vcombine.low %v926_v44, %v930_v45  ;;  %v2646_v41 = vld [vmem:[#allocation13 + $0x8] sm:$0xff] }
 0x2d9   :  { %2591 = vmatpush1.bf16.msra.mxu0 %v11800_v49  ;;  %2510 = vmatprep.subr.bf16.mxu1 %v11807_v50  ;;  %v11865_v49 = vcombine.high %v926_v44, %v930_v45  ;;  %v933_v50 = vld [vmem:[#allocation10 + $0x690] sm:$0xff]  ;;  %v11872_v0 = vcombine.low %v934_v52, %v938_v53  ;;  %v974_v31 = vld [vmem:[#allocation10 + $0x7d8] sm:$0xff] }
 0x2da   :  { %2592 = vmatprep.subr.bf16.mxu0 %v11809_v51  ;;  %v937_v51 = vld [vmem:[#allocation10 + $0x6b0] sm:$0xff]  ;;  %v978_v32 = vld [vmem:[#allocation10 + $0x7f8] sm:$0xff] }
 0x2db   :  { %v11870_v63 = vcombine.low %v933_v50, %v937_v51  ;;  %v2654_v42 = vld [vmem:[#allocation13 + $0x48] sm:$0xff]  ;;  %v11912_v45 = vcombine.low %v974_v31, %v978_v32 }
 0x2dc   :  { %2511 = vmatpush1.bf16.msra.mxu1 %v11806_v56  ;;  %v11871_v56 = vcombine.high %v933_v50, %v937_v51  ;;  %v2662_v50 = vld [vmem:[#allocation13 + $0x88] sm:$0xff] }
 0x2dd   :  { %2593 = vmatpush1.bf16.msra.mxu0 %v11808_v61  ;;  %2512 = vmatprep.subr.bf16.mxu1 %v11815_v57  ;;  %v11873_v61 = vcombine.high %v934_v52, %v938_v53  ;;  %v941_v57 = vld [vmem:[#allocation10 + $0x6d0] sm:$0xff]  ;;  %v11916_v53 = vcombine.low %v2646_v41, %v2654_v42 }
 0x2de   :  { %2594 = vmatprep.subr.bf16.mxu0 %v11817_v58  ;;  %v945_v58 = vld [vmem:[#allocation10 + $0x6f0] sm:$0xff] }
 0x2df   :  { %v11878_v37 = vcombine.low %v941_v57, %v945_v58  ;;  %v2670_v51 = vld [vmem:[#allocation13 + $0xc8] sm:$0xff] }
 0x2e0   :  { %2513 = vmatpush1.bf16.msra.mxu1 %v11814_v4  ;;  %v11879_v4 = vcombine.high %v941_v57, %v945_v58  ;;  %v2678_v57 = vld [vmem:[#allocation13 + $0x108] sm:$0xff] }
 0x2e1   :  { %2595 = vmatpush1.bf16.msra.mxu0 %v11816_v1  ;;  %2514 = vmatprep.subr.bf16.mxu1 %v11823_v2  ;;  %v11881_v1 = vcombine.high %v942_v59, %v946_v62  ;;  %v949_v2 = vld [vmem:[#allocation10 + $0x710] sm:$0xff]  ;;  %v11932_v62 = vcombine.low %v2662_v50, %v2670_v51 }
 0x2e2   :  { %2596 = vmatprep.subr.bf16.mxu0 %v11825_v3  ;;  %v953_v3 = vld [vmem:[#allocation10 + $0x730] sm:$0xff] }
 0x2e3   :  { %v11886_v14 = vcombine.low %v949_v2, %v953_v3  ;;  %v2686_v58 = vld [vmem:[#allocation13 + $0x148] sm:$0xff] }
 0x2e4   :  { %2515 = vmatpush1.bf16.msra.mxu1 %v11822_v8  ;;  %v11887_v8 = vcombine.high %v949_v2, %v953_v3  ;;  %v2694_v2 = vld [vmem:[#allocation13 + $0x188] sm:$0xff] }
 0x2e5   :  { %2597 = vmatpush1.bf16.msra.mxu0 %v11824_v9  ;;  %2516 = vmatprep.subr.bf16.mxu1 %v11831_v10  ;;  %v11889_v9 = vcombine.high %v950_v5, %v954_v6  ;;  %v957_v10 = vld [vmem:[#allocation10 + $0x750] sm:$0xff]  ;;  %v11948_v6 = vcombine.low %v2678_v57, %v2686_v58 }
 0x2e6   :  { %2598 = vmatprep.subr.bf16.mxu0 %v11833_v11  ;;  %v961_v11 = vld [vmem:[#allocation10 + $0x770] sm:$0xff] }
 0x2e7   :  { %v11894_v25 = vcombine.low %v957_v10, %v961_v11  ;;  %v2702_v3 = vld [vmem:[#allocation13 + $0x1c8] sm:$0xff] }
 0x2e8   :  { %2517 = vmatpush1.bf16.msra.mxu1 %v11830_v43  ;;  %v11895_v43 = vcombine.high %v957_v10, %v961_v11  ;;  %v2718_v10 = vld [vmem:[#allocation13 + $0x248] sm:$0xff] }
 0x2e9   :  { %2599 = vmatpush1.bf16.msra.mxu0 %v11832_v19  ;;  %2518 = vmatprep.subr.bf16.mxu1 %v11839_v20  ;;  %v11897_v19 = vcombine.high %v958_v12, %v962_v13  ;;  %v965_v20 = vld [vmem:[#allocation10 + $0x790] sm:$0xff]  ;;  %v11964_v12 = vcombine.low %v2694_v2, %v2702_v3 }
 0x2ea   :  { %2600 = vmatprep.subr.bf16.mxu0 %v11841_v22  ;;  %v969_v22 = vld [vmem:[#allocation10 + $0x7b0] sm:$0xff] }
 0x2eb   :  { %v11902_v33 = vcombine.low %v965_v20, %v969_v22 }
 0x2ec   :  { %2519 = vmatpush1.bf16.msra.mxu1 %v11838_v27  ;;  %v11903_v27 = vcombine.high %v965_v20, %v969_v22  ;;  %v2734_v20 = vld [vmem:[#allocation13 + $0x2c8] sm:$0xff] }
 0x2ed   :  { %2601 = vmatpush1.bf16.msra.mxu0 %v11840_v28  ;;  %2520 = vmatprep.subr.bf16.mxu1 %v11847_v29  ;;  %v11905_v28 = vcombine.high %v966_v23, %v970_v24  ;;  %v973_v29 = vld [vmem:[#allocation10 + $0x7d0] sm:$0xff] }
 0x2ee   :  { %2602 = vmatprep.subr.bf16.mxu0 %v11849_v30  ;;  %v977_v30 = vld [vmem:[#allocation10 + $0x7f0] sm:$0xff] }
 0x2ef   :  { %v11910_v44 = vcombine.low %v973_v29, %v977_v30 }
 0x2f0   :  { %2521 = vmatpush1.bf16.msra.mxu1 %v11846_v35  ;;  %v11911_v35 = vcombine.high %v973_v29, %v977_v30  ;;  %v2750_v29 = vld [vmem:[#allocation13 + $0x348] sm:$0xff] }
 0x2f1   :  { %2603 = vmatpush1.bf16.msra.mxu0 %v11848_v36  ;;  %2522 = vmatprep.subr.bf16.mxu1 %v11855_v39  ;;  %v11913_v36 = vcombine.high %v974_v31, %v978_v32  ;;  %v2645_v39 = vld [vmem:[#allocation13] sm:$0xff] }
 0x2f2   :  { %2604 = vmatprep.subr.bf16.mxu0 %v11857_v40  ;;  %v2653_v40 = vld [vmem:[#allocation13 + $0x40] sm:$0xff] }
 0x2f3   :  { %v11914_v52 = vcombine.low %v2645_v39, %v2653_v40 }
 0x2f4   :  { %2523 = vmatpush1.bf16.msra.mxu1 %v11854_v60  ;;  %v11915_v60 = vcombine.high %v2645_v39, %v2653_v40  ;;  %v2766_v39 = vld [vmem:[#allocation13 + $0x3c8] sm:$0xff] }
 0x2f5   :  { %2605 = vmatpush1.bf16.msra.mxu0 %v11856_v47  ;;  %2524 = vmatprep.subr.bf16.mxu1 %v11863_v48  ;;  %v11917_v47 = vcombine.high %v2646_v41, %v2654_v42  ;;  %v2661_v48 = vld [vmem:[#allocation13 + $0x80] sm:$0xff] }
 0x2f6   :  { %2606 = vmatprep.subr.bf16.mxu0 %v11865_v49  ;;  %v2669_v49 = vld [vmem:[#allocation13 + $0xc0] sm:$0xff] }
 0x2f7   :  { %v11930_v59 = vcombine.low %v2661_v48, %v2669_v49 }
 0x2f8   :  { %2525 = vmatpush1.bf16.msra.mxu1 %v11862_v54  ;;  %v11931_v54 = vcombine.high %v2661_v48, %v2669_v49  ;;  %v2782_v48 = vld [vmem:[#allocation13 + $0x448] sm:$0xff] }
 0x2f9   :  { %2607 = vmatpush1.bf16.msra.mxu0 %v11864_v55  ;;  %2526 = vmatprep.subr.bf16.mxu1 %v11871_v56  ;;  %v11933_v55 = vcombine.high %v2662_v50, %v2670_v51  ;;  %v2677_v56 = vld [vmem:[#allocation13 + $0x100] sm:$0xff] }
 0x2fa   :  { %2608 = vmatprep.subr.bf16.mxu0 %v11873_v61  ;;  %v2685_v61 = vld [vmem:[#allocation13 + $0x140] sm:$0xff] }
 0x2fb   :  { %v11946_v5 = vcombine.low %v2677_v56, %v2685_v61 }
 0x2fc   :  { %2527 = vmatpush1.bf16.msra.mxu1 %v11870_v63  ;;  %v11947_v63 = vcombine.high %v2677_v56, %v2685_v61  ;;  %v2798_v56 = vld [vmem:[#allocation13 + $0x4c8] sm:$0xff] }
 0x2fd   :  { %2609 = vmatpush1.bf16.msra.mxu0 %v11872_v0  ;;  %2528 = vmatprep.subr.bf16.mxu1 %v11879_v4  ;;  %v11949_v0 = vcombine.high %v2678_v57, %v2686_v58  ;;  %v2693_v4 = vld [vmem:[#allocation13 + $0x180] sm:$0xff] }
 0x2fe   :  { %2610 = vmatprep.subr.bf16.mxu0 %v11881_v1  ;;  %v2701_v1 = vld [vmem:[#allocation13 + $0x1c0] sm:$0xff] }
 0x2ff   :  { %v11962_v11 = vcombine.low %v2693_v4, %v2701_v1 }
 0x300   :  { %2529 = vmatpush1.bf16.msra.mxu1 %v11878_v37  ;;  %v11963_v37 = vcombine.high %v2693_v4, %v2701_v1  ;;  %v2814_v4 = vld [vmem:[#allocation13 + $0x548] sm:$0xff] }
 0x301   :  { %2611 = vmatpush1.bf16.msra.mxu0 %v11880_v7  ;;  %2530 = vmatprep.subr.bf16.mxu1 %v11887_v8  ;;  %v2709_v7 = vld [vmem:[#allocation13 + $0x200] sm:$0xff] }
 0x302   :  { %2612 = vmatprep.subr.bf16.mxu0 %v11889_v9  ;;  %v2717_v8 = vld [vmem:[#allocation13 + $0x240] sm:$0xff]  ;;  %v2710_v9 = vld [vmem:[#allocation13 + $0x208] sm:$0xff] }
 0x303   :  { %v11979_v13 = vcombine.high %v2709_v7, %v2717_v8  ;;  %v11978_v22 = vcombine.low %v2709_v7, %v2717_v8  ;;  %v11980_v23 = vcombine.low %v2710_v9, %v2718_v10  ;;  %v2830_v7 = vld [vmem:[#allocation13 + $0x5c8] sm:$0xff] }
 0x304   :  { %2531 = vmatpush1.bf16.msra.mxu1 %v11886_v14  ;;  %v11981_v14 = vcombine.high %v2710_v9, %v2718_v10 }
 0x305   :  { %2613 = vmatpush1.bf16.msra.mxu0 %v11888_v17  ;;  %2532 = vmatprep.subr.bf16.mxu1 %v11895_v43  ;;  %v2725_v17 = vld [vmem:[#allocation13 + $0x280] sm:$0xff] }
 0x306   :  { %2614 = vmatprep.subr.bf16.mxu0 %v11897_v19  ;;  %v2733_v43 = vld [vmem:[#allocation13 + $0x2c0] sm:$0xff]  ;;  %v2726_v19 = vld [vmem:[#allocation13 + $0x288] sm:$0xff] }
 0x307   :  { %v11995_v24 = vcombine.high %v2725_v17, %v2733_v43  ;;  %v11994_v30 = vcombine.low %v2725_v17, %v2733_v43  ;;  %v11996_v31 = vcombine.low %v2726_v19, %v2734_v20  ;;  %v2846_v17 = vld [vmem:[#allocation13 + $0x648] sm:$0xff] }
 0x308   :  { %2533 = vmatpush1.bf16.msra.mxu1 %v11894_v25  ;;  %v11997_v25 = vcombine.high %v2726_v19, %v2734_v20 }
 0x309   :  { %2615 = vmatpush1.bf16.msra.mxu0 %v11896_v26  ;;  %2534 = vmatprep.subr.bf16.mxu1 %v11903_v27  ;;  %v2741_v26 = vld [vmem:[#allocation13 + $0x300] sm:$0xff] }
 0x30a   :  { %2616 = vmatprep.subr.bf16.mxu0 %v11905_v28  ;;  %v2749_v27 = vld [vmem:[#allocation13 + $0x340] sm:$0xff]  ;;  %v2742_v28 = vld [vmem:[#allocation13 + $0x308] sm:$0xff] }
 0x30b   :  { %v12011_v32 = vcombine.high %v2741_v26, %v2749_v27  ;;  %v12010_v40 = vcombine.low %v2741_v26, %v2749_v27  ;;  %v12012_v41 = vcombine.low %v2742_v28, %v2750_v29  ;;  %v2862_v26 = vld [vmem:[#allocation13 + $0x6c8] sm:$0xff] }
 0x30c   :  { %2535 = vmatpush1.bf16.msra.mxu1 %v11902_v33  ;;  %v12013_v33 = vcombine.high %v2742_v28, %v2750_v29 }
 0x30d   :  { %2617 = vmatpush1.bf16.msra.mxu0 %v11904_v34  ;;  %2536 = vmatprep.subr.bf16.mxu1 %v11911_v35  ;;  %v2757_v34 = vld [vmem:[#allocation13 + $0x380] sm:$0xff] }
 0x30e   :  { %2618 = vmatprep.subr.bf16.mxu0 %v11913_v36  ;;  %v2765_v35 = vld [vmem:[#allocation13 + $0x3c0] sm:$0xff]  ;;  %v2758_v36 = vld [vmem:[#allocation13 + $0x388] sm:$0xff] }
 0x30f   :  { %v12027_v42 = vcombine.high %v2757_v34, %v2765_v35  ;;  %v12026_v49 = vcombine.low %v2757_v34, %v2765_v35  ;;  %v12028_v50 = vcombine.low %v2758_v36, %v2766_v39  ;;  %v2878_v34 = vld [vmem:[#allocation13 + $0x748] sm:$0xff] }
 0x310   :  { %2537 = vmatpush1.bf16.msra.mxu1 %v11910_v44  ;;  %v12029_v44 = vcombine.high %v2758_v36, %v2766_v39 }
 0x311   :  { %2619 = vmatpush1.bf16.msra.mxu0 %v11912_v45  ;;  %8873 = vmatprep.subr.bf16.mxu1 %v11915_v60  ;;  %v2773_v45 = vld [vmem:[#allocation13 + $0x400] sm:$0xff] }
 0x312   :  { %9037 = vmatprep.subr.bf16.mxu0 %v11917_v47  ;;  %v2781_v60 = vld [vmem:[#allocation13 + $0x440] sm:$0xff]  ;;  %v2774_v47 = vld [vmem:[#allocation13 + $0x408] sm:$0xff] }
 0x313   :  { %2539 = vmatmul.mubr.bf16.vlgmr.msra.gmra.mrb[8].mxu1 %v14063_v21  ;;  %v12043_v51 = vcombine.high %v2773_v45, %v2781_v60  ;;  %v12042_v61 = vcombine.low %v2773_v45, %v2781_v60  ;;  %v12044_v57 = vcombine.low %v2774_v47, %v2782_v48  ;;  %v2894_v45 = vld [vmem:[#allocation13 + $0x7c8] sm:$0xff] }
 0x314   :  { %2621 = vmatmul.mubr.bf16.vlgmr.msra.gmra.mrb[12].mxu0 %v14063_v21  ;;  %8874 = vmatpush1.bf16.msra.mxu1 %v11914_v52  ;;  %v11965_v21 = vcombine.high %v2694_v2, %v2702_v3  ;;  %v12045_v52 = vcombine.high %v2774_v47, %v2782_v48 }
 0x315   :  { %9038 = vmatpush1.bf16.msra.mxu0 %v11916_v53  ;;  %8875 = vmatprep.subr.bf16.mxu1 %v11931_v54  ;;  %v2789_v53 = vld [vmem:[#allocation13 + $0x480] sm:$0xff] }
 0x316   :  { %9039 = vmatprep.subr.bf16.mxu0 %v11933_v55  ;;  %v2797_v54 = vld [vmem:[#allocation13 + $0x4c0] sm:$0xff]  ;;  %v2790_v55 = vld [vmem:[#allocation13 + $0x488] sm:$0xff] }
 0x317   :  { %v12059_v58 = vcombine.high %v2789_v53, %v2797_v54  ;;  %v12058_v1 = vcombine.low %v2789_v53, %v2797_v54  ;;  %v12060_v2 = vcombine.low %v2790_v55, %v2798_v56  ;;  %v2910_v53 = vld [vmem:[#allocation13 + $0x848] sm:$0xff] }
 0x318   :  { %8876 = vmatpush1.bf16.msra.mxu1 %v11930_v59  ;;  %v12061_v59 = vcombine.high %v2790_v55, %v2798_v56 }
 0x319   :  { %9040 = vmatpush1.bf16.msra.mxu0 %v11932_v62  ;;  %8877 = vmatprep.subr.bf16.mxu1 %v11947_v63  ;;  %v2805_v62 = vld [vmem:[#allocation13 + $0x500] sm:$0xff] }
 0x31a   :  { %9041 = vmatprep.subr.bf16.mxu0 %v11949_v0  ;;  %v2813_v63 = vld [vmem:[#allocation13 + $0x540] sm:$0xff]  ;;  %v2806_v0 = vld [vmem:[#allocation13 + $0x508] sm:$0xff] }
 0x31b   :  { %v12075_v3 = vcombine.high %v2805_v62, %v2813_v63  ;;  %v12074_v8 = vcombine.low %v2805_v62, %v2813_v63  ;;  %v12076_v9 = vcombine.low %v2806_v0, %v2814_v4 }
 0x31c   :  { %8878 = vmatpush1.bf16.msra.mxu1 %v11946_v5  ;;  %v12077_v5 = vcombine.high %v2806_v0, %v2814_v4 }
 0x31d   :  { %9042 = vmatpush1.bf16.msra.mxu0 %v11948_v6  ;;  %8879 = vmatprep.subr.bf16.mxu1 %v11963_v37  ;;  %v2821_v6 = vld [vmem:[#allocation13 + $0x580] sm:$0xff] }
 0x31e   :  { %9043 = vmatprep.subr.bf16.mxu0 %v11965_v21  ;;  %v2829_v37 = vld [vmem:[#allocation13 + $0x5c0] sm:$0xff]  ;;  %v2822_v21 = vld [vmem:[#allocation13 + $0x588] sm:$0xff] }
 0x31f   :  { %v12091_v10 = vcombine.high %v2821_v6, %v2829_v37  ;;  %v12090_v43 = vcombine.low %v2821_v6, %v2829_v37  ;;  %v12092_v19 = vcombine.low %v2822_v21, %v2830_v7 }
 0x320   :  { %8880 = vmatpush1.bf16.msra.mxu1 %v11962_v11  ;;  %v12093_v11 = vcombine.high %v2822_v21, %v2830_v7 }
 0x321   :  { %9044 = vmatpush1.bf16.msra.mxu0 %v11964_v12  ;;  %8881 = vmatprep.subr.bf16.mxu1 %v11979_v13  ;;  %v2837_v12 = vld [vmem:[#allocation13 + $0x600] sm:$0xff] }
 0x322   :  { %9045 = vmatprep.subr.bf16.mxu0 %v11981_v14  ;;  %v2845_v13 = vld [vmem:[#allocation13 + $0x640] sm:$0xff]  ;;  %v2838_v14 = vld [vmem:[#allocation13 + $0x608] sm:$0xff] }
 0x323   :  { %v12107_v20 = vcombine.high %v2837_v12, %v2845_v13  ;;  %v12106_v27 = vcombine.low %v2837_v12, %v2845_v13  ;;  %v12108_v28 = vcombine.low %v2838_v14, %v2846_v17  ;;  %v2925_v12 = vld [vmem:[#allocation13 + $0x8c0] sm:$0xff]  ;;  %v2918_v13 = vld [vmem:[#allocation13 + $0x888] sm:$0xff] }
 0x324   :  { %8882 = vmatpush1.bf16.msra.mxu1 %v11978_v22  ;;  %v12109_v22 = vcombine.high %v2838_v14, %v2846_v17  ;;  %v2926_v14 = vld [vmem:[#allocation13 + $0x8c8] sm:$0xff] }
 0x325   :  { %9046 = vmatpush1.bf16.msra.mxu0 %v11980_v23  ;;  %8883 = vmatprep.subr.bf16.mxu1 %v11995_v24  ;;  %v2853_v23 = vld [vmem:[#allocation13 + $0x680] sm:$0xff] }
 0x326   :  { %9047 = vmatprep.subr.bf16.mxu0 %v11997_v25  ;;  %v2861_v24 = vld [vmem:[#allocation13 + $0x6c0] sm:$0xff]  ;;  %v2854_v25 = vld [vmem:[#allocation13 + $0x688] sm:$0xff] }
 0x327   :  { %v12123_v29 = vcombine.high %v2853_v23, %v2861_v24  ;;  %v12122_v35 = vcombine.low %v2853_v23, %v2861_v24  ;;  %v12124_v36 = vcombine.low %v2854_v25, %v2862_v26  ;;  %v12189_v24 = vcombine.high %v2918_v13, %v2926_v14 }
 0x328   :  { %8884 = vmatpush1.bf16.msra.mxu1 %v11994_v30  ;;  %v12125_v30 = vcombine.high %v2854_v25, %v2862_v26  ;;  %v2941_v25 = vld [vmem:[#allocation13 + $0x940] sm:$0xff]  ;;  %v2934_v26 = vld [vmem:[#allocation13 + $0x908] sm:$0xff] }
 0x329   :  { %9048 = vmatpush1.bf16.msra.mxu0 %v11996_v31  ;;  %8885 = vmatprep.subr.bf16.mxu1 %v12011_v32  ;;  %v2869_v31 = vld [vmem:[#allocation13 + $0x700] sm:$0xff] }
 0x32a   :  { %9049 = vmatprep.subr.bf16.mxu0 %v12013_v33  ;;  %v2877_v32 = vld [vmem:[#allocation13 + $0x740] sm:$0xff]  ;;  %v2870_v33 = vld [vmem:[#allocation13 + $0x708] sm:$0xff] }
 0x32b   :  { %v12139_v39 = vcombine.high %v2869_v31, %v2877_v32  ;;  %v12138_v60 = vcombine.low %v2869_v31, %v2877_v32  ;;  %v12140_v47 = vcombine.low %v2870_v33, %v2878_v34 }
 0x32c   :  { %8886 = vmatpush1.bf16.msra.mxu1 %v12010_v40  ;;  %v12141_v40 = vcombine.high %v2870_v33, %v2878_v34  ;;  %v2949_v33 = vld [vmem:[#allocation13 + $0x980] sm:$0xff] }
 0x32d   :  { %9050 = vmatpush1.bf16.msra.mxu0 %v12012_v41  ;;  %8887 = vmatprep.subr.bf16.mxu1 %v12027_v42  ;;  %v2885_v41 = vld [vmem:[#allocation13 + $0x780] sm:$0xff] }
 0x32e   :  { %9051 = vmatprep.subr.bf16.mxu0 %v12029_v44  ;;  %v2893_v42 = vld [vmem:[#allocation13 + $0x7c0] sm:$0xff]  ;;  %v2886_v44 = vld [vmem:[#allocation13 + $0x788] sm:$0xff] }
 0x32f   :  { %v12155_v48 = vcombine.high %v2885_v41, %v2893_v42  ;;  %v12154_v54 = vcombine.low %v2885_v41, %v2893_v42  ;;  %v12156_v55 = vcombine.low %v2886_v44, %v2894_v45  ;;  %v2957_v34 = vld [vmem:[#allocation13 + $0x9c0] sm:$0xff] }
 0x330   :  { %8888 = vmatpush1.bf16.msra.mxu1 %v12026_v49  ;;  %v12157_v49 = vcombine.high %v2886_v44, %v2894_v45  ;;  %v12219_v41 = vcombine.high %v2949_v33, %v2957_v34  ;;  %v2965_v44 = vld [vmem:[#allocation13 + $0xa00] sm:$0xff] }
 0x331   :  { %9052 = vmatpush1.bf16.msra.mxu0 %v12028_v50  ;;  %8889 = vmatprep.subr.bf16.mxu1 %v12043_v51  ;;  %v2901_v50 = vld [vmem:[#allocation13 + $0x800] sm:$0xff] }
 0x332   :  { %9053 = vmatprep.subr.bf16.mxu0 %v12045_v52  ;;  %v2909_v51 = vld [vmem:[#allocation13 + $0x840] sm:$0xff]  ;;  %v2902_v52 = vld [vmem:[#allocation13 + $0x808] sm:$0xff] }
 0x333   :  { %v12171_v56 = vcombine.high %v2901_v50, %v2909_v51  ;;  %v2973_v45 = vld [vmem:[#allocation13 + $0xa40] sm:$0xff] }
 0x334   :  { %8890 = vmatpush1.bf16.msra.mxu1 %v12042_v61  ;;  %v12173_v61 = vcombine.high %v2902_v52, %v2910_v53 }
 0x335   :  { %9054 = vmatpush1.bf16.msra.mxu0 %v12044_v57  ;;  %8891 = vmatprep.subr.bf16.mxu1 %v12059_v58  ;;  %v14075_v57 = vld [vmem:[#allocation11] sm:$0xff] }
 0x336   :  { %9055 = vmatprep.subr.bf16.mxu0 %v12061_v59  ;;  %v984_v58 = vrot.slane %v14075_v57, %v14025_v16  ;;  %v988_v59 = vrot.slane %v14075_v57, %v14028_v18  ;;  %v996_v62 = vrot.slane %v14075_v57, %v14035_v38 }
 0x338   :  { %8892 = vmatpush1.bf16.msra.mxu1 %v12058_v1 }
 0x339   :  { %9056 = vmatpush1.bf16.msra.mxu0 %v12060_v2  ;;  %8893 = vmatprep.subr.bf16.mxu1 %v12075_v3 }
 0x33a   :  { %9057 = vmatprep.subr.bf16.mxu0 %v12077_v5 }
 0x33c   :  { %8894 = vmatpush1.bf16.msra.mxu1 %v12074_v8 }
 0x33d   :  { %9058 = vmatpush1.bf16.msra.mxu0 %v12076_v9  ;;  %8895 = vmatprep.subr.bf16.mxu1 %v12091_v10  ;;  %v2917_v10 = vld [vmem:[#allocation13 + $0x880] sm:$0xff] }
 0x33e   :  { %9059 = vmatprep.subr.bf16.mxu0 %v12093_v11  ;;  %v12187_v23 = vcombine.high %v2917_v10, %v2925_v12 }
 0x340   :  { %8896 = vmatpush1.bf16.msra.mxu1 %v12090_v43  ;;  %v12170_v43 = vcombine.low %v2901_v50, %v2909_v51  ;;  %v12235_v50 = vcombine.high %v2965_v44, %v2973_v45 }
 0x341   :  { %9060 = vmatpush1.bf16.msra.mxu0 %v12092_v19  ;;  %8897 = vmatprep.subr.bf16.mxu1 %v12107_v20  ;;  %v12172_v19 = vcombine.low %v2902_v52, %v2910_v53  ;;  %v2981_v52 = vld [vmem:[#allocation13 + $0xa80] sm:$0xff] }
 0x342   :  { %9061 = vmatprep.subr.bf16.mxu0 %v12109_v22  ;;  %v2933_v22 = vld [vmem:[#allocation13 + $0x900] sm:$0xff] }
 0x343   :  { %v12203_v31 = vcombine.high %v2933_v22, %v2941_v25  ;;  %v2989_v53 = vld [vmem:[#allocation13 + $0xac0] sm:$0xff] }
 0x344   :  { %8898 = vmatpush1.bf16.msra.mxu1 %v12106_v27  ;;  %v2942_v27 = vld [vmem:[#allocation13 + $0x948] sm:$0xff] }
 0x345   :  { %9062 = vmatpush1.bf16.msra.mxu0 %v12108_v28  ;;  %8899 = vmatprep.subr.bf16.mxu1 %v12123_v29  ;;  %v12186_v29 = vcombine.low %v2917_v10, %v2925_v12  ;;  %v12205_v32 = vcombine.high %v2934_v26, %v2942_v27 }
 0x346   :  { %9063 = vmatprep.subr.bf16.mxu0 %v12125_v30  ;;  %v12188_v30 = vcombine.low %v2918_v13, %v2926_v14  ;;  %v3029_v13 = vld [vmem:[#allocation13 + $0xc00] sm:$0xff] }
 0x347   :  { %v3037_v14 = vld [vmem:[#allocation13 + $0xc40] sm:$0xff] }
 0x348   :  { %8900 = vmatpush1.bf16.msra.mxu1 %v12122_v35  ;;  %v2950_v35 = vld [vmem:[#allocation13 + $0x988] sm:$0xff] }
 0x349   :  { %9064 = vmatpush1.bf16.msra.mxu0 %v12124_v36  ;;  %8901 = vmatprep.subr.bf16.mxu1 %v12139_v39  ;;  %v2958_v36 = vld [vmem:[#allocation13 + $0x9c8] sm:$0xff]  ;;  %v12202_v39 = vcombine.low %v2933_v22, %v2941_v25 }
 0x34a   :  { %9065 = vmatprep.subr.bf16.mxu0 %v12141_v40  ;;  %v12204_v40 = vcombine.low %v2934_v26, %v2942_v27  ;;  %v12221_v42 = vcombine.high %v2950_v35, %v2958_v36  ;;  %v3045_v26 = vld [vmem:[#allocation13 + $0xc80] sm:$0xff] }
 0x34b   :  { %v3053_v27 = vld [vmem:[#allocation13 + $0xcc0] sm:$0xff] }
 0x34c   :  { %8902 = vmatpush1.bf16.msra.mxu1 %v12138_v60  ;;  %v2966_v60 = vld [vmem:[#allocation13 + $0xa08] sm:$0xff] }
 0x34d   :  { %9066 = vmatpush1.bf16.msra.mxu0 %v12140_v47  ;;  %8903 = vmatprep.subr.bf16.mxu1 %v12155_v48  ;;  %v2974_v47 = vld [vmem:[#allocation13 + $0xa48] sm:$0xff]  ;;  %v12218_v48 = vcombine.low %v2949_v33, %v2957_v34  ;;  %v12315_v33 = vcombine.high %v3045_v26, %v3053_v27 }
 0x34e   :  { %9067 = vmatprep.subr.bf16.mxu0 %v12157_v49  ;;  %v12220_v49 = vcombine.low %v2950_v35, %v2958_v36  ;;  %v12237_v51 = vcombine.high %v2966_v60, %v2974_v47  ;;  %v3061_v35 = vld [vmem:[#allocation13 + $0xd00] sm:$0xff] }
 0x34f   :  { %v3069_v36 = vld [vmem:[#allocation13 + $0xd40] sm:$0xff] }
 0x350   :  { %8904 = vmatpush1.bf16.msra.mxu1 %v12154_v54  ;;  %v2982_v54 = vld [vmem:[#allocation13 + $0xa88] sm:$0xff] }
 0x351   :  { %9068 = vmatpush1.bf16.msra.mxu0 %v12156_v55  ;;  %8914 = vmatprep.subr.bf16.mxu1 %v12171_v56  ;;  %v2990_v55 = vld [vmem:[#allocation13 + $0xac8] sm:$0xff]  ;;  %v12234_v56 = vcombine.low %v2965_v44, %v2973_v45  ;;  %v12331_v44 = vcombine.high %v3061_v35, %v3069_v36 }
 0x352   :  { %9078 = vmatprep.subr.bf16.mxu0 %v12173_v61  ;;  %v12236_v61 = vcombine.low %v2966_v60, %v2974_v47  ;;  %v3077_v60 = vld [vmem:[#allocation13 + $0xd80] sm:$0xff] }
 0x353   :  { %v3085_v47 = vld [vmem:[#allocation13 + $0xdc0] sm:$0xff] }
 0x366   :  { %v2376_v63 = vpop.f32.mrb[4].mxu1  ;;  %v14083_v0 = vpop.f32.mrb[8].mxu0 }
 0x367   :  { %v13243_v4 = vadd.f32 %v2376_v63, %v984_v58  ;;  %v2378_v1 = vpop.f32.mrb[5].mxu1  ;;  %v2460_v2 = vpop.f32.mrb[9].mxu0  ;;  %v12251_v58 = vcombine.high %v2981_v52, %v2989_v53  ;;  %v3005_v63 = vld [vmem:[#allocation13 + $0xb40] sm:$0xff] }
 0x368   :  { %v13244_v3 = vadd.f32 %v2378_v1, %v988_v59  ;;  %v13246_v5 = vadd.f32 %v2460_v2, %v996_v62  ;;  %v2380_v6 = vpop.f32.mrb[6].mxu1  ;;  %v2462_v37 = vpop.f32.mrb[10].mxu0  ;;  %v12253_v59 = vcombine.high %v2982_v54, %v2990_v55  ;;  %v2997_v62 = vld [vmem:[#allocation13 + $0xb00] sm:$0xff]  ;;  %v3006_v1 = vld [vmem:[#allocation13 + $0xb48] sm:$0xff]  ;;  %v12250_v2 = vcombine.low %v2981_v52, %v2989_v53 }
 0x369   :  { %v2629_v21 = vmax.f32 %v13243_v4, 0.0  ;;  %v2381_v7 = vpop.f32.mrb[7].mxu1  ;;  %v2463_v8 = vpop.f32.mrb[11].mxu0  ;;  %v2998_v4 = vld [vmem:[#allocation13 + $0xb08] sm:$0xff]  ;;  %v3013_v37 = vld [vmem:[#allocation13 + $0xb80] sm:$0xff]  ;;  %v12347_v52 = vcombine.high %v3077_v60, %v3085_v47 }
 0x36a   :  { %v2630_v9 = vmax.f32 %v13244_v3, 0.0  ;;  %v2632_v11 = vmax.f32 %v13246_v5, 0.0  ;;  %v12252_v3 = vcombine.low %v2982_v54, %v2990_v55  ;;  %v12267_v5 = vcombine.high %v2997_v62, %v3005_v63  ;;  %v3014_v7 = vld [vmem:[#allocation13 + $0xb88] sm:$0xff]  ;;  %v3093_v54 = vld [vmem:[#allocation13 + $0xe00] sm:$0xff] }
 0x36b   :  { %v14087_v20 = vpack.c.bf16 %v2629_v21, %v2629_v21  ;;  %v12269_v6 = vcombine.high %v2998_v4, %v3006_v1  ;;  %v3021_v21 = vld [vmem:[#allocation13 + $0xbc0] sm:$0xff]  ;;  %v3022_v8 = vld [vmem:[#allocation13 + $0xbc8] sm:$0xff]  ;;  %v12268_v10 = vcombine.low %v2998_v4, %v3006_v1 }
 0x36c   :  { %v14085_v17 = vpack.c.bf16 %v2630_v9, %v2630_v9  ;;  %v14091_v28 = vpack.c.bf16 %v2632_v11, %v2632_v11  ;;  %v12266_v9 = vcombine.low %v2997_v62, %v3005_v63  ;;  %v12283_v11 = vcombine.high %v3013_v37, %v3021_v21  ;;  %v3101_v55 = vld [vmem:[#allocation13 + $0xe40] sm:$0xff] }
 0x36d   :  { %v12285_v12 = vcombine.high %v3014_v7, %v3022_v8  ;;  %v12282_v22 = vcombine.low %v3013_v37, %v3021_v21  ;;  %v12363_v62 = vcombine.high %v3093_v54, %v3101_v55  ;;  %v3109_v4 = vld [vmem:[#allocation13 + $0xe80] sm:$0xff] }
 0x36e   :  { %8905 = vmatprep.mubr.bf16.mxu1 %v14085_v17  ;;  %9069 = vmatprep.mubr.bf16.mxu0 %v14085_v17  ;;  %v3117_v1 = vld [vmem:[#allocation13 + $0xec0] sm:$0xff] }
 0x36f   :  { %8906 = vmatmul.mubr.bf16.vlgmr.msra.gmra.mrb[12].mxu1 %v14087_v20  ;;  %9070 = vmatmul.mubr.bf16.vlgmr.msra.gmra.mrb[16].mxu0 %v14087_v20  ;;  %v12379_v37 = vcombine.high %v3109_v4, %v3117_v1 }
 0x370   :  { %8915 = vmatpush1.bf16.msra.mxu1 %v12170_v43  ;;  %9079 = vmatpush1.bf16.msra.mxu0 %v12172_v19  ;;  %v3030_v43 = vld [vmem:[#allocation13 + $0xc08] sm:$0xff] }
 0x371   :  { %8946 = vmatprep.mubr.bf16.mxu1 %v14091_v28  ;;  %9110 = vmatprep.mubr.bf16.mxu0 %v14091_v28  ;;  %v3038_v19 = vld [vmem:[#allocation13 + $0xc48] sm:$0xff] }
 0x372   :  { %8916 = vmatprep.subr.bf16.mxu1 %v12187_v23  ;;  %9080 = vmatprep.subr.bf16.mxu0 %v12189_v24  ;;  %v12284_v23 = vcombine.low %v3014_v7, %v3022_v8  ;;  %v12299_v24 = vcombine.high %v3029_v13, %v3037_v14  ;;  %v12301_v25 = vcombine.high %v3030_v43, %v3038_v19  ;;  %v3125_v7 = vld [vmem:[#allocation13 + $0xf00] sm:$0xff] }
 0x373   :  { %v3133_v8 = vld [vmem:[#allocation13 + $0xf40] sm:$0xff] }
 0x374   :  { %8917 = vmatpush1.bf16.msra.mxu1 %v12186_v29  ;;  %9081 = vmatpush1.bf16.msra.mxu0 %v12188_v30  ;;  %v3046_v29 = vld [vmem:[#allocation13 + $0xc88] sm:$0xff] }
 0x375   :  { %8918 = vmatprep.subr.bf16.mxu1 %v12203_v31  ;;  %9082 = vmatprep.subr.bf16.mxu0 %v12205_v32  ;;  %v3054_v30 = vld [vmem:[#allocation13 + $0xcc8] sm:$0xff]  ;;  %v12298_v31 = vcombine.low %v3029_v13, %v3037_v14  ;;  %v12300_v32 = vcombine.low %v3030_v43, %v3038_v19  ;;  %v992_v13 = vrot.slane %v14075_v57, %v14058_v46  ;;  %v3141_v19 = vld [vmem:[#allocation13 + $0xf80] sm:$0xff] }
 0x376   :  { %v12317_v34 = vcombine.high %v3046_v29, %v3054_v30  ;;  %v12395_v14 = vcombine.high %v3125_v7, %v3133_v8 }
 0x378   :  { %8919 = vmatpush1.bf16.msra.mxu1 %v12202_v39  ;;  %9083 = vmatpush1.bf16.msra.mxu0 %v12204_v40  ;;  %v3062_v39 = vld [vmem:[#allocation13 + $0xd08] sm:$0xff] }
 0x379   :  { %8920 = vmatprep.subr.bf16.mxu1 %v12219_v41  ;;  %9084 = vmatprep.subr.bf16.mxu0 %v12221_v42  ;;  %v3070_v40 = vld [vmem:[#allocation13 + $0xd48] sm:$0xff]  ;;  %v12314_v41 = vcombine.low %v3045_v26, %v3053_v27  ;;  %v12316_v42 = vcombine.low %v3046_v29, %v3054_v30  ;;  %v13245_v27 = vadd.f32 %v14083_v0, %v992_v13  ;;  %v3245_v13 = vld [vmem:[#allocation13 + $0x12c0] sm:$0xff] }
 0x37a   :  { %v12333_v45 = vcombine.high %v3062_v39, %v3070_v40  ;;  %v3174_v0 = vld [vmem:[#allocation13 + $0x1088] sm:$0xff] }
 0x37c   :  { %8921 = vmatpush1.bf16.msra.mxu1 %v12218_v48  ;;  %9085 = vmatpush1.bf16.msra.mxu0 %v12220_v49  ;;  %v3078_v48 = vld [vmem:[#allocation13 + $0xd88] sm:$0xff] }
 0x37d   :  { %8922 = vmatprep.subr.bf16.mxu1 %v12235_v50  ;;  %9086 = vmatprep.subr.bf16.mxu0 %v12237_v51  ;;  %v3086_v49 = vld [vmem:[#allocation13 + $0xdc8] sm:$0xff]  ;;  %v12330_v50 = vcombine.low %v3061_v35, %v3069_v36  ;;  %v12332_v51 = vcombine.low %v3062_v39, %v3070_v40  ;;  %v2631_v39 = vmax.f32 %v13245_v27, 0.0 }
 0x37e   :  { %v12349_v53 = vcombine.high %v3078_v48, %v3086_v49  ;;  %v3254_v27 = vld [vmem:[#allocation13 + $0x1308] sm:$0xff] }
 0x380   :  { %8923 = vmatpush1.bf16.msra.mxu1 %v12234_v56  ;;  %9087 = vmatpush1.bf16.msra.mxu0 %v12236_v61  ;;  %v3094_v56 = vld [vmem:[#allocation13 + $0xe08] sm:$0xff] }
 0x381   :  { %8924 = vmatprep.subr.bf16.mxu1 %v12251_v58  ;;  %9088 = vmatprep.subr.bf16.mxu0 %v12253_v59  ;;  %v3102_v61 = vld [vmem:[#allocation13 + $0xe48] sm:$0xff]  ;;  %v12346_v58 = vcombine.low %v3077_v60, %v3085_v47  ;;  %v12348_v59 = vcombine.low %v3078_v48, %v3086_v49  ;;  %v14100_v48 = vpack.c.bf16 %v2631_v39, %v2631_v39 }
 0x382   :  { %v12365_v63 = vcombine.high %v3094_v56, %v3102_v61  ;;  %v3278_v39 = vld [vmem:[#allocation13 + $0x13c8] sm:$0xff] }
 0x384   :  { %8925 = vmatpush1.bf16.msra.mxu1 %v12250_v2  ;;  %9089 = vmatpush1.bf16.msra.mxu0 %v12252_v3  ;;  %v3110_v2 = vld [vmem:[#allocation13 + $0xe88] sm:$0xff] }
 0x385   :  { %8926 = vmatprep.subr.bf16.mxu1 %v12267_v5  ;;  %9090 = vmatprep.subr.bf16.mxu0 %v12269_v6  ;;  %v3118_v3 = vld [vmem:[#allocation13 + $0xec8] sm:$0xff]  ;;  %v12362_v5 = vcombine.low %v3093_v54, %v3101_v55  ;;  %v12364_v6 = vcombine.low %v3094_v56, %v3102_v61 }
 0x386   :  { %v12381_v21 = vcombine.high %v3110_v2, %v3118_v3  ;;  %v3198_v54 = vld [vmem:[#allocation13 + $0x1148] sm:$0xff] }
 0x388   :  { %8927 = vmatpush1.bf16.msra.mxu1 %v12266_v9  ;;  %9091 = vmatpush1.bf16.msra.mxu0 %v12268_v10  ;;  %v3126_v9 = vld [vmem:[#allocation13 + $0xf08] sm:$0xff] }
 0x389   :  { %8928 = vmatprep.subr.bf16.mxu1 %v12283_v11  ;;  %9092 = vmatprep.subr.bf16.mxu0 %v12285_v12  ;;  %v3134_v10 = vld [vmem:[#allocation13 + $0xf48] sm:$0xff]  ;;  %v12378_v11 = vcombine.low %v3109_v4, %v3117_v1  ;;  %v12380_v12 = vcombine.low %v3110_v2, %v3118_v3 }
 0x38a   :  { %v12397_v43 = vcombine.high %v3126_v9, %v3134_v10  ;;  %v12396_v26 = vcombine.low %v3126_v9, %v3134_v10  ;;  %v3214_v4 = vld [vmem:[#allocation13 + $0x11c8] sm:$0xff] }
 0x38c   :  { %8929 = vmatpush1.bf16.msra.mxu1 %v12282_v22  ;;  %9093 = vmatpush1.bf16.msra.mxu0 %v12284_v23  ;;  %v3149_v22 = vld [vmem:[#allocation13 + $0xfc0] sm:$0xff]  ;;  %v3142_v23 = vld [vmem:[#allocation13 + $0xf88] sm:$0xff] }
 0x38d   :  { %8930 = vmatprep.subr.bf16.mxu1 %v12299_v24  ;;  %9094 = vmatprep.subr.bf16.mxu0 %v12301_v25  ;;  %v3150_v24 = vld [vmem:[#allocation13 + $0xfc8] sm:$0xff]  ;;  %v12394_v25 = vcombine.low %v3125_v7, %v3133_v8  ;;  %v12411_v29 = vcombine.high %v3141_v19, %v3149_v22  ;;  %v12410_v35 = vcombine.low %v3141_v19, %v3149_v22 }
 0x38e   :  { %v12413_v30 = vcombine.high %v3142_v23, %v3150_v24  ;;  %v12412_v36 = vcombine.low %v3142_v23, %v3150_v24  ;;  %v3230_v7 = vld [vmem:[#allocation13 + $0x1248] sm:$0xff] }
 0x390   :  { %8931 = vmatpush1.bf16.msra.mxu1 %v12298_v31  ;;  %9095 = vmatpush1.bf16.msra.mxu0 %v12300_v32  ;;  %v3157_v31 = vld [vmem:[#allocation13 + $0x1000] sm:$0xff] }
 0x391   :  { %8932 = vmatprep.subr.bf16.mxu1 %v12315_v33  ;;  %9096 = vmatprep.subr.bf16.mxu0 %v12317_v34  ;;  %v3165_v32 = vld [vmem:[#allocation13 + $0x1040] sm:$0xff]  ;;  %v3158_v33 = vld [vmem:[#allocation13 + $0x1008] sm:$0xff] }
 0x392   :  { %v3166_v34 = vld [vmem:[#allocation13 + $0x1048] sm:$0xff]  ;;  %v12427_v40 = vcombine.high %v3157_v31, %v3165_v32  ;;  %v12426_v60 = vcombine.low %v3157_v31, %v3165_v32 }
 0x393   :  { %v12428_v47 = vcombine.low %v3158_v33, %v3166_v34 }
 0x394   :  { %8933 = vmatpush1.bf16.msra.mxu1 %v12314_v41  ;;  %9097 = vmatpush1.bf16.msra.mxu0 %v12316_v42  ;;  %v12429_v41 = vcombine.high %v3158_v33, %v3166_v34  ;;  %v3173_v42 = vld [vmem:[#allocation13 + $0x1080] sm:$0xff] }
 0x395   :  { %8934 = vmatprep.subr.bf16.mxu1 %v12331_v44  ;;  %9098 = vmatprep.subr.bf16.mxu0 %v12333_v45  ;;  %v3181_v44 = vld [vmem:[#allocation13 + $0x10c0] sm:$0xff]  ;;  %v3182_v45 = vld [vmem:[#allocation13 + $0x10c8] sm:$0xff] }
 0x396   :  { %v12443_v49 = vcombine.high %v3173_v42, %v3181_v44  ;;  %v12442_v55 = vcombine.low %v3173_v42, %v3181_v44  ;;  %v12444_v56 = vcombine.low %v3174_v0, %v3182_v45  ;;  %v3269_v34 = vld [vmem:[#allocation13 + $0x1380] sm:$0xff] }
 0x398   :  { %8935 = vmatpush1.bf16.msra.mxu1 %v12330_v50  ;;  %9099 = vmatpush1.bf16.msra.mxu0 %v12332_v51  ;;  %v12445_v50 = vcombine.high %v3174_v0, %v3182_v45  ;;  %v3189_v51 = vld [vmem:[#allocation13 + $0x1100] sm:$0xff] }
 0x399   :  { %8936 = vmatprep.subr.bf16.mxu1 %v12347_v52  ;;  %9100 = vmatprep.subr.bf16.mxu0 %v12349_v53  ;;  %v3197_v52 = vld [vmem:[#allocation13 + $0x1140] sm:$0xff]  ;;  %v3190_v53 = vld [vmem:[#allocation13 + $0x1108] sm:$0xff] }
 0x39a   :  { %v12459_v61 = vcombine.high %v3189_v51, %v3197_v52  ;;  %v12458_v1 = vcombine.low %v3189_v51, %v3197_v52  ;;  %v12460_v2 = vcombine.low %v3190_v53, %v3198_v54  ;;  %v3285_v0 = vld [vmem:[#allocation13 + $0x1400] sm:$0xff] }
 0x39b   :  { %v3293_v45 = vld [vmem:[#allocation13 + $0x1440] sm:$0xff] }
 0x39c   :  { %8937 = vmatpush1.bf16.msra.mxu1 %v12346_v58  ;;  %9101 = vmatpush1.bf16.msra.mxu0 %v12348_v59  ;;  %v12461_v58 = vcombine.high %v3190_v53, %v3198_v54  ;;  %v3205_v59 = vld [vmem:[#allocation13 + $0x1180] sm:$0xff]  ;;  %v12555_v51 = vcombine.high %v3285_v0, %v3293_v45 }
 0x39d   :  { %8938 = vmatprep.subr.bf16.mxu1 %v12363_v62  ;;  %9102 = vmatprep.subr.bf16.mxu0 %v12365_v63  ;;  %v3213_v62 = vld [vmem:[#allocation13 + $0x11c0] sm:$0xff]  ;;  %v3206_v63 = vld [vmem:[#allocation13 + $0x1188] sm:$0xff] }
 0x39e   :  { %v12475_v3 = vcombine.high %v3205_v59, %v3213_v62  ;;  %v12474_v8 = vcombine.low %v3205_v59, %v3213_v62  ;;  %v12476_v9 = vcombine.low %v3206_v63, %v3214_v4  ;;  %v3301_v53 = vld [vmem:[#allocation13 + $0x1480] sm:$0xff] }
 0x39f   :  { %v3309_v54 = vld [vmem:[#allocation13 + $0x14c0] sm:$0xff] }
 0x3a0   :  { %8939 = vmatpush1.bf16.msra.mxu1 %v12362_v5  ;;  %9103 = vmatpush1.bf16.msra.mxu0 %v12364_v6  ;;  %v12477_v5 = vcombine.high %v3206_v63, %v3214_v4  ;;  %v3221_v6 = vld [vmem:[#allocation13 + $0x1200] sm:$0xff]  ;;  %v12571_v59 = vcombine.high %v3301_v53, %v3309_v54 }
 0x3a1   :  { %8940 = vmatprep.subr.bf16.mxu1 %v12379_v37  ;;  %9104 = vmatprep.subr.bf16.mxu0 %v12381_v21  ;;  %v3229_v37 = vld [vmem:[#allocation13 + $0x1240] sm:$0xff]  ;;  %v3222_v21 = vld [vmem:[#allocation13 + $0x1208] sm:$0xff] }
 0x3a2   :  { %v12491_v10 = vcombine.high %v3221_v6, %v3229_v37  ;;  %v12490_v19 = vcombine.low %v3221_v6, %v3229_v37  ;;  %v12492_v22 = vcombine.low %v3222_v21, %v3230_v7  ;;  %v3317_v63 = vld [vmem:[#allocation13 + $0x1500] sm:$0xff] }
 0x3a3   :  { %v3325_v4 = vld [vmem:[#allocation13 + $0x1540] sm:$0xff] }
 0x3a4   :  { %8941 = vmatpush1.bf16.msra.mxu1 %v12378_v11  ;;  %9105 = vmatpush1.bf16.msra.mxu0 %v12380_v12  ;;  %v12493_v11 = vcombine.high %v3222_v21, %v3230_v7  ;;  %v3237_v12 = vld [vmem:[#allocation13 + $0x1280] sm:$0xff]  ;;  %v12587_v6 = vcombine.high %v3317_v63, %v3325_v4 }
 0x3a5   :  { %8942 = vmatprep.subr.bf16.mxu1 %v12395_v14  ;;  %9106 = vmatprep.subr.bf16.mxu0 %v12397_v43  ;;  %v3238_v14 = vld [vmem:[#allocation13 + $0x1288] sm:$0xff]  ;;  %v12507_v23 = vcombine.high %v3237_v12, %v3245_v13  ;;  %v3333_v21 = vld [vmem:[#allocation13 + $0x1580] sm:$0xff] }
 0x3a6   :  { %v3246_v43 = vld [vmem:[#allocation13 + $0x12c8] sm:$0xff]  ;;  %v3341_v7 = vld [vmem:[#allocation13 + $0x15c0] sm:$0xff] }
 0x3a7   :  { %v12509_v24 = vcombine.high %v3238_v14, %v3246_v43  ;;  %v12508_v31 = vcombine.low %v3238_v14, %v3246_v43  ;;  %v3349_v14 = vld [vmem:[#allocation13 + $0x1600] sm:$0xff] }
 0x3a8   :  { %8943 = vmatpush1.bf16.msra.mxu1 %v12394_v25  ;;  %9107 = vmatpush1.bf16.msra.mxu0 %v12396_v26  ;;  %v3253_v25 = vld [vmem:[#allocation13 + $0x1300] sm:$0xff] }
 0x3a9   :  { %8944 = vmatprep.subr.bf16.mxu1 %v12411_v29  ;;  %9108 = vmatprep.subr.bf16.mxu0 %v12413_v30  ;;  %v3261_v26 = vld [vmem:[#allocation13 + $0x1340] sm:$0xff]  ;;  %v3262_v29 = vld [vmem:[#allocation13 + $0x1348] sm:$0xff]  ;;  %v12506_v30 = vcombine.low %v3237_v12, %v3245_v13  ;;  %v12603_v12 = vcombine.high %v3333_v21, %v3341_v7 }
 0x3aa   :  { %v12523_v32 = vcombine.high %v3253_v25, %v3261_v26  ;;  %v12525_v33 = vcombine.high %v3254_v27, %v3262_v29  ;;  %v3357_v43 = vld [vmem:[#allocation13 + $0x1640] sm:$0xff] }
 0x3ac   :  { %8945 = vmatpush1.bf16.msra.mxu1 %v12410_v35  ;;  %9109 = vmatpush1.bf16.msra.mxu0 %v12412_v36  ;;  %v3277_v35 = vld [vmem:[#allocation13 + $0x13c0] sm:$0xff]  ;;  %v3270_v36 = vld [vmem:[#allocation13 + $0x1388] sm:$0xff] }
 0x3ad   :  { %8955 = vmatprep.subr.bf16.mxu1 %v12427_v40  ;;  %9119 = vmatprep.subr.bf16.mxu0 %v12429_v41  ;;  %v12522_v40 = vcombine.low %v3253_v25, %v3261_v26  ;;  %v12524_v41 = vcombine.low %v3254_v27, %v3262_v29  ;;  %v12539_v42 = vcombine.high %v3269_v34, %v3277_v35  ;;  %v3365_v27 = vld [vmem:[#allocation13 + $0x1680] sm:$0xff] }
 0x3ae   :  { %v12541_v44 = vcombine.high %v3270_v36, %v3278_v39  ;;  %v12619_v25 = vcombine.high %v3349_v14, %v3357_v43  ;;  %v3373_v29 = vld [vmem:[#allocation13 + $0x16c0] sm:$0xff] }
 0x3af   :  { %8947 = vmatmul.mubr.bf16.vlgmr.msra.gmra.mrb[12].mxu1 %v14100_v48  ;;  %9111 = vmatmul.mubr.bf16.vlgmr.msra.gmra.mrb[16].mxu0 %v14100_v48 }
 0x3b0   :  { %8956 = vmatpush1.bf16.msra.mxu1 %v12426_v60  ;;  %9120 = vmatpush1.bf16.msra.mxu0 %v12428_v47  ;;  %v3286_v60 = vld [vmem:[#allocation13 + $0x1408] sm:$0xff] }
 0x3b1   :  { %8957 = vmatprep.subr.bf16.mxu1 %v12443_v49  ;;  %9121 = vmatprep.subr.bf16.mxu0 %v12445_v50  ;;  %v3294_v47 = vld [vmem:[#allocation13 + $0x1448] sm:$0xff]  ;;  %v12538_v49 = vcombine.low %v3269_v34, %v3277_v35  ;;  %v12540_v50 = vcombine.low %v3270_v36, %v3278_v39  ;;  %v12635_v34 = vcombine.high %v3365_v27, %v3373_v29  ;;  %v3381_v36 = vld [vmem:[#allocation13 + $0x1700] sm:$0xff] }
 0x3b2   :  { %v12557_v52 = vcombine.high %v3286_v60, %v3294_v47  ;;  %v3389_v39 = vld [vmem:[#allocation13 + $0x1740] sm:$0xff] }
 0x3b4   :  { %8958 = vmatpush1.bf16.msra.mxu1 %v12442_v55  ;;  %9122 = vmatpush1.bf16.msra.mxu0 %v12444_v56  ;;  %v3302_v55 = vld [vmem:[#allocation13 + $0x1488] sm:$0xff] }
 0x3b5   :  { %8959 = vmatprep.subr.bf16.mxu1 %v12459_v61  ;;  %9123 = vmatprep.subr.bf16.mxu0 %v12461_v58  ;;  %v3310_v56 = vld [vmem:[#allocation13 + $0x14c8] sm:$0xff]  ;;  %v12554_v61 = vcombine.low %v3285_v0, %v3293_v45  ;;  %v12556_v58 = vcombine.low %v3286_v60, %v3294_v47  ;;  %v14108_v45 = vsub.s32 5, %v14022_v15  ;;  %v12651_v60 = vcombine.high %v3381_v36, %v3389_v39 }
 0x3b6   :  { %v12573_v62 = vcombine.high %v3302_v55, %v3310_v56 }
 0x3b8   :  { %8960 = vmatpush1.bf16.msra.mxu1 %v12458_v1  ;;  %9124 = vmatpush1.bf16.msra.mxu0 %v12460_v2  ;;  %v3318_v1 = vld [vmem:[#allocation13 + $0x1508] sm:$0xff] }
 0x3b9   :  { %8961 = vmatprep.subr.bf16.mxu1 %v12475_v3  ;;  %9125 = vmatprep.subr.bf16.mxu0 %v12477_v5  ;;  %v3326_v2 = vld [vmem:[#allocation13 + $0x1548] sm:$0xff]  ;;  %v12570_v3 = vcombine.low %v3301_v53, %v3309_v54  ;;  %v12572_v5 = vcombine.low %v3302_v55, %v3310_v56  ;;  %v12650_v55 = vcombine.low %v3381_v36, %v3389_v39  ;;  %v3453_v36 = vld [vmem:[#allocation13 + $0x1940] sm:$0xff] }
 0x3ba   :  { %v12589_v37 = vcombine.high %v3318_v1, %v3326_v2  ;;  %v3406_v53 = vld [vmem:[#allocation13 + $0x17c8] sm:$0xff] }
 0x3bb   :  { %v3446_v39 = vld [vmem:[#allocation13 + $0x1908] sm:$0xff] }
 0x3bc   :  { %8962 = vmatpush1.bf16.msra.mxu1 %v12474_v8  ;;  %9126 = vmatpush1.bf16.msra.mxu0 %v12476_v9  ;;  %v3334_v8 = vld [vmem:[#allocation13 + $0x1588] sm:$0xff] }
 0x3bd   :  { %8963 = vmatprep.subr.bf16.mxu1 %v12491_v10  ;;  %9127 = vmatprep.subr.bf16.mxu0 %v12493_v11  ;;  %v3342_v9 = vld [vmem:[#allocation13 + $0x15c8] sm:$0xff]  ;;  %v12586_v10 = vcombine.low %v3317_v63, %v3325_v4  ;;  %v12588_v11 = vcombine.low %v3318_v1, %v3326_v2  ;;  %v3413_v63 = vld [vmem:[#allocation13 + $0x1800] sm:$0xff] }
 0x3be   :  { %v12605_v13 = vcombine.high %v3334_v8, %v3342_v9  ;;  %v3421_v1 = vld [vmem:[#allocation13 + $0x1840] sm:$0xff]  ;;  %v3414_v2 = vld [vmem:[#allocation13 + $0x1808] sm:$0xff] }
 0x3c0   :  { %8964 = vmatpush1.bf16.msra.mxu1 %v12490_v19  ;;  %9128 = vmatpush1.bf16.msra.mxu0 %v12492_v22  ;;  %v3350_v19 = vld [vmem:[#allocation13 + $0x1608] sm:$0xff] }
 0x3c1   :  { %8965 = vmatprep.subr.bf16.mxu1 %v12507_v23  ;;  %9129 = vmatprep.subr.bf16.mxu0 %v12509_v24  ;;  %v3358_v22 = vld [vmem:[#allocation13 + $0x1648] sm:$0xff]  ;;  %v12602_v23 = vcombine.low %v3333_v21, %v3341_v7  ;;  %v12604_v24 = vcombine.low %v3334_v8, %v3342_v9 }
 0x3c2   :  { %v12621_v26 = vcombine.high %v3350_v19, %v3358_v22 }
 0x3c4   :  { %8966 = vmatpush1.bf16.msra.mxu1 %v12506_v30  ;;  %9130 = vmatpush1.bf16.msra.mxu0 %v12508_v31  ;;  %v3366_v30 = vld [vmem:[#allocation13 + $0x1688] sm:$0xff] }
 0x3c5   :  { %8967 = vmatprep.subr.bf16.mxu1 %v12523_v32  ;;  %9131 = vmatprep.subr.bf16.mxu0 %v12525_v33  ;;  %v3374_v31 = vld [vmem:[#allocation13 + $0x16c8] sm:$0xff]  ;;  %v12618_v32 = vcombine.low %v3349_v14, %v3357_v43  ;;  %v12620_v33 = vcombine.low %v3350_v19, %v3358_v22  ;;  %v12683_v14 = vcombine.high %v3413_v63, %v3421_v1 }
 0x3c6   :  { %v12637_v35 = vcombine.high %v3366_v30, %v3374_v31  ;;  %v12636_v0 = vcombine.low %v3366_v30, %v3374_v31  ;;  %v12682_v30 = vcombine.low %v3413_v63, %v3421_v1  ;;  %v3486_v63 = vld [vmem:[#allocation13 + $0x1a48] sm:$0xff] }
 0x3c8   :  { %8968 = vmatpush1.bf16.msra.mxu1 %v12522_v40  ;;  %9132 = vmatpush1.bf16.msra.mxu0 %v12524_v41  ;;  %v3382_v40 = vld [vmem:[#allocation13 + $0x1708] sm:$0xff] }
 0x3c9   :  { %8969 = vmatprep.subr.bf16.mxu1 %v12539_v42  ;;  %9133 = vmatprep.subr.bf16.mxu0 %v12541_v44  ;;  %v3390_v41 = vld [vmem:[#allocation13 + $0x1748] sm:$0xff]  ;;  %v14105_v42 = vsub.s32 4, %v14022_v15  ;;  %v12634_v44 = vcombine.low %v3365_v27, %v3373_v29 }
 0x3ca   :  { %v12653_v47 = vcombine.high %v3382_v40, %v3390_v41  ;;  %v12652_v56 = vcombine.low %v3382_v40, %v3390_v41  ;;  %v3438_v27 = vld [vmem:[#allocation13 + $0x18c8] sm:$0xff] }
 0x3cb   :  { %v1000_v54 = vrot.slane %v14075_v57, %v14105_v42  ;;  %v3454_v40 = vld [vmem:[#allocation13 + $0x1948] sm:$0xff] }
 0x3cc   :  { %8970 = vmatpush1.bf16.msra.mxu1 %v12538_v49  ;;  %9134 = vmatpush1.bf16.msra.mxu0 %v12540_v50  ;;  %v14111_v49 = vsub.s32 7, %v14022_v15  ;;  %v3397_v50 = vld [vmem:[#allocation13 + $0x1780] sm:$0xff] }
 0x3cd   :  { %8971 = vmatprep.subr.bf16.mxu1 %v12555_v51  ;;  %9135 = vmatprep.subr.bf16.mxu0 %v12557_v52  ;;  %v3405_v51 = vld [vmem:[#allocation13 + $0x17c0] sm:$0xff]  ;;  %v3398_v52 = vld [vmem:[#allocation13 + $0x1788] sm:$0xff] }
 0x3ce   :  { %v12666_v9 = vcombine.low %v3397_v50, %v3405_v51 }
 0x3d0   :  { %8972 = vmatpush1.bf16.msra.mxu1 %v12554_v61  ;;  %9136 = vmatpush1.bf16.msra.mxu0 %v12556_v58  ;;  %v1004_v61 = vrot.slane %v14075_v57, %v14108_v45  ;;  %v1012_v58 = vrot.slane %v14075_v57, %v14111_v49 }
 0x3d1   :  { %8973 = vmatprep.subr.bf16.mxu1 %v12571_v59  ;;  %9137 = vmatprep.subr.bf16.mxu0 %v12573_v62  ;;  %v12667_v59 = vcombine.high %v3397_v50, %v3405_v51  ;;  %v12669_v62 = vcombine.high %v3398_v52, %v3406_v53  ;;  %v3461_v50 = vld [vmem:[#allocation13 + $0x1980] sm:$0xff] }
 0x3d2   :  { %v3469_v51 = vld [vmem:[#allocation13 + $0x19c0] sm:$0xff] }
 0x3d4   :  { %8974 = vmatpush1.bf16.msra.mxu1 %v12570_v3  ;;  %9138 = vmatpush1.bf16.msra.mxu0 %v12572_v5  ;;  %v3422_v3 = vld [vmem:[#allocation13 + $0x1848] sm:$0xff] }
 0x3d5   :  { %8975 = vmatprep.subr.bf16.mxu1 %v12587_v6  ;;  %9139 = vmatprep.subr.bf16.mxu0 %v12589_v37  ;;  %v12685_v43 = vcombine.high %v3414_v2, %v3422_v3  ;;  %v12684_v31 = vcombine.low %v3414_v2, %v3422_v3 }
 0x3d8   :  { %8976 = vmatpush1.bf16.msra.mxu1 %v12586_v10  ;;  %9140 = vmatpush1.bf16.msra.mxu0 %v12588_v11  ;;  %v12668_v10 = vcombine.low %v3398_v52, %v3406_v53  ;;  %v3462_v52 = vld [vmem:[#allocation13 + $0x1988] sm:$0xff] }
 0x3d9   :  { %8977 = vmatprep.subr.bf16.mxu1 %v12603_v12  ;;  %9141 = vmatprep.subr.bf16.mxu0 %v12605_v13  ;;  %v3470_v53 = vld [vmem:[#allocation13 + $0x19c8] sm:$0xff] }
 0x3da   :  { %v12732_v1 = vcombine.low %v3462_v52, %v3470_v53 }
 0x3dc   :  { %8978 = vmatpush1.bf16.msra.mxu1 %v12602_v23  ;;  %9142 = vmatpush1.bf16.msra.mxu0 %v12604_v24  ;;  %v3429_v23 = vld [vmem:[#allocation13 + $0x1880] sm:$0xff] }
 0x3dd   :  { %8979 = vmatprep.subr.bf16.mxu1 %v12619_v25  ;;  %9143 = vmatprep.subr.bf16.mxu0 %v12621_v26  ;;  %v3437_v25 = vld [vmem:[#allocation13 + $0x18c0] sm:$0xff]  ;;  %v3430_v26 = vld [vmem:[#allocation13 + $0x1888] sm:$0xff] }
 0x3e0   :  { %8980 = vmatpush1.bf16.msra.mxu1 %v12618_v32  ;;  %9144 = vmatpush1.bf16.msra.mxu0 %v12620_v33  ;;  %v3445_v33 = vld [vmem:[#allocation13 + $0x1900] sm:$0xff] }
 0x3e1   :  { %8981 = vmatprep.subr.bf16.mxu1 %v12635_v34  ;;  %9145 = vmatprep.subr.bf16.mxu0 %v12637_v35  ;;  %v12699_v34 = vcombine.high %v3429_v23, %v3437_v25  ;;  %v12701_v35 = vcombine.high %v3430_v26, %v3438_v27 }
 0x3e4   :  { %8982 = vmatpush1.bf16.msra.mxu1 %v12634_v44  ;;  %9146 = vmatpush1.bf16.msra.mxu0 %v12636_v0  ;;  %v12698_v44 = vcombine.low %v3429_v23, %v3437_v25  ;;  %v12700_v0 = vcombine.low %v3430_v26, %v3438_v27  ;;  %v3533_v25 = vld [vmem:[#allocation13 + $0x1bc0] sm:$0xff]  ;;  %v3526_v26 = vld [vmem:[#allocation13 + $0x1b88] sm:$0xff] }
 0x3e5   :  { %8983 = vmatprep.subr.bf16.mxu1 %v12651_v60  ;;  %9147 = vmatprep.subr.bf16.mxu0 %v12653_v47  ;;  %v12715_v60 = vcombine.high %v3445_v33, %v3453_v36  ;;  %v12717_v47 = vcombine.high %v3446_v39, %v3454_v40  ;;  %v3534_v27 = vld [vmem:[#allocation13 + $0x1bc8] sm:$0xff] }
 0x3e6   :  { %v2540_v4 = vpop.f32.mrb[8].mxu1 }
 0x3e7   :  { %v13247_v5 = vadd.f32 %v2540_v4, %v1000_v54  ;;  %v14119_v6 = vpop.f32.mrb[12].mxu0  ;;  %v2542_v37 = vpop.f32.mrb[9].mxu1  ;;  %v12714_v54 = vcombine.low %v3445_v33, %v3453_v36  ;;  %v12730_v4 = vcombine.low %v3461_v50, %v3469_v51  ;;  %v3549_v36 = vld [vmem:[#allocation13 + $0x1c40] sm:$0xff] }
 0x3e8   :  { %v13248_v21 = vadd.f32 %v2542_v37, %v1004_v61  ;;  %v2624_v7 = vpop.f32.mrb[13].mxu0  ;;  %8984 = vmatpush1.bf16.msra.mxu1 %v12650_v55  ;;  %9148 = vmatpush1.bf16.msra.mxu0 %v12652_v56  ;;  %v2544_v8 = vpop.f32.mrb[10].mxu1  ;;  %v12716_v55 = vcombine.low %v3446_v39, %v3454_v40  ;;  %v12731_v56 = vcombine.high %v3461_v50, %v3469_v51  ;;  %v3501_v37 = vld [vmem:[#allocation13 + $0x1ac0] sm:$0xff]  ;;  %v3542_v39 = vld [vmem:[#allocation13 + $0x1c08] sm:$0xff] }
 0x3e9   :  { %v2633_v11 = vmax.f32 %v13247_v5, 0.0  ;;  %v13250_v57 = vadd.f32 %v2624_v7, %v1012_v58  ;;  %v2626_v12 = vpop.f32.mrb[14].mxu0  ;;  %v2545_v13 = vpop.f32.mrb[11].mxu1  ;;  %8985 = vmatprep.subr.bf16.mxu1 %v12667_v59  ;;  %9149 = vmatprep.subr.bf16.mxu0 %v12669_v62  ;;  %v12733_v61 = vcombine.high %v3462_v52, %v3470_v53  ;;  %v3477_v58 = vld [vmem:[#allocation13 + $0x1a00] sm:$0xff]  ;;  %v3478_v62 = vld [vmem:[#allocation13 + $0x1a08] sm:$0xff] }
 0x3ea   :  { %v2634_v19 = vmax.f32 %v13248_v21, 0.0  ;;  %v2627_v22 = vpop.f32.mrb[15].mxu0  ;;  %v3485_v59 = vld [vmem:[#allocation13 + $0x1a40] sm:$0xff]  ;;  %v12749_v3 = vcombine.high %v3478_v62, %v3486_v63  ;;  %v3494_v21 = vld [vmem:[#allocation13 + $0x1a88] sm:$0xff] }
 0x3eb   :  { %v2636_v24 = vmax.f32 %v13250_v57, 0.0  ;;  %v14123_v32 = vpack.c.bf16 %v2633_v11, %v2633_v11  ;;  %v12747_v2 = vcombine.high %v3477_v58, %v3485_v59  ;;  %v3493_v5 = vld [vmem:[#allocation13 + $0x1a80] sm:$0xff]  ;;  %v3502_v7 = vld [vmem:[#allocation13 + $0x1ac8] sm:$0xff]  ;;  %v12746_v8 = vcombine.low %v3477_v58, %v3485_v59 }
 0x3ec   :  { %v14121_v29 = vpack.c.bf16 %v2634_v19, %v2634_v19  ;;  %8986 = vmatpush1.bf16.msra.mxu1 %v12666_v9  ;;  %9150 = vmatpush1.bf16.msra.mxu0 %v12668_v10  ;;  %v12748_v9 = vcombine.low %v3478_v62, %v3486_v63  ;;  %v12763_v10 = vcombine.high %v3493_v5, %v3501_v37  ;;  %v3509_v57 = vld [vmem:[#allocation13 + $0x1b00] sm:$0xff]  ;;  %v3510_v13 = vld [vmem:[#allocation13 + $0x1b08] sm:$0xff] }
 0x3ed   :  { %8996 = vmatprep.subr.bf16.mxu1 %v12683_v14  ;;  %9160 = vmatprep.subr.bf16.mxu0 %v12685_v43  ;;  %v14127_v41 = vpack.c.bf16 %v2636_v24, %v2636_v24  ;;  %v12765_v11 = vcombine.high %v3494_v21, %v3502_v7  ;;  %v3517_v12 = vld [vmem:[#allocation13 + $0x1b40] sm:$0xff]  ;;  %v3518_v14 = vld [vmem:[#allocation13 + $0x1b48] sm:$0xff]  ;;  %v12762_v43 = vcombine.low %v3493_v5, %v3501_v37 }
 0x3ee   :  { %8987 = vmatprep.mubr.bf16.mxu1 %v14121_v29  ;;  %9151 = vmatprep.mubr.bf16.mxu0 %v14121_v29  ;;  %v12764_v19 = vcombine.low %v3494_v21, %v3502_v7  ;;  %v12779_v22 = vcombine.high %v3509_v57, %v3517_v12  ;;  %v12781_v23 = vcombine.high %v3510_v13, %v3518_v14  ;;  %v3525_v24 = vld [vmem:[#allocation13 + $0x1b80] sm:$0xff]  ;;  %v3550_v40 = vld [vmem:[#allocation13 + $0x1c48] sm:$0xff] }
 0x3ef   :  { %8988 = vmatmul.mubr.bf16.vlgmr.msra.gmra.mrb[12].mxu1 %v14123_v32  ;;  %9152 = vmatmul.mubr.bf16.vlgmr.msra.gmra.mrb[16].mxu0 %v14123_v32  ;;  %v12795_v33 = vcombine.high %v3525_v24, %v3533_v25  ;;  %v3557_v50 = vld [vmem:[#allocation13 + $0x1c80] sm:$0xff]  ;;  %v3558_v52 = vld [vmem:[#allocation13 + $0x1c88] sm:$0xff] }
 0x3f0   :  { %8997 = vmatpush1.bf16.msra.mxu1 %v12682_v30  ;;  %9161 = vmatpush1.bf16.msra.mxu0 %v12684_v31  ;;  %v12778_v30 = vcombine.low %v3509_v57, %v3517_v12  ;;  %v12780_v31 = vcombine.low %v3510_v13, %v3518_v14  ;;  %v3565_v51 = vld [vmem:[#allocation13 + $0x1cc0] sm:$0xff]  ;;  %v3566_v53 = vld [vmem:[#allocation13 + $0x1cc8] sm:$0xff] }
 0x3f1   :  { %9028 = vmatprep.mubr.bf16.mxu1 %v14127_v41  ;;  %9192 = vmatprep.mubr.bf16.mxu0 %v14127_v41  ;;  %v3573_v58 = vld [vmem:[#allocation13 + $0x1d00] sm:$0xff]  ;;  %v3574_v62 = vld [vmem:[#allocation13 + $0x1d08] sm:$0xff] }
 0x3f2   :  { %8998 = vmatprep.subr.bf16.mxu1 %v12699_v34  ;;  %9162 = vmatprep.subr.bf16.mxu0 %v12701_v35  ;;  %v12797_v34 = vcombine.high %v3526_v26, %v3534_v27  ;;  %v3541_v35 = vld [vmem:[#allocation13 + $0x1c00] sm:$0xff]  ;;  %v3582_v63 = vld [vmem:[#allocation13 + $0x1d48] sm:$0xff] }
 0x3f3   :  { %v3581_v59 = vld [vmem:[#allocation13 + $0x1d40] sm:$0xff]  ;;  %v3590_v21 = vld [vmem:[#allocation13 + $0x1d88] sm:$0xff] }
 0x3f4   :  { %8999 = vmatpush1.bf16.msra.mxu1 %v12698_v44  ;;  %9163 = vmatpush1.bf16.msra.mxu0 %v12700_v0  ;;  %v12794_v44 = vcombine.low %v3525_v24, %v3533_v25  ;;  %v12796_v0 = vcombine.low %v3526_v26, %v3534_v27  ;;  %v3589_v5 = vld [vmem:[#allocation13 + $0x1d80] sm:$0xff]  ;;  %v3598_v7 = vld [vmem:[#allocation13 + $0x1dc8] sm:$0xff] }
 0x3f5   :  { %9000 = vmatprep.subr.bf16.mxu1 %v12715_v60  ;;  %9164 = vmatprep.subr.bf16.mxu0 %v12717_v47  ;;  %v12811_v60 = vcombine.high %v3541_v35, %v3549_v36  ;;  %v12813_v47 = vcombine.high %v3542_v39, %v3550_v40  ;;  %v3597_v37 = vld [vmem:[#allocation13 + $0x1dc0] sm:$0xff]  ;;  %v3606_v13 = vld [vmem:[#allocation13 + $0x1e08] sm:$0xff] }
 0x3f6   :  { %v3605_v57 = vld [vmem:[#allocation13 + $0x1e00] sm:$0xff]  ;;  %v3614_v14 = vld [vmem:[#allocation13 + $0x1e48] sm:$0xff] }
 0x3f7   :  { %v3613_v12 = vld [vmem:[#allocation13 + $0x1e40] sm:$0xff]  ;;  %v3622_v26 = vld [vmem:[#allocation13 + $0x1e88] sm:$0xff] }
 0x3f8   :  { %9001 = vmatpush1.bf16.msra.mxu1 %v12714_v54  ;;  %9165 = vmatpush1.bf16.msra.mxu0 %v12716_v55  ;;  %v12810_v54 = vcombine.low %v3541_v35, %v3549_v36  ;;  %v12812_v55 = vcombine.low %v3542_v39, %v3550_v40  ;;  %v3621_v24 = vld [vmem:[#allocation13 + $0x1e80] sm:$0xff]  ;;  %v3630_v27 = vld [vmem:[#allocation13 + $0x1ec8] sm:$0xff] }
 0x3f9   :  { %9002 = vmatprep.subr.bf16.mxu1 %v12731_v56  ;;  %9166 = vmatprep.subr.bf16.mxu0 %v12733_v61  ;;  %v12827_v56 = vcombine.high %v3557_v50, %v3565_v51  ;;  %v12829_v61 = vcombine.high %v3558_v52, %v3566_v53  ;;  %v3629_v25 = vld [vmem:[#allocation13 + $0x1ec0] sm:$0xff]  ;;  %v12893_v35 = vcombine.high %v3622_v26, %v3630_v27  ;;  %v3638_v40 = vld [vmem:[#allocation13 + $0x1f08] sm:$0xff] }
 0x3fa   :  { %v3637_v36 = vld [vmem:[#allocation13 + $0x1f00] sm:$0xff] }
 0x3fb   :  { %v3645_v39 = vld [vmem:[#allocation13 + $0x1f40] sm:$0xff] }
 0x3fc   :  { %9003 = vmatpush1.bf16.msra.mxu1 %v12730_v4  ;;  %9167 = vmatpush1.bf16.msra.mxu0 %v12732_v1  ;;  %v12826_v4 = vcombine.low %v3557_v50, %v3565_v51  ;;  %v12828_v1 = vcombine.low %v3558_v52, %v3566_v53  ;;  %v12907_v51 = vcombine.high %v3637_v36, %v3645_v39  ;;  %v3653_v52 = vld [vmem:[#allocation13 + $0x1f80] sm:$0xff] }
 0x3fd   :  { %9004 = vmatprep.subr.bf16.mxu1 %v12747_v2  ;;  %9168 = vmatprep.subr.bf16.mxu0 %v12749_v3  ;;  %v12843_v2 = vcombine.high %v3573_v58, %v3581_v59  ;;  %v12845_v3 = vcombine.high %v3574_v62, %v3582_v63  ;;  %v3661_v53 = vld [vmem:[#allocation13 + $0x1fc0] sm:$0xff] }
 0x400   :  { %9005 = vmatpush1.bf16.msra.mxu1 %v12746_v8  ;;  %9169 = vmatpush1.bf16.msra.mxu0 %v12748_v9  ;;  %v12842_v8 = vcombine.low %v3573_v58, %v3581_v59  ;;  %v12844_v9 = vcombine.low %v3574_v62, %v3582_v63  ;;  %v12923_v59 = vcombine.high %v3653_v52, %v3661_v53  ;;  %v2647_v63 = vld [vmem:[#allocation13 + $0x10] sm:$0xff] }
 0x401   :  { %9006 = vmatprep.subr.bf16.mxu1 %v12763_v10  ;;  %9170 = vmatprep.subr.bf16.mxu0 %v12765_v11  ;;  %v12859_v10 = vcombine.high %v3589_v5, %v3597_v37  ;;  %v12861_v11 = vcombine.high %v3590_v21, %v3598_v7 }
 0x404   :  { %9007 = vmatpush1.bf16.msra.mxu1 %v12762_v43  ;;  %9171 = vmatpush1.bf16.msra.mxu0 %v12764_v19  ;;  %v12858_v43 = vcombine.low %v3589_v5, %v3597_v37  ;;  %v12860_v19 = vcombine.low %v3590_v21, %v3598_v7 }
 0x405   :  { %9008 = vmatprep.subr.bf16.mxu1 %v12779_v22  ;;  %9172 = vmatprep.subr.bf16.mxu0 %v12781_v23  ;;  %v12875_v22 = vcombine.high %v3605_v57, %v3613_v12  ;;  %v12877_v23 = vcombine.high %v3606_v13, %v3614_v14 }
 0x408   :  { %9009 = vmatpush1.bf16.msra.mxu1 %v12778_v30  ;;  %9173 = vmatpush1.bf16.msra.mxu0 %v12780_v31  ;;  %v12874_v30 = vcombine.low %v3605_v57, %v3613_v12  ;;  %v12876_v31 = vcombine.low %v3606_v13, %v3614_v14 }
 0x409   :  { %9010 = vmatprep.subr.bf16.mxu1 %v12795_v33  ;;  %9174 = vmatprep.subr.bf16.mxu0 %v12797_v34  ;;  %v14134_v33 = vsub.s32 6, %v14022_v15  ;;  %v12891_v34 = vcombine.high %v3621_v24, %v3629_v25 }
 0x40c   :  { %9011 = vmatpush1.bf16.msra.mxu1 %v12794_v44  ;;  %9175 = vmatpush1.bf16.msra.mxu0 %v12796_v0  ;;  %v3646_v44 = vld [vmem:[#allocation13 + $0x1f48] sm:$0xff]  ;;  %v12890_v0 = vcombine.low %v3621_v24, %v3629_v25 }
 0x40d   :  { %9012 = vmatprep.subr.bf16.mxu1 %v12811_v60  ;;  %9176 = vmatprep.subr.bf16.mxu0 %v12813_v47  ;;  %v12892_v60 = vcombine.low %v3622_v26, %v3630_v27  ;;  %v13627_v47 = vld [vmem:[#allocation11] sm:$0xff]  ;;  %v12909_v15 = vcombine.high %v3638_v40, %v3646_v44 }
 0x40e   :  { %v1008_v50 = vrot.slane %v13627_v47, %v14134_v33  ;;  %v2712_v47 = vld [vmem:[#allocation13 + $0x218] sm:$0xff] }
 0x410   :  { %9013 = vmatpush1.bf16.msra.mxu1 %v12810_v54  ;;  %9177 = vmatpush1.bf16.msra.mxu0 %v12812_v55  ;;  %v3654_v54 = vld [vmem:[#allocation13 + $0x1f88] sm:$0xff]  ;;  %v13249_v58 = vadd.f32 %v14119_v6, %v1008_v50  ;;  %v2664_v6 = vld [vmem:[#allocation13 + $0x98] sm:$0xff] }
 0x411   :  { %9014 = vmatprep.subr.bf16.mxu1 %v12827_v56  ;;  %9178 = vmatprep.subr.bf16.mxu0 %v12829_v61  ;;  %v3662_v55 = vld [vmem:[#allocation13 + $0x1fc8] sm:$0xff]  ;;  %v12906_v56 = vcombine.low %v3637_v36, %v3645_v39  ;;  %v12908_v61 = vcombine.low %v3638_v40, %v3646_v44  ;;  %v2720_v50 = vld [vmem:[#allocation13 + $0x258] sm:$0xff] }
 0x412   :  { %v12925_v62 = vcombine.high %v3654_v54, %v3662_v55  ;;  %v12924_v5 = vcombine.low %v3654_v54, %v3662_v55  ;;  %v2635_v37 = vmax.f32 %v13249_v58, 0.0  ;;  %v2727_v54 = vld [vmem:[#allocation13 + $0x290] sm:$0xff] }
 0x413   :  { %v2735_v55 = vld [vmem:[#allocation13 + $0x2d0] sm:$0xff] }
 0x414   :  { %9015 = vmatpush1.bf16.msra.mxu1 %v12826_v4  ;;  %9179 = vmatpush1.bf16.msra.mxu0 %v12828_v1  ;;  %v2655_v4 = vld [vmem:[#allocation13 + $0x50] sm:$0xff]  ;;  %v2648_v1 = vld [vmem:[#allocation13 + $0x18] sm:$0xff]  ;;  %v14138_v57 = vpack.c.bf16 %v2635_v37, %v2635_v37 }
 0x415   :  { %9016 = vmatprep.subr.bf16.mxu1 %v12843_v2  ;;  %9180 = vmatprep.subr.bf16.mxu0 %v12845_v3  ;;  %v2656_v2 = vld [vmem:[#allocation13 + $0x58] sm:$0xff]  ;;  %v12922_v3 = vcombine.low %v3653_v52, %v3661_v53  ;;  %v11919_v21 = vcombine.high %v2647_v63, %v2655_v4  ;;  %v11985_v53 = vcombine.high %v2712_v47, %v2720_v50 }
 0x416   :  { %v11921_v7 = vcombine.high %v2648_v1, %v2656_v2  ;;  %v11920_v12 = vcombine.low %v2648_v1, %v2656_v2  ;;  %v2751_v1 = vld [vmem:[#allocation13 + $0x350] sm:$0xff]  ;;  %v2744_v2 = vld [vmem:[#allocation13 + $0x318] sm:$0xff] }
 0x418   :  { %9017 = vmatpush1.bf16.msra.mxu1 %v12842_v8  ;;  %9181 = vmatpush1.bf16.msra.mxu0 %v12844_v9  ;;  %v2663_v8 = vld [vmem:[#allocation13 + $0x90] sm:$0xff] }
 0x419   :  { %9018 = vmatprep.subr.bf16.mxu1 %v12859_v10  ;;  %9182 = vmatprep.subr.bf16.mxu0 %v12861_v11  ;;  %v2671_v9 = vld [vmem:[#allocation13 + $0xd0] sm:$0xff]  ;;  %v2672_v10 = vld [vmem:[#allocation13 + $0xd8] sm:$0xff]  ;;  %v11918_v11 = vcombine.low %v2647_v63, %v2655_v4 }
 0x41a   :  { %v11935_v13 = vcombine.high %v2663_v8, %v2671_v9  ;;  %v11937_v14 = vcombine.high %v2664_v6, %v2672_v10  ;;  %v11934_v24 = vcombine.low %v2663_v8, %v2671_v9  ;;  %v11936_v25 = vcombine.low %v2664_v6, %v2672_v10  ;;  %v2743_v4 = vld [vmem:[#allocation13 + $0x310] sm:$0xff]  ;;  %v2760_v6 = vld [vmem:[#allocation13 + $0x398] sm:$0xff] }
 0x41b   :  { %v2759_v8 = vld [vmem:[#allocation13 + $0x390] sm:$0xff]  ;;  %v2768_v10 = vld [vmem:[#allocation13 + $0x3d8] sm:$0xff] }
 0x41c   :  { %9019 = vmatpush1.bf16.msra.mxu1 %v12858_v43  ;;  %9183 = vmatpush1.bf16.msra.mxu0 %v12860_v19  ;;  %v2679_v43 = vld [vmem:[#allocation13 + $0x110] sm:$0xff] }
 0x41d   :  { %9020 = vmatprep.subr.bf16.mxu1 %v12875_v22  ;;  %9184 = vmatprep.subr.bf16.mxu0 %v12877_v23  ;;  %v2687_v19 = vld [vmem:[#allocation13 + $0x150] sm:$0xff]  ;;  %v2680_v22 = vld [vmem:[#allocation13 + $0x118] sm:$0xff] }
 0x41e   :  { %v2688_v23 = vld [vmem:[#allocation13 + $0x158] sm:$0xff]  ;;  %v11951_v26 = vcombine.high %v2679_v43, %v2687_v19  ;;  %v11950_v36 = vcombine.low %v2679_v43, %v2687_v19  ;;  %v2767_v9 = vld [vmem:[#allocation13 + $0x3d0] sm:$0xff] }
 0x41f   :  { %v11953_v27 = vcombine.high %v2680_v22, %v2688_v23  ;;  %v11952_v39 = vcombine.low %v2680_v22, %v2688_v23  ;;  %v2775_v43 = vld [vmem:[#allocation13 + $0x410] sm:$0xff]  ;;  %v2776_v22 = vld [vmem:[#allocation13 + $0x418] sm:$0xff] }
 0x420   :  { %9021 = vmatpush1.bf16.msra.mxu1 %v12874_v30  ;;  %9185 = vmatpush1.bf16.msra.mxu0 %v12876_v31  ;;  %v2695_v30 = vld [vmem:[#allocation13 + $0x190] sm:$0xff]  ;;  %v2784_v23 = vld [vmem:[#allocation13 + $0x458] sm:$0xff] }
 0x421   :  { %9022 = vmatprep.subr.bf16.mxu1 %v12891_v34  ;;  %9186 = vmatprep.subr.bf16.mxu0 %v12893_v35  ;;  %v2703_v31 = vld [vmem:[#allocation13 + $0x1d0] sm:$0xff]  ;;  %v2696_v34 = vld [vmem:[#allocation13 + $0x198] sm:$0xff] }
 0x422   :  { %v2704_v35 = vld [vmem:[#allocation13 + $0x1d8] sm:$0xff]  ;;  %v11967_v40 = vcombine.high %v2695_v30, %v2703_v31  ;;  %v2783_v19 = vld [vmem:[#allocation13 + $0x450] sm:$0xff] }
 0x423   :  { %v11969_v44 = vcombine.high %v2696_v34, %v2704_v35 }
 0x424   :  { %9023 = vmatpush1.bf16.msra.mxu1 %v12890_v0  ;;  %9187 = vmatpush1.bf16.msra.mxu0 %v12892_v60  ;;  %v2711_v0 = vld [vmem:[#allocation13 + $0x210] sm:$0xff] }
 0x425   :  { %9024 = vmatprep.subr.bf16.mxu1 %v12907_v51  ;;  %9188 = vmatprep.subr.bf16.mxu0 %v12909_v15  ;;  %v2719_v60 = vld [vmem:[#allocation13 + $0x250] sm:$0xff]  ;;  %v11966_v51 = vcombine.low %v2695_v30, %v2703_v31  ;;  %v11968_v15 = vcombine.low %v2696_v34, %v2704_v35  ;;  %v2792_v34 = vld [vmem:[#allocation13 + $0x498] sm:$0xff] }
 0x426   :  { %v11983_v52 = vcombine.high %v2711_v0, %v2719_v60  ;;  %v11982_v58 = vcombine.low %v2711_v0, %v2719_v60  ;;  %v2791_v30 = vld [vmem:[#allocation13 + $0x490] sm:$0xff]  ;;  %v2800_v35 = vld [vmem:[#allocation13 + $0x4d8] sm:$0xff] }
 0x427   :  { %v2799_v31 = vld [vmem:[#allocation13 + $0x4d0] sm:$0xff] }
 0x428   :  { %9025 = vmatpush1.bf16.msra.mxu1 %v12906_v56  ;;  %9189 = vmatpush1.bf16.msra.mxu0 %v12908_v61  ;;  %v2728_v56 = vld [vmem:[#allocation13 + $0x298] sm:$0xff]  ;;  %v2807_v0 = vld [vmem:[#allocation13 + $0x510] sm:$0xff] }
 0x429   :  { %9026 = vmatprep.subr.bf16.mxu1 %v12923_v59  ;;  %9190 = vmatprep.subr.bf16.mxu0 %v12925_v62  ;;  %v2736_v61 = vld [vmem:[#allocation13 + $0x2d8] sm:$0xff]  ;;  %v11984_v59 = vcombine.low %v2712_v47, %v2720_v50  ;;  %v11999_v62 = vcombine.high %v2727_v54, %v2735_v55  ;;  %v2815_v60 = vld [vmem:[#allocation13 + $0x550] sm:$0xff] }
 0x42a   :  { %v12001_v63 = vcombine.high %v2728_v56, %v2736_v61  ;;  %v12000_v37 = vcombine.low %v2728_v56, %v2736_v61  ;;  %v2808_v47 = vld [vmem:[#allocation13 + $0x518] sm:$0xff] }
 0x42b   :  { %v2816_v50 = vld [vmem:[#allocation13 + $0x558] sm:$0xff] }
 0x42c   :  { %9027 = vmatpush1.bf16.msra.mxu1 %v12922_v3  ;;  %9191 = vmatpush1.bf16.msra.mxu0 %v12924_v5  ;;  %v2752_v3 = vld [vmem:[#allocation13 + $0x358] sm:$0xff]  ;;  %v11998_v5 = vcombine.low %v2727_v54, %v2735_v55  ;;  %v2823_v54 = vld [vmem:[#allocation13 + $0x590] sm:$0xff] }
 0x42d   :  { %9201 = vmatprep.subr.bf16.mxu1 %v11919_v21  ;;  %9365 = vmatprep.subr.bf16.mxu0 %v11921_v7  ;;  %v12015_v21 = vcombine.high %v2743_v4, %v2751_v1  ;;  %v12017_v7 = vcombine.high %v2744_v2, %v2752_v3  ;;  %v2831_v55 = vld [vmem:[#allocation13 + $0x5d0] sm:$0xff]  ;;  %v2824_v56 = vld [vmem:[#allocation13 + $0x598] sm:$0xff] }
 0x42e   :  { %v2832_v61 = vld [vmem:[#allocation13 + $0x5d8] sm:$0xff] }
 0x42f   :  { %9029 = vmatmul.mubr.bf16.vlgmr.msra.gmra.mrb[12].mxu1 %v14138_v57  ;;  %9193 = vmatmul.mubr.bf16.vlgmr.msra.gmra.mrb[16].mxu0 %v14138_v57 }
 0x430   :  { %9202 = vmatpush1.bf16.msra.mxu1 %v11918_v11  ;;  %9233 = vmatprep.mubr.bf16.mxu1 %v14085_v17  ;;  %v12014_v11 = vcombine.low %v2743_v4, %v2751_v1  ;;  %v2839_v4 = vld [vmem:[#allocation13 + $0x610] sm:$0xff] }
 0x431   :  { %9366 = vmatpush1.bf16.msra.mxu0 %v11920_v12  ;;  %9397 = vmatprep.mubr.bf16.mxu0 %v14085_v17  ;;  %v12016_v12 = vcombine.low %v2744_v2, %v2752_v3  ;;  %v2847_v1 = vld [vmem:[#allocation13 + $0x650] sm:$0xff]  ;;  %v2840_v2 = vld [vmem:[#allocation13 + $0x618] sm:$0xff] }
 0x432   :  { %9203 = vmatprep.subr.bf16.mxu1 %v11935_v13  ;;  %9367 = vmatprep.subr.bf16.mxu0 %v11937_v14  ;;  %v12031_v13 = vcombine.high %v2759_v8, %v2767_v9  ;;  %v12033_v14 = vcombine.high %v2760_v6, %v2768_v10  ;;  %v2848_v3 = vld [vmem:[#allocation13 + $0x658] sm:$0xff] }
 0x434   :  { %9204 = vmatpush1.bf16.msra.mxu1 %v11934_v24  ;;  %v12030_v24 = vcombine.low %v2759_v8, %v2767_v9  ;;  %v2855_v8 = vld [vmem:[#allocation13 + $0x690] sm:$0xff] }
 0x435   :  { %9368 = vmatpush1.bf16.msra.mxu0 %v11936_v25  ;;  %9205 = vmatprep.subr.bf16.mxu1 %v11951_v26  ;;  %v12032_v25 = vcombine.low %v2760_v6, %v2768_v10  ;;  %v12047_v26 = vcombine.high %v2775_v43, %v2783_v19  ;;  %v2863_v9 = vld [vmem:[#allocation13 + $0x6d0] sm:$0xff]  ;;  %v2856_v6 = vld [vmem:[#allocation13 + $0x698] sm:$0xff] }
 0x436   :  { %9369 = vmatprep.subr.bf16.mxu0 %v11953_v27  ;;  %v12049_v27 = vcombine.high %v2776_v22, %v2784_v23  ;;  %v2864_v10 = vld [vmem:[#allocation13 + $0x6d8] sm:$0xff] }
 0x438   :  { %9206 = vmatpush1.bf16.msra.mxu1 %v11950_v36  ;;  %v12046_v36 = vcombine.low %v2775_v43, %v2783_v19  ;;  %v2871_v43 = vld [vmem:[#allocation13 + $0x710] sm:$0xff] }
 0x439   :  { %9370 = vmatpush1.bf16.msra.mxu0 %v11952_v39  ;;  %9207 = vmatprep.subr.bf16.mxu1 %v11967_v40  ;;  %v12048_v39 = vcombine.low %v2776_v22, %v2784_v23  ;;  %v12063_v40 = vcombine.high %v2791_v30, %v2799_v31  ;;  %v2879_v19 = vld [vmem:[#allocation13 + $0x750] sm:$0xff]  ;;  %v2872_v22 = vld [vmem:[#allocation13 + $0x718] sm:$0xff] }
 0x43a   :  { %9371 = vmatprep.subr.bf16.mxu0 %v11969_v44  ;;  %v12065_v44 = vcombine.high %v2792_v34, %v2800_v35  ;;  %v2880_v23 = vld [vmem:[#allocation13 + $0x758] sm:$0xff] }
 0x43c   :  { %9208 = vmatpush1.bf16.msra.mxu1 %v11966_v51  ;;  %v12062_v51 = vcombine.low %v2791_v30, %v2799_v31  ;;  %v2887_v30 = vld [vmem:[#allocation13 + $0x790] sm:$0xff] }
 0x43d   :  { %9372 = vmatpush1.bf16.msra.mxu0 %v11968_v15  ;;  %9209 = vmatprep.subr.bf16.mxu1 %v11983_v52  ;;  %v12064_v15 = vcombine.low %v2792_v34, %v2800_v35  ;;  %v12079_v52 = vcombine.high %v2807_v0, %v2815_v60  ;;  %v2895_v31 = vld [vmem:[#allocation13 + $0x7d0] sm:$0xff]  ;;  %v2888_v34 = vld [vmem:[#allocation13 + $0x798] sm:$0xff] }
 0x43e   :  { %9373 = vmatprep.subr.bf16.mxu0 %v11985_v53  ;;  %v12081_v53 = vcombine.high %v2808_v47, %v2816_v50  ;;  %v2896_v35 = vld [vmem:[#allocation13 + $0x7d8] sm:$0xff] }
 0x440   :  { %9210 = vmatpush1.bf16.msra.mxu1 %v11982_v58  ;;  %v12078_v58 = vcombine.low %v2807_v0, %v2815_v60  ;;  %v2903_v0 = vld [vmem:[#allocation13 + $0x810] sm:$0xff] }
 0x441   :  { %9374 = vmatpush1.bf16.msra.mxu0 %v11984_v59  ;;  %9211 = vmatprep.subr.bf16.mxu1 %v11999_v62  ;;  %v12080_v59 = vcombine.low %v2808_v47, %v2816_v50  ;;  %v12095_v62 = vcombine.high %v2823_v54, %v2831_v55  ;;  %v2911_v60 = vld [vmem:[#allocation13 + $0x850] sm:$0xff]  ;;  %v2904_v47 = vld [vmem:[#allocation13 + $0x818] sm:$0xff] }
 0x442   :  { %9375 = vmatprep.subr.bf16.mxu0 %v12001_v63  ;;  %v12097_v63 = vcombine.high %v2824_v56, %v2832_v61  ;;  %v2912_v50 = vld [vmem:[#allocation13 + $0x858] sm:$0xff] }
 0x444   :  { %9212 = vmatpush1.bf16.msra.mxu1 %v11998_v5  ;;  %v12094_v5 = vcombine.low %v2823_v54, %v2831_v55  ;;  %v2919_v54 = vld [vmem:[#allocation13 + $0x890] sm:$0xff] }
 0x445   :  { %9376 = vmatpush1.bf16.msra.mxu0 %v12000_v37  ;;  %9213 = vmatprep.subr.bf16.mxu1 %v12015_v21  ;;  %v12096_v37 = vcombine.low %v2824_v56, %v2832_v61  ;;  %v12111_v21 = vcombine.high %v2839_v4, %v2847_v1  ;;  %v2927_v55 = vld [vmem:[#allocation13 + $0x8d0] sm:$0xff]  ;;  %v12174_v56 = vcombine.low %v2903_v0, %v2911_v60  ;;  %v2920_v61 = vld [vmem:[#allocation13 + $0x898] sm:$0xff] }
 0x446   :  { %9377 = vmatprep.subr.bf16.mxu0 %v12017_v7  ;;  %v12113_v7 = vcombine.high %v2840_v2, %v2848_v3 }
 0x448   :  { %9214 = vmatpush1.bf16.msra.mxu1 %v12014_v11  ;;  %v12110_v11 = vcombine.low %v2839_v4, %v2847_v1  ;;  %v2943_v4 = vld [vmem:[#allocation13 + $0x950] sm:$0xff] }
 0x449   :  { %9378 = vmatpush1.bf16.msra.mxu0 %v12016_v12  ;;  %9215 = vmatprep.subr.bf16.mxu1 %v12031_v13  ;;  %v12112_v12 = vcombine.low %v2840_v2, %v2848_v3  ;;  %v12127_v13 = vcombine.high %v2855_v8, %v2863_v9  ;;  %v2936_v2 = vld [vmem:[#allocation13 + $0x918] sm:$0xff] }
 0x44a   :  { %9379 = vmatprep.subr.bf16.mxu0 %v12033_v14  ;;  %v12129_v14 = vcombine.high %v2856_v6, %v2864_v10  ;;  %v2944_v3 = vld [vmem:[#allocation13 + $0x958] sm:$0xff] }
 0x44c   :  { %9216 = vmatpush1.bf16.msra.mxu1 %v12030_v24  ;;  %v12126_v24 = vcombine.low %v2855_v8, %v2863_v9  ;;  %v2951_v8 = vld [vmem:[#allocation13 + $0x990] sm:$0xff] }
 0x44d   :  { %9380 = vmatpush1.bf16.msra.mxu0 %v12032_v25  ;;  %9217 = vmatprep.subr.bf16.mxu1 %v12047_v26  ;;  %v12128_v25 = vcombine.low %v2856_v6, %v2864_v10  ;;  %v12143_v26 = vcombine.high %v2871_v43, %v2879_v19  ;;  %v2959_v9 = vld [vmem:[#allocation13 + $0x9d0] sm:$0xff]  ;;  %v2952_v6 = vld [vmem:[#allocation13 + $0x998] sm:$0xff] }
 0x44e   :  { %9381 = vmatprep.subr.bf16.mxu0 %v12049_v27  ;;  %v12145_v27 = vcombine.high %v2872_v22, %v2880_v23  ;;  %v2960_v10 = vld [vmem:[#allocation13 + $0x9d8] sm:$0xff] }
 0x450   :  { %9218 = vmatpush1.bf16.msra.mxu1 %v12046_v36  ;;  %v12142_v36 = vcombine.low %v2871_v43, %v2879_v19  ;;  %v2967_v43 = vld [vmem:[#allocation13 + $0xa10] sm:$0xff] }
 0x451   :  { %9382 = vmatpush1.bf16.msra.mxu0 %v12048_v39  ;;  %9219 = vmatprep.subr.bf16.mxu1 %v12063_v40  ;;  %v12144_v39 = vcombine.low %v2872_v22, %v2880_v23  ;;  %v12159_v40 = vcombine.high %v2887_v30, %v2895_v31  ;;  %v2975_v19 = vld [vmem:[#allocation13 + $0xa50] sm:$0xff]  ;;  %v2968_v22 = vld [vmem:[#allocation13 + $0xa18] sm:$0xff] }
 0x452   :  { %9383 = vmatprep.subr.bf16.mxu0 %v12065_v44  ;;  %v12161_v44 = vcombine.high %v2888_v34, %v2896_v35  ;;  %v2976_v23 = vld [vmem:[#allocation13 + $0xa58] sm:$0xff] }
 0x454   :  { %9220 = vmatpush1.bf16.msra.mxu1 %v12062_v51  ;;  %v12158_v51 = vcombine.low %v2887_v30, %v2895_v31  ;;  %v2983_v30 = vld [vmem:[#allocation13 + $0xa90] sm:$0xff] }
 0x455   :  { %9384 = vmatpush1.bf16.msra.mxu0 %v12064_v15  ;;  %9221 = vmatprep.subr.bf16.mxu1 %v12079_v52  ;;  %v12160_v15 = vcombine.low %v2888_v34, %v2896_v35  ;;  %v12175_v52 = vcombine.high %v2903_v0, %v2911_v60  ;;  %v2991_v31 = vld [vmem:[#allocation13 + $0xad0] sm:$0xff]  ;;  %v2984_v34 = vld [vmem:[#allocation13 + $0xa98] sm:$0xff] }
 0x456   :  { %9385 = vmatprep.subr.bf16.mxu0 %v12081_v53  ;;  %v12177_v53 = vcombine.high %v2904_v47, %v2912_v50  ;;  %v2992_v35 = vld [vmem:[#allocation13 + $0xad8] sm:$0xff]  ;;  %v2999_v0 = vld [vmem:[#allocation13 + $0xb10] sm:$0xff] }
 0x457   :  { %v3007_v60 = vld [vmem:[#allocation13 + $0xb50] sm:$0xff] }
 0x458   :  { %9222 = vmatpush1.bf16.msra.mxu1 %v12078_v58  ;;  %v2928_v58 = vld [vmem:[#allocation13 + $0x8d8] sm:$0xff] }
 0x459   :  { %9386 = vmatpush1.bf16.msra.mxu0 %v12080_v59  ;;  %9223 = vmatprep.subr.bf16.mxu1 %v12095_v62  ;;  %v12176_v59 = vcombine.low %v2904_v47, %v2912_v50  ;;  %v12191_v62 = vcombine.high %v2919_v54, %v2927_v55  ;;  %v12193_v1 = vcombine.high %v2920_v61, %v2928_v58  ;;  %v3000_v47 = vld [vmem:[#allocation13 + $0xb18] sm:$0xff] }
 0x45a   :  { %9387 = vmatprep.subr.bf16.mxu0 %v12097_v63  ;;  %v2935_v63 = vld [vmem:[#allocation13 + $0x910] sm:$0xff]  ;;  %v3008_v50 = vld [vmem:[#allocation13 + $0xb58] sm:$0xff] }
 0x45c   :  { %9224 = vmatpush1.bf16.msra.mxu1 %v12094_v5  ;;  %v12190_v5 = vcombine.low %v2919_v54, %v2927_v55  ;;  %v3015_v54 = vld [vmem:[#allocation13 + $0xb90] sm:$0xff] }
 0x45d   :  { %9388 = vmatpush1.bf16.msra.mxu0 %v12096_v37  ;;  %9225 = vmatprep.subr.bf16.mxu1 %v12111_v21  ;;  %v12192_v37 = vcombine.low %v2920_v61, %v2928_v58  ;;  %v12207_v21 = vcombine.high %v2935_v63, %v2943_v4  ;;  %v3023_v55 = vld [vmem:[#allocation13 + $0xbd0] sm:$0xff]  ;;  %v3024_v61 = vld [vmem:[#allocation13 + $0xbd8] sm:$0xff]  ;;  %v12270_v58 = vcombine.low %v2999_v0, %v3007_v60 }
 0x45e   :  { %9389 = vmatprep.subr.bf16.mxu0 %v12113_v7  ;;  %v12209_v7 = vcombine.high %v2936_v2, %v2944_v3 }
 0x460   :  { %9226 = vmatpush1.bf16.msra.mxu1 %v12110_v11  ;;  %v12206_v11 = vcombine.low %v2935_v63, %v2943_v4  ;;  %v3031_v4 = vld [vmem:[#allocation13 + $0xc10] sm:$0xff] }
 0x461   :  { %9390 = vmatpush1.bf16.msra.mxu0 %v12112_v12  ;;  %9227 = vmatprep.subr.bf16.mxu1 %v12127_v13  ;;  %v12208_v12 = vcombine.low %v2936_v2, %v2944_v3  ;;  %v12223_v13 = vcombine.high %v2951_v8, %v2959_v9  ;;  %v3032_v2 = vld [vmem:[#allocation13 + $0xc18] sm:$0xff] }
 0x462   :  { %9391 = vmatprep.subr.bf16.mxu0 %v12129_v14  ;;  %v12225_v14 = vcombine.high %v2952_v6, %v2960_v10  ;;  %v3040_v3 = vld [vmem:[#allocation13 + $0xc58] sm:$0xff] }
 0x464   :  { %9228 = vmatpush1.bf16.msra.mxu1 %v12126_v24  ;;  %v12222_v24 = vcombine.low %v2951_v8, %v2959_v9  ;;  %v3047_v8 = vld [vmem:[#allocation13 + $0xc90] sm:$0xff] }
 0x465   :  { %9392 = vmatpush1.bf16.msra.mxu0 %v12128_v25  ;;  %9229 = vmatprep.subr.bf16.mxu1 %v12143_v26  ;;  %v12224_v25 = vcombine.low %v2952_v6, %v2960_v10  ;;  %v12239_v26 = vcombine.high %v2967_v43, %v2975_v19  ;;  %v3055_v9 = vld [vmem:[#allocation13 + $0xcd0] sm:$0xff]  ;;  %v3048_v6 = vld [vmem:[#allocation13 + $0xc98] sm:$0xff] }
 0x466   :  { %9393 = vmatprep.subr.bf16.mxu0 %v12145_v27  ;;  %v12241_v27 = vcombine.high %v2968_v22, %v2976_v23  ;;  %v3056_v10 = vld [vmem:[#allocation13 + $0xcd8] sm:$0xff] }
 0x468   :  { %9230 = vmatpush1.bf16.msra.mxu1 %v12142_v36  ;;  %v12238_v36 = vcombine.low %v2967_v43, %v2975_v19  ;;  %v3063_v43 = vld [vmem:[#allocation13 + $0xd10] sm:$0xff] }
 0x469   :  { %9394 = vmatpush1.bf16.msra.mxu0 %v12144_v39  ;;  %9231 = vmatprep.subr.bf16.mxu1 %v12159_v40  ;;  %v12240_v39 = vcombine.low %v2968_v22, %v2976_v23  ;;  %v12255_v40 = vcombine.high %v2983_v30, %v2991_v31  ;;  %v3071_v19 = vld [vmem:[#allocation13 + $0xd50] sm:$0xff]  ;;  %v3064_v22 = vld [vmem:[#allocation13 + $0xd18] sm:$0xff] }
 0x46a   :  { %9395 = vmatprep.subr.bf16.mxu0 %v12161_v44  ;;  %v12257_v44 = vcombine.high %v2984_v34, %v2992_v35  ;;  %v3072_v23 = vld [vmem:[#allocation13 + $0xd58] sm:$0xff] }
 0x46c   :  { %9232 = vmatpush1.bf16.msra.mxu1 %v12158_v51  ;;  %v12254_v51 = vcombine.low %v2983_v30, %v2991_v31  ;;  %v3079_v30 = vld [vmem:[#allocation13 + $0xd90] sm:$0xff] }
 0x46d   :  { %9396 = vmatpush1.bf16.msra.mxu0 %v12160_v15  ;;  %9242 = vmatprep.subr.bf16.mxu1 %v12175_v52  ;;  %v12256_v15 = vcombine.low %v2984_v34, %v2992_v35  ;;  %v12271_v52 = vcombine.high %v2999_v0, %v3007_v60  ;;  %v3087_v31 = vld [vmem:[#allocation13 + $0xdd0] sm:$0xff]  ;;  %v3080_v34 = vld [vmem:[#allocation13 + $0xd98] sm:$0xff] }
 0x46e   :  { %9406 = vmatprep.subr.bf16.mxu0 %v12177_v53  ;;  %v12273_v53 = vcombine.high %v3000_v47, %v3008_v50  ;;  %v3088_v35 = vld [vmem:[#allocation13 + $0xdd8] sm:$0xff]  ;;  %v3095_v0 = vld [vmem:[#allocation13 + $0xe10] sm:$0xff] }
 0x46f   :  { %9234 = vmatmul.mubr.bf16.vlgmr.msra.gmra.mrb[16].mxu1 %v14087_v20  ;;  %v3103_v60 = vld [vmem:[#allocation13 + $0xe50] sm:$0xff] }
 0x470   :  { %9398 = vmatmul.mubr.bf16.vlgmr.msra.gmra.mrb[20].mxu0 %v14087_v20  ;;  %9243 = vmatpush1.bf16.msra.mxu1 %v12174_v56  ;;  %v3016_v56 = vld [vmem:[#allocation13 + $0xb98] sm:$0xff] }
 0x471   :  { %9274 = vmatprep.mubr.bf16.mxu1 %v14091_v28  ;;  %9407 = vmatpush1.bf16.msra.mxu0 %v12176_v59  ;;  %v12272_v59 = vcombine.low %v3000_v47, %v3008_v50  ;;  %v12289_v63 = vcombine.high %v3016_v56, %v3024_v61  ;;  %v3096_v47 = vld [vmem:[#allocation13 + $0xe18] sm:$0xff] }
 0x472   :  { %9438 = vmatprep.mubr.bf16.mxu0 %v14091_v28  ;;  %9244 = vmatprep.subr.bf16.mxu1 %v12191_v62  ;;  %v12287_v62 = vcombine.high %v3015_v54, %v3023_v55  ;;  %v3104_v50 = vld [vmem:[#allocation13 + $0xe58] sm:$0xff] }
 0x473   :  { %9408 = vmatprep.subr.bf16.mxu0 %v12193_v1  ;;  %v3039_v1 = vld [vmem:[#allocation13 + $0xc50] sm:$0xff] }
 0x474   :  { %9245 = vmatpush1.bf16.msra.mxu1 %v12190_v5  ;;  %v12286_v5 = vcombine.low %v3015_v54, %v3023_v55  ;;  %v3111_v54 = vld [vmem:[#allocation13 + $0xe90] sm:$0xff] }
 0x475   :  { %9409 = vmatpush1.bf16.msra.mxu0 %v12192_v37  ;;  %9246 = vmatprep.subr.bf16.mxu1 %v12207_v21  ;;  %v12288_v37 = vcombine.low %v3016_v56, %v3024_v61  ;;  %v12303_v21 = vcombine.high %v3031_v4, %v3039_v1  ;;  %v3119_v55 = vld [vmem:[#allocation13 + $0xed0] sm:$0xff]  ;;  %v3112_v56 = vld [vmem:[#allocation13 + $0xe98] sm:$0xff] }
 0x476   :  { %9410 = vmatprep.subr.bf16.mxu0 %v12209_v7  ;;  %v12305_v7 = vcombine.high %v3032_v2, %v3040_v3  ;;  %v3120_v61 = vld [vmem:[#allocation13 + $0xed8] sm:$0xff] }
 0x478   :  { %9247 = vmatpush1.bf16.msra.mxu1 %v12206_v11  ;;  %v12302_v11 = vcombine.low %v3031_v4, %v3039_v1  ;;  %v3127_v4 = vld [vmem:[#allocation13 + $0xf10] sm:$0xff] }
 0x479   :  { %9411 = vmatpush1.bf16.msra.mxu0 %v12208_v12  ;;  %9248 = vmatprep.subr.bf16.mxu1 %v12223_v13  ;;  %v12304_v12 = vcombine.low %v3032_v2, %v3040_v3  ;;  %v12319_v13 = vcombine.high %v3047_v8, %v3055_v9  ;;  %v3135_v1 = vld [vmem:[#allocation13 + $0xf50] sm:$0xff]  ;;  %v3128_v2 = vld [vmem:[#allocation13 + $0xf18] sm:$0xff] }
 0x47a   :  { %9412 = vmatprep.subr.bf16.mxu0 %v12225_v14  ;;  %v12321_v14 = vcombine.high %v3048_v6, %v3056_v10  ;;  %v3136_v3 = vld [vmem:[#allocation13 + $0xf58] sm:$0xff] }
 0x47c   :  { %9249 = vmatpush1.bf16.msra.mxu1 %v12222_v24  ;;  %v12318_v24 = vcombine.low %v3047_v8, %v3055_v9  ;;  %v3143_v8 = vld [vmem:[#allocation13 + $0xf90] sm:$0xff] }
 0x47d   :  { %9413 = vmatpush1.bf16.msra.mxu0 %v12224_v25  ;;  %9250 = vmatprep.subr.bf16.mxu1 %v12239_v26  ;;  %v12320_v25 = vcombine.low %v3048_v6, %v3056_v10  ;;  %v12335_v26 = vcombine.high %v3063_v43, %v3071_v19  ;;  %v3151_v9 = vld [vmem:[#allocation13 + $0xfd0] sm:$0xff]  ;;  %v3144_v6 = vld [vmem:[#allocation13 + $0xf98] sm:$0xff] }
 0x47e   :  { %9414 = vmatprep.subr.bf16.mxu0 %v12241_v27  ;;  %v12337_v27 = vcombine.high %v3064_v22, %v3072_v23  ;;  %v3152_v10 = vld [vmem:[#allocation13 + $0xfd8] sm:$0xff] }
 0x480   :  { %9251 = vmatpush1.bf16.msra.mxu1 %v12238_v36  ;;  %v12334_v36 = vcombine.low %v3063_v43, %v3071_v19  ;;  %v3159_v43 = vld [vmem:[#allocation13 + $0x1010] sm:$0xff] }
 0x481   :  { %9415 = vmatpush1.bf16.msra.mxu0 %v12240_v39  ;;  %9252 = vmatprep.subr.bf16.mxu1 %v12255_v40  ;;  %v12336_v39 = vcombine.low %v3064_v22, %v3072_v23  ;;  %v12351_v40 = vcombine.high %v3079_v30, %v3087_v31  ;;  %v3167_v19 = vld [vmem:[#allocation13 + $0x1050] sm:$0xff]  ;;  %v3160_v22 = vld [vmem:[#allocation13 + $0x1018] sm:$0xff] }
 0x482   :  { %9416 = vmatprep.subr.bf16.mxu0 %v12257_v44  ;;  %v12353_v44 = vcombine.high %v3080_v34, %v3088_v35  ;;  %v3168_v23 = vld [vmem:[#allocation13 + $0x1058] sm:$0xff] }
 0x484   :  { %9253 = vmatpush1.bf16.msra.mxu1 %v12254_v51  ;;  %v12350_v51 = vcombine.low %v3079_v30, %v3087_v31  ;;  %v3175_v30 = vld [vmem:[#allocation13 + $0x1090] sm:$0xff] }
 0x485   :  { %9417 = vmatpush1.bf16.msra.mxu0 %v12256_v15  ;;  %9254 = vmatprep.subr.bf16.mxu1 %v12271_v52  ;;  %v12352_v15 = vcombine.low %v3080_v34, %v3088_v35  ;;  %v12367_v52 = vcombine.high %v3095_v0, %v3103_v60  ;;  %v3183_v31 = vld [vmem:[#allocation13 + $0x10d0] sm:$0xff]  ;;  %v12430_v34 = vcombine.low %v3159_v43, %v3167_v19  ;;  %v3176_v35 = vld [vmem:[#allocation13 + $0x1098] sm:$0xff] }
 0x486   :  { %9418 = vmatprep.subr.bf16.mxu0 %v12273_v53  ;;  %v12369_v53 = vcombine.high %v3096_v47, %v3104_v50 }
 0x488   :  { %9255 = vmatpush1.bf16.msra.mxu1 %v12270_v58  ;;  %v12366_v58 = vcombine.low %v3095_v0, %v3103_v60  ;;  %v3199_v0 = vld [vmem:[#allocation13 + $0x1150] sm:$0xff] }
 0x489   :  { %9419 = vmatpush1.bf16.msra.mxu0 %v12272_v59  ;;  %9256 = vmatprep.subr.bf16.mxu1 %v12287_v62  ;;  %v12368_v59 = vcombine.low %v3096_v47, %v3104_v50  ;;  %v12383_v62 = vcombine.high %v3111_v54, %v3119_v55  ;;  %v3192_v47 = vld [vmem:[#allocation13 + $0x1118] sm:$0xff] }
 0x48a   :  { %9420 = vmatprep.subr.bf16.mxu0 %v12289_v63  ;;  %v12385_v63 = vcombine.high %v3112_v56, %v3120_v61  ;;  %v3200_v50 = vld [vmem:[#allocation13 + $0x1158] sm:$0xff] }
 0x48c   :  { %9257 = vmatpush1.bf16.msra.mxu1 %v12286_v5  ;;  %v12382_v5 = vcombine.low %v3111_v54, %v3119_v55  ;;  %v3207_v54 = vld [vmem:[#allocation13 + $0x1190] sm:$0xff] }
 0x48d   :  { %9421 = vmatpush1.bf16.msra.mxu0 %v12288_v37  ;;  %9258 = vmatprep.subr.bf16.mxu1 %v12303_v21  ;;  %v12384_v37 = vcombine.low %v3112_v56, %v3120_v61  ;;  %v12399_v21 = vcombine.high %v3127_v4, %v3135_v1  ;;  %v3215_v55 = vld [vmem:[#allocation13 + $0x11d0] sm:$0xff]  ;;  %v3208_v56 = vld [vmem:[#allocation13 + $0x1198] sm:$0xff] }
 0x48e   :  { %9422 = vmatprep.subr.bf16.mxu0 %v12305_v7  ;;  %v12401_v7 = vcombine.high %v3128_v2, %v3136_v3  ;;  %v3216_v61 = vld [vmem:[#allocation13 + $0x11d8] sm:$0xff] }
 0x490   :  { %9259 = vmatpush1.bf16.msra.mxu1 %v12302_v11  ;;  %v12398_v11 = vcombine.low %v3127_v4, %v3135_v1  ;;  %v3223_v4 = vld [vmem:[#allocation13 + $0x1210] sm:$0xff] }
 0x491   :  { %9423 = vmatpush1.bf16.msra.mxu0 %v12304_v12  ;;  %9260 = vmatprep.subr.bf16.mxu1 %v12319_v13  ;;  %v12400_v12 = vcombine.low %v3128_v2, %v3136_v3  ;;  %v12415_v13 = vcombine.high %v3143_v8, %v3151_v9  ;;  %v3231_v1 = vld [vmem:[#allocation13 + $0x1250] sm:$0xff]  ;;  %v3224_v2 = vld [vmem:[#allocation13 + $0x1218] sm:$0xff] }
 0x492   :  { %9424 = vmatprep.subr.bf16.mxu0 %v12321_v14  ;;  %v12417_v14 = vcombine.high %v3144_v6, %v3152_v10  ;;  %v3232_v3 = vld [vmem:[#allocation13 + $0x1258] sm:$0xff] }
 0x494   :  { %9261 = vmatpush1.bf16.msra.mxu1 %v12318_v24  ;;  %v12414_v24 = vcombine.low %v3143_v8, %v3151_v9  ;;  %v3239_v8 = vld [vmem:[#allocation13 + $0x1290] sm:$0xff] }
 0x495   :  { %9425 = vmatpush1.bf16.msra.mxu0 %v12320_v25  ;;  %9262 = vmatprep.subr.bf16.mxu1 %v12335_v26  ;;  %v12416_v25 = vcombine.low %v3144_v6, %v3152_v10  ;;  %v12431_v26 = vcombine.high %v3159_v43, %v3167_v19  ;;  %v3247_v9 = vld [vmem:[#allocation13 + $0x12d0] sm:$0xff]  ;;  %v3240_v6 = vld [vmem:[#allocation13 + $0x1298] sm:$0xff] }
 0x496   :  { %9426 = vmatprep.subr.bf16.mxu0 %v12337_v27  ;;  %v12433_v27 = vcombine.high %v3160_v22, %v3168_v23  ;;  %v3248_v10 = vld [vmem:[#allocation13 + $0x12d8] sm:$0xff]  ;;  %v3255_v43 = vld [vmem:[#allocation13 + $0x1310] sm:$0xff] }
 0x497   :  { %v3263_v19 = vld [vmem:[#allocation13 + $0x1350] sm:$0xff] }
 0x498   :  { %9263 = vmatpush1.bf16.msra.mxu1 %v12334_v36  ;;  %v3184_v36 = vld [vmem:[#allocation13 + $0x10d8] sm:$0xff] }
 0x499   :  { %9427 = vmatpush1.bf16.msra.mxu0 %v12336_v39  ;;  %9264 = vmatprep.subr.bf16.mxu1 %v12351_v40  ;;  %v12432_v39 = vcombine.low %v3160_v22, %v3168_v23  ;;  %v12447_v40 = vcombine.high %v3175_v30, %v3183_v31  ;;  %v12449_v60 = vcombine.high %v3176_v35, %v3184_v36  ;;  %v3256_v22 = vld [vmem:[#allocation13 + $0x1318] sm:$0xff] }
 0x49a   :  { %9428 = vmatprep.subr.bf16.mxu0 %v12353_v44  ;;  %v3191_v44 = vld [vmem:[#allocation13 + $0x1110] sm:$0xff]  ;;  %v3264_v23 = vld [vmem:[#allocation13 + $0x1358] sm:$0xff] }
 0x49c   :  { %9265 = vmatpush1.bf16.msra.mxu1 %v12350_v51  ;;  %v12446_v51 = vcombine.low %v3175_v30, %v3183_v31  ;;  %v3271_v30 = vld [vmem:[#allocation13 + $0x1390] sm:$0xff] }
 0x49d   :  { %9429 = vmatpush1.bf16.msra.mxu0 %v12352_v15  ;;  %9266 = vmatprep.subr.bf16.mxu1 %v12367_v52  ;;  %v12448_v15 = vcombine.low %v3176_v35, %v3184_v36  ;;  %v12463_v52 = vcombine.high %v3191_v44, %v3199_v0  ;;  %v3279_v31 = vld [vmem:[#allocation13 + $0x13d0] sm:$0xff]  ;;  %v3280_v35 = vld [vmem:[#allocation13 + $0x13d8] sm:$0xff]  ;;  %v12526_v36 = vcombine.low %v3255_v43, %v3263_v19 }
 0x49e   :  { %9430 = vmatprep.subr.bf16.mxu0 %v12369_v53  ;;  %v12465_v53 = vcombine.high %v3192_v47, %v3200_v50 }
 0x4a0   :  { %9267 = vmatpush1.bf16.msra.mxu1 %v12366_v58  ;;  %v12462_v58 = vcombine.low %v3191_v44, %v3199_v0  ;;  %v3287_v0 = vld [vmem:[#allocation13 + $0x1410] sm:$0xff] }
 0x4a1   :  { %9431 = vmatpush1.bf16.msra.mxu0 %v12368_v59  ;;  %9268 = vmatprep.subr.bf16.mxu1 %v12383_v62  ;;  %v12464_v59 = vcombine.low %v3192_v47, %v3200_v50  ;;  %v12479_v62 = vcombine.high %v3207_v54, %v3215_v55  ;;  %v3288_v47 = vld [vmem:[#allocation13 + $0x1418] sm:$0xff] }
 0x4a2   :  { %9432 = vmatprep.subr.bf16.mxu0 %v12385_v63  ;;  %v12481_v63 = vcombine.high %v3208_v56, %v3216_v61  ;;  %v3296_v50 = vld [vmem:[#allocation13 + $0x1458] sm:$0xff] }
 0x4a4   :  { %9269 = vmatpush1.bf16.msra.mxu1 %v12382_v5  ;;  %v12478_v5 = vcombine.low %v3207_v54, %v3215_v55  ;;  %v3303_v54 = vld [vmem:[#allocation13 + $0x1490] sm:$0xff] }
 0x4a5   :  { %9433 = vmatpush1.bf16.msra.mxu0 %v12384_v37  ;;  %9270 = vmatprep.subr.bf16.mxu1 %v12399_v21  ;;  %v12480_v37 = vcombine.low %v3208_v56, %v3216_v61  ;;  %v12495_v21 = vcombine.high %v3223_v4, %v3231_v1  ;;  %v3311_v55 = vld [vmem:[#allocation13 + $0x14d0] sm:$0xff]  ;;  %v3304_v56 = vld [vmem:[#allocation13 + $0x1498] sm:$0xff] }
 0x4a6   :  { %9434 = vmatprep.subr.bf16.mxu0 %v12401_v7  ;;  %v12497_v7 = vcombine.high %v3224_v2, %v3232_v3  ;;  %v3312_v61 = vld [vmem:[#allocation13 + $0x14d8] sm:$0xff] }
 0x4a8   :  { %9271 = vmatpush1.bf16.msra.mxu1 %v12398_v11  ;;  %v12494_v11 = vcombine.low %v3223_v4, %v3231_v1  ;;  %v3319_v4 = vld [vmem:[#allocation13 + $0x1510] sm:$0xff] }
 0x4a9   :  { %9435 = vmatpush1.bf16.msra.mxu0 %v12400_v12  ;;  %9272 = vmatprep.subr.bf16.mxu1 %v12415_v13  ;;  %v12496_v12 = vcombine.low %v3224_v2, %v3232_v3  ;;  %v12511_v13 = vcombine.high %v3239_v8, %v3247_v9  ;;  %v3327_v1 = vld [vmem:[#allocation13 + $0x1550] sm:$0xff]  ;;  %v3320_v2 = vld [vmem:[#allocation13 + $0x1518] sm:$0xff] }
 0x4aa   :  { %9436 = vmatprep.subr.bf16.mxu0 %v12417_v14  ;;  %v12513_v14 = vcombine.high %v3240_v6, %v3248_v10  ;;  %v3328_v3 = vld [vmem:[#allocation13 + $0x1558] sm:$0xff] }
 0x4ac   :  { %9273 = vmatpush1.bf16.msra.mxu1 %v12414_v24  ;;  %v12510_v24 = vcombine.low %v3239_v8, %v3247_v9  ;;  %v3335_v8 = vld [vmem:[#allocation13 + $0x1590] sm:$0xff] }
 0x4ad   :  { %9437 = vmatpush1.bf16.msra.mxu0 %v12416_v25  ;;  %9283 = vmatprep.subr.bf16.mxu1 %v12431_v26  ;;  %v12512_v25 = vcombine.low %v3240_v6, %v3248_v10  ;;  %v12527_v26 = vcombine.high %v3255_v43, %v3263_v19  ;;  %v3343_v9 = vld [vmem:[#allocation13 + $0x15d0] sm:$0xff]  ;;  %v3336_v6 = vld [vmem:[#allocation13 + $0x1598] sm:$0xff] }
 0x4ae   :  { %9447 = vmatprep.subr.bf16.mxu0 %v12433_v27  ;;  %v12529_v27 = vcombine.high %v3256_v22, %v3264_v23  ;;  %v3344_v10 = vld [vmem:[#allocation13 + $0x15d8] sm:$0xff]  ;;  %v3351_v43 = vld [vmem:[#allocation13 + $0x1610] sm:$0xff] }
 0x4af   :  { %9275 = vmatmul.mubr.bf16.vlgmr.msra.gmra.mrb[16].mxu1 %v14100_v48  ;;  %v3359_v19 = vld [vmem:[#allocation13 + $0x1650] sm:$0xff] }
 0x4b0   :  { %9439 = vmatmul.mubr.bf16.vlgmr.msra.gmra.mrb[20].mxu0 %v14100_v48  ;;  %9284 = vmatpush1.bf16.msra.mxu1 %v12430_v34  ;;  %v3272_v34 = vld [vmem:[#allocation13 + $0x1398] sm:$0xff] }
 0x4b1   :  { %9315 = vmatprep.mubr.bf16.mxu1 %v14121_v29  ;;  %9448 = vmatpush1.bf16.msra.mxu0 %v12432_v39  ;;  %v12528_v39 = vcombine.low %v3256_v22, %v3264_v23  ;;  %v12545_v44 = vcombine.high %v3272_v34, %v3280_v35  ;;  %v3352_v22 = vld [vmem:[#allocation13 + $0x1618] sm:$0xff] }
 0x4b2   :  { %9479 = vmatprep.mubr.bf16.mxu0 %v14121_v29  ;;  %9285 = vmatprep.subr.bf16.mxu1 %v12447_v40  ;;  %v12543_v40 = vcombine.high %v3271_v30, %v3279_v31  ;;  %v3360_v23 = vld [vmem:[#allocation13 + $0x1658] sm:$0xff] }
 0x4b3   :  { %9449 = vmatprep.subr.bf16.mxu0 %v12449_v60  ;;  %v3295_v60 = vld [vmem:[#allocation13 + $0x1450] sm:$0xff] }
 0x4b4   :  { %9286 = vmatpush1.bf16.msra.mxu1 %v12446_v51  ;;  %v12542_v51 = vcombine.low %v3271_v30, %v3279_v31  ;;  %v3367_v30 = vld [vmem:[#allocation13 + $0x1690] sm:$0xff] }
 0x4b5   :  { %9450 = vmatpush1.bf16.msra.mxu0 %v12448_v15  ;;  %9287 = vmatprep.subr.bf16.mxu1 %v12463_v52  ;;  %v12544_v15 = vcombine.low %v3272_v34, %v3280_v35  ;;  %v12559_v52 = vcombine.high %v3287_v0, %v3295_v60  ;;  %v3375_v31 = vld [vmem:[#allocation13 + $0x16d0] sm:$0xff]  ;;  %v3368_v34 = vld [vmem:[#allocation13 + $0x1698] sm:$0xff] }
 0x4b6   :  { %9451 = vmatprep.subr.bf16.mxu0 %v12465_v53  ;;  %v12561_v53 = vcombine.high %v3288_v47, %v3296_v50  ;;  %v3376_v35 = vld [vmem:[#allocation13 + $0x16d8] sm:$0xff] }
 0x4b8   :  { %9288 = vmatpush1.bf16.msra.mxu1 %v12462_v58  ;;  %v12558_v58 = vcombine.low %v3287_v0, %v3295_v60  ;;  %v3383_v0 = vld [vmem:[#allocation13 + $0x1710] sm:$0xff] }
 0x4b9   :  { %9452 = vmatpush1.bf16.msra.mxu0 %v12464_v59  ;;  %9289 = vmatprep.subr.bf16.mxu1 %v12479_v62  ;;  %v12560_v59 = vcombine.low %v3288_v47, %v3296_v50  ;;  %v12575_v62 = vcombine.high %v3303_v54, %v3311_v55  ;;  %v3391_v60 = vld [vmem:[#allocation13 + $0x1750] sm:$0xff]  ;;  %v3384_v47 = vld [vmem:[#allocation13 + $0x1718] sm:$0xff] }
 0x4ba   :  { %9453 = vmatprep.subr.bf16.mxu0 %v12481_v63  ;;  %v12577_v63 = vcombine.high %v3304_v56, %v3312_v61  ;;  %v3392_v50 = vld [vmem:[#allocation13 + $0x1758] sm:$0xff] }
 0x4bc   :  { %9290 = vmatpush1.bf16.msra.mxu1 %v12478_v5  ;;  %v12574_v5 = vcombine.low %v3303_v54, %v3311_v55  ;;  %v3399_v54 = vld [vmem:[#allocation13 + $0x1790] sm:$0xff] }
 0x4bd   :  { %9454 = vmatpush1.bf16.msra.mxu0 %v12480_v37  ;;  %9291 = vmatprep.subr.bf16.mxu1 %v12495_v21  ;;  %v12576_v37 = vcombine.low %v3304_v56, %v3312_v61  ;;  %v12591_v21 = vcombine.high %v3319_v4, %v3327_v1  ;;  %v3407_v55 = vld [vmem:[#allocation13 + $0x17d0] sm:$0xff]  ;;  %v3400_v56 = vld [vmem:[#allocation13 + $0x1798] sm:$0xff] }
 0x4be   :  { %9455 = vmatprep.subr.bf16.mxu0 %v12497_v7  ;;  %v12593_v7 = vcombine.high %v3320_v2, %v3328_v3  ;;  %v3408_v61 = vld [vmem:[#allocation13 + $0x17d8] sm:$0xff] }
 0x4c0   :  { %9292 = vmatpush1.bf16.msra.mxu1 %v12494_v11  ;;  %v12590_v11 = vcombine.low %v3319_v4, %v3327_v1  ;;  %v3415_v4 = vld [vmem:[#allocation13 + $0x1810] sm:$0xff] }
 0x4c1   :  { %9456 = vmatpush1.bf16.msra.mxu0 %v12496_v12  ;;  %9293 = vmatprep.subr.bf16.mxu1 %v12511_v13  ;;  %v12592_v12 = vcombine.low %v3320_v2, %v3328_v3  ;;  %v12607_v13 = vcombine.high %v3335_v8, %v3343_v9  ;;  %v3423_v1 = vld [vmem:[#allocation13 + $0x1850] sm:$0xff]  ;;  %v3416_v2 = vld [vmem:[#allocation13 + $0x1818] sm:$0xff] }
 0x4c2   :  { %9457 = vmatprep.subr.bf16.mxu0 %v12513_v14  ;;  %v12609_v14 = vcombine.high %v3336_v6, %v3344_v10  ;;  %v3424_v3 = vld [vmem:[#allocation13 + $0x1858] sm:$0xff] }
 0x4c4   :  { %9294 = vmatpush1.bf16.msra.mxu1 %v12510_v24  ;;  %v12606_v24 = vcombine.low %v3335_v8, %v3343_v9  ;;  %v3431_v8 = vld [vmem:[#allocation13 + $0x1890] sm:$0xff] }
 0x4c5   :  { %9458 = vmatpush1.bf16.msra.mxu0 %v12512_v25  ;;  %9295 = vmatprep.subr.bf16.mxu1 %v12527_v26  ;;  %v12608_v25 = vcombine.low %v3336_v6, %v3344_v10  ;;  %v12623_v26 = vcombine.high %v3351_v43, %v3359_v19  ;;  %v3439_v9 = vld [vmem:[#allocation13 + $0x18d0] sm:$0xff]  ;;  %v12686_v6 = vcombine.low %v3415_v4, %v3423_v1  ;;  %v3432_v10 = vld [vmem:[#allocation13 + $0x1898] sm:$0xff] }
 0x4c6   :  { %9459 = vmatprep.subr.bf16.mxu0 %v12529_v27  ;;  %v12625_v27 = vcombine.high %v3352_v22, %v3360_v23 }
 0x4c8   :  { %9296 = vmatpush1.bf16.msra.mxu1 %v12526_v36  ;;  %v12622_v36 = vcombine.low %v3351_v43, %v3359_v19  ;;  %v3455_v43 = vld [vmem:[#allocation13 + $0x1950] sm:$0xff] }
 0x4c9   :  { %9460 = vmatpush1.bf16.msra.mxu0 %v12528_v39  ;;  %9297 = vmatprep.subr.bf16.mxu1 %v12543_v40  ;;  %v12624_v39 = vcombine.low %v3352_v22, %v3360_v23  ;;  %v12639_v40 = vcombine.high %v3367_v30, %v3375_v31  ;;  %v3448_v22 = vld [vmem:[#allocation13 + $0x1918] sm:$0xff] }
 0x4ca   :  { %9461 = vmatprep.subr.bf16.mxu0 %v12545_v44  ;;  %v12641_v44 = vcombine.high %v3368_v34, %v3376_v35  ;;  %v3456_v23 = vld [vmem:[#allocation13 + $0x1958] sm:$0xff] }
 0x4cc   :  { %9298 = vmatpush1.bf16.msra.mxu1 %v12542_v51  ;;  %v12638_v51 = vcombine.low %v3367_v30, %v3375_v31  ;;  %v3463_v30 = vld [vmem:[#allocation13 + $0x1990] sm:$0xff] }
 0x4cd   :  { %9462 = vmatpush1.bf16.msra.mxu0 %v12544_v15  ;;  %9299 = vmatprep.subr.bf16.mxu1 %v12559_v52  ;;  %v12640_v15 = vcombine.low %v3368_v34, %v3376_v35  ;;  %v12655_v52 = vcombine.high %v3383_v0, %v3391_v60  ;;  %v3471_v31 = vld [vmem:[#allocation13 + $0x19d0] sm:$0xff]  ;;  %v3464_v34 = vld [vmem:[#allocation13 + $0x1998] sm:$0xff] }
 0x4ce   :  { %9463 = vmatprep.subr.bf16.mxu0 %v12561_v53  ;;  %v12657_v53 = vcombine.high %v3384_v47, %v3392_v50  ;;  %v3472_v35 = vld [vmem:[#allocation13 + $0x19d8] sm:$0xff] }
 0x4d0   :  { %9300 = vmatpush1.bf16.msra.mxu1 %v12558_v58  ;;  %v12654_v58 = vcombine.low %v3383_v0, %v3391_v60  ;;  %v3479_v0 = vld [vmem:[#allocation13 + $0x1a10] sm:$0xff] }
 0x4d1   :  { %9464 = vmatpush1.bf16.msra.mxu0 %v12560_v59  ;;  %9301 = vmatprep.subr.bf16.mxu1 %v12575_v62  ;;  %v12656_v59 = vcombine.low %v3384_v47, %v3392_v50  ;;  %v12671_v62 = vcombine.high %v3399_v54, %v3407_v55  ;;  %v3487_v60 = vld [vmem:[#allocation13 + $0x1a50] sm:$0xff]  ;;  %v3480_v47 = vld [vmem:[#allocation13 + $0x1a18] sm:$0xff] }
 0x4d2   :  { %9465 = vmatprep.subr.bf16.mxu0 %v12577_v63  ;;  %v12673_v63 = vcombine.high %v3400_v56, %v3408_v61  ;;  %v3488_v50 = vld [vmem:[#allocation13 + $0x1a58] sm:$0xff] }
 0x4d4   :  { %9302 = vmatpush1.bf16.msra.mxu1 %v12574_v5  ;;  %v12670_v5 = vcombine.low %v3399_v54, %v3407_v55  ;;  %v3495_v54 = vld [vmem:[#allocation13 + $0x1a90] sm:$0xff] }
 0x4d5   :  { %9466 = vmatpush1.bf16.msra.mxu0 %v12576_v37  ;;  %9303 = vmatprep.subr.bf16.mxu1 %v12591_v21  ;;  %v12672_v37 = vcombine.low %v3400_v56, %v3408_v61  ;;  %v12687_v21 = vcombine.high %v3415_v4, %v3423_v1  ;;  %v3503_v55 = vld [vmem:[#allocation13 + $0x1ad0] sm:$0xff]  ;;  %v3496_v56 = vld [vmem:[#allocation13 + $0x1a98] sm:$0xff] }
 0x4d6   :  { %9467 = vmatprep.subr.bf16.mxu0 %v12593_v7  ;;  %v12689_v7 = vcombine.high %v3416_v2, %v3424_v3  ;;  %v3504_v61 = vld [vmem:[#allocation13 + $0x1ad8] sm:$0xff]  ;;  %v3511_v4 = vld [vmem:[#allocation13 + $0x1b10] sm:$0xff] }
 0x4d7   :  { %v3519_v1 = vld [vmem:[#allocation13 + $0x1b50] sm:$0xff] }
 0x4d8   :  { %9304 = vmatpush1.bf16.msra.mxu1 %v12590_v11  ;;  %v3440_v11 = vld [vmem:[#allocation13 + $0x18d8] sm:$0xff] }
 0x4d9   :  { %9468 = vmatpush1.bf16.msra.mxu0 %v12592_v12  ;;  %9305 = vmatprep.subr.bf16.mxu1 %v12607_v13  ;;  %v12688_v12 = vcombine.low %v3416_v2, %v3424_v3  ;;  %v12703_v13 = vcombine.high %v3431_v8, %v3439_v9  ;;  %v12705_v19 = vcombine.high %v3432_v10, %v3440_v11  ;;  %v3512_v2 = vld [vmem:[#allocation13 + $0x1b18] sm:$0xff] }
 0x4da   :  { %9469 = vmatprep.subr.bf16.mxu0 %v12609_v14  ;;  %v3447_v14 = vld [vmem:[#allocation13 + $0x1910] sm:$0xff]  ;;  %v3520_v3 = vld [vmem:[#allocation13 + $0x1b58] sm:$0xff] }
 0x4dc   :  { %9306 = vmatpush1.bf16.msra.mxu1 %v12606_v24  ;;  %v12702_v24 = vcombine.low %v3431_v8, %v3439_v9  ;;  %v12785_v9 = vcombine.high %v3512_v2, %v3520_v3 }
 0x4dd   :  { %9470 = vmatpush1.bf16.msra.mxu0 %v12608_v25  ;;  %9307 = vmatprep.subr.bf16.mxu1 %v12623_v26  ;;  %v12704_v25 = vcombine.low %v3432_v10, %v3440_v11  ;;  %v12719_v26 = vcombine.high %v3447_v14, %v3455_v43  ;;  %v3535_v10 = vld [vmem:[#allocation13 + $0x1bd0] sm:$0xff] }
 0x4de   :  { %9471 = vmatprep.subr.bf16.mxu0 %v12625_v27  ;;  %v12721_v27 = vcombine.high %v3448_v22, %v3456_v23 }
 0x4e0   :  { %9308 = vmatpush1.bf16.msra.mxu1 %v12622_v36  ;;  %v12718_v36 = vcombine.low %v3447_v14, %v3455_v43  ;;  %v3536_v14 = vld [vmem:[#allocation13 + $0x1bd8] sm:$0xff] }
 0x4e1   :  { %9472 = vmatpush1.bf16.msra.mxu0 %v12624_v39  ;;  %9309 = vmatprep.subr.bf16.mxu1 %v12639_v40  ;;  %v12720_v39 = vcombine.low %v3448_v22, %v3456_v23  ;;  %v12735_v40 = vcombine.high %v3463_v30, %v3471_v31  ;;  %v12782_v22 = vcombine.low %v3511_v4, %v3519_v1 }
 0x4e2   :  { %9473 = vmatprep.subr.bf16.mxu0 %v12641_v44  ;;  %v12737_v44 = vcombine.high %v3464_v34, %v3472_v35 }
 0x4e4   :  { %9310 = vmatpush1.bf16.msra.mxu1 %v12638_v51  ;;  %v12734_v51 = vcombine.low %v3463_v30, %v3471_v31  ;;  %v3543_v30 = vld [vmem:[#allocation13 + $0x1c10] sm:$0xff] }
 0x4e5   :  { %9474 = vmatpush1.bf16.msra.mxu0 %v12640_v15  ;;  %9311 = vmatprep.subr.bf16.mxu1 %v12655_v52  ;;  %v12736_v15 = vcombine.low %v3464_v34, %v3472_v35  ;;  %v12751_v52 = vcombine.high %v3479_v0, %v3487_v60  ;;  %v3551_v31 = vld [vmem:[#allocation13 + $0x1c50] sm:$0xff]  ;;  %v3544_v34 = vld [vmem:[#allocation13 + $0x1c18] sm:$0xff] }
 0x4e6   :  { %9475 = vmatprep.subr.bf16.mxu0 %v12657_v53  ;;  %v12753_v53 = vcombine.high %v3480_v47, %v3488_v50  ;;  %v3552_v35 = vld [vmem:[#allocation13 + $0x1c58] sm:$0xff] }
 0x4e8   :  { %9312 = vmatpush1.bf16.msra.mxu1 %v12654_v58  ;;  %v12750_v58 = vcombine.low %v3479_v0, %v3487_v60  ;;  %v3559_v0 = vld [vmem:[#allocation13 + $0x1c90] sm:$0xff] }
 0x4e9   :  { %9476 = vmatpush1.bf16.msra.mxu0 %v12656_v59  ;;  %9313 = vmatprep.subr.bf16.mxu1 %v12671_v62  ;;  %v12752_v59 = vcombine.low %v3480_v47, %v3488_v50  ;;  %v12767_v62 = vcombine.high %v3495_v54, %v3503_v55  ;;  %v3567_v60 = vld [vmem:[#allocation13 + $0x1cd0] sm:$0xff]  ;;  %v3560_v47 = vld [vmem:[#allocation13 + $0x1c98] sm:$0xff] }
 0x4ea   :  { %9477 = vmatprep.subr.bf16.mxu0 %v12673_v63  ;;  %v12769_v63 = vcombine.high %v3496_v56, %v3504_v61  ;;  %v3568_v50 = vld [vmem:[#allocation13 + $0x1cd8] sm:$0xff] }
 0x4ec   :  { %9314 = vmatpush1.bf16.msra.mxu1 %v12670_v5  ;;  %v12766_v5 = vcombine.low %v3495_v54, %v3503_v55  ;;  %v3575_v54 = vld [vmem:[#allocation13 + $0x1d10] sm:$0xff] }
 0x4ed   :  { %9478 = vmatpush1.bf16.msra.mxu0 %v12672_v37  ;;  %9324 = vmatprep.subr.bf16.mxu1 %v12687_v21  ;;  %v12768_v37 = vcombine.low %v3496_v56, %v3504_v61  ;;  %v12783_v21 = vcombine.high %v3511_v4, %v3519_v1  ;;  %v3583_v55 = vld [vmem:[#allocation13 + $0x1d50] sm:$0xff]  ;;  %v3576_v56 = vld [vmem:[#allocation13 + $0x1d18] sm:$0xff] }
 0x4ee   :  { %9488 = vmatprep.subr.bf16.mxu0 %v12689_v7  ;;  %v3584_v61 = vld [vmem:[#allocation13 + $0x1d58] sm:$0xff]  ;;  %v3591_v4 = vld [vmem:[#allocation13 + $0x1d90] sm:$0xff] }
 0x4ef   :  { %9316 = vmatmul.mubr.bf16.vlgmr.msra.gmra.mrb[16].mxu1 %v14123_v32  ;;  %v3599_v1 = vld [vmem:[#allocation13 + $0x1dd0] sm:$0xff] }
 0x4f0   :  { %9480 = vmatmul.mubr.bf16.vlgmr.msra.gmra.mrb[20].mxu0 %v14123_v32  ;;  %9325 = vmatpush1.bf16.msra.mxu1 %v12686_v6  ;;  %v3527_v6 = vld [vmem:[#allocation13 + $0x1b90] sm:$0xff] }
 0x4f1   :  { %9356 = vmatprep.mubr.bf16.mxu1 %v14127_v41  ;;  %9489 = vmatpush1.bf16.msra.mxu0 %v12688_v12 }
 0x4f2   :  { %9520 = vmatprep.mubr.bf16.mxu0 %v14127_v41  ;;  %9326 = vmatprep.subr.bf16.mxu1 %v12703_v13  ;;  %v3528_v13 = vld [vmem:[#allocation13 + $0x1b98] sm:$0xff] }
 0x4f3   :  { %9490 = vmatprep.subr.bf16.mxu0 %v12705_v19 }
 0x4f4   :  { %9327 = vmatpush1.bf16.msra.mxu1 %v12702_v24 }
 0x4f5   :  { %9491 = vmatpush1.bf16.msra.mxu0 %v12704_v25  ;;  %9328 = vmatprep.subr.bf16.mxu1 %v12719_v26  ;;  %v12784_v25 = vcombine.low %v3512_v2, %v3520_v3  ;;  %v12799_v26 = vcombine.high %v3527_v6, %v3535_v10  ;;  %v3592_v2 = vld [vmem:[#allocation13 + $0x1d98] sm:$0xff] }
 0x4f6   :  { %9492 = vmatprep.subr.bf16.mxu0 %v12721_v27  ;;  %v12801_v27 = vcombine.high %v3528_v13, %v3536_v14  ;;  %v3600_v3 = vld [vmem:[#allocation13 + $0x1dd8] sm:$0xff] }
 0x4f8   :  { %9329 = vmatpush1.bf16.msra.mxu1 %v12718_v36  ;;  %v12798_v36 = vcombine.low %v3527_v6, %v3535_v10  ;;  %v3607_v6 = vld [vmem:[#allocation13 + $0x1e10] sm:$0xff] }
 0x4f9   :  { %9493 = vmatpush1.bf16.msra.mxu0 %v12720_v39  ;;  %9330 = vmatprep.subr.bf16.mxu1 %v12735_v40  ;;  %v12800_v39 = vcombine.low %v3528_v13, %v3536_v14  ;;  %v12815_v40 = vcombine.high %v3543_v30, %v3551_v31  ;;  %v3615_v10 = vld [vmem:[#allocation13 + $0x1e50] sm:$0xff]  ;;  %v3608_v13 = vld [vmem:[#allocation13 + $0x1e18] sm:$0xff] }
 0x4fa   :  { %9494 = vmatprep.subr.bf16.mxu0 %v12737_v44  ;;  %v12817_v44 = vcombine.high %v3544_v34, %v3552_v35  ;;  %v3616_v14 = vld [vmem:[#allocation13 + $0x1e58] sm:$0xff] }
 0x4fc   :  { %9331 = vmatpush1.bf16.msra.mxu1 %v12734_v51  ;;  %v12814_v51 = vcombine.low %v3543_v30, %v3551_v31  ;;  %v12878_v30 = vcombine.low %v3607_v6, %v3615_v10  ;;  %v12880_v31 = vcombine.low %v3608_v13, %v3616_v14 }
 0x4fd   :  { %9495 = vmatpush1.bf16.msra.mxu0 %v12736_v15  ;;  %9332 = vmatprep.subr.bf16.mxu1 %v12751_v52  ;;  %v12816_v15 = vcombine.low %v3544_v34, %v3552_v35  ;;  %v12831_v52 = vcombine.high %v3559_v0, %v3567_v60 }
 0x4fe   :  { %9496 = vmatprep.subr.bf16.mxu0 %v12753_v53  ;;  %v12833_v53 = vcombine.high %v3560_v47, %v3568_v50 }
 0x500   :  { %9333 = vmatpush1.bf16.msra.mxu1 %v12750_v58  ;;  %v12830_v58 = vcombine.low %v3559_v0, %v3567_v60 }
 0x501   :  { %9497 = vmatpush1.bf16.msra.mxu0 %v12752_v59  ;;  %9334 = vmatprep.subr.bf16.mxu1 %v12767_v62  ;;  %v12832_v59 = vcombine.low %v3560_v47, %v3568_v50  ;;  %v12847_v62 = vcombine.high %v3575_v54, %v3583_v55 }
 0x502   :  { %v14156_v7 = vpop.f32.mrb[12].mxu1  ;;  %v14158_v8 = vpop.f32.mrb[16].mxu0  ;;  %9498 = vmatprep.subr.bf16.mxu0 %v12769_v63  ;;  %v12849_v63 = vcombine.high %v3576_v56, %v3584_v61 }
 0x503   :  { %v14160_v11 = vpop.f32.mrb[13].mxu1  ;;  %v14162_v12 = vpop.f32.mrb[17].mxu0 }
 0x504   :  { %v9034_v43 = vpop.f32.mrb[14].mxu1  ;;  %v9198_v19 = vpop.f32.mrb[18].mxu0  ;;  %9335 = vmatpush1.bf16.msra.mxu1 %v12766_v5  ;;  %v12846_v5 = vcombine.low %v3575_v54, %v3583_v55 }
 0x505   :  { %9499 = vmatpush1.bf16.msra.mxu0 %v12768_v37  ;;  %v9035_v23 = vpop.f32.mrb[15].mxu1  ;;  %v9199_v24 = vpop.f32.mrb[19].mxu0  ;;  %9336 = vmatprep.subr.bf16.mxu1 %v12783_v21  ;;  %v12848_v37 = vcombine.low %v3576_v56, %v3584_v61  ;;  %v12863_v21 = vcombine.high %v3591_v4, %v3599_v1  ;;  %v12862_v43 = vcombine.low %v3591_v4, %v3599_v1 }
 0x506   :  { %9500 = vmatprep.subr.bf16.mxu0 %v12785_v9  ;;  %v12865_v9 = vcombine.high %v3592_v2, %v3600_v3  ;;  %v12864_v19 = vcombine.low %v3592_v2, %v3600_v3  ;;  %v12881_v23 = vcombine.high %v3608_v13, %v3616_v14  ;;  %v3623_v24 = vld [vmem:[#allocation13 + $0x1e90] sm:$0xff]  ;;  %v2681_v14 = vld [vmem:[#allocation13 + $0x120] sm:$0xff] }
 0x508   :  { %9337 = vmatpush1.bf16.msra.mxu1 %v12782_v22  ;;  %v12879_v22 = vcombine.high %v3607_v6, %v3615_v10  ;;  %v2674_v6 = vld [vmem:[#allocation13 + $0xe8] sm:$0xff] }
 0x509   :  { %9501 = vmatpush1.bf16.msra.mxu0 %v12784_v25  ;;  %9338 = vmatprep.subr.bf16.mxu1 %v12799_v26  ;;  %v3631_v25 = vld [vmem:[#allocation13 + $0x1ed0] sm:$0xff]  ;;  %v3624_v26 = vld [vmem:[#allocation13 + $0x1e98] sm:$0xff] }
 0x50a   :  { %9502 = vmatprep.subr.bf16.mxu0 %v12801_v27  ;;  %v3632_v27 = vld [vmem:[#allocation13 + $0x1ed8] sm:$0xff]  ;;  %v12895_v34 = vcombine.high %v3623_v24, %v3631_v25  ;;  %v12894_v0 = vcombine.low %v3623_v24, %v3631_v25 }
 0x50b   :  { %v12897_v35 = vcombine.high %v3624_v26, %v3632_v27  ;;  %v12896_v60 = vcombine.low %v3624_v26, %v3632_v27 }
 0x50c   :  { %9339 = vmatpush1.bf16.msra.mxu1 %v12798_v36  ;;  %v3639_v36 = vld [vmem:[#allocation13 + $0x1f10] sm:$0xff] }
 0x50d   :  { %9503 = vmatpush1.bf16.msra.mxu0 %v12800_v39  ;;  %9340 = vmatprep.subr.bf16.mxu1 %v12815_v40  ;;  %v3647_v39 = vld [vmem:[#allocation13 + $0x1f50] sm:$0xff]  ;;  %v3640_v40 = vld [vmem:[#allocation13 + $0x1f18] sm:$0xff] }
 0x50e   :  { %9504 = vmatprep.subr.bf16.mxu0 %v12817_v44  ;;  %v3648_v44 = vld [vmem:[#allocation13 + $0x1f58] sm:$0xff]  ;;  %v12911_v47 = vcombine.high %v3639_v36, %v3647_v39  ;;  %v12910_v54 = vcombine.low %v3639_v36, %v3647_v39 }
 0x50f   :  { %v12913_v50 = vcombine.high %v3640_v40, %v3648_v44  ;;  %v12912_v55 = vcombine.low %v3640_v40, %v3648_v44 }
 0x510   :  { %9341 = vmatpush1.bf16.msra.mxu1 %v12814_v51  ;;  %v3655_v51 = vld [vmem:[#allocation13 + $0x1f90] sm:$0xff] }
 0x511   :  { %9505 = vmatpush1.bf16.msra.mxu0 %v12816_v15  ;;  %9342 = vmatprep.subr.bf16.mxu1 %v12831_v52  ;;  %v3663_v15 = vld [vmem:[#allocation13 + $0x1fd0] sm:$0xff]  ;;  %v3656_v52 = vld [vmem:[#allocation13 + $0x1f98] sm:$0xff] }
 0x512   :  { %9506 = vmatprep.subr.bf16.mxu0 %v12833_v53  ;;  %v3664_v53 = vld [vmem:[#allocation13 + $0x1fd8] sm:$0xff]  ;;  %v12927_v56 = vcombine.high %v3655_v51, %v3663_v15  ;;  %v12926_v4 = vcombine.low %v3655_v51, %v3663_v15 }
 0x513   :  { %v12929_v61 = vcombine.high %v3656_v52, %v3664_v53  ;;  %v12928_v1 = vcombine.low %v3656_v52, %v3664_v53 }
 0x514   :  { %9343 = vmatpush1.bf16.msra.mxu1 %v12830_v58  ;;  %v2649_v58 = vld [vmem:[#allocation13 + $0x20] sm:$0xff] }
 0x515   :  { %9507 = vmatpush1.bf16.msra.mxu0 %v12832_v59  ;;  %9344 = vmatprep.subr.bf16.mxu1 %v12847_v62  ;;  %v2657_v59 = vld [vmem:[#allocation13 + $0x60] sm:$0xff]  ;;  %v2650_v62 = vld [vmem:[#allocation13 + $0x28] sm:$0xff] }
 0x516   :  { %9508 = vmatprep.subr.bf16.mxu0 %v12849_v63  ;;  %v2658_v63 = vld [vmem:[#allocation13 + $0x68] sm:$0xff]  ;;  %v11923_v2 = vcombine.high %v2649_v58, %v2657_v59 }
 0x517   :  { %v11925_v3 = vcombine.high %v2650_v62, %v2658_v63  ;;  %v11924_v10 = vcombine.low %v2650_v62, %v2658_v63 }
 0x518   :  { %9345 = vmatpush1.bf16.msra.mxu1 %v12846_v5  ;;  %v2665_v5 = vld [vmem:[#allocation13 + $0xa0] sm:$0xff] }
 0x519   :  { %9509 = vmatpush1.bf16.msra.mxu0 %v12848_v37  ;;  %9346 = vmatprep.subr.bf16.mxu1 %v12863_v21  ;;  %v2673_v37 = vld [vmem:[#allocation13 + $0xe0] sm:$0xff]  ;;  %v11922_v21 = vcombine.low %v2649_v58, %v2657_v59 }
 0x51a   :  { %9510 = vmatprep.subr.bf16.mxu0 %v12865_v9  ;;  %v2666_v9 = vld [vmem:[#allocation13 + $0xa8] sm:$0xff]  ;;  %v11939_v13 = vcombine.high %v2665_v5, %v2673_v37  ;;  %v11938_v24 = vcombine.low %v2665_v5, %v2673_v37 }
 0x51b   :  { %v11940_v25 = vcombine.low %v2666_v9, %v2674_v6 }
 0x51c   :  { %9347 = vmatpush1.bf16.msra.mxu1 %v12862_v43  ;;  %v2689_v43 = vld [vmem:[#allocation13 + $0x160] sm:$0xff] }
 0x51d   :  { %9511 = vmatpush1.bf16.msra.mxu0 %v12864_v19  ;;  %9348 = vmatprep.subr.bf16.mxu1 %v12879_v22  ;;  %v11941_v19 = vcombine.high %v2666_v9, %v2674_v6  ;;  %v2682_v22 = vld [vmem:[#allocation13 + $0x128] sm:$0xff]  ;;  %v11955_v26 = vcombine.high %v2681_v14, %v2689_v43  ;;  %v11954_v36 = vcombine.low %v2681_v14, %v2689_v43  ;;  %v2761_v6 = vld [vmem:[#allocation13 + $0x3a0] sm:$0xff] }
 0x51e   :  { %9512 = vmatprep.subr.bf16.mxu0 %v12881_v23  ;;  %v2690_v23 = vld [vmem:[#allocation13 + $0x168] sm:$0xff] }
 0x51f   :  { %v11957_v27 = vcombine.high %v2682_v22, %v2690_v23  ;;  %v11956_v39 = vcombine.low %v2682_v22, %v2690_v23  ;;  %v2770_v14 = vld [vmem:[#allocation13 + $0x3e8] sm:$0xff] }
 0x520   :  { %9349 = vmatpush1.bf16.msra.mxu1 %v12878_v30  ;;  %v2697_v30 = vld [vmem:[#allocation13 + $0x1a0] sm:$0xff] }
 0x521   :  { %9513 = vmatpush1.bf16.msra.mxu0 %v12880_v31  ;;  %9350 = vmatprep.subr.bf16.mxu1 %v12895_v34  ;;  %v2705_v31 = vld [vmem:[#allocation13 + $0x1e0] sm:$0xff]  ;;  %v2698_v34 = vld [vmem:[#allocation13 + $0x1a8] sm:$0xff] }
 0x522   :  { %9514 = vmatprep.subr.bf16.mxu0 %v12897_v35  ;;  %v2706_v35 = vld [vmem:[#allocation13 + $0x1e8] sm:$0xff]  ;;  %v11971_v40 = vcombine.high %v2697_v30, %v2705_v31  ;;  %v11970_v51 = vcombine.low %v2697_v30, %v2705_v31 }
 0x523   :  { %v11973_v44 = vcombine.high %v2698_v34, %v2706_v35  ;;  %v11972_v15 = vcombine.low %v2698_v34, %v2706_v35 }
 0x524   :  { %9351 = vmatpush1.bf16.msra.mxu1 %v12894_v0  ;;  %v2713_v0 = vld [vmem:[#allocation13 + $0x220] sm:$0xff] }
 0x525   :  { %9515 = vmatpush1.bf16.msra.mxu0 %v12896_v60  ;;  %9352 = vmatprep.subr.bf16.mxu1 %v12911_v47  ;;  %v2721_v60 = vld [vmem:[#allocation13 + $0x260] sm:$0xff]  ;;  %v2714_v47 = vld [vmem:[#allocation13 + $0x228] sm:$0xff] }
 0x526   :  { %9516 = vmatprep.subr.bf16.mxu0 %v12913_v50  ;;  %v2722_v50 = vld [vmem:[#allocation13 + $0x268] sm:$0xff]  ;;  %v11987_v52 = vcombine.high %v2713_v0, %v2721_v60  ;;  %v11986_v58 = vcombine.low %v2713_v0, %v2721_v60 }
 0x527   :  { %v11989_v53 = vcombine.high %v2714_v47, %v2722_v50  ;;  %v11988_v59 = vcombine.low %v2714_v47, %v2722_v50 }
 0x528   :  { %9353 = vmatpush1.bf16.msra.mxu1 %v12910_v54  ;;  %v2729_v54 = vld [vmem:[#allocation13 + $0x2a0] sm:$0xff] }
 0x529   :  { %9517 = vmatpush1.bf16.msra.mxu0 %v12912_v55  ;;  %9354 = vmatprep.subr.bf16.mxu1 %v12927_v56  ;;  %v2737_v55 = vld [vmem:[#allocation13 + $0x2e0] sm:$0xff]  ;;  %v2730_v56 = vld [vmem:[#allocation13 + $0x2a8] sm:$0xff] }
 0x52a   :  { %9518 = vmatprep.subr.bf16.mxu0 %v12929_v61  ;;  %v2738_v61 = vld [vmem:[#allocation13 + $0x2e8] sm:$0xff]  ;;  %v12003_v62 = vcombine.high %v2729_v54, %v2737_v55  ;;  %v12002_v5 = vcombine.low %v2729_v54, %v2737_v55 }
 0x52b   :  { %v12005_v63 = vcombine.high %v2730_v56, %v2738_v61  ;;  %v12004_v37 = vcombine.low %v2730_v56, %v2738_v61 }
 0x52c   :  { %9355 = vmatpush1.bf16.msra.mxu1 %v12926_v4  ;;  %v2745_v4 = vld [vmem:[#allocation13 + $0x320] sm:$0xff] }
 0x52d   :  { %9519 = vmatpush1.bf16.msra.mxu0 %v12928_v1  ;;  %9529 = vmatprep.subr.bf16.mxu1 %v11923_v2  ;;  %v2753_v1 = vld [vmem:[#allocation13 + $0x360] sm:$0xff]  ;;  %v2746_v2 = vld [vmem:[#allocation13 + $0x328] sm:$0xff] }
 0x52e   :  { %9693 = vmatprep.subr.bf16.mxu0 %v11925_v3  ;;  %v2754_v3 = vld [vmem:[#allocation13 + $0x368] sm:$0xff]  ;;  %v12018_v43 = vcombine.low %v2745_v4, %v2753_v1 }
 0x52f   :  { %9357 = vmatmul.mubr.bf16.vlgmr.msra.gmra.mrb[16].mxu1 %v14138_v57  ;;  %v12021_v9 = vcombine.high %v2746_v2, %v2754_v3 }
 0x530   :  { %9521 = vmatmul.mubr.bf16.vlgmr.msra.gmra.mrb[20].mxu0 %v14138_v57  ;;  %9530 = vmatpush1.bf16.msra.mxu1 %v11922_v21  ;;  %v12019_v21 = vcombine.high %v2745_v4, %v2753_v1 }
 0x531   :  { %9561 = vmatprep.mubr.bf16.mxu1 %v14085_v17  ;;  %9694 = vmatpush1.bf16.msra.mxu0 %v11924_v10  ;;  %v2769_v10 = vld [vmem:[#allocation13 + $0x3e0] sm:$0xff] }
 0x532   :  { %9725 = vmatprep.mubr.bf16.mxu0 %v14085_v17  ;;  %9531 = vmatprep.subr.bf16.mxu1 %v11939_v13  ;;  %v2762_v13 = vld [vmem:[#allocation13 + $0x3a8] sm:$0xff]  ;;  %v12035_v22 = vcombine.high %v2761_v6, %v2769_v10  ;;  %v12034_v30 = vcombine.low %v2761_v6, %v2769_v10 }
 0x533   :  { %9695 = vmatprep.subr.bf16.mxu0 %v11941_v19  ;;  %v12020_v19 = vcombine.low %v2746_v2, %v2754_v3  ;;  %v12037_v23 = vcombine.high %v2762_v13, %v2770_v14  ;;  %v12036_v31 = vcombine.low %v2762_v13, %v2770_v14 }
 0x534   :  { %9532 = vmatpush1.bf16.msra.mxu1 %v11938_v24  ;;  %v2777_v24 = vld [vmem:[#allocation13 + $0x420] sm:$0xff] }
 0x535   :  { %9696 = vmatpush1.bf16.msra.mxu0 %v11940_v25  ;;  %9533 = vmatprep.subr.bf16.mxu1 %v11955_v26  ;;  %v2785_v25 = vld [vmem:[#allocation13 + $0x460] sm:$0xff]  ;;  %v2778_v26 = vld [vmem:[#allocation13 + $0x428] sm:$0xff] }
 0x536   :  { %9697 = vmatprep.subr.bf16.mxu0 %v11957_v27  ;;  %v2786_v27 = vld [vmem:[#allocation13 + $0x468] sm:$0xff]  ;;  %v12051_v34 = vcombine.high %v2777_v24, %v2785_v25  ;;  %v12050_v0 = vcombine.low %v2777_v24, %v2785_v25 }
 0x537   :  { %v12053_v35 = vcombine.high %v2778_v26, %v2786_v27  ;;  %v12052_v60 = vcombine.low %v2778_v26, %v2786_v27 }
 0x538   :  { %9534 = vmatpush1.bf16.msra.mxu1 %v11954_v36  ;;  %v2793_v36 = vld [vmem:[#allocation13 + $0x4a0] sm:$0xff] }
 0x539   :  { %9698 = vmatpush1.bf16.msra.mxu0 %v11956_v39  ;;  %9535 = vmatprep.subr.bf16.mxu1 %v11971_v40  ;;  %v2801_v39 = vld [vmem:[#allocation13 + $0x4e0] sm:$0xff]  ;;  %v2794_v40 = vld [vmem:[#allocation13 + $0x4a8] sm:$0xff] }
 0x53a   :  { %9699 = vmatprep.subr.bf16.mxu0 %v11973_v44  ;;  %v2802_v44 = vld [vmem:[#allocation13 + $0x4e8] sm:$0xff]  ;;  %v12067_v47 = vcombine.high %v2793_v36, %v2801_v39  ;;  %v12066_v54 = vcombine.low %v2793_v36, %v2801_v39 }
 0x53b   :  { %v12069_v50 = vcombine.high %v2794_v40, %v2802_v44  ;;  %v12068_v55 = vcombine.low %v2794_v40, %v2802_v44 }
 0x53c   :  { %9536 = vmatpush1.bf16.msra.mxu1 %v11970_v51  ;;  %v2809_v51 = vld [vmem:[#allocation13 + $0x520] sm:$0xff] }
 0x53d   :  { %9700 = vmatpush1.bf16.msra.mxu0 %v11972_v15  ;;  %9537 = vmatprep.subr.bf16.mxu1 %v11987_v52  ;;  %v2817_v15 = vld [vmem:[#allocation13 + $0x560] sm:$0xff]  ;;  %v2810_v52 = vld [vmem:[#allocation13 + $0x528] sm:$0xff] }
 0x53e   :  { %9701 = vmatprep.subr.bf16.mxu0 %v11989_v53  ;;  %v2818_v53 = vld [vmem:[#allocation13 + $0x568] sm:$0xff]  ;;  %v12083_v56 = vcombine.high %v2809_v51, %v2817_v15  ;;  %v12082_v4 = vcombine.low %v2809_v51, %v2817_v15 }
 0x53f   :  { %v12085_v61 = vcombine.high %v2810_v52, %v2818_v53  ;;  %v12084_v1 = vcombine.low %v2810_v52, %v2818_v53 }
 0x540   :  { %9538 = vmatpush1.bf16.msra.mxu1 %v11986_v58  ;;  %v2825_v58 = vld [vmem:[#allocation13 + $0x5a0] sm:$0xff] }
 0x541   :  { %9702 = vmatpush1.bf16.msra.mxu0 %v11988_v59  ;;  %9539 = vmatprep.subr.bf16.mxu1 %v12003_v62  ;;  %v2833_v59 = vld [vmem:[#allocation13 + $0x5e0] sm:$0xff]  ;;  %v2826_v62 = vld [vmem:[#allocation13 + $0x5a8] sm:$0xff] }
 0x542   :  { %9703 = vmatprep.subr.bf16.mxu0 %v12005_v63  ;;  %v2834_v63 = vld [vmem:[#allocation13 + $0x5e8] sm:$0xff]  ;;  %v12099_v2 = vcombine.high %v2825_v58, %v2833_v59  ;;  %v12098_v6 = vcombine.low %v2825_v58, %v2833_v59 }
 0x543   :  { %v12101_v3 = vcombine.high %v2826_v62, %v2834_v63  ;;  %v12100_v10 = vcombine.low %v2826_v62, %v2834_v63 }
 0x544   :  { %9540 = vmatpush1.bf16.msra.mxu1 %v12002_v5  ;;  %v2841_v5 = vld [vmem:[#allocation13 + $0x620] sm:$0xff] }
 0x545   :  { %9704 = vmatpush1.bf16.msra.mxu0 %v12004_v37  ;;  %9541 = vmatprep.subr.bf16.mxu1 %v12019_v21  ;;  %v2849_v37 = vld [vmem:[#allocation13 + $0x660] sm:$0xff]  ;;  %v2842_v21 = vld [vmem:[#allocation13 + $0x628] sm:$0xff] }
 0x546   :  { %9705 = vmatprep.subr.bf16.mxu0 %v12021_v9  ;;  %v2850_v9 = vld [vmem:[#allocation13 + $0x668] sm:$0xff]  ;;  %v12115_v13 = vcombine.high %v2841_v5, %v2849_v37  ;;  %v12114_v24 = vcombine.low %v2841_v5, %v2849_v37 }
 0x547   :  { %v12117_v14 = vcombine.high %v2842_v21, %v2850_v9  ;;  %v12116_v25 = vcombine.low %v2842_v21, %v2850_v9  ;;  %v2930_v5 = vld [vmem:[#allocation13 + $0x8e8] sm:$0xff]  ;;  %v2937_v9 = vld [vmem:[#allocation13 + $0x920] sm:$0xff] }
 0x548   :  { %9542 = vmatpush1.bf16.msra.mxu1 %v12018_v43  ;;  %v2857_v43 = vld [vmem:[#allocation13 + $0x6a0] sm:$0xff] }
 0x549   :  { %9706 = vmatpush1.bf16.msra.mxu0 %v12020_v19  ;;  %9543 = vmatprep.subr.bf16.mxu1 %v12035_v22  ;;  %v2865_v19 = vld [vmem:[#allocation13 + $0x6e0] sm:$0xff]  ;;  %v2858_v22 = vld [vmem:[#allocation13 + $0x6a8] sm:$0xff] }
 0x54a   :  { %9707 = vmatprep.subr.bf16.mxu0 %v12037_v23  ;;  %v2866_v23 = vld [vmem:[#allocation13 + $0x6e8] sm:$0xff]  ;;  %v12131_v26 = vcombine.high %v2857_v43, %v2865_v19  ;;  %v12130_v36 = vcombine.low %v2857_v43, %v2865_v19 }
 0x54b   :  { %v12133_v27 = vcombine.high %v2858_v22, %v2866_v23  ;;  %v12132_v39 = vcombine.low %v2858_v22, %v2866_v23 }
 0x54c   :  { %9544 = vmatpush1.bf16.msra.mxu1 %v12034_v30  ;;  %v2873_v30 = vld [vmem:[#allocation13 + $0x720] sm:$0xff] }
 0x54d   :  { %9708 = vmatpush1.bf16.msra.mxu0 %v12036_v31  ;;  %9545 = vmatprep.subr.bf16.mxu1 %v12051_v34  ;;  %v2881_v31 = vld [vmem:[#allocation13 + $0x760] sm:$0xff]  ;;  %v2874_v34 = vld [vmem:[#allocation13 + $0x728] sm:$0xff] }
 0x54e   :  { %9709 = vmatprep.subr.bf16.mxu0 %v12053_v35  ;;  %v2882_v35 = vld [vmem:[#allocation13 + $0x768] sm:$0xff]  ;;  %v12147_v40 = vcombine.high %v2873_v30, %v2881_v31  ;;  %v12146_v51 = vcombine.low %v2873_v30, %v2881_v31 }
 0x54f   :  { %v12149_v44 = vcombine.high %v2874_v34, %v2882_v35  ;;  %v12148_v15 = vcombine.low %v2874_v34, %v2882_v35 }
 0x550   :  { %9546 = vmatpush1.bf16.msra.mxu1 %v12050_v0  ;;  %v2889_v0 = vld [vmem:[#allocation13 + $0x7a0] sm:$0xff] }
 0x551   :  { %9710 = vmatpush1.bf16.msra.mxu0 %v12052_v60  ;;  %9547 = vmatprep.subr.bf16.mxu1 %v12067_v47  ;;  %v2897_v60 = vld [vmem:[#allocation13 + $0x7e0] sm:$0xff]  ;;  %v2890_v47 = vld [vmem:[#allocation13 + $0x7a8] sm:$0xff] }
 0x552   :  { %9711 = vmatprep.subr.bf16.mxu0 %v12069_v50  ;;  %v2898_v50 = vld [vmem:[#allocation13 + $0x7e8] sm:$0xff]  ;;  %v12163_v52 = vcombine.high %v2889_v0, %v2897_v60  ;;  %v12162_v58 = vcombine.low %v2889_v0, %v2897_v60 }
 0x553   :  { %v12165_v53 = vcombine.high %v2890_v47, %v2898_v50  ;;  %v12164_v59 = vcombine.low %v2890_v47, %v2898_v50 }
 0x554   :  { %9548 = vmatpush1.bf16.msra.mxu1 %v12066_v54  ;;  %v2905_v54 = vld [vmem:[#allocation13 + $0x820] sm:$0xff] }
 0x555   :  { %9712 = vmatpush1.bf16.msra.mxu0 %v12068_v55  ;;  %9549 = vmatprep.subr.bf16.mxu1 %v12083_v56  ;;  %v2913_v55 = vld [vmem:[#allocation13 + $0x860] sm:$0xff]  ;;  %v2906_v56 = vld [vmem:[#allocation13 + $0x828] sm:$0xff] }
 0x556   :  { %9713 = vmatprep.subr.bf16.mxu0 %v12085_v61  ;;  %v2914_v61 = vld [vmem:[#allocation13 + $0x868] sm:$0xff]  ;;  %v12179_v62 = vcombine.high %v2905_v54, %v2913_v55 }
 0x557   :  { %v12181_v63 = vcombine.high %v2906_v56, %v2914_v61  ;;  %v12180_v37 = vcombine.low %v2906_v56, %v2914_v61 }
 0x558   :  { %9550 = vmatpush1.bf16.msra.mxu1 %v12082_v4  ;;  %v2921_v4 = vld [vmem:[#allocation13 + $0x8a0] sm:$0xff] }
 0x559   :  { %9714 = vmatpush1.bf16.msra.mxu0 %v12084_v1  ;;  %9551 = vmatprep.subr.bf16.mxu1 %v12099_v2  ;;  %v2929_v1 = vld [vmem:[#allocation13 + $0x8e0] sm:$0xff]  ;;  %v12178_v2 = vcombine.low %v2905_v54, %v2913_v55 }
 0x55a   :  { %9715 = vmatprep.subr.bf16.mxu0 %v12101_v3  ;;  %v2922_v3 = vld [vmem:[#allocation13 + $0x8a8] sm:$0xff]  ;;  %v12195_v21 = vcombine.high %v2921_v4, %v2929_v1  ;;  %v12194_v43 = vcombine.low %v2921_v4, %v2929_v1 }
 0x55b   :  { %v12196_v19 = vcombine.low %v2922_v3, %v2930_v5 }
 0x55c   :  { %9552 = vmatpush1.bf16.msra.mxu1 %v12098_v6  ;;  %v2945_v6 = vld [vmem:[#allocation13 + $0x960] sm:$0xff] }
 0x55d   :  { %9716 = vmatpush1.bf16.msra.mxu0 %v12100_v10  ;;  %9553 = vmatprep.subr.bf16.mxu1 %v12115_v13  ;;  %v12197_v10 = vcombine.high %v2922_v3, %v2930_v5  ;;  %v2938_v13 = vld [vmem:[#allocation13 + $0x928] sm:$0xff]  ;;  %v12211_v22 = vcombine.high %v2937_v9, %v2945_v6  ;;  %v12210_v30 = vcombine.low %v2937_v9, %v2945_v6  ;;  %v3017_v5 = vld [vmem:[#allocation13 + $0xba0] sm:$0xff] }
 0x55e   :  { %9717 = vmatprep.subr.bf16.mxu0 %v12117_v14  ;;  %v2946_v14 = vld [vmem:[#allocation13 + $0x968] sm:$0xff] }
 0x55f   :  { %v12213_v23 = vcombine.high %v2938_v13, %v2946_v14  ;;  %v12212_v31 = vcombine.low %v2938_v13, %v2946_v14  ;;  %v3026_v9 = vld [vmem:[#allocation13 + $0xbe8] sm:$0xff] }
 0x560   :  { %9554 = vmatpush1.bf16.msra.mxu1 %v12114_v24  ;;  %v2953_v24 = vld [vmem:[#allocation13 + $0x9a0] sm:$0xff] }
 0x561   :  { %9718 = vmatpush1.bf16.msra.mxu0 %v12116_v25  ;;  %9555 = vmatprep.subr.bf16.mxu1 %v12131_v26  ;;  %v2961_v25 = vld [vmem:[#allocation13 + $0x9e0] sm:$0xff]  ;;  %v2954_v26 = vld [vmem:[#allocation13 + $0x9a8] sm:$0xff] }
 0x562   :  { %9719 = vmatprep.subr.bf16.mxu0 %v12133_v27  ;;  %v2962_v27 = vld [vmem:[#allocation13 + $0x9e8] sm:$0xff]  ;;  %v12227_v34 = vcombine.high %v2953_v24, %v2961_v25  ;;  %v12226_v0 = vcombine.low %v2953_v24, %v2961_v25 }
 0x563   :  { %v12229_v35 = vcombine.high %v2954_v26, %v2962_v27  ;;  %v12228_v60 = vcombine.low %v2954_v26, %v2962_v27 }
 0x564   :  { %9556 = vmatpush1.bf16.msra.mxu1 %v12130_v36  ;;  %v2969_v36 = vld [vmem:[#allocation13 + $0xa20] sm:$0xff] }
 0x565   :  { %9720 = vmatpush1.bf16.msra.mxu0 %v12132_v39  ;;  %9557 = vmatprep.subr.bf16.mxu1 %v12147_v40  ;;  %v2977_v39 = vld [vmem:[#allocation13 + $0xa60] sm:$0xff]  ;;  %v2970_v40 = vld [vmem:[#allocation13 + $0xa28] sm:$0xff] }
 0x566   :  { %9721 = vmatprep.subr.bf16.mxu0 %v12149_v44  ;;  %v2978_v44 = vld [vmem:[#allocation13 + $0xa68] sm:$0xff]  ;;  %v12243_v47 = vcombine.high %v2969_v36, %v2977_v39  ;;  %v12242_v54 = vcombine.low %v2969_v36, %v2977_v39 }
 0x567   :  { %v12245_v50 = vcombine.high %v2970_v40, %v2978_v44  ;;  %v12244_v55 = vcombine.low %v2970_v40, %v2978_v44 }
 0x568   :  { %9558 = vmatpush1.bf16.msra.mxu1 %v12146_v51  ;;  %v2985_v51 = vld [vmem:[#allocation13 + $0xaa0] sm:$0xff] }
 0x569   :  { %9722 = vmatpush1.bf16.msra.mxu0 %v12148_v15  ;;  %9559 = vmatprep.subr.bf16.mxu1 %v12163_v52  ;;  %v2993_v15 = vld [vmem:[#allocation13 + $0xae0] sm:$0xff]  ;;  %v2986_v52 = vld [vmem:[#allocation13 + $0xaa8] sm:$0xff] }
 0x56a   :  { %9723 = vmatprep.subr.bf16.mxu0 %v12165_v53  ;;  %v2994_v53 = vld [vmem:[#allocation13 + $0xae8] sm:$0xff]  ;;  %v12259_v56 = vcombine.high %v2985_v51, %v2993_v15  ;;  %v12258_v4 = vcombine.low %v2985_v51, %v2993_v15 }
 0x56b   :  { %v12261_v61 = vcombine.high %v2986_v52, %v2994_v53  ;;  %v12260_v1 = vcombine.low %v2986_v52, %v2994_v53 }
 0x56c   :  { %9560 = vmatpush1.bf16.msra.mxu1 %v12162_v58  ;;  %v3001_v58 = vld [vmem:[#allocation13 + $0xb20] sm:$0xff] }
 0x56d   :  { %9724 = vmatpush1.bf16.msra.mxu0 %v12164_v59  ;;  %9570 = vmatprep.subr.bf16.mxu1 %v12179_v62  ;;  %v3009_v59 = vld [vmem:[#allocation13 + $0xb60] sm:$0xff]  ;;  %v3002_v62 = vld [vmem:[#allocation13 + $0xb28] sm:$0xff] }
 0x56e   :  { %9734 = vmatprep.subr.bf16.mxu0 %v12181_v63  ;;  %v3010_v63 = vld [vmem:[#allocation13 + $0xb68] sm:$0xff]  ;;  %v12274_v6 = vcombine.low %v3001_v58, %v3009_v59 }
 0x56f   :  { %9562 = vmatmul.mubr.bf16.vlgmr.msra.gmra.mrb[20].mxu1 %v14087_v20  ;;  %v12277_v3 = vcombine.high %v3002_v62, %v3010_v63 }
 0x570   :  { %9726 = vmatmul.mubr.bf16.vlgmr.msra.gmra.mrb[24].mxu0 %v14087_v20  ;;  %9571 = vmatpush1.bf16.msra.mxu1 %v12178_v2  ;;  %v12275_v2 = vcombine.high %v3001_v58, %v3009_v59 }
 0x571   :  { %9602 = vmatprep.mubr.bf16.mxu1 %v14091_v28  ;;  %9735 = vmatpush1.bf16.msra.mxu0 %v12180_v37  ;;  %v3025_v37 = vld [vmem:[#allocation13 + $0xbe0] sm:$0xff] }
 0x572   :  { %9766 = vmatprep.mubr.bf16.mxu0 %v14091_v28  ;;  %9572 = vmatprep.subr.bf16.mxu1 %v12195_v21  ;;  %v3018_v21 = vld [vmem:[#allocation13 + $0xba8] sm:$0xff]  ;;  %v12291_v13 = vcombine.high %v3017_v5, %v3025_v37  ;;  %v12290_v24 = vcombine.low %v3017_v5, %v3025_v37 }
 0x573   :  { %9736 = vmatprep.subr.bf16.mxu0 %v12197_v10  ;;  %v12276_v10 = vcombine.low %v3002_v62, %v3010_v63  ;;  %v12293_v14 = vcombine.high %v3018_v21, %v3026_v9  ;;  %v12292_v25 = vcombine.low %v3018_v21, %v3026_v9 }
 0x574   :  { %9573 = vmatpush1.bf16.msra.mxu1 %v12194_v43  ;;  %v3033_v43 = vld [vmem:[#allocation13 + $0xc20] sm:$0xff] }
 0x575   :  { %9737 = vmatpush1.bf16.msra.mxu0 %v12196_v19  ;;  %9574 = vmatprep.subr.bf16.mxu1 %v12211_v22  ;;  %v3041_v19 = vld [vmem:[#allocation13 + $0xc60] sm:$0xff]  ;;  %v3034_v22 = vld [vmem:[#allocation13 + $0xc28] sm:$0xff] }
 0x576   :  { %9738 = vmatprep.subr.bf16.mxu0 %v12213_v23  ;;  %v3042_v23 = vld [vmem:[#allocation13 + $0xc68] sm:$0xff]  ;;  %v12307_v26 = vcombine.high %v3033_v43, %v3041_v19  ;;  %v12306_v36 = vcombine.low %v3033_v43, %v3041_v19 }
 0x577   :  { %v12309_v27 = vcombine.high %v3034_v22, %v3042_v23  ;;  %v12308_v39 = vcombine.low %v3034_v22, %v3042_v23 }
 0x578   :  { %9575 = vmatpush1.bf16.msra.mxu1 %v12210_v30  ;;  %v3049_v30 = vld [vmem:[#allocation13 + $0xca0] sm:$0xff] }
 0x579   :  { %9739 = vmatpush1.bf16.msra.mxu0 %v12212_v31  ;;  %9576 = vmatprep.subr.bf16.mxu1 %v12227_v34  ;;  %v3057_v31 = vld [vmem:[#allocation13 + $0xce0] sm:$0xff]  ;;  %v3050_v34 = vld [vmem:[#allocation13 + $0xca8] sm:$0xff] }
 0x57a   :  { %9740 = vmatprep.subr.bf16.mxu0 %v12229_v35  ;;  %v3058_v35 = vld [vmem:[#allocation13 + $0xce8] sm:$0xff]  ;;  %v12323_v40 = vcombine.high %v3049_v30, %v3057_v31  ;;  %v12322_v51 = vcombine.low %v3049_v30, %v3057_v31 }
 0x57b   :  { %v12325_v44 = vcombine.high %v3050_v34, %v3058_v35  ;;  %v12324_v15 = vcombine.low %v3050_v34, %v3058_v35 }
 0x57c   :  { %9577 = vmatpush1.bf16.msra.mxu1 %v12226_v0  ;;  %v3065_v0 = vld [vmem:[#allocation13 + $0xd20] sm:$0xff] }
 0x57d   :  { %9741 = vmatpush1.bf16.msra.mxu0 %v12228_v60  ;;  %9578 = vmatprep.subr.bf16.mxu1 %v12243_v47  ;;  %v3073_v60 = vld [vmem:[#allocation13 + $0xd60] sm:$0xff]  ;;  %v3066_v47 = vld [vmem:[#allocation13 + $0xd28] sm:$0xff] }
 0x57e   :  { %9742 = vmatprep.subr.bf16.mxu0 %v12245_v50  ;;  %v3074_v50 = vld [vmem:[#allocation13 + $0xd68] sm:$0xff]  ;;  %v12339_v52 = vcombine.high %v3065_v0, %v3073_v60  ;;  %v12338_v58 = vcombine.low %v3065_v0, %v3073_v60 }
 0x57f   :  { %v12341_v53 = vcombine.high %v3066_v47, %v3074_v50  ;;  %v12340_v59 = vcombine.low %v3066_v47, %v3074_v50 }
 0x580   :  { %9579 = vmatpush1.bf16.msra.mxu1 %v12242_v54  ;;  %v3081_v54 = vld [vmem:[#allocation13 + $0xda0] sm:$0xff] }
 0x581   :  { %9743 = vmatpush1.bf16.msra.mxu0 %v12244_v55  ;;  %9580 = vmatprep.subr.bf16.mxu1 %v12259_v56  ;;  %v3089_v55 = vld [vmem:[#allocation13 + $0xde0] sm:$0xff]  ;;  %v3082_v56 = vld [vmem:[#allocation13 + $0xda8] sm:$0xff] }
 0x582   :  { %9744 = vmatprep.subr.bf16.mxu0 %v12261_v61  ;;  %v3090_v61 = vld [vmem:[#allocation13 + $0xde8] sm:$0xff]  ;;  %v12355_v62 = vcombine.high %v3081_v54, %v3089_v55  ;;  %v12354_v5 = vcombine.low %v3081_v54, %v3089_v55 }
 0x583   :  { %v12357_v63 = vcombine.high %v3082_v56, %v3090_v61  ;;  %v12356_v37 = vcombine.low %v3082_v56, %v3090_v61 }
 0x584   :  { %9581 = vmatpush1.bf16.msra.mxu1 %v12258_v4  ;;  %v3097_v4 = vld [vmem:[#allocation13 + $0xe20] sm:$0xff] }
 0x585   :  { %9745 = vmatpush1.bf16.msra.mxu0 %v12260_v1  ;;  %9582 = vmatprep.subr.bf16.mxu1 %v12275_v2  ;;  %v3105_v1 = vld [vmem:[#allocation13 + $0xe60] sm:$0xff]  ;;  %v3098_v2 = vld [vmem:[#allocation13 + $0xe28] sm:$0xff] }
 0x586   :  { %9746 = vmatprep.subr.bf16.mxu0 %v12277_v3  ;;  %v3106_v3 = vld [vmem:[#allocation13 + $0xe68] sm:$0xff]  ;;  %v12371_v21 = vcombine.high %v3097_v4, %v3105_v1  ;;  %v12370_v43 = vcombine.low %v3097_v4, %v3105_v1 }
 0x587   :  { %v12373_v9 = vcombine.high %v3098_v2, %v3106_v3  ;;  %v12372_v19 = vcombine.low %v3098_v2, %v3106_v3  ;;  %v3186_v4 = vld [vmem:[#allocation13 + $0x10e8] sm:$0xff]  ;;  %v3193_v3 = vld [vmem:[#allocation13 + $0x1120] sm:$0xff] }
 0x588   :  { %9583 = vmatpush1.bf16.msra.mxu1 %v12274_v6  ;;  %v3113_v6 = vld [vmem:[#allocation13 + $0xea0] sm:$0xff] }
 0x589   :  { %9747 = vmatpush1.bf16.msra.mxu0 %v12276_v10  ;;  %9584 = vmatprep.subr.bf16.mxu1 %v12291_v13  ;;  %v3121_v10 = vld [vmem:[#allocation13 + $0xee0] sm:$0xff]  ;;  %v3114_v13 = vld [vmem:[#allocation13 + $0xea8] sm:$0xff] }
 0x58a   :  { %9748 = vmatprep.subr.bf16.mxu0 %v12293_v14  ;;  %v3122_v14 = vld [vmem:[#allocation13 + $0xee8] sm:$0xff]  ;;  %v12387_v22 = vcombine.high %v3113_v6, %v3121_v10  ;;  %v12386_v30 = vcombine.low %v3113_v6, %v3121_v10 }
 0x58b   :  { %v12389_v23 = vcombine.high %v3114_v13, %v3122_v14  ;;  %v12388_v31 = vcombine.low %v3114_v13, %v3122_v14 }
 0x58c   :  { %9585 = vmatpush1.bf16.msra.mxu1 %v12290_v24  ;;  %v3129_v24 = vld [vmem:[#allocation13 + $0xf20] sm:$0xff] }
 0x58d   :  { %9749 = vmatpush1.bf16.msra.mxu0 %v12292_v25  ;;  %9586 = vmatprep.subr.bf16.mxu1 %v12307_v26  ;;  %v3137_v25 = vld [vmem:[#allocation13 + $0xf60] sm:$0xff]  ;;  %v3130_v26 = vld [vmem:[#allocation13 + $0xf28] sm:$0xff] }
 0x58e   :  { %9750 = vmatprep.subr.bf16.mxu0 %v12309_v27  ;;  %v3138_v27 = vld [vmem:[#allocation13 + $0xf68] sm:$0xff]  ;;  %v12403_v34 = vcombine.high %v3129_v24, %v3137_v25  ;;  %v12402_v0 = vcombine.low %v3129_v24, %v3137_v25 }
 0x58f   :  { %v12405_v35 = vcombine.high %v3130_v26, %v3138_v27  ;;  %v12404_v60 = vcombine.low %v3130_v26, %v3138_v27 }
 0x590   :  { %9587 = vmatpush1.bf16.msra.mxu1 %v12306_v36  ;;  %v3145_v36 = vld [vmem:[#allocation13 + $0xfa0] sm:$0xff] }
 0x591   :  { %9751 = vmatpush1.bf16.msra.mxu0 %v12308_v39  ;;  %9588 = vmatprep.subr.bf16.mxu1 %v12323_v40  ;;  %v3153_v39 = vld [vmem:[#allocation13 + $0xfe0] sm:$0xff]  ;;  %v3146_v40 = vld [vmem:[#allocation13 + $0xfa8] sm:$0xff] }
 0x592   :  { %9752 = vmatprep.subr.bf16.mxu0 %v12325_v44  ;;  %v3154_v44 = vld [vmem:[#allocation13 + $0xfe8] sm:$0xff]  ;;  %v12419_v47 = vcombine.high %v3145_v36, %v3153_v39  ;;  %v12418_v54 = vcombine.low %v3145_v36, %v3153_v39 }
 0x593   :  { %v12421_v50 = vcombine.high %v3146_v40, %v3154_v44  ;;  %v12420_v55 = vcombine.low %v3146_v40, %v3154_v44 }
 0x594   :  { %9589 = vmatpush1.bf16.msra.mxu1 %v12322_v51  ;;  %v3161_v51 = vld [vmem:[#allocation13 + $0x1020] sm:$0xff] }
 0x595   :  { %9753 = vmatpush1.bf16.msra.mxu0 %v12324_v15  ;;  %9590 = vmatprep.subr.bf16.mxu1 %v12339_v52  ;;  %v3169_v15 = vld [vmem:[#allocation13 + $0x1060] sm:$0xff]  ;;  %v3162_v52 = vld [vmem:[#allocation13 + $0x1028] sm:$0xff] }
 0x596   :  { %9754 = vmatprep.subr.bf16.mxu0 %v12341_v53  ;;  %v3170_v53 = vld [vmem:[#allocation13 + $0x1068] sm:$0xff]  ;;  %v12435_v56 = vcombine.high %v3161_v51, %v3169_v15 }
 0x597   :  { %v12437_v61 = vcombine.high %v3162_v52, %v3170_v53  ;;  %v12436_v1 = vcombine.low %v3162_v52, %v3170_v53 }
 0x598   :  { %9591 = vmatpush1.bf16.msra.mxu1 %v12338_v58  ;;  %v3177_v58 = vld [vmem:[#allocation13 + $0x10a0] sm:$0xff] }
 0x599   :  { %9755 = vmatpush1.bf16.msra.mxu0 %v12340_v59  ;;  %9592 = vmatprep.subr.bf16.mxu1 %v12355_v62  ;;  %v3185_v59 = vld [vmem:[#allocation13 + $0x10e0] sm:$0xff]  ;;  %v12434_v62 = vcombine.low %v3161_v51, %v3169_v15 }
 0x59a   :  { %9756 = vmatprep.subr.bf16.mxu0 %v12357_v63  ;;  %v3178_v63 = vld [vmem:[#allocation13 + $0x10a8] sm:$0xff]  ;;  %v12451_v2 = vcombine.high %v3177_v58, %v3185_v59  ;;  %v12450_v6 = vcombine.low %v3177_v58, %v3185_v59 }
 0x59b   :  { %v12452_v10 = vcombine.low %v3178_v63, %v3186_v4 }
 0x59c   :  { %9593 = vmatpush1.bf16.msra.mxu1 %v12354_v5  ;;  %v3201_v5 = vld [vmem:[#allocation13 + $0x1160] sm:$0xff] }
 0x59d   :  { %9757 = vmatpush1.bf16.msra.mxu0 %v12356_v37  ;;  %9594 = vmatprep.subr.bf16.mxu1 %v12371_v21  ;;  %v12453_v37 = vcombine.high %v3178_v63, %v3186_v4  ;;  %v3194_v21 = vld [vmem:[#allocation13 + $0x1128] sm:$0xff]  ;;  %v12467_v13 = vcombine.high %v3193_v3, %v3201_v5  ;;  %v12466_v24 = vcombine.low %v3193_v3, %v3201_v5  ;;  %v3273_v4 = vld [vmem:[#allocation13 + $0x13a0] sm:$0xff] }
 0x59e   :  { %9758 = vmatprep.subr.bf16.mxu0 %v12373_v9  ;;  %v3202_v9 = vld [vmem:[#allocation13 + $0x1168] sm:$0xff] }
 0x59f   :  { %v12469_v14 = vcombine.high %v3194_v21, %v3202_v9  ;;  %v12468_v25 = vcombine.low %v3194_v21, %v3202_v9  ;;  %v3282_v3 = vld [vmem:[#allocation13 + $0x13e8] sm:$0xff] }
 0x5a0   :  { %9595 = vmatpush1.bf16.msra.mxu1 %v12370_v43  ;;  %v3209_v43 = vld [vmem:[#allocation13 + $0x11a0] sm:$0xff] }
 0x5a1   :  { %9759 = vmatpush1.bf16.msra.mxu0 %v12372_v19  ;;  %9596 = vmatprep.subr.bf16.mxu1 %v12387_v22  ;;  %v3217_v19 = vld [vmem:[#allocation13 + $0x11e0] sm:$0xff]  ;;  %v3210_v22 = vld [vmem:[#allocation13 + $0x11a8] sm:$0xff] }
 0x5a2   :  { %9760 = vmatprep.subr.bf16.mxu0 %v12389_v23  ;;  %v3218_v23 = vld [vmem:[#allocation13 + $0x11e8] sm:$0xff]  ;;  %v12483_v26 = vcombine.high %v3209_v43, %v3217_v19  ;;  %v12482_v36 = vcombine.low %v3209_v43, %v3217_v19 }
 0x5a3   :  { %v12485_v27 = vcombine.high %v3210_v22, %v3218_v23  ;;  %v12484_v39 = vcombine.low %v3210_v22, %v3218_v23 }
 0x5a4   :  { %9597 = vmatpush1.bf16.msra.mxu1 %v12386_v30  ;;  %v3225_v30 = vld [vmem:[#allocation13 + $0x1220] sm:$0xff] }
 0x5a5   :  { %9761 = vmatpush1.bf16.msra.mxu0 %v12388_v31  ;;  %9598 = vmatprep.subr.bf16.mxu1 %v12403_v34  ;;  %v3233_v31 = vld [vmem:[#allocation13 + $0x1260] sm:$0xff]  ;;  %v3226_v34 = vld [vmem:[#allocation13 + $0x1228] sm:$0xff] }
 0x5a6   :  { %9762 = vmatprep.subr.bf16.mxu0 %v12405_v35  ;;  %v3234_v35 = vld [vmem:[#allocation13 + $0x1268] sm:$0xff]  ;;  %v12499_v40 = vcombine.high %v3225_v30, %v3233_v31  ;;  %v12498_v51 = vcombine.low %v3225_v30, %v3233_v31 }
 0x5a7   :  { %v12501_v44 = vcombine.high %v3226_v34, %v3234_v35  ;;  %v12500_v15 = vcombine.low %v3226_v34, %v3234_v35 }
 0x5a8   :  { %9599 = vmatpush1.bf16.msra.mxu1 %v12402_v0  ;;  %v3241_v0 = vld [vmem:[#allocation13 + $0x12a0] sm:$0xff] }
 0x5a9   :  { %9763 = vmatpush1.bf16.msra.mxu0 %v12404_v60  ;;  %9600 = vmatprep.subr.bf16.mxu1 %v12419_v47  ;;  %v3249_v60 = vld [vmem:[#allocation13 + $0x12e0] sm:$0xff]  ;;  %v3242_v47 = vld [vmem:[#allocation13 + $0x12a8] sm:$0xff] }
 0x5aa   :  { %9764 = vmatprep.subr.bf16.mxu0 %v12421_v50  ;;  %v3250_v50 = vld [vmem:[#allocation13 + $0x12e8] sm:$0xff]  ;;  %v12515_v52 = vcombine.high %v3241_v0, %v3249_v60  ;;  %v12514_v58 = vcombine.low %v3241_v0, %v3249_v60 }
 0x5ab   :  { %v12517_v53 = vcombine.high %v3242_v47, %v3250_v50  ;;  %v12516_v59 = vcombine.low %v3242_v47, %v3250_v50 }
 0x5ac   :  { %9601 = vmatpush1.bf16.msra.mxu1 %v12418_v54  ;;  %v3257_v54 = vld [vmem:[#allocation13 + $0x1320] sm:$0xff] }
 0x5ad   :  { %9765 = vmatpush1.bf16.msra.mxu0 %v12420_v55  ;;  %9611 = vmatprep.subr.bf16.mxu1 %v12435_v56  ;;  %v3265_v55 = vld [vmem:[#allocation13 + $0x1360] sm:$0xff]  ;;  %v3258_v56 = vld [vmem:[#allocation13 + $0x1328] sm:$0xff] }
 0x5ae   :  { %9775 = vmatprep.subr.bf16.mxu0 %v12437_v61  ;;  %v3266_v61 = vld [vmem:[#allocation13 + $0x1368] sm:$0xff]  ;;  %v12530_v5 = vcombine.low %v3257_v54, %v3265_v55 }
 0x5af   :  { %9603 = vmatmul.mubr.bf16.vlgmr.msra.gmra.mrb[20].mxu1 %v14100_v48  ;;  %v12533_v63 = vcombine.high %v3258_v56, %v3266_v61 }
 0x5b0   :  { %9767 = vmatmul.mubr.bf16.vlgmr.msra.gmra.mrb[24].mxu0 %v14100_v48  ;;  %9612 = vmatpush1.bf16.msra.mxu1 %v12434_v62  ;;  %v12531_v62 = vcombine.high %v3257_v54, %v3265_v55 }
 0x5b1   :  { %9643 = vmatprep.mubr.bf16.mxu1 %v14121_v29  ;;  %9776 = vmatpush1.bf16.msra.mxu0 %v12436_v1  ;;  %v3281_v1 = vld [vmem:[#allocation13 + $0x13e0] sm:$0xff] }
 0x5b2   :  { %9807 = vmatprep.mubr.bf16.mxu0 %v14121_v29  ;;  %9613 = vmatprep.subr.bf16.mxu1 %v12451_v2  ;;  %v3274_v2 = vld [vmem:[#allocation13 + $0x13a8] sm:$0xff]  ;;  %v12547_v21 = vcombine.high %v3273_v4, %v3281_v1  ;;  %v12546_v43 = vcombine.low %v3273_v4, %v3281_v1 }
 0x5b3   :  { %9777 = vmatprep.subr.bf16.mxu0 %v12453_v37  ;;  %v12532_v37 = vcombine.low %v3258_v56, %v3266_v61  ;;  %v12549_v9 = vcombine.high %v3274_v2, %v3282_v3  ;;  %v12548_v19 = vcombine.low %v3274_v2, %v3282_v3 }
 0x5b4   :  { %9614 = vmatpush1.bf16.msra.mxu1 %v12450_v6  ;;  %v3289_v6 = vld [vmem:[#allocation13 + $0x1420] sm:$0xff] }
 0x5b5   :  { %9778 = vmatpush1.bf16.msra.mxu0 %v12452_v10  ;;  %9615 = vmatprep.subr.bf16.mxu1 %v12467_v13  ;;  %v3297_v10 = vld [vmem:[#allocation13 + $0x1460] sm:$0xff]  ;;  %v3290_v13 = vld [vmem:[#allocation13 + $0x1428] sm:$0xff] }
 0x5b6   :  { %9779 = vmatprep.subr.bf16.mxu0 %v12469_v14  ;;  %v3298_v14 = vld [vmem:[#allocation13 + $0x1468] sm:$0xff]  ;;  %v12563_v22 = vcombine.high %v3289_v6, %v3297_v10  ;;  %v12562_v30 = vcombine.low %v3289_v6, %v3297_v10 }
 0x5b7   :  { %v12565_v23 = vcombine.high %v3290_v13, %v3298_v14  ;;  %v12564_v31 = vcombine.low %v3290_v13, %v3298_v14 }
 0x5b8   :  { %9616 = vmatpush1.bf16.msra.mxu1 %v12466_v24  ;;  %v3305_v24 = vld [vmem:[#allocation13 + $0x14a0] sm:$0xff] }
 0x5b9   :  { %9780 = vmatpush1.bf16.msra.mxu0 %v12468_v25  ;;  %9617 = vmatprep.subr.bf16.mxu1 %v12483_v26  ;;  %v3313_v25 = vld [vmem:[#allocation13 + $0x14e0] sm:$0xff]  ;;  %v3306_v26 = vld [vmem:[#allocation13 + $0x14a8] sm:$0xff] }
 0x5ba   :  { %9781 = vmatprep.subr.bf16.mxu0 %v12485_v27  ;;  %v3314_v27 = vld [vmem:[#allocation13 + $0x14e8] sm:$0xff]  ;;  %v12579_v34 = vcombine.high %v3305_v24, %v3313_v25  ;;  %v12578_v0 = vcombine.low %v3305_v24, %v3313_v25 }
 0x5bb   :  { %v12581_v35 = vcombine.high %v3306_v26, %v3314_v27  ;;  %v12580_v60 = vcombine.low %v3306_v26, %v3314_v27 }
 0x5bc   :  { %9618 = vmatpush1.bf16.msra.mxu1 %v12482_v36  ;;  %v3321_v36 = vld [vmem:[#allocation13 + $0x1520] sm:$0xff] }
 0x5bd   :  { %9782 = vmatpush1.bf16.msra.mxu0 %v12484_v39  ;;  %9619 = vmatprep.subr.bf16.mxu1 %v12499_v40  ;;  %v3329_v39 = vld [vmem:[#allocation13 + $0x1560] sm:$0xff]  ;;  %v3322_v40 = vld [vmem:[#allocation13 + $0x1528] sm:$0xff] }
 0x5be   :  { %9783 = vmatprep.subr.bf16.mxu0 %v12501_v44  ;;  %v3330_v44 = vld [vmem:[#allocation13 + $0x1568] sm:$0xff]  ;;  %v12595_v47 = vcombine.high %v3321_v36, %v3329_v39  ;;  %v12594_v54 = vcombine.low %v3321_v36, %v3329_v39 }
 0x5bf   :  { %v12597_v50 = vcombine.high %v3322_v40, %v3330_v44  ;;  %v12596_v55 = vcombine.low %v3322_v40, %v3330_v44 }
 0x5c0   :  { %9620 = vmatpush1.bf16.msra.mxu1 %v12498_v51  ;;  %v3337_v51 = vld [vmem:[#allocation13 + $0x15a0] sm:$0xff] }
 0x5c1   :  { %9784 = vmatpush1.bf16.msra.mxu0 %v12500_v15  ;;  %9621 = vmatprep.subr.bf16.mxu1 %v12515_v52  ;;  %v3345_v15 = vld [vmem:[#allocation13 + $0x15e0] sm:$0xff]  ;;  %v3338_v52 = vld [vmem:[#allocation13 + $0x15a8] sm:$0xff] }
 0x5c2   :  { %9785 = vmatprep.subr.bf16.mxu0 %v12517_v53  ;;  %v3346_v53 = vld [vmem:[#allocation13 + $0x15e8] sm:$0xff]  ;;  %v12611_v56 = vcombine.high %v3337_v51, %v3345_v15  ;;  %v12610_v4 = vcombine.low %v3337_v51, %v3345_v15 }
 0x5c3   :  { %v12613_v61 = vcombine.high %v3338_v52, %v3346_v53  ;;  %v12612_v1 = vcombine.low %v3338_v52, %v3346_v53 }
 0x5c4   :  { %9622 = vmatpush1.bf16.msra.mxu1 %v12514_v58  ;;  %v3353_v58 = vld [vmem:[#allocation13 + $0x1620] sm:$0xff] }
 0x5c5   :  { %9786 = vmatpush1.bf16.msra.mxu0 %v12516_v59  ;;  %9623 = vmatprep.subr.bf16.mxu1 %v12531_v62  ;;  %v3361_v59 = vld [vmem:[#allocation13 + $0x1660] sm:$0xff]  ;;  %v3354_v62 = vld [vmem:[#allocation13 + $0x1628] sm:$0xff] }
 0x5c6   :  { %9787 = vmatprep.subr.bf16.mxu0 %v12533_v63  ;;  %v3362_v63 = vld [vmem:[#allocation13 + $0x1668] sm:$0xff]  ;;  %v12627_v2 = vcombine.high %v3353_v58, %v3361_v59  ;;  %v12626_v6 = vcombine.low %v3353_v58, %v3361_v59 }
 0x5c7   :  { %v12629_v3 = vcombine.high %v3354_v62, %v3362_v63  ;;  %v12628_v10 = vcombine.low %v3354_v62, %v3362_v63  ;;  %v3442_v58 = vld [vmem:[#allocation13 + $0x18e8] sm:$0xff]  ;;  %v3449_v63 = vld [vmem:[#allocation13 + $0x1920] sm:$0xff] }
 0x5c8   :  { %9624 = vmatpush1.bf16.msra.mxu1 %v12530_v5  ;;  %v3369_v5 = vld [vmem:[#allocation13 + $0x16a0] sm:$0xff] }
 0x5c9   :  { %9788 = vmatpush1.bf16.msra.mxu0 %v12532_v37  ;;  %9625 = vmatprep.subr.bf16.mxu1 %v12547_v21  ;;  %v3377_v37 = vld [vmem:[#allocation13 + $0x16e0] sm:$0xff]  ;;  %v3370_v21 = vld [vmem:[#allocation13 + $0x16a8] sm:$0xff] }
 0x5ca   :  { %9789 = vmatprep.subr.bf16.mxu0 %v12549_v9  ;;  %v3378_v9 = vld [vmem:[#allocation13 + $0x16e8] sm:$0xff]  ;;  %v12643_v13 = vcombine.high %v3369_v5, %v3377_v37  ;;  %v12642_v24 = vcombine.low %v3369_v5, %v3377_v37 }
 0x5cb   :  { %v12645_v14 = vcombine.high %v3370_v21, %v3378_v9  ;;  %v12644_v25 = vcombine.low %v3370_v21, %v3378_v9 }
 0x5cc   :  { %9626 = vmatpush1.bf16.msra.mxu1 %v12546_v43  ;;  %v3385_v43 = vld [vmem:[#allocation13 + $0x1720] sm:$0xff] }
 0x5cd   :  { %9790 = vmatpush1.bf16.msra.mxu0 %v12548_v19  ;;  %9627 = vmatprep.subr.bf16.mxu1 %v12563_v22  ;;  %v3393_v19 = vld [vmem:[#allocation13 + $0x1760] sm:$0xff]  ;;  %v3386_v22 = vld [vmem:[#allocation13 + $0x1728] sm:$0xff] }
 0x5ce   :  { %9791 = vmatprep.subr.bf16.mxu0 %v12565_v23  ;;  %v3394_v23 = vld [vmem:[#allocation13 + $0x1768] sm:$0xff]  ;;  %v12659_v26 = vcombine.high %v3385_v43, %v3393_v19  ;;  %v12658_v36 = vcombine.low %v3385_v43, %v3393_v19 }
 0x5cf   :  { %v12661_v27 = vcombine.high %v3386_v22, %v3394_v23  ;;  %v12660_v39 = vcombine.low %v3386_v22, %v3394_v23 }
 0x5d0   :  { %9628 = vmatpush1.bf16.msra.mxu1 %v12562_v30  ;;  %v3401_v30 = vld [vmem:[#allocation13 + $0x17a0] sm:$0xff] }
 0x5d1   :  { %9792 = vmatpush1.bf16.msra.mxu0 %v12564_v31  ;;  %9629 = vmatprep.subr.bf16.mxu1 %v12579_v34  ;;  %v3409_v31 = vld [vmem:[#allocation13 + $0x17e0] sm:$0xff]  ;;  %v3402_v34 = vld [vmem:[#allocation13 + $0x17a8] sm:$0xff] }
 0x5d2   :  { %9793 = vmatprep.subr.bf16.mxu0 %v12581_v35  ;;  %v3410_v35 = vld [vmem:[#allocation13 + $0x17e8] sm:$0xff]  ;;  %v12675_v40 = vcombine.high %v3401_v30, %v3409_v31  ;;  %v12674_v51 = vcombine.low %v3401_v30, %v3409_v31 }
 0x5d3   :  { %v12677_v44 = vcombine.high %v3402_v34, %v3410_v35  ;;  %v12676_v15 = vcombine.low %v3402_v34, %v3410_v35 }
 0x5d4   :  { %9630 = vmatpush1.bf16.msra.mxu1 %v12578_v0  ;;  %v3417_v0 = vld [vmem:[#allocation13 + $0x1820] sm:$0xff] }
 0x5d5   :  { %9794 = vmatpush1.bf16.msra.mxu0 %v12580_v60  ;;  %9631 = vmatprep.subr.bf16.mxu1 %v12595_v47  ;;  %v3425_v60 = vld [vmem:[#allocation13 + $0x1860] sm:$0xff]  ;;  %v3418_v47 = vld [vmem:[#allocation13 + $0x1828] sm:$0xff] }
 0x5d6   :  { %9795 = vmatprep.subr.bf16.mxu0 %v12597_v50  ;;  %v3426_v50 = vld [vmem:[#allocation13 + $0x1868] sm:$0xff]  ;;  %v12691_v52 = vcombine.high %v3417_v0, %v3425_v60 }
 0x5d7   :  { %v12693_v53 = vcombine.high %v3418_v47, %v3426_v50  ;;  %v12692_v59 = vcombine.low %v3418_v47, %v3426_v50 }
 0x5d8   :  { %9632 = vmatpush1.bf16.msra.mxu1 %v12594_v54  ;;  %v3433_v54 = vld [vmem:[#allocation13 + $0x18a0] sm:$0xff] }
 0x5d9   :  { %9796 = vmatpush1.bf16.msra.mxu0 %v12596_v55  ;;  %9633 = vmatprep.subr.bf16.mxu1 %v12611_v56  ;;  %v3441_v55 = vld [vmem:[#allocation13 + $0x18e0] sm:$0xff]  ;;  %v12690_v56 = vcombine.low %v3417_v0, %v3425_v60 }
 0x5da   :  { %9797 = vmatprep.subr.bf16.mxu0 %v12613_v61  ;;  %v3434_v61 = vld [vmem:[#allocation13 + $0x18a8] sm:$0xff]  ;;  %v12707_v62 = vcombine.high %v3433_v54, %v3441_v55  ;;  %v12706_v5 = vcombine.low %v3433_v54, %v3441_v55 }
 0x5db   :  { %v12708_v37 = vcombine.low %v3434_v61, %v3442_v58 }
 0x5dc   :  { %9634 = vmatpush1.bf16.msra.mxu1 %v12610_v4  ;;  %v3457_v4 = vld [vmem:[#allocation13 + $0x1960] sm:$0xff] }
 0x5dd   :  { %9798 = vmatpush1.bf16.msra.mxu0 %v12612_v1  ;;  %9635 = vmatprep.subr.bf16.mxu1 %v12627_v2  ;;  %v12709_v1 = vcombine.high %v3434_v61, %v3442_v58  ;;  %v3450_v2 = vld [vmem:[#allocation13 + $0x1928] sm:$0xff]  ;;  %v12723_v21 = vcombine.high %v3449_v63, %v3457_v4  ;;  %v12722_v43 = vcombine.low %v3449_v63, %v3457_v4 }
 0x5de   :  { %9799 = vmatprep.subr.bf16.mxu0 %v12629_v3  ;;  %v3458_v3 = vld [vmem:[#allocation13 + $0x1968] sm:$0xff] }
 0x5df   :  { %v12725_v9 = vcombine.high %v3450_v2, %v3458_v3  ;;  %v12724_v19 = vcombine.low %v3450_v2, %v3458_v3  ;;  %v3538_v2 = vld [vmem:[#allocation13 + $0x1be8] sm:$0xff] }
 0x5e0   :  { %9636 = vmatpush1.bf16.msra.mxu1 %v12626_v6  ;;  %v3465_v6 = vld [vmem:[#allocation13 + $0x19a0] sm:$0xff] }
 0x5e1   :  { %9800 = vmatpush1.bf16.msra.mxu0 %v12628_v10  ;;  %9637 = vmatprep.subr.bf16.mxu1 %v12643_v13  ;;  %v3473_v10 = vld [vmem:[#allocation13 + $0x19e0] sm:$0xff]  ;;  %v3466_v13 = vld [vmem:[#allocation13 + $0x19a8] sm:$0xff] }
 0x5e2   :  { %9801 = vmatprep.subr.bf16.mxu0 %v12645_v14  ;;  %v3474_v14 = vld [vmem:[#allocation13 + $0x19e8] sm:$0xff]  ;;  %v12739_v22 = vcombine.high %v3465_v6, %v3473_v10  ;;  %v12738_v30 = vcombine.low %v3465_v6, %v3473_v10 }
 0x5e3   :  { %v12741_v23 = vcombine.high %v3466_v13, %v3474_v14  ;;  %v12740_v31 = vcombine.low %v3466_v13, %v3474_v14 }
 0x5e4   :  { %9638 = vmatpush1.bf16.msra.mxu1 %v12642_v24  ;;  %v3481_v24 = vld [vmem:[#allocation13 + $0x1a20] sm:$0xff] }
 0x5e5   :  { %9802 = vmatpush1.bf16.msra.mxu0 %v12644_v25  ;;  %9639 = vmatprep.subr.bf16.mxu1 %v12659_v26  ;;  %v3489_v25 = vld [vmem:[#allocation13 + $0x1a60] sm:$0xff]  ;;  %v3482_v26 = vld [vmem:[#allocation13 + $0x1a28] sm:$0xff] }
 0x5e6   :  { %9803 = vmatprep.subr.bf16.mxu0 %v12661_v27  ;;  %v3490_v27 = vld [vmem:[#allocation13 + $0x1a68] sm:$0xff]  ;;  %v12755_v34 = vcombine.high %v3481_v24, %v3489_v25  ;;  %v12754_v0 = vcombine.low %v3481_v24, %v3489_v25 }
 0x5e7   :  { %v12757_v35 = vcombine.high %v3482_v26, %v3490_v27  ;;  %v12756_v60 = vcombine.low %v3482_v26, %v3490_v27 }
 0x5e8   :  { %9640 = vmatpush1.bf16.msra.mxu1 %v12658_v36  ;;  %v3497_v36 = vld [vmem:[#allocation13 + $0x1aa0] sm:$0xff] }
 0x5e9   :  { %9804 = vmatpush1.bf16.msra.mxu0 %v12660_v39  ;;  %9641 = vmatprep.subr.bf16.mxu1 %v12675_v40  ;;  %v3505_v39 = vld [vmem:[#allocation13 + $0x1ae0] sm:$0xff]  ;;  %v3498_v40 = vld [vmem:[#allocation13 + $0x1aa8] sm:$0xff] }
 0x5ea   :  { %9805 = vmatprep.subr.bf16.mxu0 %v12677_v44  ;;  %v3506_v44 = vld [vmem:[#allocation13 + $0x1ae8] sm:$0xff]  ;;  %v12771_v47 = vcombine.high %v3497_v36, %v3505_v39  ;;  %v12770_v54 = vcombine.low %v3497_v36, %v3505_v39 }
 0x5eb   :  { %v12773_v50 = vcombine.high %v3498_v40, %v3506_v44  ;;  %v12772_v55 = vcombine.low %v3498_v40, %v3506_v44 }
 0x5ec   :  { %9642 = vmatpush1.bf16.msra.mxu1 %v12674_v51  ;;  %v3513_v51 = vld [vmem:[#allocation13 + $0x1b20] sm:$0xff] }
 0x5ed   :  { %9806 = vmatpush1.bf16.msra.mxu0 %v12676_v15  ;;  %9652 = vmatprep.subr.bf16.mxu1 %v12691_v52  ;;  %v3521_v15 = vld [vmem:[#allocation13 + $0x1b60] sm:$0xff]  ;;  %v3514_v52 = vld [vmem:[#allocation13 + $0x1b28] sm:$0xff] }
 0x5ee   :  { %9816 = vmatprep.subr.bf16.mxu0 %v12693_v53  ;;  %v3522_v53 = vld [vmem:[#allocation13 + $0x1b68] sm:$0xff] }
 0x5ef   :  { %9644 = vmatmul.mubr.bf16.vlgmr.msra.gmra.mrb[20].mxu1 %v14123_v32  ;;  %v12789_v58 = vcombine.high %v3514_v52, %v3522_v53  ;;  %v12788_v6 = vcombine.low %v3514_v52, %v3522_v53 }
 0x5f0   :  { %9808 = vmatmul.mubr.bf16.vlgmr.msra.gmra.mrb[24].mxu0 %v14123_v32  ;;  %9653 = vmatpush1.bf16.msra.mxu1 %v12690_v56  ;;  %v12787_v56 = vcombine.high %v3513_v51, %v3521_v15 }
 0x5f1   :  { %9684 = vmatprep.mubr.bf16.mxu1 %v14127_v41  ;;  %9817 = vmatpush1.bf16.msra.mxu0 %v12692_v59  ;;  %v3529_v59 = vld [vmem:[#allocation13 + $0x1ba0] sm:$0xff] }
 0x5f2   :  { %9848 = vmatprep.mubr.bf16.mxu0 %v14127_v41  ;;  %9654 = vmatprep.subr.bf16.mxu1 %v12707_v62  ;;  %v3537_v62 = vld [vmem:[#allocation13 + $0x1be0] sm:$0xff] }
 0x5f3   :  { %9818 = vmatprep.subr.bf16.mxu0 %v12709_v1  ;;  %v3530_v1 = vld [vmem:[#allocation13 + $0x1ba8] sm:$0xff]  ;;  %v12803_v10 = vcombine.high %v3529_v59, %v3537_v62  ;;  %v12802_v24 = vcombine.low %v3529_v59, %v3537_v62 }
 0x5f4   :  { %9655 = vmatpush1.bf16.msra.mxu1 %v12706_v5  ;;  %v12805_v14 = vcombine.high %v3530_v1, %v3538_v2  ;;  %v12804_v25 = vcombine.low %v3530_v1, %v3538_v2 }
 0x5f5   :  { %9819 = vmatpush1.bf16.msra.mxu0 %v12708_v37  ;;  %9656 = vmatprep.subr.bf16.mxu1 %v12723_v21  ;;  %v12786_v37 = vcombine.low %v3513_v51, %v3521_v15 }
 0x5f6   :  { %9820 = vmatprep.subr.bf16.mxu0 %v12725_v9 }
 0x5f8   :  { %9657 = vmatpush1.bf16.msra.mxu1 %v12722_v43  ;;  %v3545_v43 = vld [vmem:[#allocation13 + $0x1c20] sm:$0xff] }
 0x5f9   :  { %9821 = vmatpush1.bf16.msra.mxu0 %v12724_v19  ;;  %9658 = vmatprep.subr.bf16.mxu1 %v12739_v22  ;;  %v3553_v19 = vld [vmem:[#allocation13 + $0x1c60] sm:$0xff]  ;;  %v3546_v22 = vld [vmem:[#allocation13 + $0x1c28] sm:$0xff] }
 0x5fa   :  { %9822 = vmatprep.subr.bf16.mxu0 %v12741_v23  ;;  %v3554_v23 = vld [vmem:[#allocation13 + $0x1c68] sm:$0xff]  ;;  %v12819_v26 = vcombine.high %v3545_v43, %v3553_v19  ;;  %v12818_v36 = vcombine.low %v3545_v43, %v3553_v19  ;;  %v3625_v43 = vld [vmem:[#allocation13 + $0x1ea0] sm:$0xff] }
 0x5fb   :  { %v12821_v27 = vcombine.high %v3546_v22, %v3554_v23  ;;  %v12820_v39 = vcombine.low %v3546_v22, %v3554_v23  ;;  %v3633_v19 = vld [vmem:[#allocation13 + $0x1ee0] sm:$0xff]  ;;  %v3626_v22 = vld [vmem:[#allocation13 + $0x1ea8] sm:$0xff] }
 0x5fc   :  { %9659 = vmatpush1.bf16.msra.mxu1 %v12738_v30  ;;  %v3561_v30 = vld [vmem:[#allocation13 + $0x1ca0] sm:$0xff]  ;;  %v3634_v23 = vld [vmem:[#allocation13 + $0x1ee8] sm:$0xff] }
 0x5fd   :  { %9823 = vmatpush1.bf16.msra.mxu0 %v12740_v31  ;;  %9660 = vmatprep.subr.bf16.mxu1 %v12755_v34  ;;  %v3569_v31 = vld [vmem:[#allocation13 + $0x1ce0] sm:$0xff]  ;;  %v3562_v34 = vld [vmem:[#allocation13 + $0x1ca8] sm:$0xff] }
 0x5fe   :  { %9824 = vmatprep.subr.bf16.mxu0 %v12757_v35  ;;  %v3570_v35 = vld [vmem:[#allocation13 + $0x1ce8] sm:$0xff]  ;;  %v12835_v40 = vcombine.high %v3561_v30, %v3569_v31  ;;  %v12834_v51 = vcombine.low %v3561_v30, %v3569_v31  ;;  %v3641_v30 = vld [vmem:[#allocation13 + $0x1f20] sm:$0xff] }
 0x5ff   :  { %v12837_v44 = vcombine.high %v3562_v34, %v3570_v35  ;;  %v12836_v15 = vcombine.low %v3562_v34, %v3570_v35  ;;  %v3649_v31 = vld [vmem:[#allocation13 + $0x1f60] sm:$0xff]  ;;  %v3642_v34 = vld [vmem:[#allocation13 + $0x1f28] sm:$0xff] }
 0x600   :  { %9661 = vmatpush1.bf16.msra.mxu1 %v12754_v0  ;;  %v3577_v0 = vld [vmem:[#allocation13 + $0x1d20] sm:$0xff]  ;;  %v3650_v35 = vld [vmem:[#allocation13 + $0x1f68] sm:$0xff] }
 0x601   :  { %9825 = vmatpush1.bf16.msra.mxu0 %v12756_v60  ;;  %9662 = vmatprep.subr.bf16.mxu1 %v12771_v47  ;;  %v3585_v60 = vld [vmem:[#allocation13 + $0x1d60] sm:$0xff]  ;;  %v3578_v47 = vld [vmem:[#allocation13 + $0x1d28] sm:$0xff] }
 0x602   :  { %v14180_v61 = vpop.f32.mrb[16].mxu1  ;;  %9826 = vmatprep.subr.bf16.mxu0 %v12773_v50  ;;  %v3586_v50 = vld [vmem:[#allocation13 + $0x1d68] sm:$0xff]  ;;  %v12851_v52 = vcombine.high %v3577_v0, %v3585_v60  ;;  %v12850_v59 = vcombine.low %v3577_v0, %v3585_v60  ;;  %v3657_v0 = vld [vmem:[#allocation13 + $0x1fa0] sm:$0xff] }
 0x603   :  { %v14182_v63 = vpop.f32.mrb[20].mxu0  ;;  %v14184_v4 = vpop.f32.mrb[17].mxu1  ;;  %v12853_v53 = vcombine.high %v3578_v47, %v3586_v50  ;;  %v12852_v62 = vcombine.low %v3578_v47, %v3586_v50  ;;  %v3665_v60 = vld [vmem:[#allocation13 + $0x1fe0] sm:$0xff]  ;;  %v3658_v47 = vld [vmem:[#allocation13 + $0x1fa8] sm:$0xff] }
 0x604   :  { %v14186_v3 = vpop.f32.mrb[21].mxu0  ;;  %v9362_v5 = vpop.f32.mrb[18].mxu1  ;;  %9663 = vmatpush1.bf16.msra.mxu1 %v12770_v54  ;;  %v3593_v54 = vld [vmem:[#allocation13 + $0x1da0] sm:$0xff]  ;;  %v3666_v50 = vld [vmem:[#allocation13 + $0x1fe8] sm:$0xff] }
 0x605   :  { %v9526_v21 = vpop.f32.mrb[22].mxu0  ;;  %9827 = vmatpush1.bf16.msra.mxu0 %v12772_v55  ;;  %v9363_v9 = vpop.f32.mrb[19].mxu1  ;;  %9664 = vmatprep.subr.bf16.mxu1 %v12787_v56  ;;  %v3601_v55 = vld [vmem:[#allocation13 + $0x1de0] sm:$0xff]  ;;  %v3594_v56 = vld [vmem:[#allocation13 + $0x1da8] sm:$0xff] }
 0x606   :  { %v9527_v13 = vpop.f32.mrb[23].mxu0  ;;  %9828 = vmatprep.subr.bf16.mxu0 %v12789_v58  ;;  %v3602_v58 = vld [vmem:[#allocation13 + $0x1de8] sm:$0xff]  ;;  %v12867_v1 = vcombine.high %v3593_v54, %v3601_v55  ;;  %v3609_v5 = vld [vmem:[#allocation13 + $0x1e20] sm:$0xff] }
 0x607   :  { %v12869_v2 = vcombine.high %v3594_v56, %v3602_v58  ;;  %v3610_v21 = vld [vmem:[#allocation13 + $0x1e28] sm:$0xff] }
 0x608   :  { %9665 = vmatpush1.bf16.msra.mxu1 %v12786_v37  ;;  %v3617_v37 = vld [vmem:[#allocation13 + $0x1e60] sm:$0xff]  ;;  %v3618_v9 = vld [vmem:[#allocation13 + $0x1e68] sm:$0xff] }
 0x609   :  { %9829 = vmatpush1.bf16.msra.mxu0 %v12788_v6  ;;  %9666 = vmatprep.subr.bf16.mxu1 %v12803_v10  ;;  %v12866_v6 = vcombine.low %v3593_v54, %v3601_v55  ;;  %v12868_v10 = vcombine.low %v3594_v56, %v3602_v58  ;;  %v12883_v13 = vcombine.high %v3609_v5, %v3617_v37  ;;  %v2651_v54 = vld [vmem:[#allocation13 + $0x30] sm:$0xff]  ;;  %v2652_v56 = vld [vmem:[#allocation13 + $0x38] sm:$0xff] }
 0x60a   :  { %9830 = vmatprep.subr.bf16.mxu0 %v12805_v14  ;;  %v12885_v14 = vcombine.high %v3610_v21, %v3618_v9  ;;  %v2659_v55 = vld [vmem:[#allocation13 + $0x70] sm:$0xff]  ;;  %v2660_v58 = vld [vmem:[#allocation13 + $0x78] sm:$0xff] }
 0x60c   :  { %9667 = vmatpush1.bf16.msra.mxu1 %v12802_v24  ;;  %v12882_v24 = vcombine.low %v3609_v5, %v3617_v37  ;;  %v2667_v5 = vld [vmem:[#allocation13 + $0xb0] sm:$0xff] }
 0x60d   :  { %9831 = vmatpush1.bf16.msra.mxu0 %v12804_v25  ;;  %9668 = vmatprep.subr.bf16.mxu1 %v12819_v26  ;;  %v12884_v25 = vcombine.low %v3610_v21, %v3618_v9  ;;  %v12899_v26 = vcombine.high %v3625_v43, %v3633_v19  ;;  %v2675_v37 = vld [vmem:[#allocation13 + $0xf0] sm:$0xff]  ;;  %v11926_v21 = vcombine.low %v2651_v54, %v2659_v55  ;;  %v2668_v9 = vld [vmem:[#allocation13 + $0xb8] sm:$0xff] }
 0x60e   :  { %9832 = vmatprep.subr.bf16.mxu0 %v12821_v27  ;;  %v12901_v27 = vcombine.high %v3626_v22, %v3634_v23 }
 0x610   :  { %9669 = vmatpush1.bf16.msra.mxu1 %v12818_v36  ;;  %v12898_v36 = vcombine.low %v3625_v43, %v3633_v19  ;;  %v2691_v43 = vld [vmem:[#allocation13 + $0x170] sm:$0xff] }
 0x611   :  { %9833 = vmatpush1.bf16.msra.mxu0 %v12820_v39  ;;  %9670 = vmatprep.subr.bf16.mxu1 %v12835_v40  ;;  %v12900_v39 = vcombine.low %v3626_v22, %v3634_v23  ;;  %v12915_v40 = vcombine.high %v3641_v30, %v3649_v31  ;;  %v2684_v22 = vld [vmem:[#allocation13 + $0x138] sm:$0xff] }
 0x612   :  { %9834 = vmatprep.subr.bf16.mxu0 %v12837_v44  ;;  %v12917_v44 = vcombine.high %v3642_v34, %v3650_v35  ;;  %v2692_v23 = vld [vmem:[#allocation13 + $0x178] sm:$0xff] }
 0x614   :  { %9671 = vmatpush1.bf16.msra.mxu1 %v12834_v51  ;;  %v12914_v51 = vcombine.low %v3641_v30, %v3649_v31  ;;  %v2699_v30 = vld [vmem:[#allocation13 + $0x1b0] sm:$0xff] }
 0x615   :  { %9835 = vmatpush1.bf16.msra.mxu0 %v12836_v15  ;;  %9672 = vmatprep.subr.bf16.mxu1 %v12851_v52  ;;  %v12916_v15 = vcombine.low %v3642_v34, %v3650_v35  ;;  %v12931_v52 = vcombine.high %v3657_v0, %v3665_v60  ;;  %v2707_v31 = vld [vmem:[#allocation13 + $0x1f0] sm:$0xff]  ;;  %v2700_v34 = vld [vmem:[#allocation13 + $0x1b8] sm:$0xff] }
 0x616   :  { %9836 = vmatprep.subr.bf16.mxu0 %v12853_v53  ;;  %v12933_v53 = vcombine.high %v3658_v47, %v3666_v50  ;;  %v2708_v35 = vld [vmem:[#allocation13 + $0x1f8] sm:$0xff] }
 0x618   :  { %9673 = vmatpush1.bf16.msra.mxu1 %v12850_v59  ;;  %v12930_v59 = vcombine.low %v3657_v0, %v3665_v60  ;;  %v2715_v0 = vld [vmem:[#allocation13 + $0x230] sm:$0xff] }
 0x619   :  { %9837 = vmatpush1.bf16.msra.mxu0 %v12852_v62  ;;  %9674 = vmatprep.subr.bf16.mxu1 %v12867_v1  ;;  %v12932_v62 = vcombine.low %v3658_v47, %v3666_v50  ;;  %v11927_v1 = vcombine.high %v2651_v54, %v2659_v55  ;;  %v2723_v60 = vld [vmem:[#allocation13 + $0x270] sm:$0xff]  ;;  %v2716_v47 = vld [vmem:[#allocation13 + $0x238] sm:$0xff] }
 0x61a   :  { %9838 = vmatprep.subr.bf16.mxu0 %v12869_v2  ;;  %v11929_v2 = vcombine.high %v2652_v56, %v2660_v58  ;;  %v2724_v50 = vld [vmem:[#allocation13 + $0x278] sm:$0xff]  ;;  %v2739_v54 = vld [vmem:[#allocation13 + $0x2f0] sm:$0xff] }
 0x61b   :  { %v2732_v55 = vld [vmem:[#allocation13 + $0x2b8] sm:$0xff] }
 0x61c   :  { %9675 = vmatpush1.bf16.msra.mxu1 %v12866_v6  ;;  %v2676_v6 = vld [vmem:[#allocation13 + $0xf8] sm:$0xff] }
 0x61d   :  { %9839 = vmatpush1.bf16.msra.mxu0 %v12868_v10  ;;  %9676 = vmatprep.subr.bf16.mxu1 %v12883_v13  ;;  %v11928_v10 = vcombine.low %v2652_v56, %v2660_v58  ;;  %v11943_v13 = vcombine.high %v2667_v5, %v2675_v37  ;;  %v11945_v19 = vcombine.high %v2668_v9, %v2676_v6  ;;  %v2740_v56 = vld [vmem:[#allocation13 + $0x2f8] sm:$0xff] }
 0x61e   :  { %9840 = vmatprep.subr.bf16.mxu0 %v12885_v14  ;;  %v2683_v14 = vld [vmem:[#allocation13 + $0x130] sm:$0xff]  ;;  %v11990_v58 = vcombine.low %v2715_v0, %v2723_v60 }
 0x620   :  { %9677 = vmatpush1.bf16.msra.mxu1 %v12882_v24  ;;  %v11942_v24 = vcombine.low %v2667_v5, %v2675_v37  ;;  %v2755_v5 = vld [vmem:[#allocation13 + $0x370] sm:$0xff]  ;;  %v2748_v37 = vld [vmem:[#allocation13 + $0x338] sm:$0xff] }
 0x621   :  { %9841 = vmatpush1.bf16.msra.mxu0 %v12884_v25  ;;  %9678 = vmatprep.subr.bf16.mxu1 %v12899_v26  ;;  %v11944_v25 = vcombine.low %v2668_v9, %v2676_v6  ;;  %v11959_v26 = vcombine.high %v2683_v14, %v2691_v43  ;;  %v12008_v6 = vcombine.low %v2732_v55, %v2740_v56 }
 0x622   :  { %9842 = vmatprep.subr.bf16.mxu0 %v12901_v27  ;;  %v11961_v27 = vcombine.high %v2684_v22, %v2692_v23 }
 0x624   :  { %9679 = vmatpush1.bf16.msra.mxu1 %v12898_v36  ;;  %v11958_v36 = vcombine.low %v2683_v14, %v2691_v43  ;;  %v2763_v14 = vld [vmem:[#allocation13 + $0x3b0] sm:$0xff] }
 0x625   :  { %9843 = vmatpush1.bf16.msra.mxu0 %v12900_v39  ;;  %9680 = vmatprep.subr.bf16.mxu1 %v12915_v40  ;;  %v11960_v39 = vcombine.low %v2684_v22, %v2692_v23  ;;  %v11975_v40 = vcombine.high %v2699_v30, %v2707_v31  ;;  %v2771_v43 = vld [vmem:[#allocation13 + $0x3f0] sm:$0xff]  ;;  %v2772_v22 = vld [vmem:[#allocation13 + $0x3f8] sm:$0xff] }
 0x626   :  { %9844 = vmatprep.subr.bf16.mxu0 %v12917_v44  ;;  %v11977_v44 = vcombine.high %v2700_v34, %v2708_v35 }
 0x628   :  { %9681 = vmatpush1.bf16.msra.mxu1 %v12914_v51  ;;  %v11976_v51 = vcombine.low %v2700_v34, %v2708_v35  ;;  %v2788_v34 = vld [vmem:[#allocation13 + $0x478] sm:$0xff]  ;;  %v12038_v35 = vcombine.low %v2763_v14, %v2771_v43 }
 0x629   :  { %9845 = vmatpush1.bf16.msra.mxu0 %v12916_v15  ;;  %9682 = vmatprep.subr.bf16.mxu1 %v12931_v52  ;;  %v11991_v15 = vcombine.high %v2715_v0, %v2723_v60  ;;  %v11993_v52 = vcombine.high %v2716_v47, %v2724_v50  ;;  %v2803_v0 = vld [vmem:[#allocation13 + $0x4f0] sm:$0xff]  ;;  %v2796_v60 = vld [vmem:[#allocation13 + $0x4b8] sm:$0xff] }
 0x62a   :  { %9846 = vmatprep.subr.bf16.mxu0 %v12933_v53  ;;  %v2731_v53 = vld [vmem:[#allocation13 + $0x2b0] sm:$0xff] }
 0x62b   :  { %v12006_v9 = vcombine.low %v2731_v53, %v2739_v54 }
 0x62c   :  { %9683 = vmatpush1.bf16.msra.mxu1 %v12930_v59  ;;  %v11992_v59 = vcombine.low %v2716_v47, %v2724_v50  ;;  %v2804_v47 = vld [vmem:[#allocation13 + $0x4f8] sm:$0xff] }
 0x62d   :  { %9847 = vmatpush1.bf16.msra.mxu0 %v12932_v62  ;;  %9857 = vmatprep.subr.bf16.mxu1 %v11927_v1  ;;  %v12007_v62 = vcombine.high %v2731_v53, %v2739_v54  ;;  %v12009_v1 = vcombine.high %v2732_v55, %v2740_v56  ;;  %v2819_v53 = vld [vmem:[#allocation13 + $0x570] sm:$0xff]  ;;  %v2812_v54 = vld [vmem:[#allocation13 + $0x538] sm:$0xff] }
 0x62e   :  { %10021 = vmatprep.subr.bf16.mxu0 %v11929_v2  ;;  %v2747_v2 = vld [vmem:[#allocation13 + $0x330] sm:$0xff]  ;;  %v2820_v55 = vld [vmem:[#allocation13 + $0x578] sm:$0xff] }
 0x62f   :  { %9685 = vmatmul.mubr.bf16.vlgmr.msra.gmra.mrb[20].mxu1 %v14138_v57  ;;  %v12022_v23 = vcombine.low %v2747_v2, %v2755_v5 }
 0x630   :  { %9849 = vmatmul.mubr.bf16.vlgmr.msra.gmra.mrb[24].mxu0 %v14138_v57  ;;  %9858 = vmatpush1.bf16.msra.mxu1 %v11926_v21  ;;  %v2756_v21 = vld [vmem:[#allocation13 + $0x378] sm:$0xff] }
 0x631   :  { %9889 = vmatprep.mubr.bf16.mxu1 %v14085_v17  ;;  %10022 = vmatpush1.bf16.msra.mxu0 %v11928_v10  ;;  %v12023_v10 = vcombine.high %v2747_v2, %v2755_v5  ;;  %v2835_v2 = vld [vmem:[#allocation13 + $0x5f0] sm:$0xff]  ;;  %v2828_v5 = vld [vmem:[#allocation13 + $0x5b8] sm:$0xff] }
 0x632   :  { %10053 = vmatprep.mubr.bf16.mxu0 %v14085_v17  ;;  %9859 = vmatprep.subr.bf16.mxu1 %v11943_v13  ;;  %v11974_v17 = vcombine.low %v2699_v30, %v2707_v31  ;;  %v12025_v13 = vcombine.high %v2748_v37, %v2756_v21  ;;  %v2787_v30 = vld [vmem:[#allocation13 + $0x470] sm:$0xff]  ;;  %v2780_v31 = vld [vmem:[#allocation13 + $0x438] sm:$0xff] }
 0x633   :  { %10023 = vmatprep.subr.bf16.mxu0 %v11945_v19  ;;  %v2764_v19 = vld [vmem:[#allocation13 + $0x3b8] sm:$0xff] }
 0x634   :  { %9860 = vmatpush1.bf16.msra.mxu1 %v11942_v24  ;;  %v12024_v24 = vcombine.low %v2748_v37, %v2756_v21  ;;  %v2836_v37 = vld [vmem:[#allocation13 + $0x5f8] sm:$0xff] }
 0x635   :  { %10024 = vmatpush1.bf16.msra.mxu0 %v11944_v25  ;;  %9861 = vmatprep.subr.bf16.mxu1 %v11959_v26  ;;  %v12039_v25 = vcombine.high %v2763_v14, %v2771_v43  ;;  %v12041_v26 = vcombine.high %v2764_v19, %v2772_v22  ;;  %v2851_v14 = vld [vmem:[#allocation13 + $0x670] sm:$0xff]  ;;  %v2844_v43 = vld [vmem:[#allocation13 + $0x638] sm:$0xff] }
 0x636   :  { %10025 = vmatprep.subr.bf16.mxu0 %v11961_v27  ;;  %v2779_v27 = vld [vmem:[#allocation13 + $0x430] sm:$0xff] }
 0x637   :  { %v12054_v50 = vcombine.low %v2779_v27, %v2787_v30 }
 0x638   :  { %9862 = vmatpush1.bf16.msra.mxu1 %v11958_v36  ;;  %v12040_v36 = vcombine.low %v2764_v19, %v2772_v22  ;;  %v2852_v19 = vld [vmem:[#allocation13 + $0x678] sm:$0xff] }
 0x639   :  { %10026 = vmatpush1.bf16.msra.mxu0 %v11960_v39  ;;  %9863 = vmatprep.subr.bf16.mxu1 %v11975_v40  ;;  %v12055_v39 = vcombine.high %v2779_v27, %v2787_v30  ;;  %v12057_v40 = vcombine.high %v2780_v31, %v2788_v34  ;;  %v2867_v27 = vld [vmem:[#allocation13 + $0x6f0] sm:$0xff]  ;;  %v2860_v30 = vld [vmem:[#allocation13 + $0x6b8] sm:$0xff] }
 0x63a   :  { %10027 = vmatprep.subr.bf16.mxu0 %v11977_v44  ;;  %v2795_v44 = vld [vmem:[#allocation13 + $0x4b0] sm:$0xff] }
 0x63b   :  { %v12070_v56 = vcombine.low %v2795_v44, %v2803_v0 }
 0x63c   :  { %9864 = vmatpush1.bf16.msra.mxu1 %v11974_v17  ;;  %v12056_v17 = vcombine.low %v2780_v31, %v2788_v34  ;;  %v2868_v31 = vld [vmem:[#allocation13 + $0x6f8] sm:$0xff] }
 0x63d   :  { %10028 = vmatpush1.bf16.msra.mxu0 %v11976_v51  ;;  %9865 = vmatprep.subr.bf16.mxu1 %v11991_v15  ;;  %v12071_v51 = vcombine.high %v2795_v44, %v2803_v0  ;;  %v12073_v15 = vcombine.high %v2796_v60, %v2804_v47  ;;  %v2883_v44 = vld [vmem:[#allocation13 + $0x770] sm:$0xff]  ;;  %v2876_v0 = vld [vmem:[#allocation13 + $0x738] sm:$0xff] }
 0x63e   :  { %10029 = vmatprep.subr.bf16.mxu0 %v11993_v52  ;;  %v2811_v52 = vld [vmem:[#allocation13 + $0x530] sm:$0xff] }
 0x63f   :  { %v12086_v21 = vcombine.low %v2811_v52, %v2819_v53 }
 0x640   :  { %9866 = vmatpush1.bf16.msra.mxu1 %v11990_v58  ;;  %v12072_v58 = vcombine.low %v2796_v60, %v2804_v47  ;;  %v2884_v60 = vld [vmem:[#allocation13 + $0x778] sm:$0xff] }
 0x641   :  { %10030 = vmatpush1.bf16.msra.mxu0 %v11992_v59  ;;  %9867 = vmatprep.subr.bf16.mxu1 %v12007_v62  ;;  %v12087_v59 = vcombine.high %v2811_v52, %v2819_v53  ;;  %v12089_v62 = vcombine.high %v2812_v54, %v2820_v55  ;;  %v2899_v52 = vld [vmem:[#allocation13 + $0x7f0] sm:$0xff]  ;;  %v2892_v53 = vld [vmem:[#allocation13 + $0x7b8] sm:$0xff] }
 0x642   :  { %10031 = vmatprep.subr.bf16.mxu0 %v12009_v1  ;;  %v2827_v1 = vld [vmem:[#allocation13 + $0x5b0] sm:$0xff] }
 0x643   :  { %v12102_v22 = vcombine.low %v2827_v1, %v2835_v2 }
 0x644   :  { %9868 = vmatpush1.bf16.msra.mxu1 %v12006_v9  ;;  %v12088_v9 = vcombine.low %v2812_v54, %v2820_v55  ;;  %v2900_v54 = vld [vmem:[#allocation13 + $0x7f8] sm:$0xff] }
 0x645   :  { %10032 = vmatpush1.bf16.msra.mxu0 %v12008_v6  ;;  %9869 = vmatprep.subr.bf16.mxu1 %v12023_v10  ;;  %v12103_v6 = vcombine.high %v2827_v1, %v2835_v2  ;;  %v12105_v10 = vcombine.high %v2828_v5, %v2836_v37  ;;  %v2915_v1 = vld [vmem:[#allocation13 + $0x870] sm:$0xff]  ;;  %v2908_v2 = vld [vmem:[#allocation13 + $0x838] sm:$0xff] }
 0x646   :  { %10033 = vmatprep.subr.bf16.mxu0 %v12025_v13  ;;  %v2843_v13 = vld [vmem:[#allocation13 + $0x630] sm:$0xff] }
 0x647   :  { %v12118_v34 = vcombine.low %v2843_v13, %v2851_v14 }
 0x648   :  { %9870 = vmatpush1.bf16.msra.mxu1 %v12022_v23  ;;  %v12104_v23 = vcombine.low %v2828_v5, %v2836_v37  ;;  %v2916_v5 = vld [vmem:[#allocation13 + $0x878] sm:$0xff] }
 0x649   :  { %10034 = vmatpush1.bf16.msra.mxu0 %v12024_v24  ;;  %9871 = vmatprep.subr.bf16.mxu1 %v12039_v25  ;;  %v12119_v24 = vcombine.high %v2843_v13, %v2851_v14  ;;  %v12121_v25 = vcombine.high %v2844_v43, %v2852_v19  ;;  %v2931_v13 = vld [vmem:[#allocation13 + $0x8f0] sm:$0xff] }
 0x64a   :  { %10035 = vmatprep.subr.bf16.mxu0 %v12041_v26  ;;  %v2859_v26 = vld [vmem:[#allocation13 + $0x6b0] sm:$0xff] }
 0x64b   :  { %v12134_v47 = vcombine.low %v2859_v26, %v2867_v27 }
 0x64c   :  { %9872 = vmatpush1.bf16.msra.mxu1 %v12038_v35  ;;  %v12120_v35 = vcombine.low %v2844_v43, %v2852_v19  ;;  %v2924_v43 = vld [vmem:[#allocation13 + $0x8b8] sm:$0xff] }
 0x64d   :  { %10036 = vmatpush1.bf16.msra.mxu0 %v12040_v36  ;;  %9873 = vmatprep.subr.bf16.mxu1 %v12055_v39  ;;  %v12135_v36 = vcombine.high %v2859_v26, %v2867_v27  ;;  %v12137_v39 = vcombine.high %v2860_v30, %v2868_v31  ;;  %v2932_v19 = vld [vmem:[#allocation13 + $0x8f8] sm:$0xff] }
 0x64e   :  { %10037 = vmatprep.subr.bf16.mxu0 %v12057_v40  ;;  %v2875_v40 = vld [vmem:[#allocation13 + $0x730] sm:$0xff]  ;;  %v12201_v26 = vcombine.high %v2924_v43, %v2932_v19  ;;  %v2940_v27 = vld [vmem:[#allocation13 + $0x938] sm:$0xff] }
 0x64f   :  { %v12150_v55 = vcombine.low %v2875_v40, %v2883_v44 }
 0x650   :  { %9874 = vmatpush1.bf16.msra.mxu1 %v12054_v50  ;;  %v12136_v50 = vcombine.low %v2860_v30, %v2868_v31  ;;  %v2948_v30 = vld [vmem:[#allocation13 + $0x978] sm:$0xff] }
 0x651   :  { %10038 = vmatpush1.bf16.msra.mxu0 %v12056_v17  ;;  %9875 = vmatprep.subr.bf16.mxu1 %v12071_v51  ;;  %v12151_v17 = vcombine.high %v2875_v40, %v2883_v44  ;;  %v12153_v51 = vcombine.high %v2876_v0, %v2884_v60  ;;  %v2963_v40 = vld [vmem:[#allocation13 + $0x9f0] sm:$0xff]  ;;  %v2956_v44 = vld [vmem:[#allocation13 + $0x9b8] sm:$0xff] }
 0x652   :  { %10039 = vmatprep.subr.bf16.mxu0 %v12073_v15  ;;  %v2891_v15 = vld [vmem:[#allocation13 + $0x7b0] sm:$0xff] }
 0x653   :  { %v12166_v37 = vcombine.low %v2891_v15, %v2899_v52 }
 0x654   :  { %9876 = vmatpush1.bf16.msra.mxu1 %v12070_v56  ;;  %v12152_v56 = vcombine.low %v2876_v0, %v2884_v60  ;;  %v2964_v0 = vld [vmem:[#allocation13 + $0x9f8] sm:$0xff] }
 0x655   :  { %10040 = vmatpush1.bf16.msra.mxu0 %v12072_v58  ;;  %9877 = vmatprep.subr.bf16.mxu1 %v12087_v59  ;;  %v12167_v58 = vcombine.high %v2891_v15, %v2899_v52  ;;  %v12169_v59 = vcombine.high %v2892_v53, %v2900_v54  ;;  %v2972_v15 = vld [vmem:[#allocation13 + $0xa38] sm:$0xff] }
 0x656   :  { %10041 = vmatprep.subr.bf16.mxu0 %v12089_v62  ;;  %v2907_v62 = vld [vmem:[#allocation13 + $0x830] sm:$0xff]  ;;  %v2980_v52 = vld [vmem:[#allocation13 + $0xa78] sm:$0xff] }
 0x657   :  { %v12182_v14 = vcombine.low %v2907_v62, %v2915_v1 }
 0x658   :  { %9878 = vmatpush1.bf16.msra.mxu1 %v12086_v21  ;;  %v12168_v21 = vcombine.low %v2892_v53, %v2900_v54  ;;  %v12232_v53 = vcombine.low %v2956_v44, %v2964_v0 }
 0x659   :  { %10042 = vmatpush1.bf16.msra.mxu0 %v12088_v9  ;;  %9879 = vmatprep.subr.bf16.mxu1 %v12103_v6  ;;  %v12183_v9 = vcombine.high %v2907_v62, %v2915_v1  ;;  %v12185_v6 = vcombine.high %v2908_v2, %v2916_v5  ;;  %v2996_v62 = vld [vmem:[#allocation13 + $0xaf8] sm:$0xff] }
 0x65a   :  { %10043 = vmatprep.subr.bf16.mxu0 %v12105_v10  ;;  %v2923_v10 = vld [vmem:[#allocation13 + $0x8b0] sm:$0xff] }
 0x65b   :  { %v12198_v31 = vcombine.low %v2923_v10, %v2931_v13 }
 0x65c   :  { %9880 = vmatpush1.bf16.msra.mxu1 %v12102_v22  ;;  %v12184_v22 = vcombine.low %v2908_v2, %v2916_v5  ;;  %v12248_v2 = vcombine.low %v2972_v15, %v2980_v52 }
 0x65d   :  { %10044 = vmatpush1.bf16.msra.mxu0 %v12104_v23  ;;  %9881 = vmatprep.subr.bf16.mxu1 %v12119_v24  ;;  %v12199_v23 = vcombine.high %v2923_v10, %v2931_v13  ;;  %v2939_v24 = vld [vmem:[#allocation13 + $0x930] sm:$0xff]  ;;  %v3012_v10 = vld [vmem:[#allocation13 + $0xb78] sm:$0xff] }
 0x65e   :  { %10045 = vmatprep.subr.bf16.mxu0 %v12121_v25  ;;  %v2947_v25 = vld [vmem:[#allocation13 + $0x970] sm:$0xff] }
 0x65f   :  { %v12214_v60 = vcombine.low %v2939_v24, %v2947_v25 }
 0x660   :  { %9882 = vmatpush1.bf16.msra.mxu1 %v12118_v34  ;;  %v12200_v34 = vcombine.low %v2924_v43, %v2932_v19 }
 0x661   :  { %10046 = vmatpush1.bf16.msra.mxu0 %v12120_v35  ;;  %9883 = vmatprep.subr.bf16.mxu1 %v12135_v36  ;;  %v12215_v35 = vcombine.high %v2939_v24, %v2947_v25  ;;  %v12217_v36 = vcombine.high %v2940_v27, %v2948_v30  ;;  %v3020_v24 = vld [vmem:[#allocation13 + $0xbb8] sm:$0xff] }
 0x662   :  { %10047 = vmatprep.subr.bf16.mxu0 %v12137_v39  ;;  %v2955_v39 = vld [vmem:[#allocation13 + $0x9b0] sm:$0xff]  ;;  %v3028_v25 = vld [vmem:[#allocation13 + $0xbf8] sm:$0xff] }
 0x664   :  { %9884 = vmatpush1.bf16.msra.mxu1 %v12134_v47  ;;  %v12231_v47 = vcombine.high %v2955_v39, %v2963_v40 }
 0x665   :  { %10048 = vmatpush1.bf16.msra.mxu0 %v12136_v50  ;;  %9885 = vmatprep.subr.bf16.mxu1 %v12151_v17  ;;  %v12233_v50 = vcombine.high %v2956_v44, %v2964_v0  ;;  %v2971_v17 = vld [vmem:[#allocation13 + $0xa30] sm:$0xff]  ;;  %v12296_v44 = vcombine.low %v3020_v24, %v3028_v25 }
 0x666   :  { %10049 = vmatprep.subr.bf16.mxu0 %v12153_v51  ;;  %v2979_v51 = vld [vmem:[#allocation13 + $0xa70] sm:$0xff] }
 0x667   :  { %v12247_v54 = vcombine.high %v2971_v17, %v2979_v51  ;;  %v12246_v1 = vcombine.low %v2971_v17, %v2979_v51  ;;  %v3060_v17 = vld [vmem:[#allocation13 + $0xcf8] sm:$0xff] }
 0x668   :  { %9886 = vmatpush1.bf16.msra.mxu1 %v12150_v55  ;;  %v12249_v55 = vcombine.high %v2972_v15, %v2980_v52 }
 0x669   :  { %10050 = vmatpush1.bf16.msra.mxu0 %v12152_v56  ;;  %9887 = vmatprep.subr.bf16.mxu1 %v12167_v58  ;;  %v2987_v56 = vld [vmem:[#allocation13 + $0xab0] sm:$0xff] }
 0x66a   :  { %10051 = vmatprep.subr.bf16.mxu0 %v12169_v59  ;;  %v2995_v58 = vld [vmem:[#allocation13 + $0xaf0] sm:$0xff]  ;;  %v2988_v59 = vld [vmem:[#allocation13 + $0xab8] sm:$0xff] }
 0x66b   :  { %v12263_v5 = vcombine.high %v2987_v56, %v2995_v58  ;;  %v12262_v13 = vcombine.low %v2987_v56, %v2995_v58  ;;  %v3076_v56 = vld [vmem:[#allocation13 + $0xd78] sm:$0xff] }
 0x66c   :  { %9888 = vmatpush1.bf16.msra.mxu1 %v12166_v37  ;;  %v12265_v37 = vcombine.high %v2988_v59, %v2996_v62 }
 0x66d   :  { %10052 = vmatpush1.bf16.msra.mxu0 %v12168_v21  ;;  %9898 = vmatprep.subr.bf16.mxu1 %v12183_v9  ;;  %v3003_v21 = vld [vmem:[#allocation13 + $0xb30] sm:$0xff] }
 0x66e   :  { %10062 = vmatprep.subr.bf16.mxu0 %v12185_v6  ;;  %v3011_v9 = vld [vmem:[#allocation13 + $0xb70] sm:$0xff]  ;;  %v3004_v6 = vld [vmem:[#allocation13 + $0xb38] sm:$0xff] }
 0x66f   :  { %9890 = vmatmul.mubr.bf16.vlgmr.msra.gmra.mrb[24].mxu1 %v14087_v20  ;;  %v12279_v43 = vcombine.high %v3003_v21, %v3011_v9  ;;  %v12281_v19 = vcombine.high %v3004_v6, %v3012_v10 }
 0x670   :  { %10054 = vmatmul.mubr.bf16.vlgmr.msra.gmra.mrb[28].mxu0 %v14087_v20  ;;  %9899 = vmatpush1.bf16.msra.mxu1 %v12182_v14  ;;  %v12216_v20 = vcombine.low %v2940_v27, %v2948_v30  ;;  %v12264_v14 = vcombine.low %v2988_v59, %v2996_v62  ;;  %v12280_v27 = vcombine.low %v3004_v6, %v3012_v10 }
 0x671   :  { %9930 = vmatprep.mubr.bf16.mxu1 %v14091_v28  ;;  %10063 = vmatpush1.bf16.msra.mxu0 %v12184_v22  ;;  %v3019_v22 = vld [vmem:[#allocation13 + $0xbb0] sm:$0xff] }
 0x672   :  { %10094 = vmatprep.mubr.bf16.mxu0 %v14091_v28  ;;  %9900 = vmatprep.subr.bf16.mxu1 %v12199_v23  ;;  %v12230_v28 = vcombine.low %v2955_v39, %v2963_v40  ;;  %v3027_v23 = vld [vmem:[#allocation13 + $0xbf0] sm:$0xff]  ;;  %v3044_v39 = vld [vmem:[#allocation13 + $0xc78] sm:$0xff] }
 0x673   :  { %10064 = vmatprep.subr.bf16.mxu0 %v12201_v26  ;;  %v12278_v26 = vcombine.low %v3003_v21, %v3011_v9  ;;  %v12295_v30 = vcombine.high %v3019_v22, %v3027_v23  ;;  %v12294_v40 = vcombine.low %v3019_v22, %v3027_v23  ;;  %v3092_v21 = vld [vmem:[#allocation13 + $0xdf8] sm:$0xff] }
 0x674   :  { %9901 = vmatpush1.bf16.msra.mxu1 %v12198_v31  ;;  %v12297_v31 = vcombine.high %v3020_v24, %v3028_v25  ;;  %v3108_v22 = vld [vmem:[#allocation13 + $0xe78] sm:$0xff] }
 0x675   :  { %10065 = vmatpush1.bf16.msra.mxu0 %v12200_v34  ;;  %9902 = vmatprep.subr.bf16.mxu1 %v12215_v35  ;;  %v3035_v34 = vld [vmem:[#allocation13 + $0xc30] sm:$0xff] }
 0x676   :  { %10066 = vmatprep.subr.bf16.mxu0 %v12217_v36  ;;  %v3043_v35 = vld [vmem:[#allocation13 + $0xc70] sm:$0xff]  ;;  %v3036_v36 = vld [vmem:[#allocation13 + $0xc38] sm:$0xff] }
 0x677   :  { %v12311_v0 = vcombine.high %v3035_v34, %v3043_v35  ;;  %v12310_v51 = vcombine.low %v3035_v34, %v3043_v35  ;;  %v12312_v15 = vcombine.low %v3036_v36, %v3044_v39  ;;  %v3124_v34 = vld [vmem:[#allocation13 + $0xef8] sm:$0xff] }
 0x678   :  { %9903 = vmatpush1.bf16.msra.mxu1 %v12214_v60  ;;  %v12313_v60 = vcombine.high %v3036_v36, %v3044_v39 }
 0x679   :  { %10067 = vmatpush1.bf16.msra.mxu0 %v12216_v20  ;;  %9904 = vmatprep.subr.bf16.mxu1 %v12231_v47  ;;  %v3051_v20 = vld [vmem:[#allocation13 + $0xcb0] sm:$0xff] }
 0x67a   :  { %10068 = vmatprep.subr.bf16.mxu0 %v12233_v50  ;;  %v3059_v47 = vld [vmem:[#allocation13 + $0xcf0] sm:$0xff]  ;;  %v3052_v50 = vld [vmem:[#allocation13 + $0xcb8] sm:$0xff] }
 0x67b   :  { %v12327_v52 = vcombine.high %v3051_v20, %v3059_v47  ;;  %v12326_v58 = vcombine.low %v3051_v20, %v3059_v47  ;;  %v12328_v59 = vcombine.low %v3052_v50, %v3060_v17  ;;  %v3140_v20 = vld [vmem:[#allocation13 + $0xf78] sm:$0xff] }
 0x67c   :  { %9905 = vmatpush1.bf16.msra.mxu1 %v12230_v28  ;;  %v12329_v28 = vcombine.high %v3052_v50, %v3060_v17 }
 0x67d   :  { %10069 = vmatpush1.bf16.msra.mxu0 %v12232_v53  ;;  %9906 = vmatprep.subr.bf16.mxu1 %v12247_v54  ;;  %v3067_v53 = vld [vmem:[#allocation13 + $0xd30] sm:$0xff] }
 0x67e   :  { %10070 = vmatprep.subr.bf16.mxu0 %v12249_v55  ;;  %v3075_v54 = vld [vmem:[#allocation13 + $0xd70] sm:$0xff]  ;;  %v3068_v55 = vld [vmem:[#allocation13 + $0xd38] sm:$0xff] }
 0x67f   :  { %v12343_v62 = vcombine.high %v3067_v53, %v3075_v54  ;;  %v12342_v9 = vcombine.low %v3067_v53, %v3075_v54  ;;  %v12344_v6 = vcombine.low %v3068_v55, %v3076_v56  ;;  %v3156_v53 = vld [vmem:[#allocation13 + $0xff8] sm:$0xff] }
 0x680   :  { %9907 = vmatpush1.bf16.msra.mxu1 %v12246_v1  ;;  %v12345_v1 = vcombine.high %v3068_v55, %v3076_v56 }
 0x681   :  { %10071 = vmatpush1.bf16.msra.mxu0 %v12248_v2  ;;  %9908 = vmatprep.subr.bf16.mxu1 %v12263_v5  ;;  %v3083_v2 = vld [vmem:[#allocation13 + $0xdb0] sm:$0xff] }
 0x682   :  { %10072 = vmatprep.subr.bf16.mxu0 %v12265_v37  ;;  %v3091_v5 = vld [vmem:[#allocation13 + $0xdf0] sm:$0xff]  ;;  %v3084_v37 = vld [vmem:[#allocation13 + $0xdb8] sm:$0xff] }
 0x683   :  { %v12359_v10 = vcombine.high %v3083_v2, %v3091_v5  ;;  %v12358_v23 = vcombine.low %v3083_v2, %v3091_v5  ;;  %v12360_v24 = vcombine.low %v3084_v37, %v3092_v21  ;;  %v3172_v2 = vld [vmem:[#allocation13 + $0x1078] sm:$0xff] }
 0x684   :  { %9909 = vmatpush1.bf16.msra.mxu1 %v12262_v13  ;;  %v12361_v13 = vcombine.high %v3084_v37, %v3092_v21 }
 0x685   :  { %10073 = vmatpush1.bf16.msra.mxu0 %v12264_v14  ;;  %9910 = vmatprep.subr.bf16.mxu1 %v12279_v43  ;;  %v3099_v14 = vld [vmem:[#allocation13 + $0xe30] sm:$0xff] }
 0x686   :  { %10074 = vmatprep.subr.bf16.mxu0 %v12281_v19  ;;  %v3107_v43 = vld [vmem:[#allocation13 + $0xe70] sm:$0xff]  ;;  %v3100_v19 = vld [vmem:[#allocation13 + $0xe38] sm:$0xff] }
 0x687   :  { %v12375_v25 = vcombine.high %v3099_v14, %v3107_v43  ;;  %v12374_v35 = vcombine.low %v3099_v14, %v3107_v43  ;;  %v12376_v36 = vcombine.low %v3100_v19, %v3108_v22  ;;  %v3180_v14 = vld [vmem:[#allocation13 + $0x10b8] sm:$0xff] }
 0x688   :  { %9911 = vmatpush1.bf16.msra.mxu1 %v12278_v26  ;;  %v12377_v26 = vcombine.high %v3100_v19, %v3108_v22  ;;  %v3188_v43 = vld [vmem:[#allocation13 + $0x10f8] sm:$0xff] }
 0x689   :  { %10075 = vmatpush1.bf16.msra.mxu0 %v12280_v27  ;;  %9912 = vmatprep.subr.bf16.mxu1 %v12295_v30  ;;  %v3115_v27 = vld [vmem:[#allocation13 + $0xeb0] sm:$0xff] }
 0x68a   :  { %10076 = vmatprep.subr.bf16.mxu0 %v12297_v31  ;;  %v3123_v30 = vld [vmem:[#allocation13 + $0xef0] sm:$0xff]  ;;  %v3116_v31 = vld [vmem:[#allocation13 + $0xeb8] sm:$0xff] }
 0x68b   :  { %v12391_v39 = vcombine.high %v3115_v27, %v3123_v30  ;;  %v12390_v47 = vcombine.low %v3115_v27, %v3123_v30  ;;  %v12392_v50 = vcombine.low %v3116_v31, %v3124_v34  ;;  %v3204_v27 = vld [vmem:[#allocation13 + $0x1178] sm:$0xff] }
 0x68c   :  { %9913 = vmatpush1.bf16.msra.mxu1 %v12294_v40  ;;  %v12393_v40 = vcombine.high %v3116_v31, %v3124_v34  ;;  %v12456_v31 = vcombine.low %v3180_v14, %v3188_v43 }
 0x68d   :  { %10077 = vmatpush1.bf16.msra.mxu0 %v12296_v44  ;;  %9914 = vmatprep.subr.bf16.mxu1 %v12311_v0  ;;  %v3131_v44 = vld [vmem:[#allocation13 + $0xf30] sm:$0xff] }
 0x68e   :  { %10078 = vmatprep.subr.bf16.mxu0 %v12313_v60  ;;  %v3139_v0 = vld [vmem:[#allocation13 + $0xf70] sm:$0xff]  ;;  %v3132_v60 = vld [vmem:[#allocation13 + $0xf38] sm:$0xff] }
 0x68f   :  { %v12407_v17 = vcombine.high %v3131_v44, %v3139_v0  ;;  %v12406_v54 = vcombine.low %v3131_v44, %v3139_v0  ;;  %v12408_v55 = vcombine.low %v3132_v60, %v3140_v20  ;;  %v3220_v44 = vld [vmem:[#allocation13 + $0x11f8] sm:$0xff] }
 0x690   :  { %9915 = vmatpush1.bf16.msra.mxu1 %v12310_v51  ;;  %v12409_v51 = vcombine.high %v3132_v60, %v3140_v20 }
 0x691   :  { %10079 = vmatpush1.bf16.msra.mxu0 %v12312_v15  ;;  %9916 = vmatprep.subr.bf16.mxu1 %v12327_v52  ;;  %v3147_v15 = vld [vmem:[#allocation13 + $0xfb0] sm:$0xff] }
 0x692   :  { %10080 = vmatprep.subr.bf16.mxu0 %v12329_v28  ;;  %v3155_v52 = vld [vmem:[#allocation13 + $0xff0] sm:$0xff]  ;;  %v3148_v28 = vld [vmem:[#allocation13 + $0xfb8] sm:$0xff] }
 0x693   :  { %v12423_v56 = vcombine.high %v3147_v15, %v3155_v52  ;;  %v12422_v5 = vcombine.low %v3147_v15, %v3155_v52  ;;  %v12424_v37 = vcombine.low %v3148_v28, %v3156_v53 }
 0x694   :  { %9917 = vmatpush1.bf16.msra.mxu1 %v12326_v58  ;;  %v12425_v58 = vcombine.high %v3148_v28, %v3156_v53  ;;  %v3243_v53 = vld [vmem:[#allocation13 + $0x12b0] sm:$0xff] }
 0x695   :  { %10081 = vmatpush1.bf16.msra.mxu0 %v12328_v59  ;;  %9918 = vmatprep.subr.bf16.mxu1 %v12343_v62  ;;  %v3163_v59 = vld [vmem:[#allocation13 + $0x1030] sm:$0xff] }
 0x696   :  { %10082 = vmatprep.subr.bf16.mxu0 %v12345_v1  ;;  %v3171_v62 = vld [vmem:[#allocation13 + $0x1070] sm:$0xff]  ;;  %v3164_v1 = vld [vmem:[#allocation13 + $0x1038] sm:$0xff] }
 0x697   :  { %v12439_v21 = vcombine.high %v3163_v59, %v3171_v62  ;;  %v12440_v19 = vcombine.low %v3164_v1, %v3172_v2 }
 0x698   :  { %9919 = vmatpush1.bf16.msra.mxu1 %v12342_v9  ;;  %v12441_v9 = vcombine.high %v3164_v1, %v3172_v2  ;;  %v3259_v2 = vld [vmem:[#allocation13 + $0x1330] sm:$0xff] }
 0x699   :  { %10083 = vmatpush1.bf16.msra.mxu0 %v12344_v6  ;;  %9920 = vmatprep.subr.bf16.mxu1 %v12359_v10  ;;  %v3179_v6 = vld [vmem:[#allocation13 + $0x10b0] sm:$0xff] }
 0x69a   :  { %10084 = vmatprep.subr.bf16.mxu0 %v12361_v13  ;;  %v3187_v10 = vld [vmem:[#allocation13 + $0x10f0] sm:$0xff]  ;;  %v12438_v13 = vcombine.low %v3163_v59, %v3171_v62 }
 0x69b   :  { %v12455_v22 = vcombine.high %v3179_v6, %v3187_v10  ;;  %v12454_v30 = vcombine.low %v3179_v6, %v3187_v10 }
 0x69c   :  { %9921 = vmatpush1.bf16.msra.mxu1 %v12358_v23  ;;  %v3195_v23 = vld [vmem:[#allocation13 + $0x1130] sm:$0xff] }
 0x69d   :  { %10085 = vmatpush1.bf16.msra.mxu0 %v12360_v24  ;;  %9922 = vmatprep.subr.bf16.mxu1 %v12375_v25  ;;  %v3203_v24 = vld [vmem:[#allocation13 + $0x1170] sm:$0xff]  ;;  %v12457_v25 = vcombine.high %v3180_v14, %v3188_v43 }
 0x69e   :  { %10086 = vmatprep.subr.bf16.mxu0 %v12377_v26  ;;  %v3196_v26 = vld [vmem:[#allocation13 + $0x1138] sm:$0xff]  ;;  %v12471_v34 = vcombine.high %v3195_v23, %v3203_v24  ;;  %v12470_v0 = vcombine.low %v3195_v23, %v3203_v24  ;;  %v3275_v14 = vld [vmem:[#allocation13 + $0x13b0] sm:$0xff] }
 0x69f   :  { %v3283_v43 = vld [vmem:[#allocation13 + $0x13f0] sm:$0xff] }
 0x6a0   :  { %9923 = vmatpush1.bf16.msra.mxu1 %v12374_v35  ;;  %v12473_v35 = vcombine.high %v3196_v26, %v3204_v27 }
 0x6a1   :  { %10087 = vmatpush1.bf16.msra.mxu0 %v12376_v36  ;;  %9924 = vmatprep.subr.bf16.mxu1 %v12391_v39  ;;  %v3211_v36 = vld [vmem:[#allocation13 + $0x11b0] sm:$0xff] }
 0x6a2   :  { %10088 = vmatprep.subr.bf16.mxu0 %v12393_v40  ;;  %v3219_v39 = vld [vmem:[#allocation13 + $0x11f0] sm:$0xff]  ;;  %v3212_v40 = vld [vmem:[#allocation13 + $0x11b8] sm:$0xff] }
 0x6a3   :  { %v12487_v60 = vcombine.high %v3211_v36, %v3219_v39  ;;  %v12489_v20 = vcombine.high %v3212_v40, %v3220_v44  ;;  %v12488_v15 = vcombine.low %v3212_v40, %v3220_v44  ;;  %v3307_v44 = vld [vmem:[#allocation13 + $0x14b0] sm:$0xff] }
 0x6a4   :  { %9925 = vmatpush1.bf16.msra.mxu1 %v12390_v47  ;;  %v3227_v47 = vld [vmem:[#allocation13 + $0x1230] sm:$0xff] }
 0x6a5   :  { %10089 = vmatpush1.bf16.msra.mxu0 %v12392_v50  ;;  %9926 = vmatprep.subr.bf16.mxu1 %v12407_v17  ;;  %v3235_v50 = vld [vmem:[#allocation13 + $0x1270] sm:$0xff]  ;;  %v3228_v17 = vld [vmem:[#allocation13 + $0x1238] sm:$0xff] }
 0x6a6   :  { %10090 = vmatprep.subr.bf16.mxu0 %v12409_v51  ;;  %v3236_v51 = vld [vmem:[#allocation13 + $0x1278] sm:$0xff]  ;;  %v12503_v52 = vcombine.high %v3227_v47, %v3235_v50 }
 0x6a7   :  { %v12505_v28 = vcombine.high %v3228_v17, %v3236_v51  ;;  %v12504_v59 = vcombine.low %v3228_v17, %v3236_v51  ;;  %v3323_v51 = vld [vmem:[#allocation13 + $0x1530] sm:$0xff] }
 0x6a8   :  { %9927 = vmatpush1.bf16.msra.mxu1 %v12406_v54  ;;  %v3251_v54 = vld [vmem:[#allocation13 + $0x12f0] sm:$0xff] }
 0x6a9   :  { %10091 = vmatpush1.bf16.msra.mxu0 %v12408_v55  ;;  %9928 = vmatprep.subr.bf16.mxu1 %v12423_v56  ;;  %v3244_v55 = vld [vmem:[#allocation13 + $0x12b8] sm:$0xff]  ;;  %v12519_v62 = vcombine.high %v3243_v53, %v3251_v54 }
 0x6aa   :  { %10092 = vmatprep.subr.bf16.mxu0 %v12425_v58  ;;  %v3252_v56 = vld [vmem:[#allocation13 + $0x12f8] sm:$0xff]  ;;  %v12502_v58 = vcombine.low %v3227_v47, %v3235_v50 }
 0x6ab   :  { %v12521_v1 = vcombine.high %v3244_v55, %v3252_v56  ;;  %v12520_v6 = vcombine.low %v3244_v55, %v3252_v56  ;;  %v3339_v56 = vld [vmem:[#allocation13 + $0x15b0] sm:$0xff] }
 0x6ac   :  { %9929 = vmatpush1.bf16.msra.mxu1 %v12422_v5  ;;  %v3267_v5 = vld [vmem:[#allocation13 + $0x1370] sm:$0xff] }
 0x6ad   :  { %10093 = vmatpush1.bf16.msra.mxu0 %v12424_v37  ;;  %9939 = vmatprep.subr.bf16.mxu1 %v12439_v21  ;;  %v3260_v37 = vld [vmem:[#allocation13 + $0x1338] sm:$0xff]  ;;  %v12535_v10 = vcombine.high %v3259_v2, %v3267_v5  ;;  %v12534_v23 = vcombine.low %v3259_v2, %v3267_v5 }
 0x6ae   :  { %10103 = vmatprep.subr.bf16.mxu0 %v12441_v9  ;;  %v3268_v21 = vld [vmem:[#allocation13 + $0x1378] sm:$0xff]  ;;  %v12518_v9 = vcombine.low %v3243_v53, %v3251_v54 }
 0x6af   :  { %9931 = vmatmul.mubr.bf16.vlgmr.msra.gmra.mrb[24].mxu1 %v14100_v48  ;;  %v12536_v24 = vcombine.low %v3260_v37, %v3268_v21 }
 0x6b0   :  { %10095 = vmatmul.mubr.bf16.vlgmr.msra.gmra.mrb[28].mxu0 %v14100_v48  ;;  %9940 = vmatpush1.bf16.msra.mxu1 %v12438_v13  ;;  %v12472_v48 = vcombine.low %v3196_v26, %v3204_v27  ;;  %v12537_v13 = vcombine.high %v3260_v37, %v3268_v21  ;;  %v3291_v27 = vld [vmem:[#allocation13 + $0x1430] sm:$0xff] }
 0x6b1   :  { %9971 = vmatprep.mubr.bf16.mxu1 %v14121_v29  ;;  %10104 = vmatpush1.bf16.msra.mxu0 %v12440_v19  ;;  %v3276_v19 = vld [vmem:[#allocation13 + $0x13b8] sm:$0xff]  ;;  %v3355_v21 = vld [vmem:[#allocation13 + $0x1630] sm:$0xff] }
 0x6b2   :  { %10135 = vmatprep.mubr.bf16.mxu0 %v14121_v29  ;;  %9941 = vmatprep.subr.bf16.mxu1 %v12455_v22  ;;  %v12486_v29 = vcombine.low %v3211_v36, %v3219_v39  ;;  %v3284_v22 = vld [vmem:[#allocation13 + $0x13f8] sm:$0xff] }
 0x6b3   :  { %10105 = vmatprep.subr.bf16.mxu0 %v12457_v25  ;;  %v12551_v25 = vcombine.high %v3275_v14, %v3283_v43  ;;  %v12553_v26 = vcombine.high %v3276_v19, %v3284_v22  ;;  %v12552_v36 = vcombine.low %v3276_v19, %v3284_v22  ;;  %v3371_v22 = vld [vmem:[#allocation13 + $0x16b0] sm:$0xff] }
 0x6b4   :  { %9942 = vmatpush1.bf16.msra.mxu1 %v12454_v30  ;;  %v3299_v30 = vld [vmem:[#allocation13 + $0x1470] sm:$0xff] }
 0x6b5   :  { %10106 = vmatpush1.bf16.msra.mxu0 %v12456_v31  ;;  %9943 = vmatprep.subr.bf16.mxu1 %v12471_v34  ;;  %v3292_v31 = vld [vmem:[#allocation13 + $0x1438] sm:$0xff]  ;;  %v12567_v39 = vcombine.high %v3291_v27, %v3299_v30 }
 0x6b6   :  { %10107 = vmatprep.subr.bf16.mxu0 %v12473_v35  ;;  %v3300_v34 = vld [vmem:[#allocation13 + $0x1478] sm:$0xff]  ;;  %v12550_v35 = vcombine.low %v3275_v14, %v3283_v43 }
 0x6b7   :  { %v12569_v40 = vcombine.high %v3292_v31, %v3300_v34  ;;  %v12568_v47 = vcombine.low %v3292_v31, %v3300_v34  ;;  %v3387_v34 = vld [vmem:[#allocation13 + $0x1730] sm:$0xff] }
 0x6b8   :  { %9944 = vmatpush1.bf16.msra.mxu1 %v12470_v0  ;;  %v3315_v0 = vld [vmem:[#allocation13 + $0x14f0] sm:$0xff] }
 0x6b9   :  { %10108 = vmatpush1.bf16.msra.mxu0 %v12472_v48  ;;  %9945 = vmatprep.subr.bf16.mxu1 %v12487_v60  ;;  %v3308_v48 = vld [vmem:[#allocation13 + $0x14b8] sm:$0xff]  ;;  %v12583_v50 = vcombine.high %v3307_v44, %v3315_v0 }
 0x6ba   :  { %10109 = vmatprep.subr.bf16.mxu0 %v12489_v20  ;;  %v3316_v60 = vld [vmem:[#allocation13 + $0x14f8] sm:$0xff]  ;;  %v12566_v20 = vcombine.low %v3291_v27, %v3299_v30 }
 0x6bb   :  { %v12585_v17 = vcombine.high %v3308_v48, %v3316_v60  ;;  %v12584_v53 = vcombine.low %v3308_v48, %v3316_v60  ;;  %v3403_v60 = vld [vmem:[#allocation13 + $0x17b0] sm:$0xff] }
 0x6bc   :  { %9946 = vmatpush1.bf16.msra.mxu1 %v12486_v29  ;;  %v3331_v29 = vld [vmem:[#allocation13 + $0x1570] sm:$0xff] }
 0x6bd   :  { %10110 = vmatpush1.bf16.msra.mxu0 %v12488_v15  ;;  %9947 = vmatprep.subr.bf16.mxu1 %v12503_v52  ;;  %v3324_v15 = vld [vmem:[#allocation13 + $0x1538] sm:$0xff]  ;;  %v12599_v54 = vcombine.high %v3323_v51, %v3331_v29 }
 0x6be   :  { %10111 = vmatprep.subr.bf16.mxu0 %v12505_v28  ;;  %v3332_v52 = vld [vmem:[#allocation13 + $0x1578] sm:$0xff]  ;;  %v12582_v28 = vcombine.low %v3307_v44, %v3315_v0 }
 0x6bf   :  { %v12601_v55 = vcombine.high %v3324_v15, %v3332_v52  ;;  %v12600_v2 = vcombine.low %v3324_v15, %v3332_v52  ;;  %v3419_v52 = vld [vmem:[#allocation13 + $0x1830] sm:$0xff] }
 0x6c0   :  { %9948 = vmatpush1.bf16.msra.mxu1 %v12502_v58  ;;  %v3347_v58 = vld [vmem:[#allocation13 + $0x15f0] sm:$0xff] }
 0x6c1   :  { %10112 = vmatpush1.bf16.msra.mxu0 %v12504_v59  ;;  %9949 = vmatprep.subr.bf16.mxu1 %v12519_v62  ;;  %v3340_v59 = vld [vmem:[#allocation13 + $0x15b8] sm:$0xff]  ;;  %v12615_v5 = vcombine.high %v3339_v56, %v3347_v58 }
 0x6c2   :  { %10113 = vmatprep.subr.bf16.mxu0 %v12521_v1  ;;  %v3348_v62 = vld [vmem:[#allocation13 + $0x15f8] sm:$0xff]  ;;  %v12598_v1 = vcombine.low %v3323_v51, %v3331_v29 }
 0x6c3   :  { %v12617_v37 = vcombine.high %v3340_v59, %v3348_v62  ;;  %v12616_v14 = vcombine.low %v3340_v59, %v3348_v62  ;;  %v3435_v62 = vld [vmem:[#allocation13 + $0x18b0] sm:$0xff] }
 0x6c4   :  { %9950 = vmatpush1.bf16.msra.mxu1 %v12518_v9  ;;  %v3363_v9 = vld [vmem:[#allocation13 + $0x1670] sm:$0xff] }
 0x6c5   :  { %10114 = vmatpush1.bf16.msra.mxu0 %v12520_v6  ;;  %9951 = vmatprep.subr.bf16.mxu1 %v12535_v10  ;;  %v3356_v6 = vld [vmem:[#allocation13 + $0x1638] sm:$0xff]  ;;  %v12631_v43 = vcombine.high %v3355_v21, %v3363_v9 }
 0x6c6   :  { %10115 = vmatprep.subr.bf16.mxu0 %v12537_v13  ;;  %v3364_v10 = vld [vmem:[#allocation13 + $0x1678] sm:$0xff]  ;;  %v12614_v13 = vcombine.low %v3339_v56, %v3347_v58 }
 0x6c7   :  { %v12633_v19 = vcombine.high %v3356_v6, %v3364_v10  ;;  %v12632_v27 = vcombine.low %v3356_v6, %v3364_v10  ;;  %v3451_v6 = vld [vmem:[#allocation13 + $0x1930] sm:$0xff] }
 0x6c8   :  { %9952 = vmatpush1.bf16.msra.mxu1 %v12534_v23  ;;  %v3379_v23 = vld [vmem:[#allocation13 + $0x16f0] sm:$0xff] }
 0x6c9   :  { %10116 = vmatpush1.bf16.msra.mxu0 %v12536_v24  ;;  %9953 = vmatprep.subr.bf16.mxu1 %v12551_v25  ;;  %v3372_v24 = vld [vmem:[#allocation13 + $0x16b8] sm:$0xff]  ;;  %v12647_v30 = vcombine.high %v3371_v22, %v3379_v23  ;;  %v3459_v10 = vld [vmem:[#allocation13 + $0x1970] sm:$0xff] }
 0x6ca   :  { %10117 = vmatprep.subr.bf16.mxu0 %v12553_v26  ;;  %v3380_v25 = vld [vmem:[#allocation13 + $0x16f8] sm:$0xff]  ;;  %v12630_v26 = vcombine.low %v3355_v21, %v3363_v9 }
 0x6cb   :  { %v12649_v31 = vcombine.high %v3372_v24, %v3380_v25  ;;  %v12648_v44 = vcombine.low %v3372_v24, %v3380_v25  ;;  %v3467_v25 = vld [vmem:[#allocation13 + $0x19b0] sm:$0xff] }
 0x6cc   :  { %9954 = vmatpush1.bf16.msra.mxu1 %v12550_v35  ;;  %v3395_v35 = vld [vmem:[#allocation13 + $0x1770] sm:$0xff] }
 0x6cd   :  { %10118 = vmatpush1.bf16.msra.mxu0 %v12552_v36  ;;  %9955 = vmatprep.subr.bf16.mxu1 %v12567_v39  ;;  %v3388_v36 = vld [vmem:[#allocation13 + $0x1738] sm:$0xff]  ;;  %v12663_v0 = vcombine.high %v3387_v34, %v3395_v35 }
 0x6ce   :  { %10119 = vmatprep.subr.bf16.mxu0 %v12569_v40  ;;  %v3396_v39 = vld [vmem:[#allocation13 + $0x1778] sm:$0xff]  ;;  %v12646_v40 = vcombine.low %v3371_v22, %v3379_v23  ;;  %v12727_v23 = vcombine.high %v3451_v6, %v3459_v10 }
 0x6cf   :  { %v12665_v48 = vcombine.high %v3388_v36, %v3396_v39  ;;  %v12664_v51 = vcombine.low %v3388_v36, %v3396_v39  ;;  %v3483_v36 = vld [vmem:[#allocation13 + $0x1a30] sm:$0xff] }
 0x6d0   :  { %9956 = vmatpush1.bf16.msra.mxu1 %v12566_v20  ;;  %v3411_v20 = vld [vmem:[#allocation13 + $0x17f0] sm:$0xff] }
 0x6d1   :  { %10120 = vmatpush1.bf16.msra.mxu0 %v12568_v47  ;;  %9957 = vmatprep.subr.bf16.mxu1 %v12583_v50  ;;  %v3404_v47 = vld [vmem:[#allocation13 + $0x17b8] sm:$0xff]  ;;  %v12679_v29 = vcombine.high %v3403_v60, %v3411_v20  ;;  %v3491_v39 = vld [vmem:[#allocation13 + $0x1a70] sm:$0xff] }
 0x6d2   :  { %10121 = vmatprep.subr.bf16.mxu0 %v12585_v17  ;;  %v3412_v50 = vld [vmem:[#allocation13 + $0x17f8] sm:$0xff]  ;;  %v12662_v17 = vcombine.low %v3387_v34, %v3395_v35 }
 0x6d3   :  { %v12681_v15 = vcombine.high %v3404_v47, %v3412_v50  ;;  %v12680_v56 = vcombine.low %v3404_v47, %v3412_v50  ;;  %v3507_v47 = vld [vmem:[#allocation13 + $0x1af0] sm:$0xff]  ;;  %v3500_v50 = vld [vmem:[#allocation13 + $0x1ab8] sm:$0xff] }
 0x6d4   :  { %9958 = vmatpush1.bf16.msra.mxu1 %v12582_v28  ;;  %v3427_v28 = vld [vmem:[#allocation13 + $0x1870] sm:$0xff] }
 0x6d5   :  { %10122 = vmatpush1.bf16.msra.mxu0 %v12584_v53  ;;  %9959 = vmatprep.subr.bf16.mxu1 %v12599_v54  ;;  %v3420_v53 = vld [vmem:[#allocation13 + $0x1838] sm:$0xff]  ;;  %v12695_v58 = vcombine.high %v3419_v52, %v3427_v28 }
 0x6d6   :  { %10123 = vmatprep.subr.bf16.mxu0 %v12601_v55  ;;  %v3428_v54 = vld [vmem:[#allocation13 + $0x1878] sm:$0xff]  ;;  %v12678_v55 = vcombine.low %v3403_v60, %v3411_v20  ;;  %v3499_v20 = vld [vmem:[#allocation13 + $0x1ab0] sm:$0xff] }
 0x6d7   :  { %v12697_v59 = vcombine.high %v3420_v53, %v3428_v54  ;;  %v12696_v21 = vcombine.low %v3420_v53, %v3428_v54  ;;  %v3523_v53 = vld [vmem:[#allocation13 + $0x1b70] sm:$0xff]  ;;  %v3516_v54 = vld [vmem:[#allocation13 + $0x1b38] sm:$0xff] }
 0x6d8   :  { %9960 = vmatpush1.bf16.msra.mxu1 %v12598_v1  ;;  %v3443_v1 = vld [vmem:[#allocation13 + $0x18f0] sm:$0xff] }
 0x6d9   :  { %10124 = vmatpush1.bf16.msra.mxu0 %v12600_v2  ;;  %9961 = vmatprep.subr.bf16.mxu1 %v12615_v5  ;;  %v12694_v2 = vcombine.low %v3419_v52, %v3427_v28  ;;  %v3436_v5 = vld [vmem:[#allocation13 + $0x18b8] sm:$0xff]  ;;  %v12711_v9 = vcombine.high %v3435_v62, %v3443_v1  ;;  %v3515_v28 = vld [vmem:[#allocation13 + $0x1b30] sm:$0xff] }
 0x6da   :  { %10125 = vmatprep.subr.bf16.mxu0 %v12617_v37  ;;  %v3444_v37 = vld [vmem:[#allocation13 + $0x18f8] sm:$0xff] }
 0x6db   :  { %v12712_v22 = vcombine.low %v3436_v5, %v3444_v37 }
 0x6dc   :  { %9962 = vmatpush1.bf16.msra.mxu1 %v12614_v13  ;;  %v12713_v13 = vcombine.high %v3436_v5, %v3444_v37  ;;  %v3539_v5 = vld [vmem:[#allocation13 + $0x1bf0] sm:$0xff] }
 0x6dd   :  { %10126 = vmatpush1.bf16.msra.mxu0 %v12616_v14  ;;  %9963 = vmatprep.subr.bf16.mxu1 %v12631_v43  ;;  %v3452_v14 = vld [vmem:[#allocation13 + $0x1938] sm:$0xff] }
 0x6de   :  { %10127 = vmatprep.subr.bf16.mxu0 %v12633_v19  ;;  %v3460_v43 = vld [vmem:[#allocation13 + $0x1978] sm:$0xff]  ;;  %v12710_v19 = vcombine.low %v3435_v62, %v3443_v1 }
 0x6df   :  { %v12729_v24 = vcombine.high %v3452_v14, %v3460_v43 }
 0x6e0   :  { %9964 = vmatpush1.bf16.msra.mxu1 %v12630_v26  ;;  %v3475_v26 = vld [vmem:[#allocation13 + $0x19f0] sm:$0xff] }
 0x6e1   :  { %10128 = vmatpush1.bf16.msra.mxu0 %v12632_v27  ;;  %9965 = vmatprep.subr.bf16.mxu1 %v12647_v30  ;;  %v3468_v27 = vld [vmem:[#allocation13 + $0x19b8] sm:$0xff]  ;;  %v12743_v34 = vcombine.high %v3467_v25, %v3475_v26 }
 0x6e2   :  { %10129 = vmatprep.subr.bf16.mxu0 %v12649_v31  ;;  %v3476_v30 = vld [vmem:[#allocation13 + $0x19f8] sm:$0xff]  ;;  %v12726_v31 = vcombine.low %v3451_v6, %v3459_v10 }
 0x6e3   :  { %v12745_v35 = vcombine.high %v3468_v27, %v3476_v30  ;;  %v3540_v6 = vld [vmem:[#allocation13 + $0x1bf8] sm:$0xff] }
 0x6e4   :  { %9966 = vmatpush1.bf16.msra.mxu1 %v12646_v40  ;;  %v3484_v40 = vld [vmem:[#allocation13 + $0x1a38] sm:$0xff] }
 0x6e5   :  { %10130 = vmatpush1.bf16.msra.mxu0 %v12648_v44  ;;  %9967 = vmatprep.subr.bf16.mxu1 %v12663_v0  ;;  %v3492_v44 = vld [vmem:[#allocation13 + $0x1a78] sm:$0xff]  ;;  %v12744_v0 = vcombine.low %v3468_v27, %v3476_v30  ;;  %v3555_v27 = vld [vmem:[#allocation13 + $0x1c70] sm:$0xff] }
 0x6e6   :  { %10131 = vmatprep.subr.bf16.mxu0 %v12665_v48  ;;  %v12759_v48 = vcombine.high %v3483_v36, %v3491_v39  ;;  %v12761_v60 = vcombine.high %v3484_v40, %v3492_v44  ;;  %v3548_v30 = vld [vmem:[#allocation13 + $0x1c38] sm:$0xff] }
 0x6e8   :  { %9968 = vmatpush1.bf16.msra.mxu1 %v12662_v17  ;;  %v3508_v17 = vld [vmem:[#allocation13 + $0x1af8] sm:$0xff] }
 0x6e9   :  { %10132 = vmatpush1.bf16.msra.mxu0 %v12664_v51  ;;  %9969 = vmatprep.subr.bf16.mxu1 %v12679_v29  ;;  %v12758_v51 = vcombine.low %v3483_v36, %v3491_v39  ;;  %v12760_v29 = vcombine.low %v3484_v40, %v3492_v44  ;;  %v12777_v52 = vcombine.high %v3500_v50, %v3508_v17  ;;  %v3563_v39 = vld [vmem:[#allocation13 + $0x1cb0] sm:$0xff]  ;;  %v3564_v44 = vld [vmem:[#allocation13 + $0x1cb8] sm:$0xff] }
 0x6ea   :  { %10133 = vmatprep.subr.bf16.mxu0 %v12681_v15  ;;  %v12775_v15 = vcombine.high %v3499_v20, %v3507_v47  ;;  %v3571_v40 = vld [vmem:[#allocation13 + $0x1cf0] sm:$0xff] }
 0x6ec   :  { %9970 = vmatpush1.bf16.msra.mxu1 %v12678_v55  ;;  %v3524_v55 = vld [vmem:[#allocation13 + $0x1b78] sm:$0xff] }
 0x6ed   :  { %10134 = vmatpush1.bf16.msra.mxu0 %v12680_v56  ;;  %9980 = vmatprep.subr.bf16.mxu1 %v12695_v58  ;;  %v12774_v56 = vcombine.low %v3499_v20, %v3507_v47  ;;  %v12776_v58 = vcombine.low %v3500_v50, %v3508_v17  ;;  %v12793_v1 = vcombine.high %v3516_v54, %v3524_v55  ;;  %v3579_v47 = vld [vmem:[#allocation13 + $0x1d30] sm:$0xff]  ;;  %v3580_v17 = vld [vmem:[#allocation13 + $0x1d38] sm:$0xff] }
 0x6ee   :  { %10144 = vmatprep.subr.bf16.mxu0 %v12697_v59  ;;  %v12791_v59 = vcombine.high %v3515_v28, %v3523_v53  ;;  %v3587_v50 = vld [vmem:[#allocation13 + $0x1d70] sm:$0xff] }
 0x6ef   :  { %9972 = vmatmul.mubr.bf16.vlgmr.msra.gmra.mrb[24].mxu1 %v14123_v32 }
 0x6f0   :  { %10136 = vmatmul.mubr.bf16.vlgmr.msra.gmra.mrb[28].mxu0 %v14123_v32  ;;  %9981 = vmatpush1.bf16.msra.mxu1 %v12694_v2  ;;  %v12728_v32 = vcombine.low %v3452_v14, %v3460_v43  ;;  %v3531_v2 = vld [vmem:[#allocation13 + $0x1bb0] sm:$0xff]  ;;  %v12790_v14 = vcombine.low %v3515_v28, %v3523_v53 }
 0x6f1   :  { %10012 = vmatprep.mubr.bf16.mxu1 %v14127_v41  ;;  %10145 = vmatpush1.bf16.msra.mxu0 %v12696_v21  ;;  %v3595_v53 = vld [vmem:[#allocation13 + $0x1db0] sm:$0xff] }
 0x6f2   :  { %10176 = vmatprep.mubr.bf16.mxu0 %v14127_v41  ;;  %9982 = vmatprep.subr.bf16.mxu1 %v12711_v9  ;;  %v12742_v41 = vcombine.low %v3467_v25, %v3475_v26  ;;  %v3532_v9 = vld [vmem:[#allocation13 + $0x1bb8] sm:$0xff]  ;;  %v3547_v26 = vld [vmem:[#allocation13 + $0x1c30] sm:$0xff] }
 0x6f3   :  { %10146 = vmatprep.subr.bf16.mxu0 %v12713_v13  ;;  %v12809_v25 = vcombine.high %v3532_v9, %v3540_v6 }
 0x6f4   :  { %9983 = vmatpush1.bf16.msra.mxu1 %v12710_v19 }
 0x6f5   :  { %10147 = vmatpush1.bf16.msra.mxu0 %v12712_v22  ;;  %9984 = vmatprep.subr.bf16.mxu1 %v12727_v23  ;;  %v12792_v22 = vcombine.low %v3516_v54, %v3524_v55  ;;  %v12807_v23 = vcombine.high %v3531_v2, %v3539_v5  ;;  %v3603_v54 = vld [vmem:[#allocation13 + $0x1df0] sm:$0xff]  ;;  %v3596_v55 = vld [vmem:[#allocation13 + $0x1db8] sm:$0xff] }
 0x6f6   :  { %10148 = vmatprep.subr.bf16.mxu0 %v12729_v24 }
 0x6f8   :  { %9985 = vmatpush1.bf16.msra.mxu1 %v12726_v31  ;;  %v3556_v31 = vld [vmem:[#allocation13 + $0x1c78] sm:$0xff] }
 0x6f9   :  { %10149 = vmatpush1.bf16.msra.mxu0 %v12728_v32  ;;  %9986 = vmatprep.subr.bf16.mxu1 %v12743_v34  ;;  %v12806_v32 = vcombine.low %v3531_v2, %v3539_v5  ;;  %v12808_v34 = vcombine.low %v3532_v9, %v3540_v6  ;;  %v12825_v36 = vcombine.high %v3548_v30, %v3556_v31  ;;  %v3611_v5 = vld [vmem:[#allocation13 + $0x1e30] sm:$0xff]  ;;  %v3612_v6 = vld [vmem:[#allocation13 + $0x1e38] sm:$0xff] }
 0x6fa   :  { %10150 = vmatprep.subr.bf16.mxu0 %v12745_v35  ;;  %v12823_v35 = vcombine.high %v3547_v26, %v3555_v27  ;;  %v3619_v9 = vld [vmem:[#allocation13 + $0x1e70] sm:$0xff] }
 0x6fc   :  { %9987 = vmatpush1.bf16.msra.mxu1 %v12742_v41  ;;  %v3572_v41 = vld [vmem:[#allocation13 + $0x1cf8] sm:$0xff] }
 0x6fd   :  { %10151 = vmatpush1.bf16.msra.mxu0 %v12744_v0  ;;  %9988 = vmatprep.subr.bf16.mxu1 %v12759_v48  ;;  %v12822_v0 = vcombine.low %v3547_v26, %v3555_v27  ;;  %v12824_v48 = vcombine.low %v3548_v30, %v3556_v31  ;;  %v12841_v20 = vcombine.high %v3564_v44, %v3572_v41  ;;  %v3636_v26 = vld [vmem:[#allocation13 + $0x1ef8] sm:$0xff] }
 0x6fe   :  { %10152 = vmatprep.subr.bf16.mxu0 %v12761_v60  ;;  %v12839_v60 = vcombine.high %v3563_v39, %v3571_v40  ;;  %v12886_v27 = vcombine.low %v3611_v5, %v3619_v9 }
 0x700   :  { %9989 = vmatpush1.bf16.msra.mxu1 %v12758_v51  ;;  %v3588_v51 = vld [vmem:[#allocation13 + $0x1d78] sm:$0xff] }
 0x701   :  { %10153 = vmatpush1.bf16.msra.mxu0 %v12760_v29  ;;  %9990 = vmatprep.subr.bf16.mxu1 %v12775_v15  ;;  %v12838_v29 = vcombine.low %v3563_v39, %v3571_v40  ;;  %v12840_v15 = vcombine.low %v3564_v44, %v3572_v41  ;;  %v12857_v28 = vcombine.high %v3580_v17, %v3588_v51  ;;  %v3652_v39 = vld [vmem:[#allocation13 + $0x1f78] sm:$0xff]  ;;  %v14212_v40 = vld [vmem:[#allocation14] sm:$0xff] }
 0x702   :  { %v14204_v62 = vpop.f32.mrb[20].mxu1  ;;  %10154 = vmatprep.subr.bf16.mxu0 %v12777_v52  ;;  %v12855_v52 = vcombine.high %v3579_v47, %v3587_v50 }
 0x703   :  { %v14206_v37 = vpop.f32.mrb[24].mxu0  ;;  %v14208_v21 = vpop.f32.mrb[21].mxu1 }
 0x704   :  { %v14210_v10 = vpop.f32.mrb[25].mxu0  ;;  %v9690_v13 = vpop.f32.mrb[22].mxu1  ;;  %9991 = vmatpush1.bf16.msra.mxu1 %v12774_v56  ;;  %v3604_v56 = vld [vmem:[#allocation13 + $0x1df8] sm:$0xff] }
 0x705   :  { %v9854_v43 = vpop.f32.mrb[26].mxu0  ;;  %10155 = vmatpush1.bf16.msra.mxu0 %v12776_v58  ;;  %v9691_v19 = vpop.f32.mrb[23].mxu1  ;;  %9992 = vmatprep.subr.bf16.mxu1 %v12791_v59  ;;  %v12854_v58 = vcombine.low %v3579_v47, %v3587_v50  ;;  %v12856_v59 = vcombine.low %v3580_v17, %v3588_v51  ;;  %v12873_v2 = vcombine.high %v3596_v55, %v3604_v56  ;;  %v3620_v13 = vld [vmem:[#allocation13 + $0x1e78] sm:$0xff] }
 0x706   :  { %v9855_v24 = vpop.f32.mrb[27].mxu0  ;;  %10156 = vmatprep.subr.bf16.mxu0 %v12793_v1  ;;  %v12871_v1 = vcombine.high %v3595_v53, %v3603_v54  ;;  %v12872_v43 = vcombine.low %v3596_v55, %v3604_v56  ;;  %v12887_v19 = vcombine.high %v3611_v5, %v3619_v9  ;;  %v12888_v30 = vcombine.low %v3612_v6, %v3620_v13  ;;  %v3660_v50 = vld [vmem:[#allocation13 + $0x1fb8] sm:$0xff] }
 0x707   :  { %v3635_v24 = vld [vmem:[#allocation13 + $0x1ef0] sm:$0xff]  ;;  %v3680_v47 = vrot.slane %v14212_v40, %v14028_v18  ;;  %v3668_v17 = vld [vmem:[#allocation13 + $0x1ff8] sm:$0xff]  ;;  %v3688_v51 = vrot.slane %v14212_v40, %v14035_v38 }
 0x708   :  { %9993 = vmatpush1.bf16.msra.mxu1 %v12790_v14  ;;  %v12870_v14 = vcombine.low %v3595_v53, %v3603_v54  ;;  %v12936_v56 = vcombine.low %v3660_v50, %v3668_v17  ;;  %v13503_v5 = vld [vmem:[%s14670_s9 + $0x48] sm:$0xff]  }
 0x709   :  { %10157 = vmatpush1.bf16.msra.mxu0 %v12792_v22  ;;  %9994 = vmatprep.subr.bf16.mxu1 %v12807_v23  ;;  %v12889_v22 = vcombine.high %v3612_v6, %v3620_v13  ;;  %v3627_v23 = vld [vmem:[#allocation13 + $0x1eb0] sm:$0xff]  ;;  %v13252_v53 = vadd.f32 %v14160_v11, %v3680_v47  ;;  %v13254_v54 = vadd.f32 %v14162_v12, %v3688_v51  ;;  %v13504_v6 = vld [vmem:[%s14670_s9 + $0xc8] sm:$0xff]   ;;  %v13526_v51 = vld [vmem:[%s14670_s9 + $0xb0] sm:$0xff]  }
 0x70a   :  { %10158 = vmatprep.subr.bf16.mxu0 %v12809_v25  ;;  %v3628_v25 = vld [vmem:[#allocation13 + $0x1eb8] sm:$0xff]  ;;  %v12903_v31 = vcombine.high %v3627_v23, %v3635_v24  ;;  %v12902_v44 = vcombine.low %v3627_v23, %v3635_v24  ;;  %v13510_v23 = vld [vmem:[%s14670_s9 + $0x90] sm:$0xff]   ;;  %v13511_v24 = vld [vmem:[%s14670_s9 + $0x58] sm:$0xff]   ;;  %v3704_v47 = vrot.slane %v14212_v40, %v14111_v49 }
 0x70b   :  { %v12904_v41 = vcombine.low %v3628_v25, %v3636_v26  ;;  %v13501_v11 = vld [vmem:[%s14670_s9] sm:$0xff]  }
 0x70c   :  { %9995 = vmatpush1.bf16.msra.mxu1 %v12806_v32  ;;  %v12905_v32 = vcombine.high %v3628_v25, %v3636_v26  ;;  %v13502_v12 = vld [vmem:[%s14670_s9 + $0x80] sm:$0xff]   ;;  %v13512_v25 = vld [vmem:[%s14670_s9 + $0xd8] sm:$0xff]  }
 0x70d   :  { %10159 = vmatpush1.bf16.msra.mxu0 %v12808_v34  ;;  %9996 = vmatprep.subr.bf16.mxu1 %v12823_v35  ;;  %v3643_v34 = vld [vmem:[#allocation13 + $0x1f30] sm:$0xff] }
 0x70e   :  { %10160 = vmatprep.subr.bf16.mxu0 %v12825_v36  ;;  %v3651_v35 = vld [vmem:[#allocation13 + $0x1f70] sm:$0xff]  ;;  %v3644_v36 = vld [vmem:[#allocation13 + $0x1f38] sm:$0xff] }
 0x70f   :  { %v13513_v26 = vld [vmem:[%s14670_s9 + $0x18] sm:$0xff]  }
 0x710   :  { %9997 = vmatpush1.bf16.msra.mxu1 %v12822_v0  ;;  %v12919_v0 = vcombine.high %v3643_v34, %v3651_v35 }
 0x711   :  { %10161 = vmatpush1.bf16.msra.mxu0 %v12824_v48  ;;  %9998 = vmatprep.subr.bf16.mxu1 %v12839_v60  ;;  %v12921_v48 = vcombine.high %v3644_v36, %v3652_v39  ;;  %v3659_v60 = vld [vmem:[#allocation13 + $0x1fb0] sm:$0xff] }
 0x712   :  { %10162 = vmatprep.subr.bf16.mxu0 %v12841_v20  ;;  %v3667_v20 = vld [vmem:[#allocation13 + $0x1ff0] sm:$0xff] }
 0x713   :  { %v12934_v55 = vcombine.low %v3659_v60, %v3667_v20 }
 0x714   :  { %9999 = vmatpush1.bf16.msra.mxu1 %v12838_v29  ;;  %v12918_v29 = vcombine.low %v3643_v34, %v3651_v35  ;;  %v13518_v34 = vld [vmem:[%s14670_s9 + $0xa0] sm:$0xff]   ;;  %v13519_v35 = vld [vmem:[%s14670_s9 + $0x68] sm:$0xff]  }
 0x715   :  { %10163 = vmatpush1.bf16.msra.mxu0 %v12840_v15  ;;  %10000 = vmatprep.subr.bf16.mxu1 %v12855_v52  ;;  %v12920_v15 = vcombine.low %v3644_v36, %v3652_v39  ;;  %v12935_v52 = vcombine.high %v3659_v60, %v3667_v20  ;;  %v13520_v36 = vld [vmem:[%s14670_s9 + $0xe8] sm:$0xff]   ;;  %v13524_v60 = vld [vmem:[%s14670_s9 + $0xf0] sm:$0xff]   ;;  %v3696_v20 = vrot.slane %v14212_v40, %v14108_v45 }
 0x716   :  { %10164 = vmatprep.subr.bf16.mxu0 %v12857_v28  ;;  %v12937_v28 = vcombine.high %v3660_v50, %v3668_v17  ;;  %v13521_v39 = vld [vmem:[%s14670_s9 + $0x28] sm:$0xff]   ;;  %v13525_v50 = vld [vmem:[%s14670_s9 + $0x30] sm:$0xff]  }
 0x718   :  { %10001 = vmatpush1.bf16.msra.mxu1 %v12854_v58  ;;  %v13499_v58 = vld [vmem:[%s14670_s9 + $0x40] sm:$0xff]  }
 0x719   :  { %10165 = vmatpush1.bf16.msra.mxu0 %v12856_v59  ;;  %10002 = vmatprep.subr.bf16.mxu1 %v12871_v1  ;;  %v13500_v59 = vld [vmem:[%s14670_s9 + $0xc0] sm:$0xff]   ;;  %v10186_v1 = vmax.f32 %v13252_v53, 0.0  ;;  %v13529_v53 = vld [vmem:[%s14670_s9 + $0x38] sm:$0xff]  }
 0x71a   :  { %10166 = vmatprep.subr.bf16.mxu0 %v12873_v2  ;;  %v10188_v2 = vmax.f32 %v13254_v54, 0.0 }
 0x71b   :  { %v10202_v9 = vpack.c.bf16 %v10186_v1, %v10186_v1 }
 0x71c   :  { %10003 = vmatpush1.bf16.msra.mxu1 %v12870_v14  ;;  %v10204_v13 = vpack.c.bf16 %v10188_v2, %v10188_v2  ;;  %v13505_v14 = vld [vmem:[%s14670_s9 + $0x8] sm:$0xff]   ;;  %v13534_v2 = vld [vmem:[%s14670_s9 + $0x180] sm:$0xff]  }
 0x71d   :  { %10167 = vmatpush1.bf16.msra.mxu0 %v12872_v43  ;;  %10004 = vmatprep.subr.bf16.mxu1 %v12887_v19  ;;  %v13506_v43 = vld [vmem:[%s14670_s9 + $0x88] sm:$0xff]   ;;  %v13507_v19 = vld [vmem:[%s14670_s9 + $0x50] sm:$0xff]  }
 0x71e   :  { %10168 = vmatprep.subr.bf16.mxu0 %v12889_v22  ;;  %v13509_v22 = vld [vmem:[%s14670_s9 + $0x10] sm:$0xff]  }
 0x720   :  { %10005 = vmatpush1.bf16.msra.mxu1 %v12886_v27  ;;  %v13514_v27 = vld [vmem:[%s14670_s9 + $0x98] sm:$0xff]  }
 0x721   :  { %10169 = vmatpush1.bf16.msra.mxu0 %v12888_v30  ;;  %10006 = vmatprep.subr.bf16.mxu1 %v12903_v31  ;;  %v13515_v30 = vld [vmem:[%s14670_s9 + $0x60] sm:$0xff]  }
 0x722   :  { %10170 = vmatprep.subr.bf16.mxu0 %v12905_v32  ;;  %v13516_v31 = vld [vmem:[%s14670_s9 + $0xe0] sm:$0xff]  }
 0x723   :  { %v13517_v32 = vld [vmem:[%s14670_s9 + $0x20] sm:$0xff]  }
 0x724   :  { %10007 = vmatpush1.bf16.msra.mxu1 %v12902_v44  ;;  %v3676_v44 = vrot.slane %v14212_v40, %v14025_v16 }
 0x725   :  { %10171 = vmatpush1.bf16.msra.mxu0 %v12904_v41  ;;  %10008 = vmatprep.subr.bf16.mxu1 %v12919_v0  ;;  %v13522_v41 = vld [vmem:[%s14670_s9 + $0xa8] sm:$0xff]   ;;  %v13523_v0 = vld [vmem:[%s14670_s9 + $0x70] sm:$0xff]  }
 0x726   :  { %10172 = vmatprep.subr.bf16.mxu0 %v12921_v48  ;;  %v3684_v48 = vrot.slane %v14212_v40, %v14058_v46  ;;  %v13251_v17 = vadd.f32 %v14156_v7, %v3676_v44  ;;  %v13258_v7 = vadd.f32 %v14186_v3, %v3704_v47  ;;  %v3692_v44 = vrot.slane %v14212_v40, %v14105_v42 }
 0x728   :  { %10009 = vmatpush1.bf16.msra.mxu1 %v12918_v29  ;;  %v13527_v29 = vld [vmem:[%s14670_s9 + $0x78] sm:$0xff]   ;;  %v10185_v54 = vmax.f32 %v13251_v17, 0.0  ;;  %v13255_v17 = vadd.f32 %v14180_v61, %v3692_v44 }
 0x729   :  { %10173 = vmatpush1.bf16.msra.mxu0 %v12920_v15  ;;  %10010 = vmatprep.subr.bf16.mxu1 %v12935_v52  ;;  %v13253_v15 = vadd.f32 %v14158_v8, %v3684_v48  ;;  %v13528_v52 = vld [vmem:[%s14670_s9 + $0xf8] sm:$0xff]   ;;  %v3700_v48 = vrot.slane %v14212_v40, %v14134_v33  ;;  %v13558_v40 = vld [vmem:[%s14670_s9 + $0x1b0] sm:$0xff]  }
 0x72a   :  { %10174 = vmatprep.subr.bf16.mxu0 %v12937_v28  ;;  %v13256_v28 = vadd.f32 %v14184_v4, %v3696_v20  ;;  %v13530_v8 = vld [vmem:[%s14670_s9 + $0xb8] sm:$0xff]   ;;  %v13532_v4 = vld [vmem:[%s14670_s9 + $0x1c0] sm:$0xff]   ;;  %v10201_v1 = vpack.c.bf16 %v10185_v54, %v10185_v54 }
 0x72b   :  { %v13565_v54 = vld [vmem:[%s14670_s9 + $0x200] sm:$0xff]  }
 0x72c   :  { %10011 = vmatpush1.bf16.msra.mxu1 %v12934_v55  ;;  %v13531_v55 = vld [vmem:[%s14670_s9 + $0x140] sm:$0xff]   ;;  %v10190_v3 = vmax.f32 %v13256_v28, 0.0 }
 0x72d   :  { %10175 = vmatpush1.bf16.msra.mxu0 %v12936_v56  ;;  %13067 = vmatprep.subr.bf16.mxu1 %v13499_v58  ;;  %v10187_v56 = vmax.f32 %v13253_v15, 0.0  ;;  %v10192_v58 = vmax.f32 %v13258_v7, 0.0  ;;  %v13561_v15 = vld [vmem:[%s14670_s9 + $0x138] sm:$0xff]   ;;  %v13563_v28 = vld [vmem:[%s14670_s9 + $0x240] sm:$0xff]  }
 0x72e   :  { %13089 = vmatprep.subr.bf16.mxu0 %v13500_v59  ;;  %v13533_v59 = vld [vmem:[%s14670_s9 + $0x100] sm:$0xff]  }
 0x72f   :  { %10013 = vmatmul.mubr.bf16.vlgmr.msra.gmra.mrb[24].mxu1 %v14138_v57 }
 0x730   :  { %10177 = vmatmul.mubr.bf16.vlgmr.msra.gmra.mrb[28].mxu0 %v14138_v57  ;;  %13068 = vmatpush3.bf16.msra.mxu1 %v13501_v11  ;;  %v13508_v57 = vld [vmem:[%s14670_s9 + $0xd0] sm:$0xff]   ;;  %v10203_v11 = vpack.c.bf16 %v10187_v56, %v10187_v56 }
 0x731   :  { %11280 = vmatprep.mubr.bf16.mxu1 %v10202_v9  ;;  %13090 = vmatpush3.bf16.msra.mxu0 %v13502_v12  ;;  %v13535_v12 = vld [vmem:[%s14670_s9 + $0x148] sm:$0xff]  }
 0x732   :  { %11320 = vmatprep.mubr.bf16.mxu0 %v10204_v13  ;;  %13069 = vmatprep.subr.bf16.mxu1 %v13503_v5  ;;  %v10206_v5 = vpack.c.bf16 %v10190_v3, %v10190_v3  ;;  %v13536_v9 = vld [vmem:[%s14670_s9 + $0x1c8] sm:$0xff]  }
 0x733   :  { %13091 = vmatprep.subr.bf16.mxu0 %v13504_v6  ;;  %v10208_v6 = vpack.c.bf16 %v10192_v58, %v10192_v58  ;;  %v13537_v13 = vld [vmem:[%s14670_s9 + $0x108] sm:$0xff]  }
 0x734   :  { %13070 = vmatpush3.bf16.msra.mxu1 %v13505_v14  ;;  %v13538_v14 = vld [vmem:[%s14670_s9 + $0x188] sm:$0xff]  }
 0x735   :  { %13092 = vmatpush3.bf16.msra.mxu0 %v13506_v43  ;;  %13071 = vmatprep.subr.bf16.mxu1 %v13507_v19  ;;  %v13539_v43 = vld [vmem:[%s14670_s9 + $0x150] sm:$0xff]   ;;  %v13568_v58 = vld [vmem:[%s14670_s9 + $0x2c8] sm:$0xff]  }
 0x736   :  { %13093 = vmatprep.subr.bf16.mxu0 %v13508_v57  ;;  %v13540_v19 = vld [vmem:[%s14670_s9 + $0x1d0] sm:$0xff]  }
 0x737   :  { %v13541_v57 = vld [vmem:[%s14670_s9 + $0x110] sm:$0xff]  }
 0x738   :  { %13072 = vmatpush3.bf16.msra.mxu1 %v13509_v22  ;;  %v13542_v22 = vld [vmem:[%s14670_s9 + $0x190] sm:$0xff]  }
 0x739   :  { %13094 = vmatpush3.bf16.msra.mxu0 %v13510_v23  ;;  %13073 = vmatprep.subr.bf16.mxu1 %v13511_v24  ;;  %v13543_v23 = vld [vmem:[%s14670_s9 + $0x158] sm:$0xff]  }
 0x73a   :  { %13095 = vmatprep.subr.bf16.mxu0 %v13512_v25  ;;  %v13544_v24 = vld [vmem:[%s14670_s9 + $0x1d8] sm:$0xff]  }
 0x73b   :  { %v13545_v25 = vld [vmem:[%s14670_s9 + $0x118] sm:$0xff]  }
 0x73c   :  { %13074 = vmatpush3.bf16.msra.mxu1 %v13513_v26  ;;  %v13546_v26 = vld [vmem:[%s14670_s9 + $0x198] sm:$0xff]  }
 0x73d   :  { %13096 = vmatpush3.bf16.msra.mxu0 %v13514_v27  ;;  %13075 = vmatprep.subr.bf16.mxu1 %v13515_v30  ;;  %v13547_v27 = vld [vmem:[%s14670_s9 + $0x160] sm:$0xff]  }
 0x73e   :  { %13097 = vmatprep.subr.bf16.mxu0 %v13516_v31  ;;  %v13548_v30 = vld [vmem:[%s14670_s9 + $0x1e0] sm:$0xff]  }
 0x73f   :  { %v13549_v31 = vld [vmem:[%s14670_s9 + $0x120] sm:$0xff]  }
 0x740   :  { %13076 = vmatpush3.bf16.msra.mxu1 %v13517_v32  ;;  %v13550_v32 = vld [vmem:[%s14670_s9 + $0x1a0] sm:$0xff]  }
 0x741   :  { %13098 = vmatpush3.bf16.msra.mxu0 %v13518_v34  ;;  %13077 = vmatprep.subr.bf16.mxu1 %v13519_v35  ;;  %v13551_v34 = vld [vmem:[%s14670_s9 + $0x168] sm:$0xff]  }
 0x742   :  { %13099 = vmatprep.subr.bf16.mxu0 %v13520_v36  ;;  %v13552_v35 = vld [vmem:[%s14670_s9 + $0x1e8] sm:$0xff]   ;;  %v14396_v36 = vld [vmem:[#allocation14 + $0x8] sm:$0xff] }
 0x743   :  { %v3712_v20 = vrot.slane %v14396_v36, %v14028_v18  ;;  %v3720_v47 = vrot.slane %v14396_v36, %v14035_v38  ;;  %v13559_v18 = vld [vmem:[%s14670_s9 + $0x178] sm:$0xff]  }
 0x744   :  { %13078 = vmatpush3.bf16.msra.mxu1 %v13521_v39  ;;  %v13553_v39 = vld [vmem:[%s14670_s9 + $0x128] sm:$0xff]   ;;  %v13560_v38 = vld [vmem:[%s14670_s9 + $0x1f8] sm:$0xff]  }
 0x745   :  { %13100 = vmatpush3.bf16.msra.mxu0 %v13522_v41  ;;  %13079 = vmatprep.subr.bf16.mxu1 %v13523_v0  ;;  %v13554_v41 = vld [vmem:[%s14670_s9 + $0x1a8] sm:$0xff]   ;;  %v13555_v0 = vld [vmem:[%s14670_s9 + $0x170] sm:$0xff]   ;;  %v13262_v61 = vadd.f32 %v14210_v10, %v3720_v47  ;;  %v13597_v47 = vld [vmem:[%s14670_s9 + $0x300] sm:$0xff]  }
 0x746   :  { %13101 = vmatprep.subr.bf16.mxu0 %v13524_v60  ;;  %v13556_v60 = vld [vmem:[%s14670_s9 + $0x1f0] sm:$0xff]  }
 0x748   :  { %13080 = vmatpush3.bf16.msra.mxu1 %v13525_v50  ;;  %v13557_v50 = vld [vmem:[%s14670_s9 + $0x130] sm:$0xff]  }
 0x749   :  { %13102 = vmatpush3.bf16.msra.mxu0 %v13526_v51  ;;  %13081 = vmatprep.subr.bf16.mxu1 %v13527_v29  ;;  %v13257_v51 = vadd.f32 %v14182_v63, %v3700_v48  ;;  %v13260_v29 = vadd.f32 %v14208_v21, %v3712_v20  ;;  %v13562_v63 = vld [vmem:[%s14670_s9 + $0x1b8] sm:$0xff]   ;;  %v13564_v21 = vld [vmem:[%s14670_s9 + $0x2c0] sm:$0xff]  }
 0x74a   :  { %13103 = vmatprep.subr.bf16.mxu0 %v13528_v52  ;;  %v10189_v52 = vmax.f32 %v13255_v17, 0.0  ;;  %v13594_v48 = vld [vmem:[%s14670_s9 + $0x2b8] sm:$0xff]   ;;  %v13596_v20 = vld [vmem:[%s14670_s9 + $0x3c0] sm:$0xff]  }
 0x74b   :  { %v10191_v7 = vmax.f32 %v13257_v51, 0.0  ;;  %v10194_v10 = vmax.f32 %v13260_v29, 0.0  ;;  %v13598_v17 = vld [vmem:[%s14670_s9 + $0x380] sm:$0xff]   ;;  %v13600_v51 = vld [vmem:[%s14670_s9 + $0x3c8] sm:$0xff]  }
 0x74c   :  { %13082 = vmatpush3.bf16.msra.mxu1 %v13529_v53  ;;  %v10196_v53 = vmax.f32 %v13262_v61, 0.0  ;;  %v13602_v29 = vld [vmem:[%s14670_s9 + $0x388] sm:$0xff]   ;;  %v13603_v61 = vld [vmem:[%s14670_s9 + $0x350] sm:$0xff]  }
 0x74d   :  { %13104 = vmatpush3.bf16.msra.mxu0 %v13530_v8  ;;  %13111 = vmatprep.subr.bf16.mxu1 %v13531_v55  ;;  %v10205_v8 = vpack.c.bf16 %v10189_v52, %v10189_v52  ;;  %v13566_v55 = vld [vmem:[%s14670_s9 + $0x280] sm:$0xff]   ;;  %v10207_v56 = vpack.c.bf16 %v10191_v7, %v10191_v7  ;;  %v10210_v3 = vpack.c.bf16 %v10194_v10, %v10194_v10  ;;  %v13605_v52 = vld [vmem:[%s14670_s9 + $0x310] sm:$0xff]   ;;  %v13608_v7 = vld [vmem:[%s14670_s9 + $0x3d8] sm:$0xff]  }
 0x74e   :  { %13133 = vmatprep.subr.bf16.mxu0 %v13532_v4  ;;  %v13567_v4 = vld [vmem:[%s14670_s9 + $0x248] sm:$0xff]   ;;  %v13610_v10 = vld [vmem:[%s14670_s9 + $0x398] sm:$0xff]  }
 0x74f   :  { %11281 = vmatmul.mubr.bf16.vlgmr.msra.gmra.mrb[28].mxu1 %v10201_v1  ;;  %v13569_v1 = vld [vmem:[%s14670_s9 + $0x208] sm:$0xff]  }
 0x750   :  { %11321 = vmatmul.mubr.bf16.vlgmr.msra.gmra.mrb[32].mxu0 %v10203_v11  ;;  %13112 = vmatpush3.bf16.msra.mxu1 %v13533_v59  ;;  %v10212_v59 = vpack.c.bf16 %v10196_v53, %v10196_v53  ;;  %v13571_v11 = vld [vmem:[%s14670_s9 + $0x250] sm:$0xff]   ;;  %v13611_v53 = vld [vmem:[%s14670_s9 + $0x360] sm:$0xff]  }
 0x751   :  { %11360 = vmatprep.mubr.bf16.mxu1 %v10206_v5  ;;  %13134 = vmatpush3.bf16.msra.mxu0 %v13534_v2  ;;  %v13570_v2 = vld [vmem:[%s14670_s9 + $0x288] sm:$0xff]   ;;  %v13573_v5 = vld [vmem:[%s14670_s9 + $0x210] sm:$0xff]  }
 0x752   :  { %11400 = vmatprep.mubr.bf16.mxu0 %v10208_v6  ;;  %13113 = vmatprep.subr.bf16.mxu1 %v13535_v12  ;;  %v13572_v12 = vld [vmem:[%s14670_s9 + $0x2d0] sm:$0xff]   ;;  %v13575_v6 = vld [vmem:[%s14670_s9 + $0x258] sm:$0xff]  }
 0x753   :  { %13135 = vmatprep.subr.bf16.mxu0 %v13536_v9  ;;  %v13574_v9 = vld [vmem:[%s14670_s9 + $0x290] sm:$0xff]  }
 0x754   :  { %13114 = vmatpush3.bf16.msra.mxu1 %v13537_v13  ;;  %v13576_v13 = vld [vmem:[%s14670_s9 + $0x2d8] sm:$0xff]  }
 0x755   :  { %13136 = vmatpush3.bf16.msra.mxu0 %v13538_v14  ;;  %13115 = vmatprep.subr.bf16.mxu1 %v13539_v43  ;;  %v13577_v14 = vld [vmem:[%s14670_s9 + $0x218] sm:$0xff]  }
 0x756   :  { %13137 = vmatprep.subr.bf16.mxu0 %v13540_v19  ;;  %v13578_v43 = vld [vmem:[%s14670_s9 + $0x298] sm:$0xff]   ;;  %v13579_v19 = vld [vmem:[%s14670_s9 + $0x260] sm:$0xff]  }
 0x758   :  { %13116 = vmatpush3.bf16.msra.mxu1 %v13541_v57  ;;  %v13580_v57 = vld [vmem:[%s14670_s9 + $0x2e0] sm:$0xff]  }
 0x759   :  { %13138 = vmatpush3.bf16.msra.mxu0 %v13542_v22  ;;  %13117 = vmatprep.subr.bf16.mxu1 %v13543_v23  ;;  %v13581_v22 = vld [vmem:[%s14670_s9 + $0x220] sm:$0xff]  }
 0x75a   :  { %13139 = vmatprep.subr.bf16.mxu0 %v13544_v24  ;;  %v13582_v23 = vld [vmem:[%s14670_s9 + $0x2a0] sm:$0xff]   ;;  %v13583_v24 = vld [vmem:[%s14670_s9 + $0x268] sm:$0xff]  }
 0x75c   :  { %13118 = vmatpush3.bf16.msra.mxu1 %v13545_v25  ;;  %v13584_v25 = vld [vmem:[%s14670_s9 + $0x2e8] sm:$0xff]  }
 0x75d   :  { %13140 = vmatpush3.bf16.msra.mxu0 %v13546_v26  ;;  %13119 = vmatprep.subr.bf16.mxu1 %v13547_v27  ;;  %v13585_v26 = vld [vmem:[%s14670_s9 + $0x228] sm:$0xff]   ;;  %v3708_v27 = vrot.slane %v14396_v36, %v14025_v16  ;;  %v13589_v16 = vld [vmem:[%s14670_s9 + $0x230] sm:$0xff]  }
 0x75e   :  { %13141 = vmatprep.subr.bf16.mxu0 %v13548_v30  ;;  %v13586_v30 = vld [vmem:[%s14670_s9 + $0x2a8] sm:$0xff]  }
 0x760   :  { %13120 = vmatpush3.bf16.msra.mxu1 %v13549_v31  ;;  %v13587_v31 = vld [vmem:[%s14670_s9 + $0x270] sm:$0xff]  }
 0x761   :  { %13142 = vmatpush3.bf16.msra.mxu0 %v13550_v32  ;;  %13121 = vmatprep.subr.bf16.mxu1 %v13551_v34  ;;  %v3716_v32 = vrot.slane %v14396_v36, %v14058_v46  ;;  %v13588_v34 = vld [vmem:[%s14670_s9 + $0x2f0] sm:$0xff]   ;;  %v13591_v46 = vld [vmem:[%s14670_s9 + $0x278] sm:$0xff]  }
 0x762   :  { %13143 = vmatprep.subr.bf16.mxu0 %v13552_v35  ;;  %v13259_v35 = vadd.f32 %v14204_v62, %v3708_v27  ;;  %v13593_v62 = vld [vmem:[%s14670_s9 + $0x238] sm:$0xff]  }
 0x763   :  { %v13261_v44 = vadd.f32 %v14206_v37, %v3716_v32  ;;  %v13595_v37 = vld [vmem:[%s14670_s9 + $0x340] sm:$0xff]  }
 0x764   :  { %13122 = vmatpush3.bf16.msra.mxu1 %v13553_v39  ;;  %v13590_v39 = vld [vmem:[%s14670_s9 + $0x2b0] sm:$0xff]  }
 0x765   :  { %13144 = vmatpush3.bf16.msra.mxu0 %v13554_v41  ;;  %13123 = vmatprep.subr.bf16.mxu1 %v13555_v0  ;;  %v13592_v41 = vld [vmem:[%s14670_s9 + $0x2f8] sm:$0xff]   ;;  %v10193_v0 = vmax.f32 %v13259_v35, 0.0 }
 0x766   :  { %13145 = vmatprep.subr.bf16.mxu0 %v13556_v60  ;;  %v10195_v60 = vmax.f32 %v13261_v44, 0.0 }
 0x768   :  { %13124 = vmatpush3.bf16.msra.mxu1 %v13557_v50  ;;  %v10209_v50 = vpack.c.bf16 %v10193_v0, %v10193_v0 }
 0x769   :  { %13146 = vmatpush3.bf16.msra.mxu0 %v13558_v40  ;;  %13125 = vmatprep.subr.bf16.mxu1 %v13559_v18  ;;  %v13599_v40 = vld [vmem:[%s14670_s9 + $0x348] sm:$0xff]   ;;  %v10211_v18 = vpack.c.bf16 %v10195_v60, %v10195_v60 }
 0x76a   :  { %13147 = vmatprep.subr.bf16.mxu0 %v13560_v38  ;;  %v13601_v38 = vld [vmem:[%s14670_s9 + $0x308] sm:$0xff]  }
 0x76c   :  { %13126 = vmatpush3.bf16.msra.mxu1 %v13561_v15  ;;  %v13604_v15 = vld [vmem:[%s14670_s9 + $0x3d0] sm:$0xff]  }
 0x76d   :  { %13148 = vmatpush3.bf16.msra.mxu0 %v13562_v63  ;;  %13155 = vmatprep.subr.bf16.mxu1 %v13563_v28  ;;  %v13606_v63 = vld [vmem:[%s14670_s9 + $0x390] sm:$0xff]   ;;  %v13607_v28 = vld [vmem:[%s14670_s9 + $0x358] sm:$0xff]  }
 0x76e   :  { %13177 = vmatprep.subr.bf16.mxu0 %v13564_v21  ;;  %v13609_v21 = vld [vmem:[%s14670_s9 + $0x318] sm:$0xff]  }
 0x76f   :  { %11361 = vmatmul.mubr.bf16.vlgmr.msra.gmra.mrb[32].mxu1 %v10205_v8  ;;  %v13613_v8 = vld [vmem:[%s14670_s9 + $0x320] sm:$0xff]  }
 0x770   :  { %11401 = vmatmul.mubr.bf16.vlgmr.msra.gmra.mrb[36].mxu0 %v10207_v56  ;;  %13156 = vmatpush3.bf16.msra.mxu1 %v13565_v54  ;;  %v13612_v54 = vld [vmem:[%s14670_s9 + $0x3e0] sm:$0xff]   ;;  %v13615_v56 = vld [vmem:[%s14670_s9 + $0x368] sm:$0xff]  }
 0x771   :  { %11440 = vmatprep.mubr.bf16.mxu1 %v10210_v3  ;;  %13178 = vmatpush3.bf16.msra.mxu0 %v13566_v55  ;;  %v13614_v55 = vld [vmem:[%s14670_s9 + $0x3a0] sm:$0xff]   ;;  %v13617_v3 = vld [vmem:[%s14670_s9 + $0x328] sm:$0xff]  }
 0x772   :  { %11480 = vmatprep.mubr.bf16.mxu0 %v10212_v59  ;;  %13157 = vmatprep.subr.bf16.mxu1 %v13567_v4  ;;  %v13616_v4 = vld [vmem:[%s14670_s9 + $0x3e8] sm:$0xff]   ;;  %v13619_v59 = vld [vmem:[%s14670_s9 + $0x370] sm:$0xff]  }
 0x773   :  { %13179 = vmatprep.subr.bf16.mxu0 %v13568_v58  ;;  %v13618_v58 = vld [vmem:[%s14670_s9 + $0x3a8] sm:$0xff]  }
 0x774   :  { %13158 = vmatpush3.bf16.msra.mxu1 %v13569_v1  ;;  %v13620_v1 = vld [vmem:[%s14670_s9 + $0x3f0] sm:$0xff]  }
 0x775   :  { %13180 = vmatpush3.bf16.msra.mxu0 %v13570_v2  ;;  %13159 = vmatprep.subr.bf16.mxu1 %v13571_v11  ;;  %v13621_v2 = vld [vmem:[%s14670_s9 + $0x330] sm:$0xff]  }
 0x776   :  { %13181 = vmatprep.subr.bf16.mxu0 %v13572_v12  ;;  %v13622_v11 = vld [vmem:[%s14670_s9 + $0x3b0] sm:$0xff]   ;;  %v13623_v12 = vld [vmem:[%s14670_s9 + $0x378] sm:$0xff]  }
 0x778   :  { %13160 = vmatpush3.bf16.msra.mxu1 %v13573_v5  ;;  %v13624_v5 = vld [vmem:[%s14670_s9 + $0x3f8] sm:$0xff]  }
 0x779   :  { %13182 = vmatpush3.bf16.msra.mxu0 %v13574_v9  ;;  %13161 = vmatprep.subr.bf16.mxu1 %v13575_v6  ;;  %v13625_v9 = vld [vmem:[%s14670_s9 + $0x338] sm:$0xff]  }
 0x77a   :  { %13183 = vmatprep.subr.bf16.mxu0 %v13576_v13  ;;  %v13626_v6 = vld [vmem:[%s14670_s9 + $0x3b8] sm:$0xff]   ;;  %v3724_v13 = vrot.slane %v14396_v36, %v14105_v42 }
 0x77c   :  { %13162 = vmatpush3.bf16.msra.mxu1 %v13577_v14  ;;  %v3732_v14 = vrot.slane %v14396_v36, %v14134_v33 }
 0x77d   :  { %13184 = vmatpush3.bf16.msra.mxu0 %v13578_v43  ;;  %13163 = vmatprep.subr.bf16.mxu1 %v13579_v19  ;;  %v3728_v43 = vrot.slane %v14396_v36, %v14108_v45  ;;  %v3736_v19 = vrot.slane %v14396_v36, %v14111_v49 }
 0x77e   :  { %13185 = vmatprep.subr.bf16.mxu0 %v13580_v57 }
 0x780   :  { %13164 = vmatpush3.bf16.msra.mxu1 %v13581_v22 }
 0x781   :  { %13186 = vmatpush3.bf16.msra.mxu0 %v13582_v23  ;;  %13165 = vmatprep.subr.bf16.mxu1 %v13583_v24 }
 0x782   :  { %13187 = vmatprep.subr.bf16.mxu0 %v13584_v25 }
 0x784   :  { %13166 = vmatpush3.bf16.msra.mxu1 %v13585_v26 }
 0x785   :  { %13188 = vmatpush3.bf16.msra.mxu0 %v13586_v30  ;;  %13167 = vmatprep.subr.bf16.mxu1 %v13587_v31 }
 0x786   :  { %13189 = vmatprep.subr.bf16.mxu0 %v13588_v34 }
 0x788   :  { %13168 = vmatpush3.bf16.msra.mxu1 %v13589_v16 }
 0x789   :  { %13190 = vmatpush3.bf16.msra.mxu0 %v13590_v39  ;;  %13169 = vmatprep.subr.bf16.mxu1 %v13591_v46 }
 0x78a   :  { %13191 = vmatprep.subr.bf16.mxu0 %v13592_v41 }
 0x78c   :  { %13170 = vmatpush3.bf16.msra.mxu1 %v13593_v62  ;;  %v12938_v62 = vld [vmem:[%s14671_s10] ss:$0 sm:$0xff]  ;;  %s13855_s10 = smov [#allocation16]  }
 0x78d   :  { %13192 = vmatpush3.bf16.msra.mxu0 %v13594_v48  ;;  %13199 = vmatprep.subr.bf16.mxu1 %v13595_v37  ;;  %s11576_s15 = sshll.u32 %s13855_s10, 4  ;;  %s11577_s15 = int_to_ptr.vmem [resolvable:$true] %s11576_s15 }
 0x78e   :  { %13221 = vmatprep.subr.bf16.mxu0 %v13596_v20  ;;  %s13804_s1 = scalar_lea.vmem %s11577_s15, 128  ;;  %p13809_p9 = scmp.lt.s32.totalorder %s11577_s15, %s11577_s15 }
 0x78f   :  { %11441 = vmatmul.mubr.bf16.vlgmr.msra.gmra.mrb[36].mxu1 %v10209_v50  ;;  %p13805_p8 = scmp.ne.s32.totalorder %s11577_s15, %s13804_s1  ;;  %p13810_p10 = scmp.lt.s32.totalorder %s13804_s1, %s13804_s1 }
 0x790   :  { %11481 = vmatmul.mubr.bf16.vlgmr.msra.gmra.mrb[40].mxu0 %v10211_v18  ;;  %13200 = vmatpush3.bf16.msra.mxu1 %v13597_v47 }
 0x791   :  { %13222 = vmatpush3.bf16.msra.mxu0 %v13598_v17  ;;  %13201 = vmatprep.subr.bf16.mxu1 %v13599_v40  ;;  %p13811_p11 = por %p13810_p10, %p13809_p9 }
 0x792   :  { %13223 = vmatprep.subr.bf16.mxu0 %v13600_v51 }
 0x793   :  { %p13812_p12 = pnand %p13811_p11, %p13805_p8 }
 0x794   :  { %13202 = vmatpush3.bf16.msra.mxu1 %v13601_v38 }
 0x795   :  { %13224 = vmatpush3.bf16.msra.mxu0 %v13602_v29  ;;  %13203 = vmatprep.subr.bf16.mxu1 %v13603_v61 }
 0x796   :  { %13225 = vmatprep.subr.bf16.mxu0 %v13604_v15 }
 0x798   :  { %13204 = vmatpush3.bf16.msra.mxu1 %v13605_v52 }
 0x799   :  { %13226 = vmatpush3.bf16.msra.mxu0 %v13606_v63  ;;  %13205 = vmatprep.subr.bf16.mxu1 %v13607_v28 }
 0x79a   :  { %13227 = vmatprep.subr.bf16.mxu0 %v13608_v7 }
 0x79c   :  { %13206 = vmatpush3.bf16.msra.mxu1 %v13609_v21 }
 0x79d   :  { %13228 = vmatpush3.bf16.msra.mxu0 %v13610_v10  ;;  %13207 = vmatprep.subr.bf16.mxu1 %v13611_v53 }
 0x79e   :  { %13229 = vmatprep.subr.bf16.mxu0 %v13612_v54 }
 0x7a0   :  { %13208 = vmatpush3.bf16.msra.mxu1 %v13613_v8 }
 0x7a1   :  { %13230 = vmatpush3.bf16.msra.mxu0 %v13614_v55  ;;  %13209 = vmatprep.subr.bf16.mxu1 %v13615_v56 }
 0x7a2   :  { %13231 = vmatprep.subr.bf16.mxu0 %v13616_v4 }
 0x7a4   :  { %13210 = vmatpush3.bf16.msra.mxu1 %v13617_v3 }
 0x7a5   :  { %13232 = vmatpush3.bf16.msra.mxu0 %v13618_v58  ;;  %13211 = vmatprep.subr.bf16.mxu1 %v13619_v59 }
 0x7a6   :  { %13233 = vmatprep.subr.bf16.mxu0 %v13620_v1 }
 0x7a8   :  { %13212 = vmatpush3.bf16.msra.mxu1 %v13621_v2 }
 0x7a9   :  { %13234 = vmatpush3.bf16.msra.mxu0 %v13622_v11  ;;  %13213 = vmatprep.subr.bf16.mxu1 %v13623_v12 }
 0x7aa   :  { %13235 = vmatprep.subr.bf16.mxu0 %v13624_v5 }
 0x7ac   :  { %13214 = vmatpush3.bf16.msra.mxu1 %v13625_v9 }
 0x7ad   :  { %13236 = vmatpush3.bf16.msra.mxu0 %v13626_v6 }
 0x802   :  { %v10014_v57 = vpop.f32.mrb[24].mxu1 }
 0x803   :  { %v13263_v22 = vadd.f32 %v10014_v57, %v3724_v13  ;;  %v10178_v23 = vpop.f32.mrb[28].mxu0  ;;  %v10016_v24 = vpop.f32.mrb[25].mxu1 }
 0x804   :  { %v13265_v25 = vadd.f32 %v10178_v23, %v3732_v14  ;;  %v13264_v26 = vadd.f32 %v10016_v24, %v3728_v43  ;;  %v10180_v27 = vpop.f32.mrb[29].mxu0  ;;  %v10018_v30 = vpop.f32.mrb[26].mxu1 }
 0x805   :  { %v10197_v31 = vmax.f32 %v13263_v22, 0.0  ;;  %v13266_v32 = vadd.f32 %v10180_v27, %v3736_v19  ;;  %v10182_v42 = vpop.f32.mrb[30].mxu0  ;;  %v10019_v34 = vpop.f32.mrb[27].mxu1 }
 0x806   :  { %v10199_v16 = vmax.f32 %v13265_v25, 0.0  ;;  %v10198_v33 = vmax.f32 %v13264_v26, 0.0  ;;  %v10183_v35 = vpop.f32.mrb[31].mxu0 }
 0x807   :  { %v10200_v39 = vmax.f32 %v13266_v32, 0.0  ;;  %v10213_v46 = vpack.c.bf16 %v10197_v31, %v10197_v31 }
 0x808   :  { %v10214_v45 = vpack.c.bf16 %v10198_v33, %v10198_v33  ;;  %v10215_v49 = vpack.c.bf16 %v10199_v16, %v10199_v16 }
 0x809   :  { %v10216_v44 = vpack.c.bf16 %v10200_v39, %v10200_v39 }
 0x80a   :  { %11520 = vmatprep.mubr.bf16.mxu1 %v10214_v45 }
 0x80b   :  { %11560 = vmatprep.mubr.bf16.mxu0 %v10216_v44  ;;  %11521 = vmatmul.mubr.bf16.vlgmr.msra.gmra.mrb[40].mxu1 %v10213_v46 }
 0x80c   :  { %11561 = vmatmul.mubr.bf16.vlgmr.msra.gmra.mrb[44].mxu0 %v10215_v49 }
 0x822   :  { %v13083_v36 = vpop.f32.mrb[28].mxu1 }
 0x823   :  { %v13105_v41 = vpop.f32.mrb[32].mxu0  ;;  %v13084_v0 = vpop.f32.mrb[29].mxu1 }
 0x824   :  { %v13085_v48 = vadd.f32 %v13084_v0, %v13083_v36  ;;  %v13106_v37 = vpop.f32.mrb[33].mxu0  ;;  %v13086_v60 = vpop.f32.mrb[30].mxu1 }
 0x825   :  { %v13107_v20 = vadd.f32 %v13106_v37, %v13105_v41  ;;  %v13108_v47 = vpop.f32.mrb[34].mxu0  ;;  %v13087_v50 = vpop.f32.mrb[31].mxu1 }
 0x826   :  { %v11283_v17 = vadd.f32 %v13085_v48, %v12938_v62  ;;  %v13109_v40 = vpop.f32.mrb[35].mxu0 }
 0x828   :  { %v11323_v18 = vadd.f32 %v13107_v20, %v11283_v17 }
 0x842   :  { %v13127_v51 = vpop.f32.mrb[32].mxu1 }
 0x843   :  { %v13149_v38 = vpop.f32.mrb[36].mxu0  ;;  %v13128_v29 = vpop.f32.mrb[33].mxu1 }
 0x844   :  { %v13129_v61 = vadd.f32 %v13128_v29, %v13127_v51  ;;  %v13150_v15 = vpop.f32.mrb[37].mxu0  ;;  %v13130_v52 = vpop.f32.mrb[34].mxu1 }
 0x845   :  { %v13151_v63 = vadd.f32 %v13150_v15, %v13149_v38  ;;  %v13152_v28 = vpop.f32.mrb[38].mxu0  ;;  %v13131_v7 = vpop.f32.mrb[35].mxu1 }
 0x846   :  { %v11363_v21 = vadd.f32 %v13129_v61, %v11323_v18  ;;  %v13153_v10 = vpop.f32.mrb[39].mxu0 }
 0x848   :  { %v11403_v53 = vadd.f32 %v13151_v63, %v11363_v21 }
 0x862   :  { %v13171_v54 = vpop.f32.mrb[36].mxu1 }
 0x863   :  { %v13193_v8 = vpop.f32.mrb[40].mxu0  ;;  %v13172_v55 = vpop.f32.mrb[37].mxu1 }
 0x864   :  { %v13173_v56 = vadd.f32 %v13172_v55, %v13171_v54  ;;  %v13194_v4 = vpop.f32.mrb[41].mxu0  ;;  %v13174_v3 = vpop.f32.mrb[38].mxu1 }
 0x865   :  { %v13195_v58 = vadd.f32 %v13194_v4, %v13193_v8  ;;  %v13196_v59 = vpop.f32.mrb[42].mxu0  ;;  %v13175_v1 = vpop.f32.mrb[39].mxu1 }
 0x866   :  { %v11443_v2 = vadd.f32 %v13173_v56, %v11403_v53  ;;  %v13197_v11 = vpop.f32.mrb[43].mxu0 }
 0x868   :  { %v11483_v12 = vadd.f32 %v13195_v58, %v11443_v2 }
 0x8de   :  { %v13215_v5 = vpop.f32.mrb[40].mxu1 }
 0x8df   :  { %v13237_v9 = vpop.f32.mrb[44].mxu0  ;;  %v13216_v6 = vpop.f32.mrb[41].mxu1 }
 0x8e0   :  { %v13217_v13 = vadd.f32 %v13216_v6, %v13215_v5  ;;  %v13238_v14 = vpop.f32.mrb[45].mxu0  ;;  %v13218_v43 = vpop.f32.mrb[42].mxu1 }
 0x8e1   :  { %v13239_v19 = vadd.f32 %v13238_v14, %v13237_v9  ;;  %v13240_v57 = vpop.f32.mrb[46].mxu0  ;;  %v13219_v22 = vpop.f32.mrb[43].mxu1 }
 0x8e2   :  { %v11523_v23 = vadd.f32 %v13217_v13, %v11483_v12  ;;  %v13241_v24 = vpop.f32.mrb[47].mxu0 }
 0x8e4   :  { %v11563_v25 = vadd.f32 %v13239_v19, %v11523_v23 }
 0x8e6   :  { %v11568_v26 = vmax.f32 %v11563_v25, 0.0 }
 0x8e8   :  { %11569 = vst [vmem:[#allocation16] sm:$0xff] %v11568_v26 }
 0x8e9   :  { %13815 = shalt.err (!%p13812_p12)
}
 0x8ea   :  { %s13816_s17 = scalar_lea.hbm %s14672_s11, 128 }
 0x8eb   :  { %p13817_p13 = scmp.ne.s32.totalorder %s14672_s11, %s13816_s17  ;;  %p13820_p0 = scmp.lt.u32.totalorder %s13816_s17, %s14672_s11 }
 0x8ed   :  { %p13822_p1 = pnand %p13820_p0, %p13817_p13 }
 0x8ef   :  { %13825 = shalt.err (!%p13822_p1)
}
 0x8f0   :  { %11579 = dma.vmem_to_hbm [thread:$0]  %s11577_s15, 128, %s14672_s11, [#allocation4]  }
 0x8f1   :  { %13836 = dma.done.wait [#allocation4], 128  }
 0x8f2   :  { %13837 = vsyncadd [#allocation4], 4294967168 }
 0x8f3   :  { %11583 = vsyncpa [#allocation3], 1 }
 0x8f4   :  { %11584 = vsyncpa [#allocation6], 1 }
 0x8f5   :  { %11585 = vsyncpa [#allocation9], 1 }
 0x8f6   :  { %11586 = vsyncpa [#allocation12], 1 }
 0x8f7   :  { %11587 = vsyncpa [#allocation15], 1 }
 0x8f8   :  { %11588 = vsyncpa [#allocation4], 1 }

</bundles_post_ra>
